<compile_context>
chip_gen: v7x
topology: tpu7x:2x2x1
jax: 0.10.0
libtpu: 0.0.40
codegen_flags: <defaults>
</compile_context>

<pallas_src>
from functools import partial

import numpy as np
import jax
import jax.numpy as jnp
from jax.experimental import pallas as pl
from jax.experimental.pallas import tpu as pltpu

F32 = jnp.float32
BF16 = jnp.bfloat16


def _const_spec(shape):
    """BlockSpec for an operand whose block never changes across the grid.

    Single-buffered via pipeline_mode=pl.Buffered(1) when available (saves the
    useless second VMEM buffer); falls back to a plain BlockSpec otherwise.
    """
    index_map = lambda t: (0,) * len(shape)
    try:
        return pl.BlockSpec(shape, index_map, pipeline_mode=pl.Buffered(1))
    except (AttributeError, TypeError):
        return pl.BlockSpec(shape, index_map)


def _stride2_gather(h_in, w_in, n_img, rows_per_img_in, m_pad):
    """One-hot im2col gather matrix for a 3x3 / stride-2 / pad-1 conv.

    Returns S of shape (n_img * 9 * m_pad, n_img * rows_per_img_in), bf16:
      S[n*9*m_pad + t*m_pad + (i*w_out + j), n*rows_per_img_in + r*w_in + c] = 1
    with t = kh*3 + kw, r = 2i+kh-1, c = 2j+kw-1 when in range; rows that fall
    in the zero padding (or in the m >= h_out*w_out row padding) are all-zero.
    """
    h_out, w_out = (h_in + 1) // 2, (w_in + 1) // 2
    m_out = h_out * w_out
    assert m_pad >= m_out
    S = np.zeros((n_img * 9 * m_pad, n_img * rows_per_img_in), np.float32)
    for n in range(n_img):
        for kh in range(3):
            for kw in range(3):
                t = kh * 3 + kw
                for i in range(h_out):
                    for j in range(w_out):
                        r, c = 2 * i + kh - 1, 2 * j + kw - 1
                        if 0 <= r < h_in and 0 <= c < w_in:
                            S[n * 9 * m_pad + t * m_pad + i * w_out + j,
                              n * rows_per_img_in + r * w_in + c] = 1.0
    return jnp.asarray(S, dtype=BF16)


# -----------------------------------------------------------------------------
# Fused AlignmentHead kernel.  Grid = (9,) over conv1 taps ("arbitrary").
#   step 0      : zero conv1 accumulator + local head (2 x 1x1 conv, ReLU, pool)
#   every step  : acc += (N*M1, Cin) x (Cin, C1) matmul with the streamed tap
#                 weight (weights + tap activations double-buffered -> DMA
#                 pipelined behind compute)
#   last step   : bias+ReLU, conv2, conv3 (gather-matmul form), global pool
# -----------------------------------------------------------------------------
def _alignment_kernel(xl_ref, lw1_ref, lw2_ref,
                      xg_ref, w1_ref, b1_ref,
                      sel2_ref, w2_ref, b2_ref,
                      sel3_ref, w3_ref, b3_ref,
                      lfeat_ref, gfeat_ref, acc_ref,
                      *, N, HW_local, M2P, M3P, M3):
    t = pl.program_id(0)
    last = pl.num_programs(0) - 1

    # ---- step 0: init accumulator + local alignment head (tiny, hidden) -----
    @pl.when(t == 0)
    def _():
        acc_ref[...] = jnp.zeros_like(acc_ref)
        h1l = jnp.maximum(
            jnp.dot(xl_ref[...], lw1_ref[...], preferred_element_type=F32),
            0.0).astype(BF16)
        h2l = jnp.maximum(
            jnp.dot(h1l, lw2_ref[...], preferred_element_type=F32), 0.0)
        # context feature: global average pool over all pixels of each image
        lfeat_ref[...] = jnp.mean(h2l.reshape(N, HW_local, h2l.shape[-1]), axis=1)
        # TODO(synk): LocalAlignmentHead conv3 (128->1) + sigmoid is discarded
        # by AlignmentHead in eval mode, so it is intentionally not computed.

    # ---- every step: one conv1 tap, streamed weight + streamed im2col LHS ---
    acc_ref[...] += jnp.dot(xg_ref[0], w1_ref[0], preferred_element_type=F32)

    # ---- last step: bias+ReLU, conv2, conv3, global average pool ------------
    @pl.when(t == last)
    def _():
        C3 = w3_ref.shape[-1]
        h1 = jnp.maximum(acc_ref[...] + b1_ref[...], 0.0).astype(BF16)  # (N*M1,C1)

        # conv2: one one-hot gather matmul, repack to (N*M2P, 9*C1), one matmul
        pat2 = jnp.dot(sel2_ref[...], h1,
                       preferred_element_type=F32).astype(BF16)   # (N*9*M2P, C1)
        P2 = jnp.concatenate(
            [jnp.concatenate(
                [pat2[(n * 9 + tt) * M2P:(n * 9 + tt + 1) * M2P, :]
                 for tt in range(9)], axis=1)
             for n in range(N)], axis=0)                          # (N*M2P, 9*C1)
        h2 = jnp.maximum(
            jnp.dot(P2, w2_ref[...], preferred_element_type=F32) + b2_ref[...],
            0.0).astype(BF16)                                     # (N*M2P, C2)

        # conv3: same pattern
        pat3 = jnp.dot(sel3_ref[...], h2,
                       preferred_element_type=F32).astype(BF16)   # (N*9*M3P, C2)
        P3 = jnp.concatenate(
            [jnp.concatenate(
                [pat3[(n * 9 + tt) * M3P:(n * 9 + tt + 1) * M3P, :]
                 for tt in range(9)], axis=1)
             for n in range(N)], axis=0)                          # (N*M3P, 9*C2)
        h3 = jnp.maximum(
            jnp.dot(P3, w3_ref[...], preferred_element_type=F32) + b3_ref[...],
            0.0)                                                  # (N*M3P, C3)

        # global average pool over the M3 valid output positions per image
        gfeat_ref[...] = jnp.mean(h3.reshape(N, M3P, C3)[:, :M3, :], axis=1)
        # TODO(synk): GlobalAlignmentHead fc (128->2) is discarded by
        # AlignmentHead in eval mode, so it is intentionally not computed.


@jax.jit
def alignment_forward(x_local_nchw, x_global_nchw, p):
    # ---- local head input: (N*HW, 256) bf16 rows --------------------------
    N, Cl, Hl, Wl = x_local_nchw.shape
    HW_local = Hl * Wl
    xl = jnp.transpose(x_local_nchw, (0, 2, 3, 1)).astype(BF16)
    xl = xl.reshape(N * HW_local, Cl)

    # ---- global head geometry ----------------------------------------------
    Ng, Cin, H, W = x_global_nchw.shape
    assert Ng == N and H % 2 == 0 and W % 2 == 0
    Ho1, Wo1 = (H + 1) // 2, (W + 1) // 2
    Ho2, Wo2 = (Ho1 + 1) // 2, (Wo1 + 1) // 2
    Ho3, Wo3 = (Ho2 + 1) // 2, (Wo2 + 1) // 2
    M1, M2, M3 = Ho1 * Wo1, Ho2 * Wo2, Ho3 * Wo3
    M2P = -(-M2 // 16) * 16          # pad to bf16 sublane tile (16 rows)
    M3P = -(-M3 // 16) * 16
    C1 = p["g_w1"].shape[-1]
    C2 = p["g_w2"].shape[-1]
    C3 = p["g_w3"].shape[-1]

    # conv1 im2col LHS, one (N*M1, Cin) bf16 slab per tap (streamed per tap).
    # TODO(synk): if the producing network emitted NHWC activations this single
    # small XLA transpose/pad/gather fusion could be elided entirely.
    xg = jnp.transpose(x_global_nchw, (0, 2, 3, 1)).astype(BF16)   # NHWC
    xp = jnp.pad(xg, ((0, 0), (1, 1), (1, 1), (0, 0)))
    taps = [xp[:, kh:kh + 2 * Ho1:2, kw:kw + 2 * Wo1:2, :].reshape(N * M1, Cin)
            for kh in range(3) for kw in range(3)]
    x_taps = jnp.stack(taps, axis=0)                               # (9, N*M1, Cin)

    # one-hot gather matrices for the (tiny) conv2 / conv3 stages
    sel2 = _stride2_gather(Ho1, Wo1, N, M1, M2P)    # (N*9*M2P, N*M1)
    sel3 = _stride2_gather(Ho2, Wo2, N, M2P, M3P)   # (N*9*M3P, N*M2P)

    kernel = partial(_alignment_kernel, N=N, HW_local=HW_local,
                     M2P=M2P, M3P=M3P, M3=M3)

    in_specs = [
        _const_spec((N * HW_local, Cl)),                       # local x
        _const_spec(p["l_w1"].shape),                          # local w1
        _const_spec(p["l_w2"].shape),                          # local w2
        pl.BlockSpec((1, N * M1, Cin), lambda t: (t, 0, 0)),   # conv1 LHS (stream)
        pl.BlockSpec((1, Cin, C1), lambda t: (t, 0, 0)),       # conv1 W (stream)
        _const_spec((1, C1)),                                  # bn1 bias
        _const_spec(sel2.shape),
        _const_spec(p["g_w2"].shape),
        _const_spec((1, C2)),                                  # bn2 bias
        _const_spec(sel3.shape),
        _const_spec(p["g_w3"].shape),
        _const_spec((1, C3)),                                  # bn3 bias
    ]
    out_shape = (jax.ShapeDtypeStruct((N, p["l_w2"].shape[-1]), F32),
                 jax.ShapeDtypeStruct((N, C3), F32))
    out_specs = (pl.BlockSpec((N, p["l_w2"].shape[-1]), lambda t: (0, 0)),
                 pl.BlockSpec((N, C3), lambda t: (0, 0)))

    lfeat, gfeat = pl.pallas_call(
        kernel,
        out_shape=out_shape,
        grid_spec=pltpu.PrefetchScalarGridSpec(
            num_scalar_prefetch=0,
            grid=(9,),
            in_specs=in_specs,
            out_specs=out_specs,
            scratch_shapes=[pltpu.VMEM((N * M1, C1), F32)]),
        compiler_params=pltpu.CompilerParams(
            dimension_semantics=("arbitrary",),
            vmem_limit_bytes=20 * 1024 * 1024),
    )(xl, p["l_w1"], p["l_w2"],
      x_taps, p["g_w1"], p["g_bias1"],
      sel2, p["g_w2"], p["g_bias2"],
      sel3, p["g_w3"], p["g_bias3"])

    return lfeat.reshape(N, -1, 1, 1), gfeat      # (N,128,1,1), (N,128)


# -----------------------------------------------------------------------------
# AlignmentHead eval-mode forward
# -----------------------------------------------------------------------------
def alignment_head_forward(inputs, params):
    # TODO(synk): training-mode domain losses (MSE / sigmoid focal loss) and
    # GradientScalarLayer (backward-only) are not part of the eval forward.
    lfeat, gfeat = alignment_forward(inputs["local_head_feature"],
                                     inputs["global_head_feature"], params)
    return {"local_head_feature": lfeat,       # (N, 128, 1, 1)
            "global_head_feature": gfeat}      # (N, 128)


# -----------------------------------------------------------------------------
# Deterministic synthetic parameters (shapes match the PyTorch module).
# 3x3 conv weights: PyTorch (Cout, Cin, 3, 3) -> tap-major (9, Cin, Cout),
# BatchNorm scale folded into the weights (bf16), bias kept separately (f32).
# conv2/conv3 additionally reshaped to (9*Cin, Cout) for the collapsed matmul.
# -----------------------------------------------------------------------------
def _bn_params(key, C):
    k1, k2, k3, k4 = jax.random.split(key, 4)
    gamma = 1.0 + 0.1 * jax.random.normal(k1, (C,), F32)
    beta = 0.1 * jax.random.normal(k2, (C,), F32)
    mean = 0.1 * jax.random.normal(k3, (C,), F32)
    var = 1.0 + 0.1 * jax.random.uniform(k4, (C,), F32)
    scale = gamma / jnp.sqrt(var + 1e-5)     # BN(x) = scale * x + bias
    bias = beta - mean * scale
    return scale, bias


def init_params(key):
    ks = jax.random.split(key, 8)
    nrm = lambda k, shape, std: std * jax.random.normal(k, shape, F32)
    p = {}
    # LocalAlignmentHead: 1x1 convs stored as (Cin, Cout), bf16, std=0.01
    p["l_w1"] = nrm(ks[0], (256, 256), 0.01).astype(BF16)
    p["l_w2"] = nrm(ks[1], (256, 128), 0.01).astype(BF16)
    # GlobalAlignmentHead: 3x3 convs as (9, Cin, Cout) with BN scale folded
    w1 = nrm(ks[2], (9, 1024, 512), 0.02)
    w2 = nrm(ks[3], (9, 512, 128), 0.02)
    w3 = nrm(ks[4], (9, 128, 128), 0.02)
    s1, b1 = _bn_params(ks[5], 512)
    s2, b2 = _bn_params(ks[6], 128)
    s3, b3 = _bn_params(ks[7], 128)
    p["g_w1"] = (w1 * s1[None, None, :]).astype(BF16)                      # (9,1024,512)
    p["g_w2"] = (w2 * s2[None, None, :]).reshape(9 * 512, 128).astype(BF16)
    p["g_w3"] = (w3 * s3[None, None, :]).reshape(9 * 128, 128).astype(BF16)
    p["g_bias1"] = b1.reshape(1, 512).astype(F32)
    p["g_bias2"] = b2.reshape(1, 128).astype(F32)
    p["g_bias3"] = b3.reshape(1, 128).astype(F32)
    # TODO(synk): local conv3 (128->1) and global fc (128->2) parameters are
    # omitted -- their outputs are discarded by AlignmentHead in eval mode.
    return p


if __name__ == "__main__":
    key = jax.random.PRNGKey(0)
    kp, k1, k2 = jax.random.split(key, 3)
    params = init_params(kp)
    inputs = {
        "local_head_feature": jax.random.normal(k1, (2, 256, 16, 16), F32),
        "global_head_feature": jax.random.normal(k2, (2, 1024, 16, 16), F32),
        "feature domain": "source",
    }
    out = alignment_head_forward(inputs, params)
    jax.block_until_ready(out)
    assert out["local_head_feature"].shape == (2, 128, 1, 1)
    assert out["global_head_feature"].shape == (2, 128)
    assert np.all(np.isfinite(np.asarray(out["local_head_feature"], np.float32)))
    assert np.all(np.isfinite(np.asarray(out["global_head_feature"], np.float32)))
    print("KERNEL_OK")
</pallas_src>

<mosaic_0001>
module attributes {stable_mosaic.version = 11 : i64} {
  func.func @_alignment_kernel(%arg0: i32, %arg1: memref<512x256xbf16, #tpu.memory_space<vmem>>, %arg2: memref<256x256xbf16, #tpu.memory_space<vmem>>, %arg3: memref<256x128xbf16, #tpu.memory_space<vmem>>, %arg4: memref<1x128x1024xbf16, #tpu.memory_space<vmem>>, %arg5: memref<1x1024x512xbf16, #tpu.memory_space<vmem>>, %arg6: memref<1x512xf32, #tpu.memory_space<vmem>>, %arg7: memref<288x128xbf16, #tpu.memory_space<vmem>>, %arg8: memref<4608x128xbf16, #tpu.memory_space<vmem>>, %arg9: memref<1x128xf32, #tpu.memory_space<vmem>>, %arg10: memref<288x32xbf16, #tpu.memory_space<vmem>>, %arg11: memref<1152x128xbf16, #tpu.memory_space<vmem>>, %arg12: memref<1x128xf32, #tpu.memory_space<vmem>>, %arg13: memref<2x128xf32, #tpu.memory_space<vmem>>, %arg14: memref<2x128xf32, #tpu.memory_space<vmem>>, %arg15: memref<128x512xf32, #tpu.memory_space<vmem>>) attributes {dimension_semantics = [#tpu.dimension_semantics<arbitrary>], iteration_bounds = array<i64: 9>, scalar_prefetch = 0 : i64, scratch_operands = 1 : i64, tpu.core_type = #tpu.core_type<tc>, window_params = [{pipeline_mode = #tpu.pipeline_mode<synchronous>, transform_indices = @transform_0, window_bounds = array<i64: 512, 256>}, {pipeline_mode = #tpu.pipeline_mode<synchronous>, transform_indices = @transform_1, window_bounds = array<i64: 256, 256>}, {pipeline_mode = #tpu.pipeline_mode<synchronous>, transform_indices = @transform_2, window_bounds = array<i64: 256, 128>}, {transform_indices = @transform_3, window_bounds = array<i64: 1, 128, 1024>}, {transform_indices = @transform_4, window_bounds = array<i64: 1, 1024, 512>}, {pipeline_mode = #tpu.pipeline_mode<synchronous>, transform_indices = @transform_5, window_bounds = array<i64: 1, 512>}, {pipeline_mode = #tpu.pipeline_mode<synchronous>, transform_indices = @transform_6, window_bounds = array<i64: 288, 128>}, {pipeline_mode = #tpu.pipeline_mode<synchronous>, transform_indices = @transform_7, window_bounds = array<i64: 4608, 128>}, {pipeline_mode = #tpu.pipeline_mode<synchronous>, transform_indices = @transform_8, window_bounds = array<i64: 1, 128>}, {pipeline_mode = #tpu.pipeline_mode<synchronous>, transform_indices = @transform_9, window_bounds = array<i64: 288, 32>}, {pipeline_mode = #tpu.pipeline_mode<synchronous>, transform_indices = @transform_10, window_bounds = array<i64: 1152, 128>}, {pipeline_mode = #tpu.pipeline_mode<synchronous>, transform_indices = @transform_11, window_bounds = array<i64: 1, 128>}, {pipeline_mode = #tpu.pipeline_mode<synchronous>, transform_indices = @transform_12, window_bounds = array<i64: 2, 128>}, {pipeline_mode = #tpu.pipeline_mode<synchronous>, transform_indices = @transform_13, window_bounds = array<i64: 2, 128>}]} {
    %c0_i32 = arith.constant 0 : i32
    %0 = arith.cmpi eq, %arg0, %c0_i32 : i32
    %1 = arith.extui %0 : i1 to i32
    %c0_i32_0 = arith.constant 0 : i32
    %2 = arith.cmpi ne, %1, %c0_i32_0 : i32
    scf.if %2 {
      %cst_11 = arith.constant 0.000000e+00 : f32
      %14 = vector.broadcast %cst_11 : f32 to vector<128x512xf32>
      %c0_12 = arith.constant 0 : index
      %c0_13 = arith.constant 0 : index
      %15 = vector.load %arg15[%c0_12, %c0_13] : memref<128x512xf32, #tpu.memory_space<vmem>>, vector<128x512xf32>
      tpu.vector_store %arg15[%c0_12, %c0_13], %14 {strides = array<i32>} : memref<128x512xf32, #tpu.memory_space<vmem>>, vector<128x512xf32>,
      %c0_14 = arith.constant 0 : index
      %c0_15 = arith.constant 0 : index
      %16 = vector.load %arg1[%c0_14, %c0_15] : memref<512x256xbf16, #tpu.memory_space<vmem>>, vector<512x256xbf16>
      %c0_16 = arith.constant 0 : index
      %c0_17 = arith.constant 0 : index
      %17 = vector.load %arg2[%c0_16, %c0_17] : memref<256x256xbf16, #tpu.memory_space<vmem>>, vector<256x256xbf16>
      %cst_18 = arith.constant dense<0.000000e+00> : vector<512x256xf32>
      %18 = tpu.matmul %16, %17, %cst_18 {dimension_numbers = #tpu.dot_dimension_numbers<[1], [0], [0], [1], [0, 0, 1, 1], [], []>} : vector<512x256xbf16>, vector<256x256xbf16>, vector<512x256xf32> -> vector<512x256xf32>
      %cst_19 = arith.constant 0.000000e+00 : f32
      %19 = vector.broadcast %cst_19 : f32 to vector<512x256xf32>
      %20 = arith.maximumf %18, %19 : vector<512x256xf32>
      %21 = arith.truncf %20 : vector<512x256xf32> to vector<512x256xbf16>
      %c0_20 = arith.constant 0 : index
      %c0_21 = arith.constant 0 : index
      %22 = vector.load %arg3[%c0_20, %c0_21] : memref<256x128xbf16, #tpu.memory_space<vmem>>, vector<256x128xbf16>
      %cst_22 = arith.constant dense<0.000000e+00> : vector<512x128xf32>
      %23 = tpu.matmul %21, %22, %cst_22 {dimension_numbers = #tpu.dot_dimension_numbers<[1], [0], [0], [1], [0, 0, 1, 1], [], []>} : vector<512x256xbf16>, vector<256x128xbf16>, vector<512x128xf32> -> vector<512x128xf32>
      %cst_23 = arith.constant 0.000000e+00 : f32
      %24 = vector.broadcast %cst_23 : f32 to vector<512x128xf32>
      %25 = arith.maximumf %23, %24 : vector<512x128xf32>
      %26 = vector.shape_cast %25 : vector<512x128xf32> to vector<2x256x128xf32>
      %cst_24 = arith.constant dense<0.000000e+00> : vector<2x128xf32>
      %27 = vector.multi_reduction <add>, %26, %cst_24 [1] : vector<2x256x128xf32> to vector<2x128xf32>
      %cst_25 = arith.constant 2.560000e+02 : f32
      %28 = vector.broadcast %cst_25 : f32 to vector<2x128xf32>
      %29 = arith.divf %27, %28 : vector<2x128xf32>
      %c0_26 = arith.constant 0 : index
      %c0_27 = arith.constant 0 : index
      %30 = vector.load %arg13[%c0_26, %c0_27] : memref<2x128xf32, #tpu.memory_space<vmem>>, vector<2x128xf32>
      tpu.vector_store %arg13[%c0_26, %c0_27], %29 {strides = array<i32>} : memref<2x128xf32, #tpu.memory_space<vmem>>, vector<2x128xf32>,
    } else {
    }
    %c0 = arith.constant 0 : index
    %c0_1 = arith.constant 0 : index
    %3 = vector.load %arg15[%c0, %c0_1] : memref<128x512xf32, #tpu.memory_space<vmem>>, vector<128x512xf32>
    %c0_2 = arith.constant 0 : index
    %c0_3 = arith.constant 0 : index
    %c0_4 = arith.constant 0 : index
    %4 = vector.load %arg4[%c0_2, %c0_3, %c0_4] : memref<1x128x1024xbf16, #tpu.memory_space<vmem>>, vector<1x128x1024xbf16>
    %5 = vector.shape_cast %4 : vector<1x128x1024xbf16> to vector<128x1024xbf16>
    %c0_5 = arith.constant 0 : index
    %c0_6 = arith.constant 0 : index
    %c0_7 = arith.constant 0 : index
    %6 = vector.load %arg5[%c0_5, %c0_6, %c0_7] : memref<1x1024x512xbf16, #tpu.memory_space<vmem>>, vector<1x1024x512xbf16>
    %7 = vector.shape_cast %6 : vector<1x1024x512xbf16> to vector<1024x512xbf16>
    %cst = arith.constant dense<0.000000e+00> : vector<128x512xf32>
    %8 = tpu.matmul %5, %7, %cst {dimension_numbers = #tpu.dot_dimension_numbers<[1], [0], [0], [1], [0, 0, 1, 1], [], []>} : vector<128x1024xbf16>, vector<1024x512xbf16>, vector<128x512xf32> -> vector<128x512xf32>
    %9 = arith.addf %3, %8 : vector<128x512xf32>
    %c0_8 = arith.constant 0 : index
    %c0_9 = arith.constant 0 : index
    %10 = vector.load %arg15[%c0_8, %c0_9] : memref<128x512xf32, #tpu.memory_space<vmem>>, vector<128x512xf32>
    tpu.vector_store %arg15[%c0_8, %c0_9], %9 {strides = array<i32>} : memref<128x512xf32, #tpu.memory_space<vmem>>, vector<128x512xf32>,
    %c8_i32 = arith.constant 8 : i32
    %11 = arith.cmpi eq, %arg0, %c8_i32 : i32
    %12 = arith.extui %11 : i1 to i32
    %c0_i32_10 = arith.constant 0 : i32
    %13 = arith.cmpi ne, %12, %c0_i32_10 : i32
    scf.if %13 {
      %c0_11 = arith.constant 0 : index
      %c0_12 = arith.constant 0 : index
      %14 = vector.load %arg15[%c0_11, %c0_12] : memref<128x512xf32, #tpu.memory_space<vmem>>, vector<128x512xf32>
      %c0_13 = arith.constant 0 : index
      %c0_14 = arith.constant 0 : index
      %15 = vector.load %arg6[%c0_13, %c0_14] : memref<1x512xf32, #tpu.memory_space<vmem>>, vector<1x512xf32>
      %16 = vector.broadcast %15 : vector<1x512xf32> to vector<128x512xf32>
      %17 = arith.addf %14, %16 : vector<128x512xf32>
      %cst_15 = arith.constant 0.000000e+00 : f32
      %18 = vector.broadcast %cst_15 : f32 to vector<128x512xf32>
      %19 = arith.maximumf %17, %18 : vector<128x512xf32>
      %20 = arith.truncf %19 : vector<128x512xf32> to vector<128x512xbf16>
      %c0_16 = arith.constant 0 : index
      %c0_17 = arith.constant 0 : index
      %21 = vector.load %arg7[%c0_16, %c0_17] : memref<288x128xbf16, #tpu.memory_space<vmem>>, vector<288x128xbf16>
      %cst_18 = arith.constant dense<0.000000e+00> : vector<288x512xf32>
      %22 = tpu.matmul %21, %20, %cst_18 {dimension_numbers = #tpu.dot_dimension_numbers<[1], [0], [0], [1], [0, 0, 1, 1], [], []>} : vector<288x128xbf16>, vector<128x512xbf16>, vector<288x512xf32> -> vector<288x512xf32>
      %23 = arith.truncf %22 : vector<288x512xf32> to vector<288x512xbf16>
      %24 = vector.extract_strided_slice %23 {offsets = [0, 0], sizes = [16, 512], strides = [1, 1]} : vector<288x512xbf16> to vector<16x512xbf16>
      %25 = vector.extract_strided_slice %23 {offsets = [16, 0], sizes = [16, 512], strides = [1, 1]} : vector<288x512xbf16> to vector<16x512xbf16>
      %26 = vector.extract_strided_slice %23 {offsets = [32, 0], sizes = [16, 512], strides = [1, 1]} : vector<288x512xbf16> to vector<16x512xbf16>
      %27 = vector.extract_strided_slice %23 {offsets = [48, 0], sizes = [16, 512], strides = [1, 1]} : vector<288x512xbf16> to vector<16x512xbf16>
      %28 = vector.extract_strided_slice %23 {offsets = [64, 0], sizes = [16, 512], strides = [1, 1]} : vector<288x512xbf16> to vector<16x512xbf16>
      %29 = vector.extract_strided_slice %23 {offsets = [80, 0], sizes = [16, 512], strides = [1, 1]} : vector<288x512xbf16> to vector<16x512xbf16>
      %30 = vector.extract_strided_slice %23 {offsets = [96, 0], sizes = [16, 512], strides = [1, 1]} : vector<288x512xbf16> to vector<16x512xbf16>
      %31 = vector.extract_strided_slice %23 {offsets = [112, 0], sizes = [16, 512], strides = [1, 1]} : vector<288x512xbf16> to vector<16x512xbf16>
      %32 = vector.extract_strided_slice %23 {offsets = [128, 0], sizes = [16, 512], strides = [1, 1]} : vector<288x512xbf16> to vector<16x512xbf16>
      %33 = tpu.concatenate %24, %25, %26, %27, %28, %29, %30, %31, %32 in 1 : vector<16x512xbf16>, vector<16x512xbf16>, vector<16x512xbf16>, vector<16x512xbf16>, vector<16x512xbf16>, vector<16x512xbf16>, vector<16x512xbf16>, vector<16x512xbf16>, vector<16x512xbf16> -> vector<16x4608xbf16>
      %34 = vector.extract_strided_slice %23 {offsets = [144, 0], sizes = [16, 512], strides = [1, 1]} : vector<288x512xbf16> to vector<16x512xbf16>
      %35 = vector.extract_strided_slice %23 {offsets = [160, 0], sizes = [16, 512], strides = [1, 1]} : vector<288x512xbf16> to vector<16x512xbf16>
      %36 = vector.extract_strided_slice %23 {offsets = [176, 0], sizes = [16, 512], strides = [1, 1]} : vector<288x512xbf16> to vector<16x512xbf16>
      %37 = vector.extract_strided_slice %23 {offsets = [192, 0], sizes = [16, 512], strides = [1, 1]} : vector<288x512xbf16> to vector<16x512xbf16>
      %38 = vector.extract_strided_slice %23 {offsets = [208, 0], sizes = [16, 512], strides = [1, 1]} : vector<288x512xbf16> to vector<16x512xbf16>
      %39 = vector.extract_strided_slice %23 {offsets = [224, 0], sizes = [16, 512], strides = [1, 1]} : vector<288x512xbf16> to vector<16x512xbf16>
      %40 = vector.extract_strided_slice %23 {offsets = [240, 0], sizes = [16, 512], strides = [1, 1]} : vector<288x512xbf16> to vector<16x512xbf16>
      %41 = vector.extract_strided_slice %23 {offsets = [256, 0], sizes = [16, 512], strides = [1, 1]} : vector<288x512xbf16> to vector<16x512xbf16>
      %42 = vector.extract_strided_slice %23 {offsets = [272, 0], sizes = [16, 512], strides = [1, 1]} : vector<288x512xbf16> to vector<16x512xbf16>
      %43 = tpu.concatenate %34, %35, %36, %37, %38, %39, %40, %41, %42 in 1 : vector<16x512xbf16>, vector<16x512xbf16>, vector<16x512xbf16>, vector<16x512xbf16>, vector<16x512xbf16>, vector<16x512xbf16>, vector<16x512xbf16>, vector<16x512xbf16>, vector<16x512xbf16> -> vector<16x4608xbf16>
      %44 = tpu.concatenate %33, %43 in 0 : vector<16x4608xbf16>, vector<16x4608xbf16> -> vector<32x4608xbf16>
      %c0_19 = arith.constant 0 : index
      %c0_20 = arith.constant 0 : index
      %45 = vector.load %arg8[%c0_19, %c0_20] : memref<4608x128xbf16, #tpu.memory_space<vmem>>, vector<4608x128xbf16>
      %cst_21 = arith.constant dense<0.000000e+00> : vector<32x128xf32>
      %46 = tpu.matmul %44, %45, %cst_21 {dimension_numbers = #tpu.dot_dimension_numbers<[1], [0], [0], [1], [0, 0, 1, 1], [], []>} : vector<32x4608xbf16>, vector<4608x128xbf16>, vector<32x128xf32> -> vector<32x128xf32>
      %c0_22 = arith.constant 0 : index
      %c0_23 = arith.constant 0 : index
      %47 = vector.load %arg9[%c0_22, %c0_23] : memref<1x128xf32, #tpu.memory_space<vmem>>, vector<1x128xf32>
      %48 = vector.broadcast %47 : vector<1x128xf32> to vector<32x128xf32>
      %49 = arith.addf %46, %48 : vector<32x128xf32>
      %cst_24 = arith.constant 0.000000e+00 : f32
      %50 = vector.broadcast %cst_24 : f32 to vector<32x128xf32>
      %51 = arith.maximumf %49, %50 : vector<32x128xf32>
      %52 = arith.truncf %51 : vector<32x128xf32> to vector<32x128xbf16>
      %c0_25 = arith.constant 0 : index
      %c0_26 = arith.constant 0 : index
      %53 = vector.load %arg10[%c0_25, %c0_26] : memref<288x32xbf16, #tpu.memory_space<vmem>>, vector<288x32xbf16>
      %cst_27 = arith.constant dense<0.000000e+00> : vector<288x128xf32>
      %54 = tpu.matmul %53, %52, %cst_27 {dimension_numbers = #tpu.dot_dimension_numbers<[1], [0], [0], [1], [0, 0, 1, 1], [], []>} : vector<288x32xbf16>, vector<32x128xbf16>, vector<288x128xf32> -> vector<288x128xf32>
      %55 = arith.truncf %54 : vector<288x128xf32> to vector<288x128xbf16>
      %56 = vector.extract_strided_slice %55 {offsets = [0, 0], sizes = [16, 128], strides = [1, 1]} : vector<288x128xbf16> to vector<16x128xbf16>
      %57 = vector.extract_strided_slice %55 {offsets = [16, 0], sizes = [16, 128], strides = [1, 1]} : vector<288x128xbf16> to vector<16x128xbf16>
      %58 = vector.extract_strided_slice %55 {offsets = [32, 0], sizes = [16, 128], strides = [1, 1]} : vector<288x128xbf16> to vector<16x128xbf16>
      %59 = vector.extract_strided_slice %55 {offsets = [48, 0], sizes = [16, 128], strides = [1, 1]} : vector<288x128xbf16> to vector<16x128xbf16>
      %60 = vector.extract_strided_slice %55 {offsets = [64, 0], sizes = [16, 128], strides = [1, 1]} : vector<288x128xbf16> to vector<16x128xbf16>
      %61 = vector.extract_strided_slice %55 {offsets = [80, 0], sizes = [16, 128], strides = [1, 1]} : vector<288x128xbf16> to vector<16x128xbf16>
      %62 = vector.extract_strided_slice %55 {offsets = [96, 0], sizes = [16, 128], strides = [1, 1]} : vector<288x128xbf16> to vector<16x128xbf16>
      %63 = vector.extract_strided_slice %55 {offsets = [112, 0], sizes = [16, 128], strides = [1, 1]} : vector<288x128xbf16> to vector<16x128xbf16>
      %64 = vector.extract_strided_slice %55 {offsets = [128, 0], sizes = [16, 128], strides = [1, 1]} : vector<288x128xbf16> to vector<16x128xbf16>
      %65 = tpu.concatenate %56, %57, %58, %59, %60, %61, %62, %63, %64 in 1 : vector<16x128xbf16>, vector<16x128xbf16>, vector<16x128xbf16>, vector<16x128xbf16>, vector<16x128xbf16>, vector<16x128xbf16>, vector<16x128xbf16>, vector<16x128xbf16>, vector<16x128xbf16> -> vector<16x1152xbf16>
      %66 = vector.extract_strided_slice %55 {offsets = [144, 0], sizes = [16, 128], strides = [1, 1]} : vector<288x128xbf16> to vector<16x128xbf16>
      %67 = vector.extract_strided_slice %55 {offsets = [160, 0], sizes = [16, 128], strides = [1, 1]} : vector<288x128xbf16> to vector<16x128xbf16>
      %68 = vector.extract_strided_slice %55 {offsets = [176, 0], sizes = [16, 128], strides = [1, 1]} : vector<288x128xbf16> to vector<16x128xbf16>
      %69 = vector.extract_strided_slice %55 {offsets = [192, 0], sizes = [16, 128], strides = [1, 1]} : vector<288x128xbf16> to vector<16x128xbf16>
      %70 = vector.extract_strided_slice %55 {offsets = [208, 0], sizes = [16, 128], strides = [1, 1]} : vector<288x128xbf16> to vector<16x128xbf16>
      %71 = vector.extract_strided_slice %55 {offsets = [224, 0], sizes = [16, 128], strides = [1, 1]} : vector<288x128xbf16> to vector<16x128xbf16>
      %72 = vector.extract_strided_slice %55 {offsets = [240, 0], sizes = [16, 128], strides = [1, 1]} : vector<288x128xbf16> to vector<16x128xbf16>
      %73 = vector.extract_strided_slice %55 {offsets = [256, 0], sizes = [16, 128], strides = [1, 1]} : vector<288x128xbf16> to vector<16x128xbf16>
      %74 = vector.extract_strided_slice %55 {offsets = [272, 0], sizes = [16, 128], strides = [1, 1]} : vector<288x128xbf16> to vector<16x128xbf16>
      %75 = tpu.concatenate %66, %67, %68, %69, %70, %71, %72, %73, %74 in 1 : vector<16x128xbf16>, vector<16x128xbf16>, vector<16x128xbf16>, vector<16x128xbf16>, vector<16x128xbf16>, vector<16x128xbf16>, vector<16x128xbf16>, vector<16x128xbf16>, vector<16x128xbf16> -> vector<16x1152xbf16>
      %76 = tpu.concatenate %65, %75 in 0 : vector<16x1152xbf16>, vector<16x1152xbf16> -> vector<32x1152xbf16>
      %c0_28 = arith.constant 0 : index
      %c0_29 = arith.constant 0 : index
      %77 = vector.load %arg11[%c0_28, %c0_29] : memref<1152x128xbf16, #tpu.memory_space<vmem>>, vector<1152x128xbf16>
      %cst_30 = arith.constant dense<0.000000e+00> : vector<32x128xf32>
      %78 = tpu.matmul %76, %77, %cst_30 {dimension_numbers = #tpu.dot_dimension_numbers<[1], [0], [0], [1], [0, 0, 1, 1], [], []>} : vector<32x1152xbf16>, vector<1152x128xbf16>, vector<32x128xf32> -> vector<32x128xf32>
      %c0_31 = arith.constant 0 : index
      %c0_32 = arith.constant 0 : index
      %79 = vector.load %arg12[%c0_31, %c0_32] : memref<1x128xf32, #tpu.memory_space<vmem>>, vector<1x128xf32>
      %80 = vector.broadcast %79 : vector<1x128xf32> to vector<32x128xf32>
      %81 = arith.addf %78, %80 : vector<32x128xf32>
      %cst_33 = arith.constant 0.000000e+00 : f32
      %82 = vector.broadcast %cst_33 : f32 to vector<32x128xf32>
      %83 = arith.maximumf %81, %82 : vector<32x128xf32>
      %84 = vector.shape_cast %83 : vector<32x128xf32> to vector<2x16x128xf32>
      %85 = vector.extract_strided_slice %84 {offsets = [0, 0, 0], sizes = [2, 4, 128], strides = [1, 1, 1]} : vector<2x16x128xf32> to vector<2x4x128xf32>
      %cst_34 = arith.constant dense<0.000000e+00> : vector<2x128xf32>
      %86 = vector.multi_reduction <add>, %85, %cst_34 [1] : vector<2x4x128xf32> to vector<2x128xf32>
      %cst_35 = arith.constant 4.000000e+00 : f32
      %87 = vector.broadcast %cst_35 : f32 to vector<2x128xf32>
      %88 = arith.divf %86, %87 : vector<2x128xf32>
      %c0_36 = arith.constant 0 : index
      %c0_37 = arith.constant 0 : index
      %89 = vector.load %arg14[%c0_36, %c0_37] : memref<2x128xf32, #tpu.memory_space<vmem>>, vector<2x128xf32>
      tpu.vector_store %arg14[%c0_36, %c0_37], %88 {strides = array<i32>} : memref<2x128xf32, #tpu.memory_space<vmem>>, vector<2x128xf32>,
    } else {
    }
    return
  }
  func.func @transform_0(%arg0: i32) -> (i32, i32) {
    %c0_i32 = arith.constant 0 : i32
    %c0_i32_0 = arith.constant 0 : i32
    %c0_i32_1 = arith.constant 0 : i32
    return %c0_i32, %c0_i32_0 : i32, i32
  }
  func.func @transform_1(%arg0: i32) -> (i32, i32) {
    %c0_i32 = arith.constant 0 : i32
    %c0_i32_0 = arith.constant 0 : i32
    %c0_i32_1 = arith.constant 0 : i32
    return %c0_i32, %c0_i32_0 : i32, i32
  }
  func.func @transform_2(%arg0: i32) -> (i32, i32) {
    %c0_i32 = arith.constant 0 : i32
    %c0_i32_0 = arith.constant 0 : i32
    %c0_i32_1 = arith.constant 0 : i32
    return %c0_i32, %c0_i32_0 : i32, i32
  }
  func.func @transform_3(%arg0: i32) -> (i32, i32, i32) {
    %c0_i32 = arith.constant 0 : i32
    %c0_i32_0 = arith.constant 0 : i32
    %c0_i32_1 = arith.constant 0 : i32
    return %arg0, %c0_i32, %c0_i32_0 : i32, i32, i32
  }
  func.func @transform_4(%arg0: i32) -> (i32, i32, i32) {
    %c0_i32 = arith.constant 0 : i32
    %c0_i32_0 = arith.constant 0 : i32
    %c0_i32_1 = arith.constant 0 : i32
    return %arg0, %c0_i32, %c0_i32_0 : i32, i32, i32
  }
  func.func @transform_5(%arg0: i32) -> (i32, i32) {
    %c0_i32 = arith.constant 0 : i32
    %c0_i32_0 = arith.constant 0 : i32
    %c0_i32_1 = arith.constant 0 : i32
    return %c0_i32, %c0_i32_0 : i32, i32
  }
  func.func @transform_6(%arg0: i32) -> (i32, i32) {
    %c0_i32 = arith.constant 0 : i32
    %c0_i32_0 = arith.constant 0 : i32
    %c0_i32_1 = arith.constant 0 : i32
    return %c0_i32, %c0_i32_0 : i32, i32
  }
  func.func @transform_7(%arg0: i32) -> (i32, i32) {
    %c0_i32 = arith.constant 0 : i32
    %c0_i32_0 = arith.constant 0 : i32
    %c0_i32_1 = arith.constant 0 : i32
    return %c0_i32, %c0_i32_0 : i32, i32
  }
  func.func @transform_8(%arg0: i32) -> (i32, i32) {
    %c0_i32 = arith.constant 0 : i32
    %c0_i32_0 = arith.constant 0 : i32
    %c0_i32_1 = arith.constant 0 : i32
    return %c0_i32, %c0_i32_0 : i32, i32
  }
  func.func @transform_9(%arg0: i32) -> (i32, i32) {
    %c0_i32 = arith.constant 0 : i32
    %c0_i32_0 = arith.constant 0 : i32
    %c0_i32_1 = arith.constant 0 : i32
    return %c0_i32, %c0_i32_0 : i32, i32
  }
  func.func @transform_10(%arg0: i32) -> (i32, i32) {
    %c0_i32 = arith.constant 0 : i32
    %c0_i32_0 = arith.constant 0 : i32
    %c0_i32_1 = arith.constant 0 : i32
    return %c0_i32, %c0_i32_0 : i32, i32
  }
  func.func @transform_11(%arg0: i32) -> (i32, i32) {
    %c0_i32 = arith.constant 0 : i32
    %c0_i32_0 = arith.constant 0 : i32
    %c0_i32_1 = arith.constant 0 : i32
    return %c0_i32, %c0_i32_0 : i32, i32
  }
  func.func @transform_12(%arg0: i32) -> (i32, i32) {
    %c0_i32 = arith.constant 0 : i32
    %c0_i32_0 = arith.constant 0 : i32
    %c0_i32_1 = arith.constant 0 : i32
    return %c0_i32, %c0_i32_0 : i32, i32
  }
  func.func @transform_13(%arg0: i32) -> (i32, i32) {
    %c0_i32 = arith.constant 0 : i32
    %c0_i32_0 = arith.constant 0 : i32
    %c0_i32_1 = arith.constant 0 : i32
    return %c0_i32, %c0_i32_0 : i32, i32
  }
}

</mosaic_0001>

<bundles_post_ra>
// kernel: alignment_forward.1
= control target key start
LH: loop header
LB: loop body
LE: loop exit
PB: predicated region body
PF: predicated region fallthrough
CT: control target
= control target key end

     0   :  { %19 = vsyncpa [#allocation4], 0  ;;  %s16205_s0 = inlined_call_operand.vmem [shape: bf16[512,256], index: 0, kind: input, shape index: {}]   ;;  %s16206_s1 = inlined_call_operand.vmem [shape: bf16[256,256], index: 1, kind: input, shape index: {}]   ;;  %s16207_s2 = inlined_call_operand.vmem [shape: bf16[256,128], index: 2, kind: input, shape index: {}]   ;;  %s16208_s3 = inlined_call_operand.vmem [shape: bf16[9,128,1024], index: 3, kind: input, shape index: {}]   ;;  %s16209_s4 = inlined_call_operand.vmem [shape: bf16[9,1024,512], index: 4, kind: input, shape index: {}]   ;;  %s16210_s5 = inlined_call_operand.vmem [shape: f32[1,512], index: 5, kind: input, shape index: {}]   ;;  %s16211_s6 = inlined_call_operand.vmem [shape: bf16[288,128], index: 6, kind: input, shape index: {}]   ;;  %s16212_s7 = inlined_call_operand.vmem [shape: bf16[4608,128], index: 7, kind: input, shape index: {}]   ;;  %s16213_s8 = inlined_call_operand.vmem [shape: f32[1,128], index: 8, kind: input, shape index: {}]   ;;  %s16214_s9 = inlined_call_operand.vmem [shape: bf16[288,32], index: 9, kind: input, shape index: {}]   ;;  %s16215_s10 = inlined_call_operand.vmem [shape: bf16[1152,128], index: 10, kind: input, shape index: {}]   ;;  %s16216_s11 = inlined_call_operand.vmem [shape: f32[1,128], index: 11, kind: input, shape index: {}]   ;;  %s16217_s12 = inlined_call_operand.hbm [shape: f32[2,128], index: 12, kind: output, shape index: {0}]   ;;  %s16218_s13 = inlined_call_operand.hbm [shape: f32[2,128], index: 13, kind: output, shape index: {1}]  }
   0x1   :  { %20 = vsyncpa [#allocation6], 0  ;;  %s13479_s25 = smov 0  }
   0x2 LB: > { %s13485_s26 = sadd.s32 4294967295, %s13402_s25   ;;  %p10610_p0 = scmp.ge.s32.totalorder %s13402_s25, 1  ;;  %s13402_s25 = sphi %s13479_s25, %s26_s25  }
   0x3   : > { %p392_p1 = scmp.lt.s32.totalorder %s13402_s25, 10 }
   0x5   : > { %p393_p2 = pnand %p10610_p0, %p392_p1 }
   0x6   : > { %p436_p3 = scmp.lt.s32.totalorder (!%p393_p2), %s13485_s26, 8  ;;  %p10615_p4 = scmp.ne.s32.totalorder (!%p393_p2), %s13485_s26, 0 }
   0x7   : > { %396 = sbr.rel (%p393_p2) target bundleno = 2719 (0xa9f), region = 68 }
   0xe   : > { %s437_s27 = scalar_select %p436_p3, %s13485_s26, 8 }
   0xf   : > { %450 = sbr.rel (%p10615_p4) target bundleno = 782 (0x30e), region = 72  ;;  %v13505_v0 = vld [vmem:[%s16206_s1 + $0x4] ss:$8 sps:$4 sm:$0xff] (!%p10615_p4)   ;;  %v13404_v1 = vmov (!%p10615_p4), 0.0   ;;  %v12398_v2 = vld [vmem:[%s16206_s1] ss:$8 sps:$4 sm:$0xff] (!%p10615_p4)  }
  0x10   : > { %s11471_s28 = sshll.u32 %s437_s27, 9  ;;  %s11472_s29 = sshll.u32 %s437_s27, 11  ;;  %451 = vst [vmem:[#allocation2] sm:$0xff] (!%p10615_p4), %v13404_v1  ;;  %452 = vst [vmem:[#allocation2 + $0x8] sm:$0xff] (!%p10615_p4), %v13404_v1  ;;  %1091 = vmatprep.subr.bf16.mxu0 (!%p10615_p4), %v13505_v0  ;;  %v12399_v3 = vld [vmem:[%s16206_s1 + $0x14] ss:$8 sps:$4 sm:$0xff] (!%p10615_p4)  }
  0x11   : > { %s13494_s15 = scalar_lea.vmem %s16208_s3, %s11471_s28  ;;  %s13499_s18 = scalar_lea.vmem %s16209_s4, %s11472_s29  ;;  %453 = vst [vmem:[#allocation2 + $0x10] sm:$0xff] (!%p10615_p4), %v13404_v1  ;;  %454 = vst [vmem:[#allocation2 + $0x18] sm:$0xff] (!%p10615_p4), %v13404_v1  ;;  %1092 = vmatpush1.bf16.msra.mxu0 (!%p10615_p4), %v12398_v2  ;;  %v12401_v4 = vld [vmem:[%s16206_s1 + $0x10] ss:$8 sps:$4 sm:$0xff] (!%p10615_p4)   ;;  %v12402_v5 = vld [vmem:[%s16206_s1 + $0x24] ss:$8 sps:$4 sm:$0xff] (!%p10615_p4)  }
  0x12   : > { %455 = vst [vmem:[#allocation2 + $0x20] sm:$0xff] (!%p10615_p4), %v13404_v1  ;;  %456 = vst [vmem:[#allocation2 + $0x28] sm:$0xff] (!%p10615_p4), %v13404_v1  ;;  %1093 = vmatprep.subr.bf16.mxu0 (!%p10615_p4), %v12399_v3  ;;  %v12404_v6 = vld [vmem:[%s16206_s1 + $0x20] ss:$8 sps:$4 sm:$0xff] (!%p10615_p4)   ;;  %v12405_v7 = vld [vmem:[%s16206_s1 + $0x34] ss:$8 sps:$4 sm:$0xff] (!%p10615_p4)  }
  0x13   : > { %457 = vst [vmem:[#allocation2 + $0x30] sm:$0xff] (!%p10615_p4), %v13404_v1  ;;  %458 = vst [vmem:[#allocation2 + $0x38] sm:$0xff] (!%p10615_p4), %v13404_v1  ;;  %v12407_v8 = vld [vmem:[%s16206_s1 + $0x30] ss:$8 sps:$4 sm:$0xff] (!%p10615_p4)   ;;  %v12408_v9 = vld [vmem:[%s16206_s1 + $0x44] ss:$8 sps:$4 sm:$0xff] (!%p10615_p4)  }
  0x14   : > { %459 = vst [vmem:[#allocation2 + $0x40] sm:$0xff] (!%p10615_p4), %v13404_v1  ;;  %460 = vst [vmem:[#allocation2 + $0x48] sm:$0xff] (!%p10615_p4), %v13404_v1  ;;  %v12410_v10 = vld [vmem:[%s16206_s1 + $0x40] ss:$8 sps:$4 sm:$0xff] (!%p10615_p4)   ;;  %v12411_v11 = vld [vmem:[%s16206_s1 + $0x54] ss:$8 sps:$4 sm:$0xff] (!%p10615_p4)  }
  0x15   : > { %461 = vst [vmem:[#allocation2 + $0x50] sm:$0xff] (!%p10615_p4), %v13404_v1  ;;  %462 = vst [vmem:[#allocation2 + $0x58] sm:$0xff] (!%p10615_p4), %v13404_v1  ;;  %1094 = vmatpush1.bf16.msra.mxu0 (!%p10615_p4), %v12401_v4  ;;  %v12413_v12 = vld [vmem:[%s16206_s1 + $0x50] ss:$8 sps:$4 sm:$0xff] (!%p10615_p4)   ;;  %v12414_v13 = vld [vmem:[%s16206_s1 + $0x64] ss:$8 sps:$4 sm:$0xff] (!%p10615_p4)  }
  0x16   : > { %463 = vst [vmem:[#allocation2 + $0x60] sm:$0xff] %v13404_v1  ;;  %464 = vst [vmem:[#allocation2 + $0x68] sm:$0xff] %v13404_v1  ;;  %1095 = vmatprep.subr.bf16.mxu0 %v12402_v5  ;;  %v12446_v14 = vld [vmem:[%s16205_s0 + $0x4] ss:$8 sps:$4 sm:$0xff]   ;;  %v12416_v15 = vld [vmem:[%s16206_s1 + $0x60] ss:$8 sps:$4 sm:$0xff]  }
  0x17   : > { %465 = vst [vmem:[#allocation2 + $0x70] sm:$0xff] %v13404_v1  ;;  %466 = vst [vmem:[#allocation2 + $0x78] sm:$0xff] %v13404_v1  ;;  %v12417_v16 = vld [vmem:[%s16206_s1 + $0x74] ss:$8 sps:$4 sm:$0xff]   ;;  %1123 = vmatprep.mubr.bf16.mxu0 %v12446_v14  ;;  %v12419_v17 = vld [vmem:[%s16206_s1 + $0x70] ss:$8 sps:$4 sm:$0xff]  }
  0x18   : > { %467 = vst [vmem:[#allocation2 + $0x80] sm:$0xff] %v13404_v1  ;;  %468 = vst [vmem:[#allocation2 + $0x88] sm:$0xff] %v13404_v1  ;;  %v12420_v18 = vld [vmem:[%s16206_s1 + $0x84] ss:$8 sps:$4 sm:$0xff]   ;;  %v12422_v19 = vld [vmem:[%s16206_s1 + $0x80] ss:$8 sps:$4 sm:$0xff]  }
  0x19   : > { %469 = vst [vmem:[#allocation2 + $0x90] sm:$0xff] %v13404_v1  ;;  %470 = vst [vmem:[#allocation2 + $0x98] sm:$0xff] %v13404_v1  ;;  %1096 = vmatpush1.bf16.msra.mxu0 %v12404_v6  ;;  %v12423_v20 = vld [vmem:[%s16206_s1 + $0x94] ss:$8 sps:$4 sm:$0xff]   ;;  %v12425_v21 = vld [vmem:[%s16206_s1 + $0x90] ss:$8 sps:$4 sm:$0xff]  }
  0x1a   : > { %471 = vst [vmem:[#allocation2 + $0xa0] sm:$0xff] %v13404_v1  ;;  %472 = vst [vmem:[#allocation2 + $0xa8] sm:$0xff] %v13404_v1  ;;  %1097 = vmatprep.subr.bf16.mxu0 %v12405_v7  ;;  %v12426_v22 = vld [vmem:[%s16206_s1 + $0xa4] ss:$8 sps:$4 sm:$0xff]   ;;  %v12428_v23 = vld [vmem:[%s16206_s1 + $0xa0] ss:$8 sps:$4 sm:$0xff]  }
  0x1b   : > { %473 = vst [vmem:[#allocation2 + $0xb0] sm:$0xff] %v13404_v1  ;;  %474 = vst [vmem:[#allocation2 + $0xb8] sm:$0xff] %v13404_v1  ;;  %v12429_v24 = vld [vmem:[%s16206_s1 + $0xb4] ss:$8 sps:$4 sm:$0xff]   ;;  %v12431_v25 = vld [vmem:[%s16206_s1 + $0xb0] ss:$8 sps:$4 sm:$0xff]  }
  0x1c   : > { %475 = vst [vmem:[#allocation2 + $0xc0] sm:$0xff] %v13404_v1  ;;  %476 = vst [vmem:[#allocation2 + $0xc8] sm:$0xff] %v13404_v1  ;;  %v12432_v26 = vld [vmem:[%s16206_s1 + $0xc4] ss:$8 sps:$4 sm:$0xff]   ;;  %v12434_v27 = vld [vmem:[%s16206_s1 + $0xc0] ss:$8 sps:$4 sm:$0xff]  }
  0x1d   : > { %477 = vst [vmem:[#allocation2 + $0xd0] sm:$0xff] %v13404_v1  ;;  %478 = vst [vmem:[#allocation2 + $0xd8] sm:$0xff] %v13404_v1  ;;  %1098 = vmatpush1.bf16.msra.mxu0 %v12407_v8  ;;  %v12435_v28 = vld [vmem:[%s16206_s1 + $0xd4] ss:$8 sps:$4 sm:$0xff]   ;;  %v12437_v29 = vld [vmem:[%s16206_s1 + $0xd0] ss:$8 sps:$4 sm:$0xff]  }
  0x1e   : > { %479 = vst [vmem:[#allocation2 + $0xe0] sm:$0xff] %v13404_v1  ;;  %480 = vst [vmem:[#allocation2 + $0xe8] sm:$0xff] %v13404_v1  ;;  %1099 = vmatprep.subr.bf16.mxu0 %v12408_v9  ;;  %v12438_v30 = vld [vmem:[%s16206_s1 + $0xe4] ss:$8 sps:$4 sm:$0xff]   ;;  %v12440_v31 = vld [vmem:[%s16206_s1 + $0xe0] ss:$8 sps:$4 sm:$0xff]  }
  0x1f   : > { %481 = vst [vmem:[#allocation2 + $0xf0] sm:$0xff] %v13404_v1  ;;  %482 = vst [vmem:[#allocation2 + $0xf8] sm:$0xff] %v13404_v1  ;;  %v12441_v32 = vld [vmem:[%s16206_s1 + $0xf4] ss:$8 sps:$4 sm:$0xff]   ;;  %v12443_v33 = vld [vmem:[%s16206_s1 + $0xf0] ss:$8 sps:$4 sm:$0xff]  }
  0x20   : > { %483 = vst [vmem:[#allocation2 + $0x100] sm:$0xff] %v13404_v1  ;;  %484 = vst [vmem:[#allocation2 + $0x108] sm:$0xff] %v13404_v1  ;;  %v12444_v34 = vld [vmem:[%s16205_s0] ss:$8 sps:$4 sm:$0xff]   ;;  %v12447_v35 = vld [vmem:[%s16205_s0 + $0x14] ss:$8 sps:$4 sm:$0xff]  }
  0x21   : > { %485 = vst [vmem:[#allocation2 + $0x110] sm:$0xff] %v13404_v1  ;;  %486 = vst [vmem:[#allocation2 + $0x118] sm:$0xff] %v13404_v1  ;;  %1100 = vmatpush1.bf16.msra.mxu0 %v12410_v10  ;;  %v12449_v36 = vld [vmem:[%s16205_s0 + $0x10] ss:$8 sps:$4 sm:$0xff]   ;;  %v12450_v37 = vld [vmem:[%s16205_s0 + $0x24] ss:$8 sps:$4 sm:$0xff]  }
  0x22   : > { %487 = vst [vmem:[#allocation2 + $0x120] sm:$0xff] %v13404_v1  ;;  %488 = vst [vmem:[#allocation2 + $0x128] sm:$0xff] %v13404_v1  ;;  %1101 = vmatprep.subr.bf16.mxu0 %v12411_v11  ;;  %v12452_v38 = vld [vmem:[%s16205_s0 + $0x20] ss:$8 sps:$4 sm:$0xff]   ;;  %v12453_v39 = vld [vmem:[%s16205_s0 + $0x34] ss:$8 sps:$4 sm:$0xff]  }
  0x23   : > { %489 = vst [vmem:[#allocation2 + $0x130] sm:$0xff] %v13404_v1  ;;  %490 = vst [vmem:[#allocation2 + $0x138] sm:$0xff] %v13404_v1  ;;  %v12455_v40 = vld [vmem:[%s16205_s0 + $0x30] ss:$8 sps:$4 sm:$0xff]   ;;  %v12456_v41 = vld [vmem:[%s16205_s0 + $0x44] ss:$8 sps:$4 sm:$0xff]  }
  0x24   : > { %491 = vst [vmem:[#allocation2 + $0x140] sm:$0xff] %v13404_v1  ;;  %492 = vst [vmem:[#allocation2 + $0x148] sm:$0xff] %v13404_v1  ;;  %v12504_v42 = vld [vmem:[%s16207_s2] sm:$0xff]   ;;  %v13405_v43 = vmov 0   ;;  %v12459_v45 = vld [vmem:[%s16205_s0 + $0x54] ss:$8 sps:$4 sm:$0xff]  }
  0x25   : > { %493 = vst [vmem:[#allocation2 + $0x150] sm:$0xff] %v13404_v1  ;;  %494 = vst [vmem:[#allocation2 + $0x158] sm:$0xff] %v13404_v1  ;;  %1102 = vmatpush1.bf16.msra.mxu0 %v12413_v12  ;;  %1764 = vmatprep.subr.bf16.mxu1 %v13405_v43  ;;  %v12458_v44 = vld [vmem:[%s16205_s0 + $0x40] ss:$8 sps:$4 sm:$0xff]   ;;  %v12509_v47 = vld [vmem:[%s16207_s2 + $0x10] sm:$0xff]   ;;  %vm2196_vm0 = vcmask 1041409  }
  0x26   : > { %495 = vst [vmem:[#allocation2 + $0x160] sm:$0xff] %v13404_v1  ;;  %496 = vst [vmem:[#allocation2 + $0x168] sm:$0xff] %v13404_v1  ;;  %1103 = vmatprep.subr.bf16.mxu0 %v12414_v13  ;;  %1765 = vmatpush1.bf16.msra.mxu1 %v12504_v42  ;;  %v12508_v46 = vld [vmem:[%s16207_s2 + $0x8] sm:$0xff]   ;;  %v12461_v48 = vld [vmem:[%s16205_s0 + $0x50] ss:$8 sps:$4 sm:$0xff]  }
  0x27   : > { %497 = vst [vmem:[#allocation2 + $0x170] sm:$0xff] %v13404_v1  ;;  %498 = vst [vmem:[#allocation2 + $0x178] sm:$0xff] %v13404_v1  ;;  %1766 = vmatprep.subr.bf16.mxu1 %v13405_v43  ;;  %v12462_v49 = vld [vmem:[%s16205_s0 + $0x64] ss:$8 sps:$4 sm:$0xff]   ;;  %v12513_v50 = vld [vmem:[%s16207_s2 + $0x18] sm:$0xff]  }
  0x28   : > { %499 = vst [vmem:[#allocation2 + $0x180] sm:$0xff] %v13404_v1  ;;  %500 = vst [vmem:[#allocation2 + $0x188] sm:$0xff] %v13404_v1  ;;  %v12514_v51 = vld [vmem:[%s16207_s2 + $0x20] sm:$0xff]   ;;  %v12465_v53 = vld [vmem:[%s16205_s0 + $0x74] ss:$8 sps:$4 sm:$0xff]  }
  0x29   : > { %501 = vst [vmem:[#allocation2 + $0x190] sm:$0xff] %v13404_v1  ;;  %502 = vst [vmem:[#allocation2 + $0x198] sm:$0xff] %v13404_v1  ;;  %1104 = vmatpush1.bf16.msra.mxu0 %v12416_v15  ;;  %v12464_v52 = vld [vmem:[%s16205_s0 + $0x60] ss:$8 sps:$4 sm:$0xff]   ;;  %v12519_v55 = vld [vmem:[%s16207_s2 + $0x30] sm:$0xff]  }
  0x2a   : > { %503 = vst [vmem:[#allocation2 + $0x1a0] sm:$0xff] %v13404_v1  ;;  %504 = vst [vmem:[#allocation2 + $0x1a8] sm:$0xff] %v13404_v1  ;;  %1105 = vmatprep.subr.bf16.mxu0 %v12417_v16  ;;  %1767 = vmatpush1.bf16.msra.mxu1 %v12508_v46  ;;  %v12518_v54 = vld [vmem:[%s16207_s2 + $0x28] sm:$0xff]   ;;  %v12467_v56 = vld [vmem:[%s16205_s0 + $0x70] ss:$8 sps:$4 sm:$0xff]  }
  0x2b   : > { %505 = vst [vmem:[#allocation2 + $0x1b0] sm:$0xff] %v13404_v1  ;;  %506 = vst [vmem:[#allocation2 + $0x1b8] sm:$0xff] %v13404_v1  ;;  %1768 = vmatprep.subr.bf16.mxu1 %v13405_v43  ;;  %v12468_v57 = vld [vmem:[%s16205_s0 + $0x84] ss:$8 sps:$4 sm:$0xff]   ;;  %v12523_v58 = vld [vmem:[%s16207_s2 + $0x38] sm:$0xff]  }
  0x2c   : > { %507 = vst [vmem:[#allocation2 + $0x1c0] sm:$0xff] %v13404_v1  ;;  %508 = vst [vmem:[#allocation2 + $0x1c8] sm:$0xff] %v13404_v1  ;;  %v12524_v59 = vld [vmem:[%s16207_s2 + $0x40] sm:$0xff]   ;;  %v12471_v61 = vld [vmem:[%s16205_s0 + $0x94] ss:$8 sps:$4 sm:$0xff]  }
  0x2d   : > { %509 = vst [vmem:[#allocation2 + $0x1d0] sm:$0xff] %v13404_v1  ;;  %510 = vst [vmem:[#allocation2 + $0x1d8] sm:$0xff] %v13404_v1  ;;  %1106 = vmatpush1.bf16.msra.mxu0 %v12419_v17  ;;  %v12470_v60 = vld [vmem:[%s16205_s0 + $0x80] ss:$8 sps:$4 sm:$0xff]   ;;  %v12529_v63 = vld [vmem:[%s16207_s2 + $0x50] sm:$0xff]  }
  0x2e   : > { %511 = vst [vmem:[#allocation2 + $0x1e0] sm:$0xff] %v13404_v1  ;;  %512 = vst [vmem:[#allocation2 + $0x1e8] sm:$0xff] %v13404_v1  ;;  %1107 = vmatprep.subr.bf16.mxu0 %v12420_v18  ;;  %1769 = vmatpush1.bf16.msra.mxu1 %v12509_v47  ;;  %v12528_v62 = vld [vmem:[%s16207_s2 + $0x48] sm:$0xff]   ;;  %v12473_v0 = vld [vmem:[%s16205_s0 + $0x90] ss:$8 sps:$4 sm:$0xff]  }
  0x2f   : > { %513 = vst [vmem:[#allocation2 + $0x1f0] sm:$0xff] %v13404_v1  ;;  %514 = vst [vmem:[#allocation2 + $0x1f8] sm:$0xff] %v13404_v1  ;;  %1770 = vmatprep.subr.bf16.mxu1 %v13405_v43  ;;  %v12474_v1 = vld [vmem:[%s16205_s0 + $0xa4] ss:$8 sps:$4 sm:$0xff]   ;;  %v12533_v2 = vld [vmem:[%s16207_s2 + $0x58] sm:$0xff]  }
  0x30   : > { %v12534_v3 = vld [vmem:[%s16207_s2 + $0x60] sm:$0xff]   ;;  %v12477_v5 = vld [vmem:[%s16205_s0 + $0xb4] ss:$8 sps:$4 sm:$0xff]   ;;  %v12538_v6 = vld [vmem:[%s16207_s2 + $0x68] sm:$0xff]  }
  0x31   : > { %1108 = vmatpush1.bf16.msra.mxu0 %v12422_v19  ;;  %v12476_v4 = vld [vmem:[%s16205_s0 + $0xa0] ss:$8 sps:$4 sm:$0xff]   ;;  %v12539_v7 = vld [vmem:[%s16207_s2 + $0x70] sm:$0xff]   ;;  %v12480_v9 = vld [vmem:[%s16205_s0 + $0xc4] ss:$8 sps:$4 sm:$0xff]  }
  0x32   : > { %1109 = vmatprep.subr.bf16.mxu0 %v12423_v20  ;;  %1771 = vmatpush1.bf16.msra.mxu1 %v12513_v50  ;;  %v12479_v8 = vld [vmem:[%s16205_s0 + $0xb0] ss:$8 sps:$4 sm:$0xff]   ;;  %v12482_v11 = vld [vmem:[%s16205_s0 + $0xc0] ss:$8 sps:$4 sm:$0xff]   ;;  %v12483_v12 = vld [vmem:[%s16205_s0 + $0xd4] ss:$8 sps:$4 sm:$0xff]  }
  0x33   : > { %1772 = vmatprep.subr.bf16.mxu1 %v13405_v43  ;;  %v12543_v10 = vld [vmem:[%s16207_s2 + $0x78] sm:$0xff]   ;;  %v12486_v14 = vld [vmem:[%s16205_s0 + $0xe4] ss:$8 sps:$4 sm:$0xff]   ;;  %v12488_v15 = vld [vmem:[%s16205_s0 + $0xe0] ss:$8 sps:$4 sm:$0xff]  }
  0x34   : > { %v12485_v13 = vld [vmem:[%s16205_s0 + $0xd0] ss:$8 sps:$4 sm:$0xff]   ;;  %v12489_v16 = vld [vmem:[%s16205_s0 + $0xf4] ss:$8 sps:$4 sm:$0xff]   ;;  %v12492_v18 = vld [vmem:[%s16205_s0 + $0x104] ss:$8 sps:$4 sm:$0xff]  }
  0x35   : > { %1110 = vmatpush1.bf16.msra.mxu0 %v12425_v21  ;;  %v12491_v17 = vld [vmem:[%s16205_s0 + $0xf0] ss:$8 sps:$4 sm:$0xff]   ;;  %v12494_v19 = vld [vmem:[%s16205_s0 + $0x100] ss:$8 sps:$4 sm:$0xff]   ;;  %v12495_v20 = vld [vmem:[%s16205_s0 + $0x114] ss:$8 sps:$4 sm:$0xff]  }
  0x36   : > { %1111 = vmatprep.subr.bf16.mxu0 %v12426_v22  ;;  %1773 = vmatpush1.bf16.msra.mxu1 %v12514_v51  ;;  %v12497_v21 = vld [vmem:[%s16205_s0 + $0x110] ss:$8 sps:$4 sm:$0xff]   ;;  %v12498_v22 = vld [vmem:[%s16205_s0 + $0x124] ss:$8 sps:$4 sm:$0xff]  }
  0x37   : > { %1774 = vmatprep.subr.bf16.mxu1 %v13405_v43 }
  0x39   : > { %1112 = vmatpush1.bf16.msra.mxu0 %v12428_v23  ;;  %v12500_v23 = vld [vmem:[%s16205_s0 + $0x120] ss:$8 sps:$4 sm:$0xff]  }
  0x3a   : > { %1113 = vmatprep.subr.bf16.mxu0 %v12429_v24  ;;  %1775 = vmatpush1.bf16.msra.mxu1 %v12518_v54  ;;  %v12501_v24 = vld [vmem:[%s16205_s0 + $0x134] ss:$8 sps:$4 sm:$0xff]  }
  0x3b   : > { %1776 = vmatprep.subr.bf16.mxu1 %v13405_v43 }
  0x3d   : > { %1114 = vmatpush1.bf16.msra.mxu0 %v12431_v25  ;;  %v12503_v25 = vld [vmem:[%s16205_s0 + $0x130] ss:$8 sps:$4 sm:$0xff]  }
  0x3e   : > { %1115 = vmatprep.subr.bf16.mxu0 %v12432_v26  ;;  %1777 = vmatpush1.bf16.msra.mxu1 %v12519_v55  ;;  %v12505_v26 = vld [vmem:[%s16205_s0 + $0x144] ss:$8 sps:$4 sm:$0xff]   ;;  %v12546_v55 = vld [vmem:[%s16205_s0 + $0x1c0] ss:$8 sps:$4 sm:$0xff]  }
  0x3f   : > { %1778 = vmatprep.subr.bf16.mxu1 %v13405_v43 }
  0x41   : > { %1116 = vmatpush1.bf16.msra.mxu0 %v12434_v27  ;;  %v12507_v27 = vld [vmem:[%s16205_s0 + $0x140] ss:$8 sps:$4 sm:$0xff]  }
  0x42   : > { %1117 = vmatprep.subr.bf16.mxu0 %v12435_v28  ;;  %1779 = vmatpush1.bf16.msra.mxu1 %v12523_v58  ;;  %v12510_v28 = vld [vmem:[%s16205_s0 + $0x154] ss:$8 sps:$4 sm:$0xff]  }
  0x43   : > { %1780 = vmatprep.subr.bf16.mxu1 %v13405_v43 }
  0x45   : > { %1118 = vmatpush1.bf16.msra.mxu0 %v12437_v29  ;;  %v12512_v29 = vld [vmem:[%s16205_s0 + $0x150] ss:$8 sps:$4 sm:$0xff]  }
  0x46   : > { %1119 = vmatprep.subr.bf16.mxu0 %v12438_v30  ;;  %1781 = vmatpush1.bf16.msra.mxu1 %v12524_v59  ;;  %v12515_v30 = vld [vmem:[%s16205_s0 + $0x164] ss:$8 sps:$4 sm:$0xff]  }
  0x47   : > { %1782 = vmatprep.subr.bf16.mxu1 %v13405_v43 }
  0x49   : > { %1120 = vmatpush1.bf16.msra.mxu0 %v12440_v31  ;;  %v12517_v31 = vld [vmem:[%s16205_s0 + $0x160] ss:$8 sps:$4 sm:$0xff]  }
  0x4a   : > { %1121 = vmatprep.subr.bf16.mxu0 %v12441_v32  ;;  %1783 = vmatpush1.bf16.msra.mxu1 %v12528_v62  ;;  %v12520_v32 = vld [vmem:[%s16205_s0 + $0x174] ss:$8 sps:$4 sm:$0xff]  }
  0x4b   : > { %1784 = vmatprep.subr.bf16.mxu1 %v13405_v43 }
  0x4d   : > { %1122 = vmatpush1.bf16.msra.mxu0 %v12443_v33  ;;  %v12522_v33 = vld [vmem:[%s16205_s0 + $0x170] ss:$8 sps:$4 sm:$0xff]  }
  0x4e   : > { %1785 = vmatpush1.bf16.msra.mxu1 %v12529_v63 }
  0x4f   : > { %1786 = vmatprep.subr.bf16.mxu1 %v13405_v43 }
  0x50   : > { %1124 = vmatmul.mubr.bf16.vlgmr.msra.gmra.mrb[0].mxu0 %v12444_v34  ;;  %v12525_v34 = vld [vmem:[%s16205_s0 + $0x184] ss:$8 sps:$4 sm:$0xff]  }
  0x51   : > { %1133 = vmatprep.mubr.bf16.mxu0 %v12447_v35  ;;  %v12527_v35 = vld [vmem:[%s16205_s0 + $0x180] ss:$8 sps:$4 sm:$0xff]  }
  0x52   : > { %1787 = vmatpush1.bf16.msra.mxu1 %v12533_v2 }
  0x53   : > { %1788 = vmatprep.subr.bf16.mxu1 %v13405_v43 }
  0x56   : > { %1789 = vmatpush1.bf16.msra.mxu1 %v12534_v3  ;;  %v12549_v3 = vld [vmem:[%s16205_s0 + $0x1d0] ss:$8 sps:$4 sm:$0xff]  }
  0x57   : > { %1790 = vmatprep.subr.bf16.mxu1 %v13405_v43 }
  0x58   : > { %1134 = vmatmul.mubr.bf16.gmra.mrb[4].mxu0 %v12449_v36  ;;  %v12530_v36 = vld [vmem:[%s16205_s0 + $0x194] ss:$8 sps:$4 sm:$0xff]  }
  0x59   : > { %1143 = vmatprep.mubr.bf16.mxu0 %v12450_v37  ;;  %v12532_v37 = vld [vmem:[%s16205_s0 + $0x190] ss:$8 sps:$4 sm:$0xff]  }
  0x5a   : > { %1791 = vmatpush1.bf16.msra.mxu1 %v12538_v6 }
  0x5b   : > { %1792 = vmatprep.subr.bf16.mxu1 %v13405_v43 }
  0x5e   : > { %1793 = vmatpush1.bf16.msra.mxu1 %v12539_v7 }
  0x5f   : > { %1794 = vmatprep.subr.bf16.mxu1 %v13405_v43  ;;  %v12542_v43 = vld [vmem:[%s16205_s0 + $0x1b0] ss:$8 sps:$4 sm:$0xff]  }
  0x60   : > { %1144 = vmatmul.mubr.bf16.gmra.mrb[8].mxu0 %v12452_v38  ;;  %v12535_v38 = vld [vmem:[%s16205_s0 + $0x1a4] ss:$8 sps:$4 sm:$0xff]  }
  0x61   : > { %1153 = vmatprep.mubr.bf16.mxu0 %v12453_v39  ;;  %v12537_v39 = vld [vmem:[%s16205_s0 + $0x1a0] ss:$8 sps:$4 sm:$0xff]  }
  0x62   : > { %1795 = vmatpush1.bf16.msra.mxu1 %v12543_v10 }
  0x68   : > { %1154 = vmatmul.mubr.bf16.gmra.mrb[12].mxu0 %v12455_v40  ;;  %v12540_v40 = vld [vmem:[%s16205_s0 + $0x1b4] ss:$8 sps:$4 sm:$0xff]  }
  0x69   : > { %1163 = vmatprep.mubr.bf16.mxu0 %v12456_v41 }
  0x70   : > { %1164 = vmatmul.mubr.bf16.gmra.mrb[16].mxu0 %v12458_v44 }
  0x71   : > { %1173 = vmatprep.mubr.bf16.mxu0 %v12459_v45  ;;  %v12544_v45 = vld [vmem:[%s16205_s0 + $0x1c4] ss:$8 sps:$4 sm:$0xff]  }
  0x78   : > { %1174 = vmatmul.mubr.bf16.gmra.mrb[20].mxu0 %v12461_v48 }
  0x79   : > { %1183 = vmatprep.mubr.bf16.mxu0 %v12462_v49 }
  0x80   : > { %1184 = vmatmul.mubr.bf16.gmra.mrb[24].mxu0 %v12464_v52 }
  0x81   : > { %1193 = vmatprep.mubr.bf16.mxu0 %v12465_v53 }
  0x88   : > { %1194 = vmatmul.mubr.bf16.gmra.mrb[28].mxu0 %v12467_v56 }
  0x89   : > { %1203 = vmatprep.mubr.bf16.mxu0 %v12468_v57  ;;  %v12547_v57 = vld [vmem:[%s16205_s0 + $0x1d4] ss:$8 sps:$4 sm:$0xff]  }
  0x90   : > { %1204 = vmatmul.mubr.bf16.gmra.mrb[32].mxu0 %v12470_v60 }
  0x91   : > { %1213 = vmatprep.mubr.bf16.mxu0 %v12471_v61 }
  0x98   : > { %1214 = vmatmul.mubr.bf16.gmra.mrb[36].mxu0 %v12473_v0 }
  0x99   : > { %1223 = vmatprep.mubr.bf16.mxu0 %v12474_v1 }
  0xa0   : > { %1224 = vmatmul.mubr.bf16.gmra.mrb[40].mxu0 %v12476_v4 }
  0xa1   : > { %1233 = vmatprep.mubr.bf16.mxu0 %v12477_v5  ;;  %v12550_v5 = vld [vmem:[%s16205_s0 + $0x1e4] ss:$8 sps:$4 sm:$0xff]  }
  0xa8   : > { %1234 = vmatmul.mubr.bf16.gmra.mrb[44].mxu0 %v12479_v8 }
  0xa9   : > { %1243 = vmatprep.mubr.bf16.mxu0 %v12480_v9 }
  0xb0   : > { %1244 = vmatmul.mubr.bf16.gmra.mrb[48].mxu0 %v12482_v11 }
  0xb1   : > { %1253 = vmatprep.mubr.bf16.mxu0 %v12483_v12 }
  0xb8   : > { %1254 = vmatmul.mubr.bf16.gmra.mrb[52].mxu0 %v12485_v13 }
  0xb9   : > { %1263 = vmatprep.mubr.bf16.mxu0 %v12486_v14 }
  0xc0   : > { %1264 = vmatmul.mubr.bf16.gmra.mrb[56].mxu0 %v12488_v15  ;;  %v12552_v15 = vld [vmem:[%s16205_s0 + $0x1e0] ss:$8 sps:$4 sm:$0xff]  }
  0xc1   : > { %1273 = vmatprep.mubr.bf16.mxu0 %v12489_v16 }
  0xc8   : > { %1274 = vmatmul.mubr.bf16.gmra.mrb[60].mxu0 %v12491_v17  ;;  %v12553_v17 = vld [vmem:[%s16205_s0 + $0x1f4] ss:$8 sps:$4 sm:$0xff]  }
  0xc9   : > { %1283 = vmatprep.mubr.bf16.mxu0 %v12492_v18 }
  0xd0   : > { %1284 = vmatmul.mubr.bf16.gmra.mrb[64].mxu0 %v12494_v19 }
  0xd1   : > { %1293 = vmatprep.mubr.bf16.mxu0 %v12495_v20 }
  0xd8   : > { %1294 = vmatmul.mubr.bf16.gmra.mrb[68].mxu0 %v12497_v21 }
  0xd9   : > { %1303 = vmatprep.mubr.bf16.mxu0 %v12498_v22 }
  0xe0   : > { %1304 = vmatmul.mubr.bf16.gmra.mrb[72].mxu0 %v12500_v23 }
  0xe1   : > { %1313 = vmatprep.mubr.bf16.mxu0 %v12501_v24 }
  0xe8   : > { %1314 = vmatmul.mubr.bf16.gmra.mrb[76].mxu0 %v12503_v25 }
  0xe9   : > { %1323 = vmatprep.mubr.bf16.mxu0 %v12505_v26 }
  0xf0   : > { %1324 = vmatmul.mubr.bf16.gmra.mrb[80].mxu0 %v12507_v27  ;;  %v12555_v27 = vld [vmem:[%s16205_s0 + $0x1f0] ss:$8 sps:$4 sm:$0xff]  }
  0xf1   : > { %1333 = vmatprep.mubr.bf16.mxu0 %v12510_v28 }
  0xf8   : > { %1334 = vmatmul.mubr.bf16.gmra.mrb[84].mxu0 %v12512_v29 }
  0xf9   : > { %1343 = vmatprep.mubr.bf16.mxu0 %v12515_v30 }
 0x100   : > { %1344 = vmatmul.mubr.bf16.gmra.mrb[88].mxu0 %v12517_v31 }
 0x101   : > { %1353 = vmatprep.mubr.bf16.mxu0 %v12520_v32 }
 0x108   : > { %1354 = vmatmul.mubr.bf16.gmra.mrb[92].mxu0 %v12522_v33 }
 0x109   : > { %1363 = vmatprep.mubr.bf16.mxu0 %v12525_v34 }
 0x110   : > { %1364 = vmatmul.mubr.bf16.gmra.mrb[96].mxu0 %v12527_v35 }
 0x111   : > { %1373 = vmatprep.mubr.bf16.mxu0 %v12530_v36 }
 0x118   : > { %1374 = vmatmul.mubr.bf16.gmra.mrb[100].mxu0 %v12532_v37 }
 0x119   : > { %1383 = vmatprep.mubr.bf16.mxu0 %v12535_v38 }
 0x120   : > { %1384 = vmatmul.mubr.bf16.gmra.mrb[104].mxu0 %v12537_v39 }
 0x121   : > { %1393 = vmatprep.mubr.bf16.mxu0 %v12540_v40 }
 0x123   : > { %v1125_v41 = vpop.f32.mrb[0].mxu0 }
 0x124   : > { %v1127_v42 = vpop.f32.mrb[1].mxu0  ;;  %v1444_v46 = vmax.f32 %v1125_v41, 0.0 }
 0x125   : > { %v1129_v44 = vpop.f32.mrb[2].mxu0  ;;  %v1445_v49 = vmax.f32 %v1127_v42, 0.0 }
 0x126   : > { %v1446_v47 = vmax.f32 %v1129_v44, 0.0  ;;  %v1131_v48 = vpop.f32.mrb[3].mxu0 }
 0x127   : > { %v1447_v50 = vmax.f32 %v1131_v48, 0.0 }
 0x128   : > { %v1572_v51 = vpack.c.bf16 %v1446_v47, %v1444_v46  ;;  %1394 = vmatmul.mubr.bf16.gmra.mrb[108].mxu0 %v12542_v43 }
 0x129   : > { %v1573_v52 = vpack.c.bf16 %v1447_v50, %v1445_v49  ;;  %1403 = vmatprep.mubr.bf16.mxu0 %v12544_v45 }
 0x12b   : > { %v1135_v53 = vpop.f32.mrb[4].mxu0  ;;  %1796 = vmatprep.mubr.bf16.mxu1 %v1573_v52 }
 0x12c   : > { %v1137_v54 = vpop.f32.mrb[5].mxu0  ;;  %1797 = vmatmul.mubr.bf16.vlgmr.msra.gmra.mrb[0].mxu1 %v1572_v51  ;;  %v1448_v58 = vmax.f32 %v1135_v53, 0.0 }
 0x12d   : > { %v1139_v56 = vpop.f32.mrb[6].mxu0  ;;  %v1449_v61 = vmax.f32 %v1137_v54, 0.0 }
 0x12e   : > { %v1450_v59 = vmax.f32 %v1139_v56, 0.0  ;;  %v1141_v60 = vpop.f32.mrb[7].mxu0 }
 0x12f   : > { %v1451_v62 = vmax.f32 %v1141_v60, 0.0 }
 0x130   : > { %v1574_v63 = vpack.c.bf16 %v1450_v59, %v1448_v58  ;;  %1404 = vmatmul.mubr.bf16.gmra.mrb[112].mxu0 %v12546_v55 }
 0x131   : > { %v1575_v0 = vpack.c.bf16 %v1451_v62, %v1449_v61  ;;  %1413 = vmatprep.mubr.bf16.mxu0 %v12547_v57 }
 0x133   : > { %v1145_v1 = vpop.f32.mrb[8].mxu0  ;;  %1804 = vmatprep.mubr.bf16.mxu1 %v1575_v0 }
 0x134   : > { %v1147_v2 = vpop.f32.mrb[9].mxu0  ;;  %1805 = vmatmul.mubr.bf16.gmra.mrb[4].mxu1 %v1574_v63  ;;  %v1452_v6 = vmax.f32 %v1145_v1, 0.0 }
 0x135   : > { %v1149_v4 = vpop.f32.mrb[10].mxu0  ;;  %v1453_v9 = vmax.f32 %v1147_v2, 0.0 }
 0x136   : > { %v1454_v7 = vmax.f32 %v1149_v4, 0.0  ;;  %v1151_v8 = vpop.f32.mrb[11].mxu0 }
 0x137   : > { %v1455_v10 = vmax.f32 %v1151_v8, 0.0 }
 0x138   : > { %v1576_v11 = vpack.c.bf16 %v1454_v7, %v1452_v6  ;;  %1414 = vmatmul.mubr.bf16.gmra.mrb[116].mxu0 %v12549_v3 }
 0x139   : > { %v1577_v12 = vpack.c.bf16 %v1455_v10, %v1453_v9  ;;  %1423 = vmatprep.mubr.bf16.mxu0 %v12550_v5 }
 0x13b   : > { %v1155_v13 = vpop.f32.mrb[12].mxu0  ;;  %1812 = vmatprep.mubr.bf16.mxu1 %v1577_v12 }
 0x13c   : > { %v1157_v14 = vpop.f32.mrb[13].mxu0  ;;  %1813 = vmatmul.mubr.bf16.gmra.mrb[8].mxu1 %v1576_v11  ;;  %v1456_v18 = vmax.f32 %v1155_v13, 0.0 }
 0x13d   : > { %v1159_v16 = vpop.f32.mrb[14].mxu0  ;;  %v1457_v21 = vmax.f32 %v1157_v14, 0.0 }
 0x13e   : > { %v1458_v19 = vmax.f32 %v1159_v16, 0.0  ;;  %v1161_v20 = vpop.f32.mrb[15].mxu0 }
 0x13f   : > { %v1459_v22 = vmax.f32 %v1161_v20, 0.0 }
 0x140   : > { %v1578_v23 = vpack.c.bf16 %v1458_v19, %v1456_v18  ;;  %1424 = vmatmul.mubr.bf16.gmra.mrb[120].mxu0 %v12552_v15 }
 0x141   : > { %v1579_v24 = vpack.c.bf16 %v1459_v22, %v1457_v21  ;;  %1433 = vmatprep.mubr.bf16.mxu0 %v12553_v17 }
 0x143   : > { %v1165_v25 = vpop.f32.mrb[16].mxu0  ;;  %1820 = vmatprep.mubr.bf16.mxu1 %v1579_v24 }
 0x144   : > { %v1167_v26 = vpop.f32.mrb[17].mxu0  ;;  %1821 = vmatmul.mubr.bf16.gmra.mrb[12].mxu1 %v1578_v23  ;;  %v1460_v29 = vmax.f32 %v1165_v25, 0.0 }
 0x145   : > { %v1169_v28 = vpop.f32.mrb[18].mxu0  ;;  %v1461_v32 = vmax.f32 %v1167_v26, 0.0 }
 0x146   : > { %v1462_v30 = vmax.f32 %v1169_v28, 0.0  ;;  %v1171_v31 = vpop.f32.mrb[19].mxu0 }
 0x147   : > { %v1463_v33 = vmax.f32 %v1171_v31, 0.0 }
 0x148   : > { %v1580_v34 = vpack.c.bf16 %v1462_v30, %v1460_v29  ;;  %1434 = vmatmul.mubr.bf16.gmra.mrb[124].mxu0 %v12555_v27 }
 0x149   : > { %v1581_v35 = vpack.c.bf16 %v1463_v33, %v1461_v32 }
 0x14b   : > { %v1175_v36 = vpop.f32.mrb[20].mxu0  ;;  %1828 = vmatprep.mubr.bf16.mxu1 %v1581_v35 }
 0x14c   : > { %v1177_v37 = vpop.f32.mrb[21].mxu0  ;;  %1829 = vmatmul.mubr.bf16.gmra.mrb[16].mxu1 %v1580_v34  ;;  %v1464_v39 = vmax.f32 %v1175_v36, 0.0 }
 0x14d   : > { %v1179_v38 = vpop.f32.mrb[22].mxu0  ;;  %v1465_v42 = vmax.f32 %v1177_v37, 0.0 }
 0x14e   : > { %v1466_v40 = vmax.f32 %v1179_v38, 0.0  ;;  %v1181_v41 = vpop.f32.mrb[23].mxu0 }
 0x14f   : > { %v1467_v43 = vmax.f32 %v1181_v41, 0.0 }
 0x150   : > { %v1582_v44 = vpack.c.bf16 %v1466_v40, %v1464_v39 }
 0x151   : > { %v1583_v45 = vpack.c.bf16 %v1467_v43, %v1465_v42 }
 0x153   : > { %v1185_v46 = vpop.f32.mrb[24].mxu0  ;;  %1836 = vmatprep.mubr.bf16.mxu1 %v1583_v45 }
 0x154   : > { %v1187_v47 = vpop.f32.mrb[25].mxu0  ;;  %1837 = vmatmul.mubr.bf16.gmra.mrb[20].mxu1 %v1582_v44  ;;  %v1468_v49 = vmax.f32 %v1185_v46, 0.0 }
 0x155   : > { %v1189_v48 = vpop.f32.mrb[26].mxu0  ;;  %v1469_v52 = vmax.f32 %v1187_v47, 0.0 }
 0x156   : > { %v1470_v50 = vmax.f32 %v1189_v48, 0.0  ;;  %v1191_v51 = vpop.f32.mrb[27].mxu0 }
 0x157   : > { %v1471_v53 = vmax.f32 %v1191_v51, 0.0 }
 0x158   : > { %v1584_v54 = vpack.c.bf16 %v1470_v50, %v1468_v49 }
 0x159   : > { %v1585_v55 = vpack.c.bf16 %v1471_v53, %v1469_v52 }
 0x15b   : > { %v1195_v56 = vpop.f32.mrb[28].mxu0  ;;  %1844 = vmatprep.mubr.bf16.mxu1 %v1585_v55 }
 0x15c   : > { %v1197_v57 = vpop.f32.mrb[29].mxu0  ;;  %1845 = vmatmul.mubr.bf16.gmra.mrb[24].mxu1 %v1584_v54  ;;  %v1472_v59 = vmax.f32 %v1195_v56, 0.0 }
 0x15d   : > { %v1199_v58 = vpop.f32.mrb[30].mxu0  ;;  %v1473_v62 = vmax.f32 %v1197_v57, 0.0 }
 0x15e   : > { %v1474_v60 = vmax.f32 %v1199_v58, 0.0  ;;  %v1201_v61 = vpop.f32.mrb[31].mxu0 }
 0x15f   : > { %v1475_v63 = vmax.f32 %v1201_v61, 0.0 }
 0x160   : > { %v1586_v0 = vpack.c.bf16 %v1474_v60, %v1472_v59 }
 0x161   : > { %v1587_v1 = vpack.c.bf16 %v1475_v63, %v1473_v62 }
 0x163   : > { %v1205_v2 = vpop.f32.mrb[32].mxu0  ;;  %1852 = vmatprep.mubr.bf16.mxu1 %v1587_v1 }
 0x164   : > { %v1207_v3 = vpop.f32.mrb[33].mxu0  ;;  %1853 = vmatmul.mubr.bf16.gmra.mrb[28].mxu1 %v1586_v0  ;;  %v1476_v5 = vmax.f32 %v1205_v2, 0.0 }
 0x165   : > { %v1209_v4 = vpop.f32.mrb[34].mxu0  ;;  %v1477_v8 = vmax.f32 %v1207_v3, 0.0 }
 0x166   : > { %v1478_v6 = vmax.f32 %v1209_v4, 0.0  ;;  %v1211_v7 = vpop.f32.mrb[35].mxu0 }
 0x167   : > { %v1479_v9 = vmax.f32 %v1211_v7, 0.0 }
 0x168   : > { %v1588_v10 = vpack.c.bf16 %v1478_v6, %v1476_v5 }
 0x169   : > { %v1589_v11 = vpack.c.bf16 %v1479_v9, %v1477_v8 }
 0x16b   : > { %v1215_v12 = vpop.f32.mrb[36].mxu0  ;;  %1860 = vmatprep.mubr.bf16.mxu1 %v1589_v11 }
 0x16c   : > { %v1217_v13 = vpop.f32.mrb[37].mxu0  ;;  %1861 = vmatmul.mubr.bf16.gmra.mrb[32].mxu1 %v1588_v10  ;;  %v1480_v15 = vmax.f32 %v1215_v12, 0.0 }
 0x16d   : > { %v1219_v14 = vpop.f32.mrb[38].mxu0  ;;  %v1481_v18 = vmax.f32 %v1217_v13, 0.0 }
 0x16e   : > { %v1482_v16 = vmax.f32 %v1219_v14, 0.0  ;;  %v1221_v17 = vpop.f32.mrb[39].mxu0 }
 0x16f   : > { %v1483_v19 = vmax.f32 %v1221_v17, 0.0 }
 0x170   : > { %v1590_v20 = vpack.c.bf16 %v1482_v16, %v1480_v15 }
 0x171   : > { %v1591_v21 = vpack.c.bf16 %v1483_v19, %v1481_v18 }
 0x173   : > { %v1225_v22 = vpop.f32.mrb[40].mxu0  ;;  %1868 = vmatprep.mubr.bf16.mxu1 %v1591_v21 }
 0x174   : > { %v1227_v23 = vpop.f32.mrb[41].mxu0  ;;  %1869 = vmatmul.mubr.bf16.gmra.mrb[36].mxu1 %v1590_v20  ;;  %v1484_v25 = vmax.f32 %v1225_v22, 0.0 }
 0x175   : > { %v1229_v24 = vpop.f32.mrb[42].mxu0  ;;  %v1485_v28 = vmax.f32 %v1227_v23, 0.0 }
 0x176   : > { %v1486_v26 = vmax.f32 %v1229_v24, 0.0  ;;  %v1231_v27 = vpop.f32.mrb[43].mxu0 }
 0x177   : > { %v1487_v29 = vmax.f32 %v1231_v27, 0.0 }
 0x178   : > { %v1592_v30 = vpack.c.bf16 %v1486_v26, %v1484_v25 }
 0x179   : > { %v1593_v31 = vpack.c.bf16 %v1487_v29, %v1485_v28 }
 0x17b   : > { %v1235_v32 = vpop.f32.mrb[44].mxu0  ;;  %1876 = vmatprep.mubr.bf16.mxu1 %v1593_v31 }
 0x17c   : > { %v1237_v33 = vpop.f32.mrb[45].mxu0  ;;  %1877 = vmatmul.mubr.bf16.gmra.mrb[40].mxu1 %v1592_v30  ;;  %v1488_v35 = vmax.f32 %v1235_v32, 0.0 }
 0x17d   : > { %v1239_v34 = vpop.f32.mrb[46].mxu0  ;;  %v1489_v38 = vmax.f32 %v1237_v33, 0.0 }
 0x17e   : > { %v1490_v36 = vmax.f32 %v1239_v34, 0.0  ;;  %v1241_v37 = vpop.f32.mrb[47].mxu0 }
 0x17f   : > { %v1491_v39 = vmax.f32 %v1241_v37, 0.0 }
 0x180   : > { %v1594_v40 = vpack.c.bf16 %v1490_v36, %v1488_v35 }
 0x181   : > { %v1595_v41 = vpack.c.bf16 %v1491_v39, %v1489_v38 }
 0x183   : > { %v1245_v42 = vpop.f32.mrb[48].mxu0  ;;  %1884 = vmatprep.mubr.bf16.mxu1 %v1595_v41 }
 0x184   : > { %v1247_v43 = vpop.f32.mrb[49].mxu0  ;;  %1885 = vmatmul.mubr.bf16.gmra.mrb[44].mxu1 %v1594_v40  ;;  %v1492_v45 = vmax.f32 %v1245_v42, 0.0 }
 0x185   : > { %v1249_v44 = vpop.f32.mrb[50].mxu0  ;;  %v1493_v48 = vmax.f32 %v1247_v43, 0.0 }
 0x186   : > { %v1494_v46 = vmax.f32 %v1249_v44, 0.0  ;;  %v1251_v47 = vpop.f32.mrb[51].mxu0 }
 0x187   : > { %v1495_v49 = vmax.f32 %v1251_v47, 0.0 }
 0x188   : > { %v1596_v50 = vpack.c.bf16 %v1494_v46, %v1492_v45 }
 0x189   : > { %v1597_v51 = vpack.c.bf16 %v1495_v49, %v1493_v48 }
 0x18b   : > { %v1255_v52 = vpop.f32.mrb[52].mxu0  ;;  %1892 = vmatprep.mubr.bf16.mxu1 %v1597_v51 }
 0x18c   : > { %v1257_v53 = vpop.f32.mrb[53].mxu0  ;;  %1893 = vmatmul.mubr.bf16.gmra.mrb[48].mxu1 %v1596_v50  ;;  %v1496_v55 = vmax.f32 %v1255_v52, 0.0 }
 0x18d   : > { %v1259_v54 = vpop.f32.mrb[54].mxu0  ;;  %v1497_v58 = vmax.f32 %v1257_v53, 0.0 }
 0x18e   : > { %v1498_v56 = vmax.f32 %v1259_v54, 0.0  ;;  %v1261_v57 = vpop.f32.mrb[55].mxu0 }
 0x18f   : > { %v1499_v59 = vmax.f32 %v1261_v57, 0.0 }
 0x190   : > { %v1598_v60 = vpack.c.bf16 %v1498_v56, %v1496_v55 }
 0x191   : > { %v1599_v61 = vpack.c.bf16 %v1499_v59, %v1497_v58 }
 0x193   : > { %v1265_v62 = vpop.f32.mrb[56].mxu0  ;;  %1900 = vmatprep.mubr.bf16.mxu1 %v1599_v61 }
 0x194   : > { %v1267_v63 = vpop.f32.mrb[57].mxu0  ;;  %1901 = vmatmul.mubr.bf16.gmra.mrb[52].mxu1 %v1598_v60  ;;  %v1500_v1 = vmax.f32 %v1265_v62, 0.0 }
 0x195   : > { %v1269_v0 = vpop.f32.mrb[58].mxu0  ;;  %v1501_v4 = vmax.f32 %v1267_v63, 0.0 }
 0x196   : > { %v1502_v2 = vmax.f32 %v1269_v0, 0.0  ;;  %v1271_v3 = vpop.f32.mrb[59].mxu0 }
 0x197   : > { %v1503_v5 = vmax.f32 %v1271_v3, 0.0 }
 0x198   : > { %v1600_v6 = vpack.c.bf16 %v1502_v2, %v1500_v1 }
 0x199   : > { %v1601_v7 = vpack.c.bf16 %v1503_v5, %v1501_v4 }
 0x19b   : > { %v1275_v8 = vpop.f32.mrb[60].mxu0  ;;  %1908 = vmatprep.mubr.bf16.mxu1 %v1601_v7 }
 0x19c   : > { %v1277_v9 = vpop.f32.mrb[61].mxu0  ;;  %1909 = vmatmul.mubr.bf16.gmra.mrb[56].mxu1 %v1600_v6  ;;  %v1504_v11 = vmax.f32 %v1275_v8, 0.0 }
 0x19d   : > { %v1279_v10 = vpop.f32.mrb[62].mxu0  ;;  %v1505_v14 = vmax.f32 %v1277_v9, 0.0 }
 0x19e   : > { %v1506_v12 = vmax.f32 %v1279_v10, 0.0  ;;  %v1281_v13 = vpop.f32.mrb[63].mxu0 }
 0x19f   : > { %v1507_v15 = vmax.f32 %v1281_v13, 0.0 }
 0x1a0   : > { %v1602_v16 = vpack.c.bf16 %v1506_v12, %v1504_v11 }
 0x1a1   : > { %v1603_v17 = vpack.c.bf16 %v1507_v15, %v1505_v14 }
 0x1a3   : > { %v1285_v18 = vpop.f32.mrb[64].mxu0  ;;  %1916 = vmatprep.mubr.bf16.mxu1 %v1603_v17 }
 0x1a4   : > { %v1287_v19 = vpop.f32.mrb[65].mxu0  ;;  %1917 = vmatmul.mubr.bf16.gmra.mrb[60].mxu1 %v1602_v16  ;;  %v1508_v21 = vmax.f32 %v1285_v18, 0.0 }
 0x1a5   : > { %v1289_v20 = vpop.f32.mrb[66].mxu0  ;;  %v1509_v24 = vmax.f32 %v1287_v19, 0.0 }
 0x1a6   : > { %v1510_v22 = vmax.f32 %v1289_v20, 0.0  ;;  %v1291_v23 = vpop.f32.mrb[67].mxu0 }
 0x1a7   : > { %v1511_v25 = vmax.f32 %v1291_v23, 0.0 }
 0x1a8   : > { %v1604_v26 = vpack.c.bf16 %v1510_v22, %v1508_v21 }
 0x1a9   : > { %v1605_v27 = vpack.c.bf16 %v1511_v25, %v1509_v24 }
 0x1ab   : > { %v1295_v28 = vpop.f32.mrb[68].mxu0  ;;  %1924 = vmatprep.mubr.bf16.mxu1 %v1605_v27 }
 0x1ac   : > { %v1297_v29 = vpop.f32.mrb[69].mxu0  ;;  %1925 = vmatmul.mubr.bf16.gmra.mrb[64].mxu1 %v1604_v26  ;;  %v1512_v31 = vmax.f32 %v1295_v28, 0.0 }
 0x1ad   : > { %v1299_v30 = vpop.f32.mrb[70].mxu0  ;;  %v1513_v34 = vmax.f32 %v1297_v29, 0.0 }
 0x1ae   : > { %v1514_v32 = vmax.f32 %v1299_v30, 0.0  ;;  %v1301_v33 = vpop.f32.mrb[71].mxu0 }
 0x1af   : > { %v1515_v35 = vmax.f32 %v1301_v33, 0.0 }
 0x1b0   : > { %v1606_v36 = vpack.c.bf16 %v1514_v32, %v1512_v31 }
 0x1b1   : > { %v1607_v37 = vpack.c.bf16 %v1515_v35, %v1513_v34 }
 0x1b3   : > { %v1305_v38 = vpop.f32.mrb[72].mxu0  ;;  %1932 = vmatprep.mubr.bf16.mxu1 %v1607_v37 }
 0x1b4   : > { %v1307_v39 = vpop.f32.mrb[73].mxu0  ;;  %1933 = vmatmul.mubr.bf16.gmra.mrb[68].mxu1 %v1606_v36  ;;  %v1516_v41 = vmax.f32 %v1305_v38, 0.0 }
 0x1b5   : > { %v1309_v40 = vpop.f32.mrb[74].mxu0  ;;  %v1517_v44 = vmax.f32 %v1307_v39, 0.0 }
 0x1b6   : > { %v1518_v42 = vmax.f32 %v1309_v40, 0.0  ;;  %v1311_v43 = vpop.f32.mrb[75].mxu0 }
 0x1b7   : > { %v1519_v45 = vmax.f32 %v1311_v43, 0.0 }
 0x1b8   : > { %v1608_v46 = vpack.c.bf16 %v1518_v42, %v1516_v41 }
 0x1b9   : > { %v1609_v47 = vpack.c.bf16 %v1519_v45, %v1517_v44 }
 0x1bb   : > { %v1315_v48 = vpop.f32.mrb[76].mxu0  ;;  %1940 = vmatprep.mubr.bf16.mxu1 %v1609_v47 }
 0x1bc   : > { %v1317_v49 = vpop.f32.mrb[77].mxu0  ;;  %1941 = vmatmul.mubr.bf16.gmra.mrb[72].mxu1 %v1608_v46  ;;  %v1520_v51 = vmax.f32 %v1315_v48, 0.0 }
 0x1bd   : > { %v1319_v50 = vpop.f32.mrb[78].mxu0  ;;  %v1521_v54 = vmax.f32 %v1317_v49, 0.0 }
 0x1be   : > { %v1522_v52 = vmax.f32 %v1319_v50, 0.0  ;;  %v1321_v53 = vpop.f32.mrb[79].mxu0 }
 0x1bf   : > { %v1523_v55 = vmax.f32 %v1321_v53, 0.0 }
 0x1c0   : > { %v1610_v56 = vpack.c.bf16 %v1522_v52, %v1520_v51 }
 0x1c1   : > { %v1611_v57 = vpack.c.bf16 %v1523_v55, %v1521_v54 }
 0x1c3   : > { %v1325_v58 = vpop.f32.mrb[80].mxu0  ;;  %1948 = vmatprep.mubr.bf16.mxu1 %v1611_v57 }
 0x1c4   : > { %v1327_v59 = vpop.f32.mrb[81].mxu0  ;;  %1949 = vmatmul.mubr.bf16.gmra.mrb[76].mxu1 %v1610_v56  ;;  %v1524_v61 = vmax.f32 %v1325_v58, 0.0 }
 0x1c5   : > { %v1329_v60 = vpop.f32.mrb[82].mxu0  ;;  %v1525_v0 = vmax.f32 %v1327_v59, 0.0 }
 0x1c6   : > { %v1526_v62 = vmax.f32 %v1329_v60, 0.0  ;;  %v1331_v63 = vpop.f32.mrb[83].mxu0 }
 0x1c7   : > { %v1527_v1 = vmax.f32 %v1331_v63, 0.0 }
 0x1c8   : > { %v1612_v2 = vpack.c.bf16 %v1526_v62, %v1524_v61 }
 0x1c9   : > { %v1613_v3 = vpack.c.bf16 %v1527_v1, %v1525_v0 }
 0x1cb   : > { %v1335_v4 = vpop.f32.mrb[84].mxu0  ;;  %1956 = vmatprep.mubr.bf16.mxu1 %v1613_v3 }
 0x1cc   : > { %v1337_v5 = vpop.f32.mrb[85].mxu0  ;;  %1957 = vmatmul.mubr.bf16.gmra.mrb[80].mxu1 %v1612_v2  ;;  %v1528_v7 = vmax.f32 %v1335_v4, 0.0 }
 0x1cd   : > { %v1339_v6 = vpop.f32.mrb[86].mxu0  ;;  %v1529_v10 = vmax.f32 %v1337_v5, 0.0 }
 0x1ce   : > { %v1530_v8 = vmax.f32 %v1339_v6, 0.0  ;;  %v1341_v9 = vpop.f32.mrb[87].mxu0 }
 0x1cf   : > { %v1531_v11 = vmax.f32 %v1341_v9, 0.0 }
 0x1d0   : > { %v1614_v12 = vpack.c.bf16 %v1530_v8, %v1528_v7 }
 0x1d1   : > { %v1615_v13 = vpack.c.bf16 %v1531_v11, %v1529_v10 }
 0x1d3   : > { %v1345_v14 = vpop.f32.mrb[88].mxu0  ;;  %1964 = vmatprep.mubr.bf16.mxu1 %v1615_v13 }
 0x1d4   : > { %v1347_v15 = vpop.f32.mrb[89].mxu0  ;;  %1965 = vmatmul.mubr.bf16.gmra.mrb[84].mxu1 %v1614_v12  ;;  %v1532_v17 = vmax.f32 %v1345_v14, 0.0 }
 0x1d5   : > { %v1349_v16 = vpop.f32.mrb[90].mxu0  ;;  %v1533_v20 = vmax.f32 %v1347_v15, 0.0 }
 0x1d6   : > { %v1534_v18 = vmax.f32 %v1349_v16, 0.0  ;;  %v1351_v19 = vpop.f32.mrb[91].mxu0 }
 0x1d7   : > { %v1535_v21 = vmax.f32 %v1351_v19, 0.0 }
 0x1d8   : > { %v1616_v22 = vpack.c.bf16 %v1534_v18, %v1532_v17 }
 0x1d9   : > { %v1617_v23 = vpack.c.bf16 %v1535_v21, %v1533_v20 }
 0x1db   : > { %v1355_v24 = vpop.f32.mrb[92].mxu0  ;;  %1972 = vmatprep.mubr.bf16.mxu1 %v1617_v23 }
 0x1dc   : > { %v1357_v25 = vpop.f32.mrb[93].mxu0  ;;  %1973 = vmatmul.mubr.bf16.gmra.mrb[88].mxu1 %v1616_v22  ;;  %v1536_v27 = vmax.f32 %v1355_v24, 0.0 }
 0x1dd   : > { %v1359_v26 = vpop.f32.mrb[94].mxu0  ;;  %v1537_v30 = vmax.f32 %v1357_v25, 0.0 }
 0x1de   : > { %v1538_v28 = vmax.f32 %v1359_v26, 0.0  ;;  %v1361_v29 = vpop.f32.mrb[95].mxu0 }
 0x1df   : > { %v1539_v31 = vmax.f32 %v1361_v29, 0.0 }
 0x1e0   : > { %v1618_v32 = vpack.c.bf16 %v1538_v28, %v1536_v27 }
 0x1e1   : > { %v1619_v33 = vpack.c.bf16 %v1539_v31, %v1537_v30 }
 0x1e3   : > { %v1365_v34 = vpop.f32.mrb[96].mxu0  ;;  %1980 = vmatprep.mubr.bf16.mxu1 %v1619_v33 }
 0x1e4   : > { %v1367_v35 = vpop.f32.mrb[97].mxu0  ;;  %1981 = vmatmul.mubr.bf16.gmra.mrb[92].mxu1 %v1618_v32  ;;  %v1540_v37 = vmax.f32 %v1365_v34, 0.0 }
 0x1e5   : > { %v1369_v36 = vpop.f32.mrb[98].mxu0  ;;  %v1541_v40 = vmax.f32 %v1367_v35, 0.0 }
 0x1e6   : > { %v1542_v38 = vmax.f32 %v1369_v36, 0.0  ;;  %v1371_v39 = vpop.f32.mrb[99].mxu0 }
 0x1e7   : > { %v1543_v41 = vmax.f32 %v1371_v39, 0.0 }
 0x1e8   : > { %v1620_v42 = vpack.c.bf16 %v1542_v38, %v1540_v37 }
 0x1e9   : > { %v1621_v43 = vpack.c.bf16 %v1543_v41, %v1541_v40 }
 0x1eb   : > { %v1375_v44 = vpop.f32.mrb[100].mxu0  ;;  %1988 = vmatprep.mubr.bf16.mxu1 %v1621_v43 }
 0x1ec   : > { %v1377_v45 = vpop.f32.mrb[101].mxu0  ;;  %1989 = vmatmul.mubr.bf16.gmra.mrb[96].mxu1 %v1620_v42  ;;  %v1544_v47 = vmax.f32 %v1375_v44, 0.0 }
 0x1ed   : > { %v1379_v46 = vpop.f32.mrb[102].mxu0  ;;  %v1545_v50 = vmax.f32 %v1377_v45, 0.0 }
 0x1ee   : > { %v1546_v48 = vmax.f32 %v1379_v46, 0.0  ;;  %v1381_v49 = vpop.f32.mrb[103].mxu0 }
 0x1ef   : > { %v1547_v51 = vmax.f32 %v1381_v49, 0.0 }
 0x1f0   : > { %v1622_v52 = vpack.c.bf16 %v1546_v48, %v1544_v47 }
 0x1f1   : > { %v1623_v53 = vpack.c.bf16 %v1547_v51, %v1545_v50 }
 0x1f3   : > { %v1385_v54 = vpop.f32.mrb[104].mxu0  ;;  %1996 = vmatprep.mubr.bf16.mxu1 %v1623_v53 }
 0x1f4   : > { %v1387_v55 = vpop.f32.mrb[105].mxu0  ;;  %1997 = vmatmul.mubr.bf16.gmra.mrb[100].mxu1 %v1622_v52  ;;  %v1548_v57 = vmax.f32 %v1385_v54, 0.0 }
 0x1f5   : > { %v1389_v56 = vpop.f32.mrb[106].mxu0  ;;  %v1549_v60 = vmax.f32 %v1387_v55, 0.0 }
 0x1f6   : > { %v1550_v58 = vmax.f32 %v1389_v56, 0.0  ;;  %v1391_v59 = vpop.f32.mrb[107].mxu0 }
 0x1f7   : > { %v1551_v61 = vmax.f32 %v1391_v59, 0.0 }
 0x1f8   : > { %v1624_v62 = vpack.c.bf16 %v1550_v58, %v1548_v57 }
 0x1f9   : > { %v1625_v63 = vpack.c.bf16 %v1551_v61, %v1549_v60 }
 0x1fb   : > { %v1395_v0 = vpop.f32.mrb[108].mxu0  ;;  %2004 = vmatprep.mubr.bf16.mxu1 %v1625_v63 }
 0x1fc   : > { %v1397_v1 = vpop.f32.mrb[109].mxu0  ;;  %2005 = vmatmul.mubr.bf16.gmra.mrb[104].mxu1 %v1624_v62  ;;  %v1552_v3 = vmax.f32 %v1395_v0, 0.0 }
 0x1fd   : > { %v1399_v2 = vpop.f32.mrb[110].mxu0  ;;  %v1553_v6 = vmax.f32 %v1397_v1, 0.0 }
 0x1fe   : > { %v1554_v4 = vmax.f32 %v1399_v2, 0.0  ;;  %v1401_v5 = vpop.f32.mrb[111].mxu0 }
 0x1ff   : > { %v1555_v7 = vmax.f32 %v1401_v5, 0.0  ;;  %v1798_v8 = vpop.f32.mrb[0].mxu1 }
 0x200   : > { %v1626_v9 = vpack.c.bf16 %v1554_v4, %v1552_v3  ;;  %v1800_v10 = vpop.f32.mrb[1].mxu1  ;;  %v2053_v13 = vmax.f32 %v1798_v8, 0.0 }
 0x201   : > { %v1627_v11 = vpack.c.bf16 %v1555_v7, %v1553_v6  ;;  %v1801_v12 = vpop.f32.mrb[2].mxu1 }
 0x202   : > { %v2054_v14 = vmax.f32 %v1801_v12, 0.0  ;;  %v1803_v15 = vpop.f32.mrb[3].mxu1 }
 0x203   : > { %v1405_v16 = vpop.f32.mrb[112].mxu0  ;;  %2012 = vmatprep.mubr.bf16.mxu1 %v1627_v11 }
 0x204   : > { %v2117_v17 = vadd.f32 %v2054_v14, %v2053_v13  ;;  %v1407_v18 = vpop.f32.mrb[113].mxu0  ;;  %2013 = vmatmul.mubr.bf16.gmra.mrb[108].mxu1 %v1626_v9  ;;  %v1556_v20 = vmax.f32 %v1405_v16, 0.0 }
 0x205   : > { %v1409_v19 = vpop.f32.mrb[114].mxu0  ;;  %v1557_v23 = vmax.f32 %v1407_v18, 0.0 }
 0x206   : > { %v1558_v21 = vmax.f32 %v1409_v19, 0.0  ;;  %v1411_v22 = vpop.f32.mrb[115].mxu0 }
 0x207   : > { %v1559_v24 = vmax.f32 %v1411_v22, 0.0  ;;  %v1806_v25 = vpop.f32.mrb[4].mxu1 }
 0x208   : > { %v1628_v26 = vpack.c.bf16 %v1558_v21, %v1556_v20  ;;  %v2055_v27 = vmax.f32 %v1806_v25, 0.0  ;;  %v1808_v28 = vpop.f32.mrb[5].mxu1 }
 0x209   : > { %v1629_v29 = vpack.c.bf16 %v1559_v24, %v1557_v23  ;;  %v1809_v30 = vpop.f32.mrb[6].mxu1 }
 0x20a   : > { %v2118_v31 = vadd.f32 %v2117_v17, %v2055_v27  ;;  %v2056_v32 = vmax.f32 %v1809_v30, 0.0  ;;  %v1811_v33 = vpop.f32.mrb[7].mxu1 }
 0x20b   : > { %v1415_v34 = vpop.f32.mrb[116].mxu0  ;;  %2020 = vmatprep.mubr.bf16.mxu1 %v1629_v29 }
 0x20c   : > { %v2119_v35 = vadd.f32 %v2118_v31, %v2056_v32  ;;  %v1417_v36 = vpop.f32.mrb[117].mxu0  ;;  %2021 = vmatmul.mubr.bf16.gmra.mrb[112].mxu1 %v1628_v26  ;;  %v1560_v38 = vmax.f32 %v1415_v34, 0.0 }
 0x20d   : > { %v1419_v37 = vpop.f32.mrb[118].mxu0  ;;  %v1561_v41 = vmax.f32 %v1417_v36, 0.0 }
 0x20e   : > { %v1562_v39 = vmax.f32 %v1419_v37, 0.0  ;;  %v1421_v40 = vpop.f32.mrb[119].mxu0 }
 0x20f   : > { %v1563_v42 = vmax.f32 %v1421_v40, 0.0  ;;  %v1814_v43 = vpop.f32.mrb[8].mxu1 }
 0x210   : > { %v1630_v44 = vpack.c.bf16 %v1562_v39, %v1560_v38  ;;  %v2057_v45 = vmax.f32 %v1814_v43, 0.0  ;;  %v1816_v46 = vpop.f32.mrb[9].mxu1 }
 0x211   : > { %v1631_v47 = vpack.c.bf16 %v1563_v42, %v1561_v41  ;;  %v1817_v48 = vpop.f32.mrb[10].mxu1 }
 0x212   : > { %v2120_v49 = vadd.f32 %v2119_v35, %v2057_v45  ;;  %v2058_v50 = vmax.f32 %v1817_v48, 0.0  ;;  %v1819_v51 = vpop.f32.mrb[11].mxu1 }
 0x213   : > { %v1425_v52 = vpop.f32.mrb[120].mxu0  ;;  %2028 = vmatprep.mubr.bf16.mxu1 %v1631_v47 }
 0x214   : > { %v2121_v53 = vadd.f32 %v2120_v49, %v2058_v50  ;;  %v1427_v54 = vpop.f32.mrb[121].mxu0  ;;  %2029 = vmatmul.mubr.bf16.gmra.mrb[116].mxu1 %v1630_v44  ;;  %v1564_v56 = vmax.f32 %v1425_v52, 0.0 }
 0x215   : > { %v1429_v55 = vpop.f32.mrb[122].mxu0  ;;  %v1565_v59 = vmax.f32 %v1427_v54, 0.0 }
 0x216   : > { %v1566_v57 = vmax.f32 %v1429_v55, 0.0  ;;  %v1431_v58 = vpop.f32.mrb[123].mxu0 }
 0x217   : > { %v1567_v60 = vmax.f32 %v1431_v58, 0.0  ;;  %v1822_v61 = vpop.f32.mrb[12].mxu1 }
 0x218   : > { %v1632_v62 = vpack.c.bf16 %v1566_v57, %v1564_v56  ;;  %v2059_v63 = vmax.f32 %v1822_v61, 0.0  ;;  %v1824_v0 = vpop.f32.mrb[13].mxu1 }
 0x219   : > { %v1633_v1 = vpack.c.bf16 %v1567_v60, %v1565_v59  ;;  %v1825_v2 = vpop.f32.mrb[14].mxu1 }
 0x21a   : > { %v2122_v3 = vadd.f32 %v2121_v53, %v2059_v63  ;;  %v2060_v4 = vmax.f32 %v1825_v2, 0.0  ;;  %v1827_v5 = vpop.f32.mrb[15].mxu1 }
 0x21b   : > { %v1435_v6 = vpop.f32.mrb[124].mxu0  ;;  %2036 = vmatprep.mubr.bf16.mxu1 %v1633_v1 }
 0x21c   : > { %v2123_v7 = vadd.f32 %v2122_v3, %v2060_v4  ;;  %v1437_v8 = vpop.f32.mrb[125].mxu0  ;;  %2037 = vmatmul.mubr.bf16.gmra.mrb[120].mxu1 %v1632_v62  ;;  %v1568_v10 = vmax.f32 %v1435_v6, 0.0 }
 0x21d   : > { %v1439_v9 = vpop.f32.mrb[126].mxu0  ;;  %v1569_v13 = vmax.f32 %v1437_v8, 0.0 }
 0x21e   : > { %v1570_v11 = vmax.f32 %v1439_v9, 0.0  ;;  %v1441_v12 = vpop.f32.mrb[127].mxu0 }
 0x21f   : > { %v1571_v14 = vmax.f32 %v1441_v12, 0.0  ;;  %v1830_v15 = vpop.f32.mrb[16].mxu1 }
 0x220   : > { %v1634_v16 = vpack.c.bf16 %v1570_v11, %v1568_v10  ;;  %v2061_v17 = vmax.f32 %v1830_v15, 0.0  ;;  %v1832_v18 = vpop.f32.mrb[17].mxu1 }
 0x221   : > { %v1635_v19 = vpack.c.bf16 %v1571_v14, %v1569_v13  ;;  %v1833_v20 = vpop.f32.mrb[18].mxu1 }
 0x222   : > { %v2124_v21 = vadd.f32 %v2123_v7, %v2061_v17  ;;  %v2062_v22 = vmax.f32 %v1833_v20, 0.0  ;;  %v1835_v23 = vpop.f32.mrb[19].mxu1 }
 0x223   : > { %2044 = vmatprep.mubr.bf16.mxu1 %v1635_v19 }
 0x224   : > { %v2125_v24 = vadd.f32 %v2124_v21, %v2062_v22  ;;  %2045 = vmatmul.mubr.bf16.gmra.mrb[124].mxu1 %v1634_v16 }
 0x227   : > { %v1838_v25 = vpop.f32.mrb[20].mxu1 }
 0x228   : > { %v2063_v26 = vmax.f32 %v1838_v25, 0.0  ;;  %v1840_v27 = vpop.f32.mrb[21].mxu1 }
 0x229   : > { %v1841_v28 = vpop.f32.mrb[22].mxu1 }
 0x22a   : > { %v2126_v29 = vadd.f32 %v2125_v24, %v2063_v26  ;;  %v2064_v30 = vmax.f32 %v1841_v28, 0.0  ;;  %v1843_v31 = vpop.f32.mrb[23].mxu1 }
 0x22c   : > { %v2127_v32 = vadd.f32 %v2126_v29, %v2064_v30 }
 0x22f   : > { %v1846_v33 = vpop.f32.mrb[24].mxu1 }
 0x230   : > { %v2065_v34 = vmax.f32 %v1846_v33, 0.0  ;;  %v1848_v35 = vpop.f32.mrb[25].mxu1 }
 0x231   : > { %v1849_v36 = vpop.f32.mrb[26].mxu1 }
 0x232   : > { %v2128_v37 = vadd.f32 %v2127_v32, %v2065_v34  ;;  %v2066_v38 = vmax.f32 %v1849_v36, 0.0  ;;  %v1851_v39 = vpop.f32.mrb[27].mxu1 }
 0x234   : > { %v2129_v40 = vadd.f32 %v2128_v37, %v2066_v38 }
 0x237   : > { %v1854_v41 = vpop.f32.mrb[28].mxu1 }
 0x238   : > { %v2067_v42 = vmax.f32 %v1854_v41, 0.0  ;;  %v1856_v43 = vpop.f32.mrb[29].mxu1 }
 0x239   : > { %v1857_v44 = vpop.f32.mrb[30].mxu1 }
 0x23a   : > { %v2130_v45 = vadd.f32 %v2129_v40, %v2067_v42  ;;  %v2068_v46 = vmax.f32 %v1857_v44, 0.0  ;;  %v1859_v47 = vpop.f32.mrb[31].mxu1 }
 0x23c   : > { %v2131_v48 = vadd.f32 %v2130_v45, %v2068_v46 }
 0x23f   : > { %v1862_v49 = vpop.f32.mrb[32].mxu1 }
 0x240   : > { %v2069_v50 = vmax.f32 %v1862_v49, 0.0  ;;  %v1864_v51 = vpop.f32.mrb[33].mxu1 }
 0x241   : > { %v1865_v52 = vpop.f32.mrb[34].mxu1 }
 0x242   : > { %v2132_v53 = vadd.f32 %v2131_v48, %v2069_v50  ;;  %v2070_v54 = vmax.f32 %v1865_v52, 0.0  ;;  %v1867_v55 = vpop.f32.mrb[35].mxu1 }
 0x244   : > { %v2133_v56 = vadd.f32 %v2132_v53, %v2070_v54 }
 0x247   : > { %v1870_v57 = vpop.f32.mrb[36].mxu1 }
 0x248   : > { %v2071_v58 = vmax.f32 %v1870_v57, 0.0  ;;  %v1872_v59 = vpop.f32.mrb[37].mxu1 }
 0x249   : > { %v1873_v60 = vpop.f32.mrb[38].mxu1 }
 0x24a   : > { %v2134_v61 = vadd.f32 %v2133_v56, %v2071_v58  ;;  %v2072_v62 = vmax.f32 %v1873_v60, 0.0  ;;  %v1875_v63 = vpop.f32.mrb[39].mxu1 }
 0x24c   : > { %v2135_v0 = vadd.f32 %v2134_v61, %v2072_v62 }
 0x24f   : > { %v1878_v1 = vpop.f32.mrb[40].mxu1 }
 0x250   : > { %v2073_v2 = vmax.f32 %v1878_v1, 0.0  ;;  %v1880_v3 = vpop.f32.mrb[41].mxu1 }
 0x251   : > { %v1881_v4 = vpop.f32.mrb[42].mxu1 }
 0x252   : > { %v2136_v5 = vadd.f32 %v2135_v0, %v2073_v2  ;;  %v2074_v6 = vmax.f32 %v1881_v4, 0.0  ;;  %v1883_v7 = vpop.f32.mrb[43].mxu1 }
 0x254   : > { %v2137_v8 = vadd.f32 %v2136_v5, %v2074_v6 }
 0x257   : > { %v1886_v9 = vpop.f32.mrb[44].mxu1 }
 0x258   : > { %v2075_v10 = vmax.f32 %v1886_v9, 0.0  ;;  %v1888_v11 = vpop.f32.mrb[45].mxu1 }
 0x259   : > { %v1889_v12 = vpop.f32.mrb[46].mxu1 }
 0x25a   : > { %v2138_v13 = vadd.f32 %v2137_v8, %v2075_v10  ;;  %v2076_v14 = vmax.f32 %v1889_v12, 0.0  ;;  %v1891_v15 = vpop.f32.mrb[47].mxu1 }
 0x25c   : > { %v2139_v16 = vadd.f32 %v2138_v13, %v2076_v14 }
 0x25f   : > { %v1894_v17 = vpop.f32.mrb[48].mxu1 }
 0x260   : > { %v2077_v18 = vmax.f32 %v1894_v17, 0.0  ;;  %v1896_v19 = vpop.f32.mrb[49].mxu1 }
 0x261   : > { %v1897_v20 = vpop.f32.mrb[50].mxu1 }
 0x262   : > { %v2140_v21 = vadd.f32 %v2139_v16, %v2077_v18  ;;  %v2078_v22 = vmax.f32 %v1897_v20, 0.0  ;;  %v1899_v23 = vpop.f32.mrb[51].mxu1 }
 0x264   : > { %v2141_v24 = vadd.f32 %v2140_v21, %v2078_v22 }
 0x267   : > { %v1902_v25 = vpop.f32.mrb[52].mxu1 }
 0x268   : > { %v2079_v26 = vmax.f32 %v1902_v25, 0.0  ;;  %v1904_v27 = vpop.f32.mrb[53].mxu1 }
 0x269   : > { %v1905_v28 = vpop.f32.mrb[54].mxu1 }
 0x26a   : > { %v2142_v29 = vadd.f32 %v2141_v24, %v2079_v26  ;;  %v2080_v30 = vmax.f32 %v1905_v28, 0.0  ;;  %v1907_v31 = vpop.f32.mrb[55].mxu1 }
 0x26c   : > { %v2143_v32 = vadd.f32 %v2142_v29, %v2080_v30 }
 0x26f   : > { %v1910_v33 = vpop.f32.mrb[56].mxu1 }
 0x270   : > { %v2081_v34 = vmax.f32 %v1910_v33, 0.0  ;;  %v1912_v35 = vpop.f32.mrb[57].mxu1 }
 0x271   : > { %v1913_v36 = vpop.f32.mrb[58].mxu1 }
 0x272   : > { %v2144_v37 = vadd.f32 %v2143_v32, %v2081_v34  ;;  %v2082_v38 = vmax.f32 %v1913_v36, 0.0  ;;  %v1915_v39 = vpop.f32.mrb[59].mxu1 }
 0x274   : > { %v2145_v40 = vadd.f32 %v2144_v37, %v2082_v38 }
 0x277   : > { %v1918_v41 = vpop.f32.mrb[60].mxu1 }
 0x278   : > { %v2083_v42 = vmax.f32 %v1918_v41, 0.0  ;;  %v1920_v43 = vpop.f32.mrb[61].mxu1 }
 0x279   : > { %v1921_v44 = vpop.f32.mrb[62].mxu1 }
 0x27a   : > { %v2146_v45 = vadd.f32 %v2145_v40, %v2083_v42  ;;  %v2084_v46 = vmax.f32 %v1921_v44, 0.0  ;;  %v1923_v47 = vpop.f32.mrb[63].mxu1 }
 0x27c   : > { %v13921_v48 = vadd.f32 %v2146_v45, %v2084_v46 }
 0x27f   : > { %v1926_v49 = vpop.f32.mrb[64].mxu1 }
 0x280   : > { %v1928_v50 = vpop.f32.mrb[65].mxu1  ;;  %v2085_v52 = vmax.f32 %v1926_v49, 0.0 }
 0x281   : > { %v1929_v51 = vpop.f32.mrb[66].mxu1 }
 0x282   : > { %v2086_v53 = vmax.f32 %v1929_v51, 0.0  ;;  %v1931_v54 = vpop.f32.mrb[67].mxu1 }
 0x284   : > { %v2154_v55 = vadd.f32 %v2086_v53, %v2085_v52 }
 0x287   : > { %v1934_v56 = vpop.f32.mrb[68].mxu1 }
 0x288   : > { %v2087_v57 = vmax.f32 %v1934_v56, 0.0  ;;  %v1936_v58 = vpop.f32.mrb[69].mxu1 }
 0x289   : > { %v1937_v59 = vpop.f32.mrb[70].mxu1 }
 0x28a   : > { %v2155_v60 = vadd.f32 %v2154_v55, %v2087_v57  ;;  %v2088_v61 = vmax.f32 %v1937_v59, 0.0  ;;  %v1939_v62 = vpop.f32.mrb[71].mxu1 }
 0x28c   : > { %v2156_v63 = vadd.f32 %v2155_v60, %v2088_v61 }
 0x28f   : > { %v1942_v0 = vpop.f32.mrb[72].mxu1 }
 0x290   : > { %v2089_v1 = vmax.f32 %v1942_v0, 0.0  ;;  %v1944_v2 = vpop.f32.mrb[73].mxu1 }
 0x291   : > { %v1945_v3 = vpop.f32.mrb[74].mxu1 }
 0x292   : > { %v2157_v4 = vadd.f32 %v2156_v63, %v2089_v1  ;;  %v2090_v5 = vmax.f32 %v1945_v3, 0.0  ;;  %v1947_v6 = vpop.f32.mrb[75].mxu1 }
 0x294   : > { %v2158_v7 = vadd.f32 %v2157_v4, %v2090_v5 }
 0x297   : > { %v1950_v8 = vpop.f32.mrb[76].mxu1 }
 0x298   : > { %v2091_v9 = vmax.f32 %v1950_v8, 0.0  ;;  %v1952_v10 = vpop.f32.mrb[77].mxu1 }
 0x299   : > { %v1953_v11 = vpop.f32.mrb[78].mxu1 }
 0x29a   : > { %v2159_v12 = vadd.f32 %v2158_v7, %v2091_v9  ;;  %v2092_v13 = vmax.f32 %v1953_v11, 0.0  ;;  %v1955_v14 = vpop.f32.mrb[79].mxu1 }
 0x29c   : > { %v2160_v15 = vadd.f32 %v2159_v12, %v2092_v13 }
 0x29f   : > { %v1958_v16 = vpop.f32.mrb[80].mxu1 }
 0x2a0   : > { %v2093_v17 = vmax.f32 %v1958_v16, 0.0  ;;  %v1960_v18 = vpop.f32.mrb[81].mxu1 }
 0x2a1   : > { %v1961_v19 = vpop.f32.mrb[82].mxu1 }
 0x2a2   : > { %v2161_v20 = vadd.f32 %v2160_v15, %v2093_v17  ;;  %v2094_v21 = vmax.f32 %v1961_v19, 0.0  ;;  %v1963_v22 = vpop.f32.mrb[83].mxu1 }
 0x2a4   : > { %v2162_v23 = vadd.f32 %v2161_v20, %v2094_v21 }
 0x2a7   : > { %v1966_v24 = vpop.f32.mrb[84].mxu1 }
 0x2a8   : > { %v2095_v25 = vmax.f32 %v1966_v24, 0.0  ;;  %v1968_v26 = vpop.f32.mrb[85].mxu1 }
 0x2a9   : > { %v1969_v27 = vpop.f32.mrb[86].mxu1 }
 0x2aa   : > { %v2163_v28 = vadd.f32 %v2162_v23, %v2095_v25  ;;  %v2096_v29 = vmax.f32 %v1969_v27, 0.0  ;;  %v1971_v30 = vpop.f32.mrb[87].mxu1 }
 0x2ac   : > { %v2164_v31 = vadd.f32 %v2163_v28, %v2096_v29 }
 0x2af   : > { %v1974_v32 = vpop.f32.mrb[88].mxu1 }
 0x2b0   : > { %v2097_v33 = vmax.f32 %v1974_v32, 0.0  ;;  %v1976_v34 = vpop.f32.mrb[89].mxu1 }
 0x2b1   : > { %v1977_v35 = vpop.f32.mrb[90].mxu1 }
 0x2b2   : > { %v2165_v36 = vadd.f32 %v2164_v31, %v2097_v33  ;;  %v2098_v37 = vmax.f32 %v1977_v35, 0.0  ;;  %v1979_v38 = vpop.f32.mrb[91].mxu1 }
 0x2b4   : > { %v2166_v39 = vadd.f32 %v2165_v36, %v2098_v37  ;;  %v2148_v37 = vrot.slane %v13921_v48, 4 }
 0x2b7   : > { %v1982_v40 = vpop.f32.mrb[92].mxu1 }
 0x2b8   : > { %v2099_v41 = vmax.f32 %v1982_v40, 0.0  ;;  %v1984_v42 = vpop.f32.mrb[93].mxu1 }
 0x2b9   : > { %v1985_v43 = vpop.f32.mrb[94].mxu1  ;;  %v2149_v42 = vadd.f32 %v2148_v37, %v13921_v48 }
 0x2ba   : > { %v2167_v44 = vadd.f32 %v2166_v39, %v2099_v41  ;;  %v2100_v45 = vmax.f32 %v1985_v43, 0.0  ;;  %v1987_v46 = vpop.f32.mrb[95].mxu1 }
 0x2bc   : > { %v2168_v47 = vadd.f32 %v2167_v44, %v2100_v45 }
 0x2bf   : > { %v1990_v49 = vpop.f32.mrb[96].mxu1 }
 0x2c0   : > { %v2101_v50 = vmax.f32 %v1990_v49, 0.0  ;;  %v1992_v51 = vpop.f32.mrb[97].mxu1 }
 0x2c1   : > { %v1993_v52 = vpop.f32.mrb[98].mxu1 }
 0x2c2   : > { %v2169_v53 = vadd.f32 %v2168_v47, %v2101_v50  ;;  %v2102_v54 = vmax.f32 %v1993_v52, 0.0  ;;  %v1995_v55 = vpop.f32.mrb[99].mxu1  ;;  %v2150_v47 = vrot.slane %v2149_v42, 2 }
 0x2c4   : > { %v2170_v56 = vadd.f32 %v2169_v53, %v2102_v54  ;;  %v2151_v53 = vadd.f32 %v2150_v47, %v2149_v42 }
 0x2c7   : > { %v1998_v57 = vpop.f32.mrb[100].mxu1 }
 0x2c8   : > { %v2103_v58 = vmax.f32 %v1998_v57, 0.0  ;;  %v2000_v59 = vpop.f32.mrb[101].mxu1 }
 0x2c9   : > { %v2001_v60 = vpop.f32.mrb[102].mxu1 }
 0x2ca   : > { %v2171_v61 = vadd.f32 %v2170_v56, %v2103_v58  ;;  %v2104_v62 = vmax.f32 %v2001_v60, 0.0  ;;  %v2003_v63 = vpop.f32.mrb[103].mxu1  ;;  %v2152_v56 = vrot.slane %v2151_v53, 1 }
 0x2cc   : > { %v2172_v0 = vadd.f32 %v2171_v61, %v2104_v62  ;;  %v2153_v59 = vadd.f32 %v2152_v56, %v2151_v53 }
 0x2ce   : > { %v2192_v48 = vmul.f32 0.00390625, %v2153_v59 }
 0x2cf   : > { %v2006_v1 = vpop.f32.mrb[104].mxu1 }
 0x2d0   : > { %v2105_v2 = vmax.f32 %v2006_v1, 0.0  ;;  %v2008_v3 = vpop.f32.mrb[105].mxu1 }
 0x2d1   : > { %v2009_v4 = vpop.f32.mrb[106].mxu1 }
 0x2d2   : > { %v2173_v5 = vadd.f32 %v2172_v0, %v2105_v2  ;;  %v2106_v6 = vmax.f32 %v2009_v4, 0.0  ;;  %v2011_v7 = vpop.f32.mrb[107].mxu1 }
 0x2d4   : > { %v2174_v8 = vadd.f32 %v2173_v5, %v2106_v6 }
 0x2d7   : > { %v2014_v9 = vpop.f32.mrb[108].mxu1 }
 0x2d8   : > { %v2107_v10 = vmax.f32 %v2014_v9, 0.0  ;;  %v2016_v11 = vpop.f32.mrb[109].mxu1 }
 0x2d9   : > { %v2017_v12 = vpop.f32.mrb[110].mxu1 }
 0x2da   : > { %v2175_v13 = vadd.f32 %v2174_v8, %v2107_v10  ;;  %v2108_v14 = vmax.f32 %v2017_v12, 0.0  ;;  %v2019_v15 = vpop.f32.mrb[111].mxu1 }
 0x2dc   : > { %v2176_v16 = vadd.f32 %v2175_v13, %v2108_v14 }
 0x2df   : > { %v2022_v17 = vpop.f32.mrb[112].mxu1 }
 0x2e0   : > { %v2109_v18 = vmax.f32 %v2022_v17, 0.0  ;;  %v2024_v19 = vpop.f32.mrb[113].mxu1 }
 0x2e1   : > { %v2025_v20 = vpop.f32.mrb[114].mxu1 }
 0x2e2   : > { %v2177_v21 = vadd.f32 %v2176_v16, %v2109_v18  ;;  %v2110_v22 = vmax.f32 %v2025_v20, 0.0  ;;  %v2027_v23 = vpop.f32.mrb[115].mxu1 }
 0x2e4   : > { %v2178_v24 = vadd.f32 %v2177_v21, %v2110_v22 }
 0x2e7   : > { %v2030_v25 = vpop.f32.mrb[116].mxu1 }
 0x2e8   : > { %v2111_v26 = vmax.f32 %v2030_v25, 0.0  ;;  %v2032_v27 = vpop.f32.mrb[117].mxu1 }
 0x2e9   : > { %v2033_v28 = vpop.f32.mrb[118].mxu1 }
 0x2ea   : > { %v2179_v29 = vadd.f32 %v2178_v24, %v2111_v26  ;;  %v2112_v30 = vmax.f32 %v2033_v28, 0.0  ;;  %v2035_v31 = vpop.f32.mrb[119].mxu1 }
 0x2ec   : > { %v2180_v32 = vadd.f32 %v2179_v29, %v2112_v30 }
 0x2ef   : > { %v2038_v33 = vpop.f32.mrb[120].mxu1 }
 0x2f0   : > { %v2113_v34 = vmax.f32 %v2038_v33, 0.0  ;;  %v2040_v35 = vpop.f32.mrb[121].mxu1 }
 0x2f1   : > { %v2041_v36 = vpop.f32.mrb[122].mxu1 }
 0x2f2   : > { %v2181_v38 = vadd.f32 %v2180_v32, %v2113_v34  ;;  %v2114_v39 = vmax.f32 %v2041_v36, 0.0  ;;  %v2043_v40 = vpop.f32.mrb[123].mxu1 }
 0x2f4   : > { %v2182_v41 = vadd.f32 %v2181_v38, %v2114_v39 }
 0x2f7   : > { %v2046_v43 = vpop.f32.mrb[124].mxu1 }
 0x2f8   : > { %v2115_v44 = vmax.f32 %v2046_v43, 0.0  ;;  %v2048_v45 = vpop.f32.mrb[125].mxu1 }
 0x2f9   : > { %v2049_v46 = vpop.f32.mrb[126].mxu1 }
 0x2fa   : > { %v2183_v49 = vadd.f32 %v2182_v41, %v2115_v44  ;;  %v2116_v50 = vmax.f32 %v2049_v46, 0.0  ;;  %v2051_v51 = vpop.f32.mrb[127].mxu1 }
 0x2fc   : > { %v2184_v52 = vadd.f32 %v2183_v49, %v2116_v50 }
 0x2fe   : > { %v2185_v54 = vrot.slane %v2184_v52, 4 }
 0x300   : > { %v2186_v55 = vadd.f32 %v2185_v54, %v2184_v52 }
 0x302   : > { %v2187_v57 = vrot.slane %v2186_v55, 2 }
 0x304   : > { %v2188_v58 = vadd.f32 %v2187_v57, %v2186_v55 }
 0x306   : > { %v2189_v60 = vrot.slane %v2188_v58, 1 }
 0x308   : > { %v2190_v61 = vadd.f32 %v2189_v60, %v2188_v58 }
 0x30a   : > { %v2193_v62 = vmul.f32 0.00390625, %v2190_v61 }
 0x30c   : > { %v2197_v63 = vsel %vm2196_vm0, %v2193_v62, %v2192_v48 }
 0x30d   : > { %2199 = vst [vmem:[#allocation3] sm:$0x3] %v2197_v63 }
 0x30e PF: > { %v12556_v0 = vld [vmem:[%s13499_s18 + $0x4] ss:$16 sps:$4 sm:$0xff]   ;;  %v12558_v1 = vld [vmem:[%s13499_s18 + $0xc] ss:$16 sps:$4 sm:$0xff]   ;;  %v12560_v2 = vld [vmem:[%s13499_s18] ss:$16 sps:$4 sm:$0xff]  }
 0x30f   : > { %4184 = vmatprep.subr.bf16.mxu0 %v12556_v0  ;;  %v12561_v3 = vld [vmem:[%s13499_s18 + $0x8] ss:$16 sps:$4 sm:$0xff]   ;;  %4636 = vmatprep.subr.bf16.mxu1 %v12558_v1  ;;  %v12562_v4 = vld [vmem:[%s13499_s18 + $0x24] ss:$16 sps:$4 sm:$0xff]   ;;  %v12564_v5 = vld [vmem:[%s13499_s18 + $0x2c] ss:$16 sps:$4 sm:$0xff]  }
 0x310   : > { %4185 = vmatpush1.bf16.msra.mxu0 %v12560_v2  ;;  %4637 = vmatpush1.bf16.msra.mxu1 %v12561_v3  ;;  %v12566_v6 = vld [vmem:[%s13499_s18 + $0x20] ss:$16 sps:$4 sm:$0xff]   ;;  %v12567_v7 = vld [vmem:[%s13499_s18 + $0x28] ss:$16 sps:$4 sm:$0xff]   ;;  %v12568_v8 = vld [vmem:[%s13499_s18 + $0x44] ss:$16 sps:$4 sm:$0xff]  }
 0x311   : > { %4186 = vmatprep.subr.bf16.mxu0 %v12562_v4  ;;  %4638 = vmatprep.subr.bf16.mxu1 %v12564_v5  ;;  %v12570_v9 = vld [vmem:[%s13499_s18 + $0x4c] ss:$16 sps:$4 sm:$0xff]   ;;  %v12572_v10 = vld [vmem:[%s13499_s18 + $0x40] ss:$16 sps:$4 sm:$0xff]   ;;  %v12573_v11 = vld [vmem:[%s13499_s18 + $0x48] ss:$16 sps:$4 sm:$0xff]  }
 0x312   : > { %v12574_v12 = vld [vmem:[%s13499_s18 + $0x64] ss:$16 sps:$4 sm:$0xff]   ;;  %v12576_v13 = vld [vmem:[%s13499_s18 + $0x6c] ss:$16 sps:$4 sm:$0xff]   ;;  %v12578_v14 = vld [vmem:[%s13499_s18 + $0x60] ss:$16 sps:$4 sm:$0xff]  }
 0x313   : > { %v12579_v15 = vld [vmem:[%s13499_s18 + $0x68] ss:$16 sps:$4 sm:$0xff]   ;;  %v12580_v16 = vld [vmem:[%s13499_s18 + $0x84] ss:$16 sps:$4 sm:$0xff]   ;;  %v12582_v17 = vld [vmem:[%s13499_s18 + $0x8c] ss:$16 sps:$4 sm:$0xff]  }
 0x314   : > { %4187 = vmatpush1.bf16.msra.mxu0 %v12566_v6  ;;  %4639 = vmatpush1.bf16.msra.mxu1 %v12567_v7  ;;  %v12584_v18 = vld [vmem:[%s13499_s18 + $0x80] ss:$16 sps:$4 sm:$0xff]   ;;  %v12585_v19 = vld [vmem:[%s13499_s18 + $0x88] ss:$16 sps:$4 sm:$0xff]   ;;  %v12586_v20 = vld [vmem:[%s13499_s18 + $0xa4] ss:$16 sps:$4 sm:$0xff]  }
 0x315   : > { %4188 = vmatprep.subr.bf16.mxu0 %v12568_v8  ;;  %4640 = vmatprep.subr.bf16.mxu1 %v12570_v9  ;;  %v12588_v21 = vld [vmem:[%s13499_s18 + $0xac] ss:$16 sps:$4 sm:$0xff]   ;;  %v12590_v22 = vld [vmem:[%s13499_s18 + $0xa0] ss:$16 sps:$4 sm:$0xff]   ;;  %v12591_v23 = vld [vmem:[%s13499_s18 + $0xa8] ss:$16 sps:$4 sm:$0xff]  }
 0x316   : > { %v12592_v24 = vld [vmem:[%s13499_s18 + $0xc4] ss:$16 sps:$4 sm:$0xff]   ;;  %v12594_v25 = vld [vmem:[%s13499_s18 + $0xcc] ss:$16 sps:$4 sm:$0xff]   ;;  %v12596_v26 = vld [vmem:[%s13499_s18 + $0xc0] ss:$16 sps:$4 sm:$0xff]  }
 0x317   : > { %v12597_v27 = vld [vmem:[%s13499_s18 + $0xc8] ss:$16 sps:$4 sm:$0xff]   ;;  %v12598_v28 = vld [vmem:[%s13499_s18 + $0xe4] ss:$16 sps:$4 sm:$0xff]   ;;  %v12600_v29 = vld [vmem:[%s13499_s18 + $0xec] ss:$16 sps:$4 sm:$0xff]  }
 0x318   : > { %4189 = vmatpush1.bf16.msra.mxu0 %v12572_v10  ;;  %4641 = vmatpush1.bf16.msra.mxu1 %v12573_v11  ;;  %v12602_v30 = vld [vmem:[%s13499_s18 + $0xe0] ss:$16 sps:$4 sm:$0xff]   ;;  %v12603_v31 = vld [vmem:[%s13499_s18 + $0xe8] ss:$16 sps:$4 sm:$0xff]   ;;  %v12604_v32 = vld [vmem:[%s13499_s18 + $0x104] ss:$16 sps:$4 sm:$0xff]  }
 0x319   : > { %4190 = vmatprep.subr.bf16.mxu0 %v12574_v12  ;;  %4642 = vmatprep.subr.bf16.mxu1 %v12576_v13  ;;  %v12606_v33 = vld [vmem:[%s13499_s18 + $0x10c] ss:$16 sps:$4 sm:$0xff]   ;;  %v12608_v34 = vld [vmem:[%s13499_s18 + $0x100] ss:$16 sps:$4 sm:$0xff]   ;;  %v12609_v35 = vld [vmem:[%s13499_s18 + $0x108] ss:$16 sps:$4 sm:$0xff]  }
 0x31a   : > { %v12610_v36 = vld [vmem:[%s13499_s18 + $0x124] ss:$16 sps:$4 sm:$0xff]   ;;  %v12612_v37 = vld [vmem:[%s13499_s18 + $0x12c] ss:$16 sps:$4 sm:$0xff]   ;;  %v12614_v38 = vld [vmem:[%s13499_s18 + $0x120] ss:$16 sps:$4 sm:$0xff]  }
 0x31b   : > { %v12615_v39 = vld [vmem:[%s13499_s18 + $0x128] ss:$16 sps:$4 sm:$0xff]   ;;  %v12616_v40 = vld [vmem:[%s13499_s18 + $0x144] ss:$16 sps:$4 sm:$0xff]   ;;  %v12618_v41 = vld [vmem:[%s13499_s18 + $0x14c] ss:$16 sps:$4 sm:$0xff]  }
 0x31c   : > { %4191 = vmatpush1.bf16.msra.mxu0 %v12578_v14  ;;  %4643 = vmatpush1.bf16.msra.mxu1 %v12579_v15  ;;  %v12620_v42 = vld [vmem:[%s13499_s18 + $0x140] ss:$16 sps:$4 sm:$0xff]   ;;  %v12621_v43 = vld [vmem:[%s13499_s18 + $0x148] ss:$16 sps:$4 sm:$0xff]   ;;  %v12622_v44 = vld [vmem:[%s13499_s18 + $0x164] ss:$16 sps:$4 sm:$0xff]  }
 0x31d   : > { %4192 = vmatprep.subr.bf16.mxu0 %v12580_v16  ;;  %4644 = vmatprep.subr.bf16.mxu1 %v12582_v17  ;;  %v12624_v45 = vld [vmem:[%s13499_s18 + $0x16c] ss:$16 sps:$4 sm:$0xff]   ;;  %v2264_v46 = vld [vmem:[%s13494_s15] sm:$0xff]  ;;  %v12627_v50 = vld [vmem:[%s13499_s18 + $0x168] ss:$16 sps:$4 sm:$0xff]   ;;  %p11048_p5 = scmp.ne.s32.totalorder %s13485_s26, 8 }
 0x31e   : > { %v2268_v47 = vld [vmem:[%s13494_s15 + $0x20] sm:$0xff]  ;;  %v12630_v53 = vld [vmem:[%s13499_s18 + $0x18c] ss:$16 sps:$4 sm:$0xff]   ;;  %v12633_v55 = vld [vmem:[%s13499_s18 + $0x188] ss:$16 sps:$4 sm:$0xff]  }
 0x31f   : > { %v12626_v49 = vld [vmem:[%s13499_s18 + $0x160] ss:$16 sps:$4 sm:$0xff]   ;;  %v10729_v51 = vcombine.high %v2264_v46, %v2268_v47  ;;  %v12628_v52 = vld [vmem:[%s13499_s18 + $0x184] ss:$16 sps:$4 sm:$0xff]   ;;  %v12636_v57 = vld [vmem:[%s13499_s18 + $0x1ac] ss:$16 sps:$4 sm:$0xff]   ;;  %v10728_v7 = vcombine.low %v2264_v46, %v2268_v47 }
 0x320   : > { %4193 = vmatpush1.bf16.msra.mxu0 %v12584_v18  ;;  %4645 = vmatpush1.bf16.msra.mxu1 %v12585_v19  ;;  %v12632_v54 = vld [vmem:[%s13499_s18 + $0x180] ss:$16 sps:$4 sm:$0xff]   ;;  %v12634_v56 = vld [vmem:[%s13499_s18 + $0x1a4] ss:$16 sps:$4 sm:$0xff]   ;;  %v12639_v59 = vld [vmem:[%s13499_s18 + $0x1a8] ss:$16 sps:$4 sm:$0xff]  }
 0x321   : > { %4194 = vmatprep.subr.bf16.mxu0 %v12586_v20  ;;  %4646 = vmatprep.subr.bf16.mxu1 %v12588_v21  ;;  %v12638_v58 = vld [vmem:[%s13499_s18 + $0x1a0] ss:$16 sps:$4 sm:$0xff]   ;;  %v12640_v60 = vld [vmem:[%s13499_s18 + $0x1c4] ss:$16 sps:$4 sm:$0xff]   ;;  %v12642_v61 = vld [vmem:[%s13499_s18 + $0x1cc] ss:$16 sps:$4 sm:$0xff]  }
 0x322   : > { %4216 = vmatprep.mubr.bf16.mxu0 %v10729_v51  ;;  %4668 = vmatprep.mubr.bf16.mxu1 %v10729_v51  ;;  %v12644_v48 = vld [vmem:[%s13499_s18 + $0x1c0] ss:$16 sps:$4 sm:$0xff]   ;;  %v12645_v62 = vld [vmem:[%s13499_s18 + $0x1c8] ss:$16 sps:$4 sm:$0xff]   ;;  %v12646_v63 = vld [vmem:[%s13499_s18 + $0x1e4] ss:$16 sps:$4 sm:$0xff]  }
 0x323   : > { %v12648_v0 = vld [vmem:[%s13499_s18 + $0x1ec] ss:$16 sps:$4 sm:$0xff]   ;;  %v12650_v1 = vld [vmem:[%s13499_s18 + $0x1e0] ss:$16 sps:$4 sm:$0xff]   ;;  %v12651_v2 = vld [vmem:[%s13499_s18 + $0x1e8] ss:$16 sps:$4 sm:$0xff]  }
 0x324   : > { %4195 = vmatpush1.bf16.msra.mxu0 %v12590_v22  ;;  %4647 = vmatpush1.bf16.msra.mxu1 %v12591_v23  ;;  %v12654_v3 = vld [vmem:[%s13499_s18 + $0x204] ss:$16 sps:$4 sm:$0xff]   ;;  %v12657_v4 = vld [vmem:[%s13499_s18 + $0x20c] ss:$16 sps:$4 sm:$0xff]   ;;  %v12652_v5 = vld [vmem:[%s13499_s18 + $0x200] ss:$16 sps:$4 sm:$0xff]  }
 0x325   : > { %4196 = vmatprep.subr.bf16.mxu0 %v12592_v24  ;;  %4648 = vmatprep.subr.bf16.mxu1 %v12594_v25  ;;  %v12655_v6 = vld [vmem:[%s13499_s18 + $0x208] ss:$16 sps:$4 sm:$0xff]   ;;  %v2272_v8 = vld [vmem:[%s13494_s15 + $0x40] sm:$0xff]  ;;  %v12663_v11 = vld [vmem:[%s13499_s18 + $0x22c] ss:$16 sps:$4 sm:$0xff]  }
 0x326   : > { %v2276_v9 = vld [vmem:[%s13494_s15 + $0x60] sm:$0xff]  ;;  %v12661_v14 = vld [vmem:[%s13499_s18 + $0x228] ss:$16 sps:$4 sm:$0xff]   ;;  %v12669_v16 = vld [vmem:[%s13499_s18 + $0x24c] ss:$16 sps:$4 sm:$0xff]  }
 0x327   : > { %v12660_v10 = vld [vmem:[%s13499_s18 + $0x224] ss:$16 sps:$4 sm:$0xff]   ;;  %v10737_v12 = vcombine.high %v2272_v8, %v2276_v9  ;;  %v12658_v13 = vld [vmem:[%s13499_s18 + $0x220] ss:$16 sps:$4 sm:$0xff]   ;;  %v10736_v18 = vcombine.low %v2272_v8, %v2276_v9  ;;  %v12667_v21 = vld [vmem:[%s13499_s18 + $0x248] ss:$16 sps:$4 sm:$0xff]  }
 0x328   : > { %4197 = vmatpush1.bf16.msra.mxu0 %v12596_v26  ;;  %4649 = vmatpush1.bf16.msra.mxu1 %v12597_v27  ;;  %v12666_v15 = vld [vmem:[%s13499_s18 + $0x244] ss:$16 sps:$4 sm:$0xff]   ;;  %v12664_v20 = vld [vmem:[%s13499_s18 + $0x240] ss:$16 sps:$4 sm:$0xff]   ;;  %v12675_v23 = vld [vmem:[%s13499_s18 + $0x26c] ss:$16 sps:$4 sm:$0xff]  }
 0x329   : > { %4198 = vmatprep.subr.bf16.mxu0 %v12598_v28  ;;  %4650 = vmatprep.subr.bf16.mxu1 %v12600_v29  ;;  %v2280_v17 = vld [vmem:[%s13494_s15 + $0x80] sm:$0xff]  ;;  %v12673_v26 = vld [vmem:[%s13499_s18 + $0x268] ss:$16 sps:$4 sm:$0xff]   ;;  %v12681_v28 = vld [vmem:[%s13499_s18 + $0x28c] ss:$16 sps:$4 sm:$0xff]  }
 0x32a   : > { %v2284_v19 = vld [vmem:[%s13494_s15 + $0xa0] sm:$0xff]  ;;  %v12699_v47 = vld [vmem:[%s13499_s18 + $0x2ec] ss:$16 sps:$4 sm:$0xff]   ;;  %v12697_v51 = vld [vmem:[%s13499_s18 + $0x2e8] ss:$16 sps:$4 sm:$0xff]  }
 0x32b   : > { %v12672_v22 = vld [vmem:[%s13499_s18 + $0x264] ss:$16 sps:$4 sm:$0xff]   ;;  %v10745_v24 = vcombine.high %v2280_v17, %v2284_v19  ;;  %v12670_v25 = vld [vmem:[%s13499_s18 + $0x260] ss:$16 sps:$4 sm:$0xff]  }
 0x32c   : > { %4199 = vmatpush1.bf16.msra.mxu0 %v12602_v30  ;;  %4651 = vmatpush1.bf16.msra.mxu1 %v12603_v31  ;;  %v12678_v27 = vld [vmem:[%s13499_s18 + $0x284] ss:$16 sps:$4 sm:$0xff]   ;;  %v10744_v30 = vcombine.low %v2280_v17, %v2284_v19  ;;  %v12718_v9 = vld [vmem:[%s13499_s18 + $0x360] ss:$16 sps:$4 sm:$0xff]   ;;  %v12735_v19 = vld [vmem:[%s13499_s18 + $0x3ac] ss:$16 sps:$4 sm:$0xff]  }
 0x32d   : > { %4200 = vmatprep.subr.bf16.mxu0 %v12604_v32  ;;  %4652 = vmatprep.subr.bf16.mxu1 %v12606_v33  ;;  %v2288_v29 = vld [vmem:[%s13494_s15 + $0xc0] sm:$0xff]  ;;  %v12679_v33 = vld [vmem:[%s13499_s18 + $0x288] ss:$16 sps:$4 sm:$0xff]  }
 0x32e   : > { %v2292_v31 = vld [vmem:[%s13494_s15 + $0xe0] sm:$0xff] }
 0x32f   : > { %v12676_v32 = vld [vmem:[%s13499_s18 + $0x280] ss:$16 sps:$4 sm:$0xff]   ;;  %v12696_v46 = vld [vmem:[%s13499_s18 + $0x2e4] ss:$16 sps:$4 sm:$0xff]  }
 0x330   : > { %4201 = vmatpush1.bf16.msra.mxu0 %v12608_v34  ;;  %4653 = vmatpush1.bf16.msra.mxu1 %v12609_v35  ;;  %v12684_v34 = vld [vmem:[%s13499_s18 + $0x2a4] ss:$16 sps:$4 sm:$0xff]   ;;  %v12687_v35 = vld [vmem:[%s13499_s18 + $0x2ac] ss:$16 sps:$4 sm:$0xff]  }
 0x331   : > { %4202 = vmatprep.subr.bf16.mxu0 %v12610_v36  ;;  %4654 = vmatprep.subr.bf16.mxu1 %v12612_v37  ;;  %v10753_v36 = vcombine.high %v2288_v29, %v2292_v31  ;;  %v12682_v37 = vld [vmem:[%s13499_s18 + $0x2a0] ss:$16 sps:$4 sm:$0xff]  }
 0x332   : > { %v2324_v17 = vld [vmem:[%s13494_s15 + $0x1e0] sm:$0xff] }
 0x334   : > { %4203 = vmatpush1.bf16.msra.mxu0 %v12614_v38  ;;  %4655 = vmatpush1.bf16.msra.mxu1 %v12615_v39  ;;  %v12685_v38 = vld [vmem:[%s13499_s18 + $0x2a8] ss:$16 sps:$4 sm:$0xff]   ;;  %v12690_v39 = vld [vmem:[%s13499_s18 + $0x2c4] ss:$16 sps:$4 sm:$0xff]  }
 0x335   : > { %4204 = vmatprep.subr.bf16.mxu0 %v12616_v40  ;;  %4656 = vmatprep.subr.bf16.mxu1 %v12618_v41  ;;  %v12693_v40 = vld [vmem:[%s13499_s18 + $0x2cc] ss:$16 sps:$4 sm:$0xff]   ;;  %v12688_v41 = vld [vmem:[%s13499_s18 + $0x2c0] ss:$16 sps:$4 sm:$0xff]  }
 0x338   : > { %4205 = vmatpush1.bf16.msra.mxu0 %v12620_v42  ;;  %4657 = vmatpush1.bf16.msra.mxu1 %v12621_v43  ;;  %v12691_v42 = vld [vmem:[%s13499_s18 + $0x2c8] ss:$16 sps:$4 sm:$0xff]   ;;  %v10752_v43 = vcombine.low %v2288_v29, %v2292_v31  ;;  %v12747_v31 = vld [vmem:[%s13499_s18 + $0x3ec] ss:$16 sps:$4 sm:$0xff]  }
 0x339   : > { %4206 = vmatprep.subr.bf16.mxu0 %v12622_v44  ;;  %4658 = vmatprep.subr.bf16.mxu1 %v12624_v45  ;;  %v2296_v44 = vld [vmem:[%s13494_s15 + $0x100] sm:$0xff]  ;;  %v12739_v29 = vld [vmem:[%s13499_s18 + $0x3c8] ss:$16 sps:$4 sm:$0xff]  }
 0x33a   : > { %v2300_v45 = vld [vmem:[%s13494_s15 + $0x120] sm:$0xff] }
 0x33c   : > { %4207 = vmatpush1.bf16.msra.mxu0 %v12626_v49  ;;  %4659 = vmatpush1.bf16.msra.mxu1 %v12627_v50  ;;  %v10761_v49 = vcombine.high %v2296_v44, %v2300_v45  ;;  %v12694_v50 = vld [vmem:[%s13499_s18 + $0x2e0] ss:$16 sps:$4 sm:$0xff]  }
 0x33d   : > { %4208 = vmatprep.subr.bf16.mxu0 %v12628_v52  ;;  %4660 = vmatprep.subr.bf16.mxu1 %v12630_v53  ;;  %v12702_v52 = vld [vmem:[%s13499_s18 + $0x304] ss:$16 sps:$4 sm:$0xff]   ;;  %v12705_v53 = vld [vmem:[%s13499_s18 + $0x30c] ss:$16 sps:$4 sm:$0xff]  }
 0x340   : > { %4209 = vmatpush1.bf16.msra.mxu0 %v12632_v54  ;;  %4661 = vmatpush1.bf16.msra.mxu1 %v12633_v55  ;;  %v2304_v54 = vld [vmem:[%s13494_s15 + $0x140] sm:$0xff]  ;;  %v10760_v55 = vcombine.low %v2296_v44, %v2300_v45 }
 0x341   : > { %4210 = vmatprep.subr.bf16.mxu0 %v12634_v56  ;;  %4662 = vmatprep.subr.bf16.mxu1 %v12636_v57  ;;  %v2308_v56 = vld [vmem:[%s13494_s15 + $0x160] sm:$0xff] }
 0x342   : > { %v12700_v57 = vld [vmem:[%s13499_s18 + $0x300] ss:$16 sps:$4 sm:$0xff]  }
 0x343   : > { %v12754_v45 = vld [vmem:[%s13499_s18 + $0x420] ss:$16 sps:$4 sm:$0xff]  }
 0x344   : > { %4211 = vmatpush1.bf16.msra.mxu0 %v12638_v58  ;;  %4663 = vmatpush1.bf16.msra.mxu1 %v12639_v59  ;;  %v12703_v58 = vld [vmem:[%s13499_s18 + $0x308] ss:$16 sps:$4 sm:$0xff]   ;;  %v12708_v59 = vld [vmem:[%s13499_s18 + $0x324] ss:$16 sps:$4 sm:$0xff]  }
 0x345   : > { %4212 = vmatprep.subr.bf16.mxu0 %v12640_v60  ;;  %4664 = vmatprep.subr.bf16.mxu1 %v12642_v61  ;;  %v12711_v60 = vld [vmem:[%s13499_s18 + $0x32c] ss:$16 sps:$4 sm:$0xff]   ;;  %v10769_v61 = vcombine.high %v2304_v54, %v2308_v56 }
 0x348   : > { %4213 = vmatpush1.bf16.msra.mxu0 %v12644_v48  ;;  %4665 = vmatpush1.bf16.msra.mxu1 %v12645_v62  ;;  %v12706_v48 = vld [vmem:[%s13499_s18 + $0x320] ss:$16 sps:$4 sm:$0xff]   ;;  %v12709_v62 = vld [vmem:[%s13499_s18 + $0x328] ss:$16 sps:$4 sm:$0xff]  }
 0x349   : > { %4214 = vmatprep.subr.bf16.mxu0 %v12646_v63  ;;  %4666 = vmatprep.subr.bf16.mxu1 %v12648_v0  ;;  %v12714_v63 = vld [vmem:[%s13499_s18 + $0x344] ss:$16 sps:$4 sm:$0xff]   ;;  %v12717_v0 = vld [vmem:[%s13499_s18 + $0x34c] ss:$16 sps:$4 sm:$0xff]  }
 0x34c   : > { %4215 = vmatpush1.bf16.msra.mxu0 %v12650_v1  ;;  %4667 = vmatpush1.bf16.msra.mxu1 %v12651_v2  ;;  %v2312_v1 = vld [vmem:[%s13494_s15 + $0x180] sm:$0xff]  ;;  %v10768_v2 = vcombine.low %v2304_v54, %v2308_v56  ;;  %v2285_v54 = vld [vmem:[%s13494_s15 + $0xa8] sm:$0xff] }
 0x34d   : > { %4297 = vmatprep.subr.bf16.mxu0 %v12654_v3  ;;  %4749 = vmatprep.subr.bf16.mxu1 %v12657_v4  ;;  %v2316_v3 = vld [vmem:[%s13494_s15 + $0x1a0] sm:$0xff]  ;;  %v12771_v56 = vld [vmem:[%s13499_s18 + $0x46c] ss:$16 sps:$4 sm:$0xff]  }
 0x34e   : > { %v12712_v4 = vld [vmem:[%s13499_s18 + $0x340] ss:$16 sps:$4 sm:$0xff]   ;;  %v10777_v8 = vcombine.high %v2312_v1, %v2316_v3 }
 0x34f   : > { %4217 = vmatmul.mubr.bf16.vlgmr.msra.gmra.mrb[0].mxu0 %v10728_v7  ;;  %4669 = vmatmul.mubr.bf16.vlgmr.msra.gmra.mrb[0].mxu1 %v10728_v7  ;;  %v12723_v7 = vld [vmem:[%s13499_s18 + $0x36c] ss:$16 sps:$4 sm:$0xff]  }
 0x350   : > { %4298 = vmatpush1.bf16.msra.mxu0 %v12652_v5  ;;  %4750 = vmatpush1.bf16.msra.mxu1 %v12655_v6  ;;  %v12715_v5 = vld [vmem:[%s13499_s18 + $0x348] ss:$16 sps:$4 sm:$0xff]   ;;  %v12720_v6 = vld [vmem:[%s13499_s18 + $0x364] ss:$16 sps:$4 sm:$0xff]  }
 0x351   : > { %4299 = vmatprep.subr.bf16.mxu0 %v12660_v10  ;;  %4751 = vmatprep.subr.bf16.mxu1 %v12663_v11  ;;  %v12721_v10 = vld [vmem:[%s13499_s18 + $0x368] ss:$16 sps:$4 sm:$0xff]   ;;  %v12726_v11 = vld [vmem:[%s13499_s18 + $0x384] ss:$16 sps:$4 sm:$0xff]  }
 0x352   : > { %4226 = vmatprep.mubr.bf16.mxu0 %v10737_v12  ;;  %4678 = vmatprep.mubr.bf16.mxu1 %v10737_v12  ;;  %v12729_v12 = vld [vmem:[%s13499_s18 + $0x38c] ss:$16 sps:$4 sm:$0xff]  }
 0x354   : > { %4300 = vmatpush1.bf16.msra.mxu0 %v12658_v13  ;;  %4752 = vmatpush1.bf16.msra.mxu1 %v12661_v14  ;;  %v12724_v13 = vld [vmem:[%s13499_s18 + $0x380] ss:$16 sps:$4 sm:$0xff]   ;;  %v12727_v14 = vld [vmem:[%s13499_s18 + $0x388] ss:$16 sps:$4 sm:$0xff]  }
 0x355   : > { %4301 = vmatprep.subr.bf16.mxu0 %v12666_v15  ;;  %4753 = vmatprep.subr.bf16.mxu1 %v12669_v16  ;;  %v10776_v15 = vcombine.low %v2312_v1, %v2316_v3  ;;  %v2320_v16 = vld [vmem:[%s13494_s15 + $0x1c0] sm:$0xff]  ;;  %v12775_v1 = vld [vmem:[%s13499_s18 + $0x488] ss:$16 sps:$4 sm:$0xff]   ;;  %v12783_v3 = vld [vmem:[%s13499_s18 + $0x4ac] ss:$16 sps:$4 sm:$0xff]  }
 0x357   : > { %4227 = vmatmul.mubr.bf16.gmra.mrb[4].mxu0 %v10736_v18  ;;  %4679 = vmatmul.mubr.bf16.gmra.mrb[4].mxu1 %v10736_v18  ;;  %v12732_v18 = vld [vmem:[%s13499_s18 + $0x3a4] ss:$16 sps:$4 sm:$0xff]  }
 0x358   : > { %4302 = vmatpush1.bf16.msra.mxu0 %v12664_v20  ;;  %4754 = vmatpush1.bf16.msra.mxu1 %v12667_v21  ;;  %v10785_v20 = vcombine.high %v2320_v16, %v2324_v17  ;;  %v12730_v21 = vld [vmem:[%s13499_s18 + $0x3a0] ss:$16 sps:$4 sm:$0xff]  }
 0x359   : > { %4303 = vmatprep.subr.bf16.mxu0 %v12672_v22  ;;  %4755 = vmatprep.subr.bf16.mxu1 %v12675_v23  ;;  %v12733_v22 = vld [vmem:[%s13499_s18 + $0x3a8] ss:$16 sps:$4 sm:$0xff]   ;;  %v12738_v23 = vld [vmem:[%s13499_s18 + $0x3c4] ss:$16 sps:$4 sm:$0xff]  }
 0x35a   : > { %4236 = vmatprep.mubr.bf16.mxu0 %v10745_v24  ;;  %4688 = vmatprep.mubr.bf16.mxu1 %v10745_v24  ;;  %v12741_v24 = vld [vmem:[%s13499_s18 + $0x3cc] ss:$16 sps:$4 sm:$0xff]  }
 0x35c   : > { %4304 = vmatpush1.bf16.msra.mxu0 %v12670_v25  ;;  %4756 = vmatpush1.bf16.msra.mxu1 %v12673_v26  ;;  %v2265_v25 = vld [vmem:[%s13494_s15 + $0x8] sm:$0xff]  ;;  %v10784_v26 = vcombine.low %v2320_v16, %v2324_v17  ;;  %v12790_v17 = vld [vmem:[%s13499_s18 + $0x4e0] ss:$16 sps:$4 sm:$0xff]  }
 0x35d   : > { %4305 = vmatprep.subr.bf16.mxu0 %v12678_v27  ;;  %4757 = vmatprep.subr.bf16.mxu1 %v12681_v28  ;;  %v2269_v27 = vld [vmem:[%s13494_s15 + $0x28] sm:$0xff]  ;;  %v12736_v28 = vld [vmem:[%s13499_s18 + $0x3c0] ss:$16 sps:$4 sm:$0xff]  }
 0x35f   : > { %4237 = vmatmul.mubr.bf16.gmra.mrb[8].mxu0 %v10744_v30  ;;  %4689 = vmatmul.mubr.bf16.gmra.mrb[8].mxu1 %v10744_v30  ;;  %v12744_v30 = vld [vmem:[%s13499_s18 + $0x3e4] ss:$16 sps:$4 sm:$0xff]  }
 0x360   : > { %4306 = vmatpush1.bf16.msra.mxu0 %v12676_v32  ;;  %4758 = vmatpush1.bf16.msra.mxu1 %v12679_v33  ;;  %v10731_v32 = vcombine.high %v2265_v25, %v2269_v27  ;;  %v12742_v33 = vld [vmem:[%s13499_s18 + $0x3e0] ss:$16 sps:$4 sm:$0xff]  }
 0x361   : > { %4307 = vmatprep.subr.bf16.mxu0 %v12684_v34  ;;  %4759 = vmatprep.subr.bf16.mxu1 %v12687_v35  ;;  %v12745_v34 = vld [vmem:[%s13499_s18 + $0x3e8] ss:$16 sps:$4 sm:$0xff]   ;;  %v12750_v35 = vld [vmem:[%s13499_s18 + $0x404] ss:$16 sps:$4 sm:$0xff]  }
 0x362   : > { %4246 = vmatprep.mubr.bf16.mxu0 %v10753_v36  ;;  %4698 = vmatprep.mubr.bf16.mxu1 %v10753_v36  ;;  %v12753_v36 = vld [vmem:[%s13499_s18 + $0x40c] ss:$16 sps:$4 sm:$0xff]  }
 0x364   : > { %4308 = vmatpush1.bf16.msra.mxu0 %v12682_v37  ;;  %4760 = vmatpush1.bf16.msra.mxu1 %v12685_v38  ;;  %v2273_v37 = vld [vmem:[%s13494_s15 + $0x48] sm:$0xff]  ;;  %v10730_v38 = vcombine.low %v2265_v25, %v2269_v27 }
 0x365   : > { %4309 = vmatprep.subr.bf16.mxu0 %v12690_v39  ;;  %4761 = vmatprep.subr.bf16.mxu1 %v12693_v40  ;;  %v2277_v39 = vld [vmem:[%s13494_s15 + $0x68] sm:$0xff]  ;;  %v12748_v40 = vld [vmem:[%s13499_s18 + $0x400] ss:$16 sps:$4 sm:$0xff]  }
 0x366   : > { %v10739_v44 = vcombine.high %v2273_v37, %v2277_v39  ;;  %v2309_v25 = vld [vmem:[%s13494_s15 + $0x168] sm:$0xff] }
 0x367   : > { %4247 = vmatmul.mubr.bf16.gmra.mrb[12].mxu0 %v10752_v43  ;;  %4699 = vmatmul.mubr.bf16.gmra.mrb[12].mxu1 %v10752_v43  ;;  %v12759_v43 = vld [vmem:[%s13499_s18 + $0x42c] ss:$16 sps:$4 sm:$0xff]  }
 0x368   : > { %4310 = vmatpush1.bf16.msra.mxu0 %v12688_v41  ;;  %4762 = vmatpush1.bf16.msra.mxu1 %v12691_v42  ;;  %v12751_v41 = vld [vmem:[%s13499_s18 + $0x408] ss:$16 sps:$4 sm:$0xff]   ;;  %v12756_v42 = vld [vmem:[%s13499_s18 + $0x424] ss:$16 sps:$4 sm:$0xff]   ;;  %v12807_v27 = vld [vmem:[%s13499_s18 + $0x52c] ss:$16 sps:$4 sm:$0xff]  }
 0x369   : > { %4311 = vmatprep.subr.bf16.mxu0 %v12696_v46  ;;  %4763 = vmatprep.subr.bf16.mxu1 %v12699_v47  ;;  %v12757_v46 = vld [vmem:[%s13499_s18 + $0x428] ss:$16 sps:$4 sm:$0xff]   ;;  %v12762_v47 = vld [vmem:[%s13499_s18 + $0x444] ss:$16 sps:$4 sm:$0xff]  }
 0x36a   : > { %4256 = vmatprep.mubr.bf16.mxu0 %v10761_v49  ;;  %4708 = vmatprep.mubr.bf16.mxu1 %v10761_v49  ;;  %v12765_v49 = vld [vmem:[%s13499_s18 + $0x44c] ss:$16 sps:$4 sm:$0xff]  }
 0x36c   : > { %4312 = vmatpush1.bf16.msra.mxu0 %v12694_v50  ;;  %4764 = vmatpush1.bf16.msra.mxu1 %v12697_v51  ;;  %v12760_v50 = vld [vmem:[%s13499_s18 + $0x440] ss:$16 sps:$4 sm:$0xff]   ;;  %v12763_v51 = vld [vmem:[%s13499_s18 + $0x448] ss:$16 sps:$4 sm:$0xff]  }
 0x36d   : > { %4313 = vmatprep.subr.bf16.mxu0 %v12702_v52  ;;  %4765 = vmatprep.subr.bf16.mxu1 %v12705_v53  ;;  %v10738_v52 = vcombine.low %v2273_v37, %v2277_v39  ;;  %v2281_v53 = vld [vmem:[%s13494_s15 + $0x88] sm:$0xff] }
 0x36e   : > { %v12811_v37 = vld [vmem:[%s13499_s18 + $0x548] ss:$16 sps:$4 sm:$0xff]   ;;  %v12819_v39 = vld [vmem:[%s13499_s18 + $0x56c] ss:$16 sps:$4 sm:$0xff]  }
 0x36f   : > { %4257 = vmatmul.mubr.bf16.gmra.mrb[16].mxu0 %v10760_v55  ;;  %4709 = vmatmul.mubr.bf16.gmra.mrb[16].mxu1 %v10760_v55  ;;  %v12768_v55 = vld [vmem:[%s13499_s18 + $0x464] ss:$16 sps:$4 sm:$0xff]  }
 0x370   : > { %4314 = vmatpush1.bf16.msra.mxu0 %v12700_v57  ;;  %4766 = vmatpush1.bf16.msra.mxu1 %v12703_v58  ;;  %v10747_v57 = vcombine.high %v2281_v53, %v2285_v54  ;;  %v12766_v58 = vld [vmem:[%s13499_s18 + $0x460] ss:$16 sps:$4 sm:$0xff]  }
 0x371   : > { %4315 = vmatprep.subr.bf16.mxu0 %v12708_v59  ;;  %4767 = vmatprep.subr.bf16.mxu1 %v12711_v60  ;;  %v12769_v59 = vld [vmem:[%s13499_s18 + $0x468] ss:$16 sps:$4 sm:$0xff]   ;;  %v12774_v60 = vld [vmem:[%s13499_s18 + $0x484] ss:$16 sps:$4 sm:$0xff]  }
 0x372   : > { %4266 = vmatprep.mubr.bf16.mxu0 %v10769_v61  ;;  %4718 = vmatprep.mubr.bf16.mxu1 %v10769_v61  ;;  %v12777_v61 = vld [vmem:[%s13499_s18 + $0x48c] ss:$16 sps:$4 sm:$0xff]  }
 0x374   : > { %4316 = vmatpush1.bf16.msra.mxu0 %v12706_v48  ;;  %4768 = vmatpush1.bf16.msra.mxu1 %v12709_v62  ;;  %v2289_v48 = vld [vmem:[%s13494_s15 + $0xc8] sm:$0xff]  ;;  %v10746_v62 = vcombine.low %v2281_v53, %v2285_v54  ;;  %v12826_v54 = vld [vmem:[%s13499_s18 + $0x5a0] ss:$16 sps:$4 sm:$0xff]  }
 0x375   : > { %4317 = vmatprep.subr.bf16.mxu0 %v12714_v63  ;;  %4769 = vmatprep.subr.bf16.mxu1 %v12717_v0  ;;  %v2293_v63 = vld [vmem:[%s13494_s15 + $0xe8] sm:$0xff]  ;;  %v12772_v0 = vld [vmem:[%s13499_s18 + $0x480] ss:$16 sps:$4 sm:$0xff]  }
 0x377   : > { %4267 = vmatmul.mubr.bf16.gmra.mrb[20].mxu0 %v10768_v2  ;;  %4719 = vmatmul.mubr.bf16.gmra.mrb[20].mxu1 %v10768_v2  ;;  %v12780_v2 = vld [vmem:[%s13499_s18 + $0x4a4] ss:$16 sps:$4 sm:$0xff]  }
 0x378   : > { %4318 = vmatpush1.bf16.msra.mxu0 %v12712_v4  ;;  %4770 = vmatpush1.bf16.msra.mxu1 %v12715_v5  ;;  %v10755_v4 = vcombine.high %v2289_v48, %v2293_v63  ;;  %v12778_v5 = vld [vmem:[%s13499_s18 + $0x4a0] ss:$16 sps:$4 sm:$0xff]  }
 0x379   : > { %4319 = vmatprep.subr.bf16.mxu0 %v12720_v6  ;;  %4771 = vmatprep.subr.bf16.mxu1 %v12723_v7  ;;  %v12781_v6 = vld [vmem:[%s13499_s18 + $0x4a8] ss:$16 sps:$4 sm:$0xff]   ;;  %v12786_v7 = vld [vmem:[%s13499_s18 + $0x4c4] ss:$16 sps:$4 sm:$0xff]  }
 0x37a   : > { %4276 = vmatprep.mubr.bf16.mxu0 %v10777_v8  ;;  %4728 = vmatprep.mubr.bf16.mxu1 %v10777_v8  ;;  %v12789_v8 = vld [vmem:[%s13499_s18 + $0x4cc] ss:$16 sps:$4 sm:$0xff]  }
 0x37c   : > { %4320 = vmatpush1.bf16.msra.mxu0 %v12718_v9  ;;  %4772 = vmatpush1.bf16.msra.mxu1 %v12721_v10  ;;  %v2297_v9 = vld [vmem:[%s13494_s15 + $0x108] sm:$0xff]  ;;  %v10754_v10 = vcombine.low %v2289_v48, %v2293_v63  ;;  %v2270_v48 = vld [vmem:[%s13494_s15 + $0x30] sm:$0xff] }
 0x37d   : > { %4321 = vmatprep.subr.bf16.mxu0 %v12726_v11  ;;  %4773 = vmatprep.subr.bf16.mxu1 %v12729_v12  ;;  %v2301_v11 = vld [vmem:[%s13494_s15 + $0x128] sm:$0xff]  ;;  %v12784_v12 = vld [vmem:[%s13499_s18 + $0x4c0] ss:$16 sps:$4 sm:$0xff]  }
 0x37e   : > { %v10763_v16 = vcombine.high %v2297_v9, %v2301_v11  ;;  %v12843_v63 = vld [vmem:[%s13499_s18 + $0x5ec] ss:$16 sps:$4 sm:$0xff]  }
 0x37f   : > { %4277 = vmatmul.mubr.bf16.gmra.mrb[24].mxu0 %v10776_v15  ;;  %4729 = vmatmul.mubr.bf16.gmra.mrb[24].mxu1 %v10776_v15  ;;  %v12795_v15 = vld [vmem:[%s13499_s18 + $0x4ec] ss:$16 sps:$4 sm:$0xff]  }
 0x380   : > { %4322 = vmatpush1.bf16.msra.mxu0 %v12724_v13  ;;  %4774 = vmatpush1.bf16.msra.mxu1 %v12727_v14  ;;  %v12787_v13 = vld [vmem:[%s13499_s18 + $0x4c8] ss:$16 sps:$4 sm:$0xff]   ;;  %v12792_v14 = vld [vmem:[%s13499_s18 + $0x4e4] ss:$16 sps:$4 sm:$0xff]  }
 0x381   : > { %4323 = vmatprep.subr.bf16.mxu0 %v12732_v18  ;;  %4775 = vmatprep.subr.bf16.mxu1 %v12735_v19  ;;  %v12793_v18 = vld [vmem:[%s13499_s18 + $0x4e8] ss:$16 sps:$4 sm:$0xff]   ;;  %v12798_v19 = vld [vmem:[%s13499_s18 + $0x504] ss:$16 sps:$4 sm:$0xff]  }
 0x382   : > { %4286 = vmatprep.mubr.bf16.mxu0 %v10785_v20  ;;  %4738 = vmatprep.mubr.bf16.mxu1 %v10785_v20  ;;  %v12801_v20 = vld [vmem:[%s13499_s18 + $0x50c] ss:$16 sps:$4 sm:$0xff]  }
 0x384   : > { %4324 = vmatpush1.bf16.msra.mxu0 %v12730_v21  ;;  %4776 = vmatpush1.bf16.msra.mxu1 %v12733_v22  ;;  %v12796_v21 = vld [vmem:[%s13499_s18 + $0x500] ss:$16 sps:$4 sm:$0xff]   ;;  %v12799_v22 = vld [vmem:[%s13499_s18 + $0x508] ss:$16 sps:$4 sm:$0xff]  }
 0x385   : > { %4325 = vmatprep.subr.bf16.mxu0 %v12738_v23  ;;  %4777 = vmatprep.subr.bf16.mxu1 %v12741_v24  ;;  %v10762_v23 = vcombine.low %v2297_v9, %v2301_v11  ;;  %v2305_v24 = vld [vmem:[%s13494_s15 + $0x148] sm:$0xff] }
 0x386   : > { %v12847_v9 = vld [vmem:[%s13499_s18 + $0x608] ss:$16 sps:$4 sm:$0xff]   ;;  %v12855_v11 = vld [vmem:[%s13499_s18 + $0x62c] ss:$16 sps:$4 sm:$0xff]  }
 0x387   : > { %4287 = vmatmul.mubr.bf16.gmra.mrb[28].mxu0 %v10784_v26  ;;  %4739 = vmatmul.mubr.bf16.gmra.mrb[28].mxu1 %v10784_v26  ;;  %v12804_v26 = vld [vmem:[%s13499_s18 + $0x524] ss:$16 sps:$4 sm:$0xff]  }
 0x388   : > { %4326 = vmatpush1.bf16.msra.mxu0 %v12736_v28  ;;  %4778 = vmatpush1.bf16.msra.mxu1 %v12739_v29  ;;  %v10771_v28 = vcombine.high %v2305_v24, %v2309_v25  ;;  %v12802_v29 = vld [vmem:[%s13499_s18 + $0x520] ss:$16 sps:$4 sm:$0xff]  }
 0x389   : > { %4327 = vmatprep.subr.bf16.mxu0 %v12744_v30  ;;  %4779 = vmatprep.subr.bf16.mxu1 %v12747_v31  ;;  %v12805_v30 = vld [vmem:[%s13499_s18 + $0x528] ss:$16 sps:$4 sm:$0xff]   ;;  %v12810_v31 = vld [vmem:[%s13499_s18 + $0x544] ss:$16 sps:$4 sm:$0xff]  }
 0x38a   : > { %4329 = vmatprep.mubr.bf16.mxu0 %v10731_v32  ;;  %4781 = vmatprep.mubr.bf16.mxu1 %v10731_v32  ;;  %v12813_v32 = vld [vmem:[%s13499_s18 + $0x54c] ss:$16 sps:$4 sm:$0xff]  }
 0x38c   : > { %4328 = vmatpush1.bf16.msra.mxu0 %v12742_v33  ;;  %4780 = vmatpush1.bf16.msra.mxu1 %v12745_v34  ;;  %v2313_v33 = vld [vmem:[%s13494_s15 + $0x188] sm:$0xff]  ;;  %v10770_v34 = vcombine.low %v2305_v24, %v2309_v25  ;;  %v12862_v25 = vld [vmem:[%s13499_s18 + $0x660] ss:$16 sps:$4 sm:$0xff]  }
 0x38d   : > { %4410 = vmatprep.subr.bf16.mxu0 %v12750_v35  ;;  %4862 = vmatprep.subr.bf16.mxu1 %v12753_v36  ;;  %v2317_v35 = vld [vmem:[%s13494_s15 + $0x1a8] sm:$0xff]  ;;  %v12808_v36 = vld [vmem:[%s13499_s18 + $0x540] ss:$16 sps:$4 sm:$0xff]  }
 0x38f   : > { %4330 = vmatmul.mubr.bf16.vlgmr.msra.gmra.mrb[0].mxu0 %v10730_v38  ;;  %4782 = vmatmul.mubr.bf16.vlgmr.msra.gmra.mrb[0].mxu1 %v10730_v38  ;;  %v12816_v38 = vld [vmem:[%s13499_s18 + $0x564] ss:$16 sps:$4 sm:$0xff]  }
 0x390   : > { %4411 = vmatpush1.bf16.msra.mxu0 %v12748_v40  ;;  %4863 = vmatpush1.bf16.msra.mxu1 %v12751_v41  ;;  %v10779_v40 = vcombine.high %v2313_v33, %v2317_v35  ;;  %v12814_v41 = vld [vmem:[%s13499_s18 + $0x560] ss:$16 sps:$4 sm:$0xff]  }
 0x391   : > { %4412 = vmatprep.subr.bf16.mxu0 %v12756_v42  ;;  %4864 = vmatprep.subr.bf16.mxu1 %v12759_v43  ;;  %v12817_v42 = vld [vmem:[%s13499_s18 + $0x568] ss:$16 sps:$4 sm:$0xff]   ;;  %v12822_v43 = vld [vmem:[%s13499_s18 + $0x584] ss:$16 sps:$4 sm:$0xff]  }
 0x392   : > { %4339 = vmatprep.mubr.bf16.mxu0 %v10739_v44  ;;  %4791 = vmatprep.mubr.bf16.mxu1 %v10739_v44  ;;  %v12825_v44 = vld [vmem:[%s13499_s18 + $0x58c] ss:$16 sps:$4 sm:$0xff]  }
 0x394   : > { %4413 = vmatpush1.bf16.msra.mxu0 %v12754_v45  ;;  %4865 = vmatpush1.bf16.msra.mxu1 %v12757_v46  ;;  %v2321_v45 = vld [vmem:[%s13494_s15 + $0x1c8] sm:$0xff]  ;;  %v10778_v46 = vcombine.low %v2313_v33, %v2317_v35 }
 0x395   : > { %4414 = vmatprep.subr.bf16.mxu0 %v12762_v47  ;;  %4866 = vmatprep.subr.bf16.mxu1 %v12765_v49  ;;  %v2325_v47 = vld [vmem:[%s13494_s15 + $0x1e8] sm:$0xff]  ;;  %v12820_v49 = vld [vmem:[%s13499_s18 + $0x580] ss:$16 sps:$4 sm:$0xff]  }
 0x396   : > { %v10787_v53 = vcombine.high %v2321_v45, %v2325_v47  ;;  %v12871_v33 = vld [vmem:[%s13499_s18 + $0x688] ss:$16 sps:$4 sm:$0xff]   ;;  %v12879_v35 = vld [vmem:[%s13499_s18 + $0x6ac] ss:$16 sps:$4 sm:$0xff]  }
 0x397   : > { %4340 = vmatmul.mubr.bf16.gmra.mrb[4].mxu0 %v10738_v52  ;;  %4792 = vmatmul.mubr.bf16.gmra.mrb[4].mxu1 %v10738_v52  ;;  %v12831_v52 = vld [vmem:[%s13499_s18 + $0x5ac] ss:$16 sps:$4 sm:$0xff]  }
 0x398   : > { %4415 = vmatpush1.bf16.msra.mxu0 %v12760_v50  ;;  %4867 = vmatpush1.bf16.msra.mxu1 %v12763_v51  ;;  %v12823_v50 = vld [vmem:[%s13499_s18 + $0x588] ss:$16 sps:$4 sm:$0xff]   ;;  %v12828_v51 = vld [vmem:[%s13499_s18 + $0x5a4] ss:$16 sps:$4 sm:$0xff]  }
 0x399   : > { %4416 = vmatprep.subr.bf16.mxu0 %v12768_v55  ;;  %4868 = vmatprep.subr.bf16.mxu1 %v12771_v56  ;;  %v12829_v55 = vld [vmem:[%s13499_s18 + $0x5a8] ss:$16 sps:$4 sm:$0xff]   ;;  %v12834_v56 = vld [vmem:[%s13499_s18 + $0x5c4] ss:$16 sps:$4 sm:$0xff]  }
 0x39a   : > { %4349 = vmatprep.mubr.bf16.mxu0 %v10747_v57  ;;  %4801 = vmatprep.mubr.bf16.mxu1 %v10747_v57  ;;  %v12837_v57 = vld [vmem:[%s13499_s18 + $0x5cc] ss:$16 sps:$4 sm:$0xff]  }
 0x39c   : > { %4417 = vmatpush1.bf16.msra.mxu0 %v12766_v58  ;;  %4869 = vmatpush1.bf16.msra.mxu1 %v12769_v59  ;;  %v12832_v58 = vld [vmem:[%s13499_s18 + $0x5c0] ss:$16 sps:$4 sm:$0xff]   ;;  %v12835_v59 = vld [vmem:[%s13499_s18 + $0x5c8] ss:$16 sps:$4 sm:$0xff]  }
 0x39d   : > { %4418 = vmatprep.subr.bf16.mxu0 %v12774_v60  ;;  %4870 = vmatprep.subr.bf16.mxu1 %v12777_v61  ;;  %v10786_v60 = vcombine.low %v2321_v45, %v2325_v47  ;;  %v2266_v61 = vld [vmem:[%s13494_s15 + $0x10] sm:$0xff]  ;;  %v12883_v45 = vld [vmem:[%s13499_s18 + $0x6c8] ss:$16 sps:$4 sm:$0xff]   ;;  %v12891_v47 = vld [vmem:[%s13499_s18 + $0x6ec] ss:$16 sps:$4 sm:$0xff]  }
 0x39f   : > { %4350 = vmatmul.mubr.bf16.gmra.mrb[8].mxu0 %v10746_v62  ;;  %4802 = vmatmul.mubr.bf16.gmra.mrb[8].mxu1 %v10746_v62  ;;  %v12840_v62 = vld [vmem:[%s13499_s18 + $0x5e4] ss:$16 sps:$4 sm:$0xff]  }
 0x3a0   : > { %4419 = vmatpush1.bf16.msra.mxu0 %v12772_v0  ;;  %4871 = vmatpush1.bf16.msra.mxu1 %v12775_v1  ;;  %v10733_v0 = vcombine.high %v2266_v61, %v2270_v48  ;;  %v12838_v1 = vld [vmem:[%s13499_s18 + $0x5e0] ss:$16 sps:$4 sm:$0xff]  }
 0x3a1   : > { %4420 = vmatprep.subr.bf16.mxu0 %v12780_v2  ;;  %4872 = vmatprep.subr.bf16.mxu1 %v12783_v3  ;;  %v12841_v2 = vld [vmem:[%s13499_s18 + $0x5e8] ss:$16 sps:$4 sm:$0xff]   ;;  %v12846_v3 = vld [vmem:[%s13499_s18 + $0x604] ss:$16 sps:$4 sm:$0xff]  }
 0x3a2   : > { %4359 = vmatprep.mubr.bf16.mxu0 %v10755_v4  ;;  %4811 = vmatprep.mubr.bf16.mxu1 %v10755_v4  ;;  %v12849_v4 = vld [vmem:[%s13499_s18 + $0x60c] ss:$16 sps:$4 sm:$0xff]  }
 0x3a4   : > { %4421 = vmatpush1.bf16.msra.mxu0 %v12778_v5  ;;  %4873 = vmatpush1.bf16.msra.mxu1 %v12781_v6  ;;  %v10732_v5 = vcombine.low %v2266_v61, %v2270_v48  ;;  %v2274_v6 = vld [vmem:[%s13494_s15 + $0x50] sm:$0xff] }
 0x3a5   : > { %4422 = vmatprep.subr.bf16.mxu0 %v12786_v7  ;;  %4874 = vmatprep.subr.bf16.mxu1 %v12789_v8  ;;  %v2278_v7 = vld [vmem:[%s13494_s15 + $0x70] sm:$0xff] }
 0x3a6   : > { %v12844_v8 = vld [vmem:[%s13499_s18 + $0x600] ss:$16 sps:$4 sm:$0xff]  }
 0x3a7   : > { %4360 = vmatmul.mubr.bf16.gmra.mrb[12].mxu0 %v10754_v10  ;;  %4812 = vmatmul.mubr.bf16.gmra.mrb[12].mxu1 %v10754_v10  ;;  %v12852_v10 = vld [vmem:[%s13499_s18 + $0x624] ss:$16 sps:$4 sm:$0xff]   ;;  %v12898_v48 = vld [vmem:[%s13499_s18 + $0x720] ss:$16 sps:$4 sm:$0xff]  }
 0x3a8   : > { %4423 = vmatpush1.bf16.msra.mxu0 %v12784_v12  ;;  %4875 = vmatpush1.bf16.msra.mxu1 %v12787_v13  ;;  %v10741_v12 = vcombine.high %v2274_v6, %v2278_v7  ;;  %v12850_v13 = vld [vmem:[%s13499_s18 + $0x620] ss:$16 sps:$4 sm:$0xff]  }
 0x3a9   : > { %4424 = vmatprep.subr.bf16.mxu0 %v12792_v14  ;;  %4876 = vmatprep.subr.bf16.mxu1 %v12795_v15  ;;  %v12853_v14 = vld [vmem:[%s13499_s18 + $0x628] ss:$16 sps:$4 sm:$0xff]   ;;  %v12858_v15 = vld [vmem:[%s13499_s18 + $0x644] ss:$16 sps:$4 sm:$0xff]  }
 0x3aa   : > { %4369 = vmatprep.mubr.bf16.mxu0 %v10763_v16  ;;  %4821 = vmatprep.mubr.bf16.mxu1 %v10763_v16  ;;  %v12861_v16 = vld [vmem:[%s13499_s18 + $0x64c] ss:$16 sps:$4 sm:$0xff]  }
 0x3ac   : > { %4425 = vmatpush1.bf16.msra.mxu0 %v12790_v17  ;;  %4877 = vmatpush1.bf16.msra.mxu1 %v12793_v18  ;;  %v10740_v17 = vcombine.low %v2274_v6, %v2278_v7  ;;  %v2282_v18 = vld [vmem:[%s13494_s15 + $0x90] sm:$0xff]  ;;  %v12915_v7 = vld [vmem:[%s13499_s18 + $0x76c] ss:$16 sps:$4 sm:$0xff]  }
 0x3ad   : > { %4426 = vmatprep.subr.bf16.mxu0 %v12798_v19  ;;  %4878 = vmatprep.subr.bf16.mxu1 %v12801_v20  ;;  %v2286_v19 = vld [vmem:[%s13494_s15 + $0xb0] sm:$0xff] }
 0x3ae   : > { %v12856_v20 = vld [vmem:[%s13499_s18 + $0x640] ss:$16 sps:$4 sm:$0xff]   ;;  %v10749_v24 = vcombine.high %v2282_v18, %v2286_v19  ;;  %v12912_v6 = vld [vmem:[%s13499_s18 + $0x764] ss:$16 sps:$4 sm:$0xff]  }
 0x3af   : > { %4370 = vmatmul.mubr.bf16.gmra.mrb[16].mxu0 %v10762_v23  ;;  %4822 = vmatmul.mubr.bf16.gmra.mrb[16].mxu1 %v10762_v23  ;;  %v12867_v23 = vld [vmem:[%s13499_s18 + $0x66c] ss:$16 sps:$4 sm:$0xff]  }
 0x3b0   : > { %4427 = vmatpush1.bf16.msra.mxu0 %v12796_v21  ;;  %4879 = vmatpush1.bf16.msra.mxu1 %v12799_v22  ;;  %v12859_v21 = vld [vmem:[%s13499_s18 + $0x648] ss:$16 sps:$4 sm:$0xff]   ;;  %v12864_v22 = vld [vmem:[%s13499_s18 + $0x664] ss:$16 sps:$4 sm:$0xff]  }
 0x3b1   : > { %4428 = vmatprep.subr.bf16.mxu0 %v12804_v26  ;;  %4880 = vmatprep.subr.bf16.mxu1 %v12807_v27  ;;  %v12865_v26 = vld [vmem:[%s13499_s18 + $0x668] ss:$16 sps:$4 sm:$0xff]   ;;  %v12870_v27 = vld [vmem:[%s13499_s18 + $0x684] ss:$16 sps:$4 sm:$0xff]  }
 0x3b2   : > { %4379 = vmatprep.mubr.bf16.mxu0 %v10771_v28  ;;  %4831 = vmatprep.mubr.bf16.mxu1 %v10771_v28  ;;  %v12873_v28 = vld [vmem:[%s13499_s18 + $0x68c] ss:$16 sps:$4 sm:$0xff]  }
 0x3b4   : > { %4429 = vmatpush1.bf16.msra.mxu0 %v12802_v29  ;;  %4881 = vmatpush1.bf16.msra.mxu1 %v12805_v30  ;;  %v10748_v29 = vcombine.low %v2282_v18, %v2286_v19  ;;  %v2290_v30 = vld [vmem:[%s13494_s15 + $0xd0] sm:$0xff]  ;;  %v12927_v19 = vld [vmem:[%s13499_s18 + $0x7ac] ss:$16 sps:$4 sm:$0xff]  }
 0x3b5   : > { %4430 = vmatprep.subr.bf16.mxu0 %v12810_v31  ;;  %4882 = vmatprep.subr.bf16.mxu1 %v12813_v32  ;;  %v2294_v31 = vld [vmem:[%s13494_s15 + $0xf0] sm:$0xff] }
 0x3b6   : > { %v12868_v32 = vld [vmem:[%s13499_s18 + $0x680] ss:$16 sps:$4 sm:$0xff]   ;;  %v12924_v18 = vld [vmem:[%s13499_s18 + $0x7a4] ss:$16 sps:$4 sm:$0xff]  }
 0x3b7   : > { %4380 = vmatmul.mubr.bf16.gmra.mrb[20].mxu0 %v10770_v34  ;;  %4832 = vmatmul.mubr.bf16.gmra.mrb[20].mxu1 %v10770_v34  ;;  %v12876_v34 = vld [vmem:[%s13499_s18 + $0x6a4] ss:$16 sps:$4 sm:$0xff]  }
 0x3b8   : > { %4431 = vmatpush1.bf16.msra.mxu0 %v12808_v36  ;;  %4883 = vmatpush1.bf16.msra.mxu1 %v12811_v37  ;;  %v10757_v36 = vcombine.high %v2290_v30, %v2294_v31  ;;  %v12874_v37 = vld [vmem:[%s13499_s18 + $0x6a0] ss:$16 sps:$4 sm:$0xff]  }
 0x3b9   : > { %4432 = vmatprep.subr.bf16.mxu0 %v12816_v38  ;;  %4884 = vmatprep.subr.bf16.mxu1 %v12819_v39  ;;  %v12877_v38 = vld [vmem:[%s13499_s18 + $0x6a8] ss:$16 sps:$4 sm:$0xff]   ;;  %v12882_v39 = vld [vmem:[%s13499_s18 + $0x6c4] ss:$16 sps:$4 sm:$0xff]  }
 0x3ba   : > { %4389 = vmatprep.mubr.bf16.mxu0 %v10779_v40  ;;  %4841 = vmatprep.mubr.bf16.mxu1 %v10779_v40  ;;  %v12885_v40 = vld [vmem:[%s13499_s18 + $0x6cc] ss:$16 sps:$4 sm:$0xff]  }
 0x3bc   : > { %4433 = vmatpush1.bf16.msra.mxu0 %v12814_v41  ;;  %4885 = vmatpush1.bf16.msra.mxu1 %v12817_v42  ;;  %v10756_v41 = vcombine.low %v2290_v30, %v2294_v31  ;;  %v2298_v42 = vld [vmem:[%s13494_s15 + $0x110] sm:$0xff]  ;;  %v12939_v31 = vld [vmem:[%s13499_s18 + $0x7ec] ss:$16 sps:$4 sm:$0xff]  }
 0x3bd   : > { %4434 = vmatprep.subr.bf16.mxu0 %v12822_v43  ;;  %4886 = vmatprep.subr.bf16.mxu1 %v12825_v44  ;;  %v2302_v43 = vld [vmem:[%s13494_s15 + $0x130] sm:$0xff] }
 0x3be   : > { %v12880_v44 = vld [vmem:[%s13499_s18 + $0x6c0] ss:$16 sps:$4 sm:$0xff]   ;;  %v12936_v30 = vld [vmem:[%s13499_s18 + $0x7e4] ss:$16 sps:$4 sm:$0xff]  }
 0x3bf   : > { %4390 = vmatmul.mubr.bf16.gmra.mrb[24].mxu0 %v10778_v46  ;;  %4842 = vmatmul.mubr.bf16.gmra.mrb[24].mxu1 %v10778_v46  ;;  %v12888_v46 = vld [vmem:[%s13499_s18 + $0x6e4] ss:$16 sps:$4 sm:$0xff]  }
 0x3c0   : > { %4435 = vmatpush1.bf16.msra.mxu0 %v12820_v49  ;;  %4887 = vmatpush1.bf16.msra.mxu1 %v12823_v50  ;;  %v10765_v49 = vcombine.high %v2298_v42, %v2302_v43  ;;  %v12886_v50 = vld [vmem:[%s13499_s18 + $0x6e0] ss:$16 sps:$4 sm:$0xff]  }
 0x3c1   : > { %4436 = vmatprep.subr.bf16.mxu0 %v12828_v51  ;;  %4888 = vmatprep.subr.bf16.mxu1 %v12831_v52  ;;  %v12889_v51 = vld [vmem:[%s13499_s18 + $0x6e8] ss:$16 sps:$4 sm:$0xff]   ;;  %v12894_v52 = vld [vmem:[%s13499_s18 + $0x704] ss:$16 sps:$4 sm:$0xff]  }
 0x3c2   : > { %4399 = vmatprep.mubr.bf16.mxu0 %v10787_v53  ;;  %4851 = vmatprep.mubr.bf16.mxu1 %v10787_v53  ;;  %v12897_v53 = vld [vmem:[%s13499_s18 + $0x70c] ss:$16 sps:$4 sm:$0xff]  }
 0x3c4   : > { %4437 = vmatpush1.bf16.msra.mxu0 %v12826_v54  ;;  %4889 = vmatpush1.bf16.msra.mxu1 %v12829_v55  ;;  %v10764_v54 = vcombine.low %v2298_v42, %v2302_v43  ;;  %v2306_v55 = vld [vmem:[%s13494_s15 + $0x150] sm:$0xff]  ;;  %v2291_v43 = vld [vmem:[%s13494_s15 + $0xd8] sm:$0xff] }
 0x3c5   : > { %4438 = vmatprep.subr.bf16.mxu0 %v12834_v56  ;;  %4890 = vmatprep.subr.bf16.mxu1 %v12837_v57  ;;  %v2310_v56 = vld [vmem:[%s13494_s15 + $0x170] sm:$0xff] }
 0x3c6   : > { %v12892_v57 = vld [vmem:[%s13499_s18 + $0x700] ss:$16 sps:$4 sm:$0xff]   ;;  %v10773_v61 = vcombine.high %v2306_v55, %v2310_v56 }
 0x3c7   : > { %4400 = vmatmul.mubr.bf16.gmra.mrb[28].mxu0 %v10786_v60  ;;  %4852 = vmatmul.mubr.bf16.gmra.mrb[28].mxu1 %v10786_v60  ;;  %v12903_v60 = vld [vmem:[%s13499_s18 + $0x72c] ss:$16 sps:$4 sm:$0xff]  }
 0x3c8   : > { %4439 = vmatpush1.bf16.msra.mxu0 %v12832_v58  ;;  %4891 = vmatpush1.bf16.msra.mxu1 %v12835_v59  ;;  %v12895_v58 = vld [vmem:[%s13499_s18 + $0x708] ss:$16 sps:$4 sm:$0xff]   ;;  %v12900_v59 = vld [vmem:[%s13499_s18 + $0x724] ss:$16 sps:$4 sm:$0xff]  }
 0x3c9   : > { %4440 = vmatprep.subr.bf16.mxu0 %v12840_v62  ;;  %4892 = vmatprep.subr.bf16.mxu1 %v12843_v63  ;;  %v12901_v62 = vld [vmem:[%s13499_s18 + $0x728] ss:$16 sps:$4 sm:$0xff]   ;;  %v12906_v63 = vld [vmem:[%s13499_s18 + $0x744] ss:$16 sps:$4 sm:$0xff]  }
 0x3ca   : > { %4442 = vmatprep.mubr.bf16.mxu0 %v10733_v0  ;;  %4894 = vmatprep.mubr.bf16.mxu1 %v10733_v0  ;;  %v12909_v0 = vld [vmem:[%s13499_s18 + $0x74c] ss:$16 sps:$4 sm:$0xff]  }
 0x3cc   : > { %4441 = vmatpush1.bf16.msra.mxu0 %v12838_v1  ;;  %4893 = vmatpush1.bf16.msra.mxu1 %v12841_v2  ;;  %v10772_v1 = vcombine.low %v2306_v55, %v2310_v56  ;;  %v2314_v2 = vld [vmem:[%s13494_s15 + $0x190] sm:$0xff]  ;;  %v2315_v56 = vld [vmem:[%s13494_s15 + $0x198] sm:$0xff] }
 0x3cd   : > { %4523 = vmatprep.subr.bf16.mxu0 %v12846_v3  ;;  %4975 = vmatprep.subr.bf16.mxu1 %v12849_v4  ;;  %v2318_v3 = vld [vmem:[%s13494_s15 + $0x1b0] sm:$0xff] }
 0x3ce   : > { %v12904_v4 = vld [vmem:[%s13499_s18 + $0x740] ss:$16 sps:$4 sm:$0xff]  }
 0x3cf   : > { %4443 = vmatmul.mubr.bf16.vlgmr.msra.gmra.mrb[0].mxu0 %v10732_v5  ;;  %4895 = vmatmul.mubr.bf16.vlgmr.msra.gmra.mrb[0].mxu1 %v10732_v5  ;;  %v12907_v5 = vld [vmem:[%s13499_s18 + $0x748] ss:$16 sps:$4 sm:$0xff]  }
 0x3d0   : > { %4524 = vmatpush1.bf16.msra.mxu0 %v12844_v8  ;;  %4976 = vmatpush1.bf16.msra.mxu1 %v12847_v9  ;;  %v10781_v8 = vcombine.high %v2314_v2, %v2318_v3  ;;  %v12910_v9 = vld [vmem:[%s13499_s18 + $0x760] ss:$16 sps:$4 sm:$0xff]  }
 0x3d1   : > { %4525 = vmatprep.subr.bf16.mxu0 %v12852_v10  ;;  %4977 = vmatprep.subr.bf16.mxu1 %v12855_v11  ;;  %v12913_v10 = vld [vmem:[%s13499_s18 + $0x768] ss:$16 sps:$4 sm:$0xff]   ;;  %v12918_v11 = vld [vmem:[%s13499_s18 + $0x784] ss:$16 sps:$4 sm:$0xff]  }
 0x3d2   : > { %4452 = vmatprep.mubr.bf16.mxu0 %v10741_v12  ;;  %4904 = vmatprep.mubr.bf16.mxu1 %v10741_v12  ;;  %v12921_v12 = vld [vmem:[%s13499_s18 + $0x78c] ss:$16 sps:$4 sm:$0xff]  }
 0x3d4   : > { %4526 = vmatpush1.bf16.msra.mxu0 %v12850_v13  ;;  %4978 = vmatpush1.bf16.msra.mxu1 %v12853_v14  ;;  %v10780_v13 = vcombine.low %v2314_v2, %v2318_v3  ;;  %v2322_v14 = vld [vmem:[%s13494_s15 + $0x1d0] sm:$0xff]  ;;  %v2201_v2 = vld [vmem:[#allocation2 + $0x8] sm:$0xff]  ;;  %v2203_v3 = vld [vmem:[#allocation2 + $0x18] sm:$0xff] }
 0x3d5   : > { %4527 = vmatprep.subr.bf16.mxu0 %v12858_v15  ;;  %4979 = vmatprep.subr.bf16.mxu1 %v12861_v16  ;;  %v2326_v15 = vld [vmem:[%s13494_s15 + $0x1f0] sm:$0xff] }
 0x3d6   : > { %v12916_v16 = vld [vmem:[%s13499_s18 + $0x780] ss:$16 sps:$4 sm:$0xff]  }
 0x3d7   : > { %4453 = vmatmul.mubr.bf16.gmra.mrb[4].mxu0 %v10740_v17  ;;  %4905 = vmatmul.mubr.bf16.gmra.mrb[4].mxu1 %v10740_v17  ;;  %v12919_v17 = vld [vmem:[%s13499_s18 + $0x788] ss:$16 sps:$4 sm:$0xff]  }
 0x3d8   : > { %4528 = vmatpush1.bf16.msra.mxu0 %v12856_v20  ;;  %4980 = vmatpush1.bf16.msra.mxu1 %v12859_v21  ;;  %v10789_v20 = vcombine.high %v2322_v14, %v2326_v15  ;;  %v12922_v21 = vld [vmem:[%s13499_s18 + $0x7a0] ss:$16 sps:$4 sm:$0xff]  }
 0x3d9   : > { %4529 = vmatprep.subr.bf16.mxu0 %v12864_v22  ;;  %4981 = vmatprep.subr.bf16.mxu1 %v12867_v23  ;;  %v12925_v22 = vld [vmem:[%s13499_s18 + $0x7a8] ss:$16 sps:$4 sm:$0xff]   ;;  %v12930_v23 = vld [vmem:[%s13499_s18 + $0x7c4] ss:$16 sps:$4 sm:$0xff]  }
 0x3da   : > { %4462 = vmatprep.mubr.bf16.mxu0 %v10749_v24  ;;  %4914 = vmatprep.mubr.bf16.mxu1 %v10749_v24  ;;  %v12933_v24 = vld [vmem:[%s13499_s18 + $0x7cc] ss:$16 sps:$4 sm:$0xff]  }
 0x3dc   : > { %4530 = vmatpush1.bf16.msra.mxu0 %v12862_v25  ;;  %4982 = vmatpush1.bf16.msra.mxu1 %v12865_v26  ;;  %v10788_v25 = vcombine.low %v2322_v14, %v2326_v15  ;;  %v2267_v26 = vld [vmem:[%s13494_s15 + $0x18] sm:$0xff] }
 0x3dd   : > { %4531 = vmatprep.subr.bf16.mxu0 %v12870_v27  ;;  %4983 = vmatprep.subr.bf16.mxu1 %v12873_v28  ;;  %v2271_v27 = vld [vmem:[%s13494_s15 + $0x38] sm:$0xff]  ;;  %v12928_v28 = vld [vmem:[%s13499_s18 + $0x7c0] ss:$16 sps:$4 sm:$0xff]  }
 0x3df   : > { %4463 = vmatmul.mubr.bf16.gmra.mrb[8].mxu0 %v10748_v29  ;;  %4915 = vmatmul.mubr.bf16.gmra.mrb[8].mxu1 %v10748_v29  ;;  %v12931_v29 = vld [vmem:[%s13499_s18 + $0x7c8] ss:$16 sps:$4 sm:$0xff]  }
 0x3e0   : > { %4532 = vmatpush1.bf16.msra.mxu0 %v12868_v32  ;;  %4984 = vmatpush1.bf16.msra.mxu1 %v12871_v33  ;;  %v10735_v32 = vcombine.high %v2267_v26, %v2271_v27  ;;  %v12934_v33 = vld [vmem:[%s13499_s18 + $0x7e0] ss:$16 sps:$4 sm:$0xff]  }
 0x3e1   : > { %4533 = vmatprep.subr.bf16.mxu0 %v12876_v34  ;;  %4985 = vmatprep.subr.bf16.mxu1 %v12879_v35  ;;  %v12937_v34 = vld [vmem:[%s13499_s18 + $0x7e8] ss:$16 sps:$4 sm:$0xff]  }
 0x3e2   : > { %4472 = vmatprep.mubr.bf16.mxu0 %v10757_v36  ;;  %4924 = vmatprep.mubr.bf16.mxu1 %v10757_v36  ;;  %v2275_v35 = vld [vmem:[%s13494_s15 + $0x58] sm:$0xff] }
 0x3e3   : > { %v2279_v36 = vld [vmem:[%s13494_s15 + $0x78] sm:$0xff] }
 0x3e4   : > { %4534 = vmatpush1.bf16.msra.mxu0 %v12874_v37  ;;  %4986 = vmatpush1.bf16.msra.mxu1 %v12877_v38  ;;  %v10734_v37 = vcombine.low %v2267_v26, %v2271_v27  ;;  %v10743_v38 = vcombine.high %v2275_v35, %v2279_v36  ;;  %v2209_v26 = vld [vmem:[#allocation2 + $0x48] sm:$0xff]  ;;  %v2211_v27 = vld [vmem:[#allocation2 + $0x58] sm:$0xff] }
 0x3e5   : > { %4535 = vmatprep.subr.bf16.mxu0 %v12882_v39  ;;  %4987 = vmatprep.subr.bf16.mxu1 %v12885_v40  ;;  %v2283_v39 = vld [vmem:[%s13494_s15 + $0x98] sm:$0xff] }
 0x3e6   : > { %v2287_v40 = vld [vmem:[%s13494_s15 + $0xb8] sm:$0xff] }
 0x3e7   : > { %4473 = vmatmul.mubr.bf16.gmra.mrb[12].mxu0 %v10756_v41  ;;  %4925 = vmatmul.mubr.bf16.gmra.mrb[12].mxu1 %v10756_v41  ;;  %v10742_v41 = vcombine.low %v2275_v35, %v2279_v36  ;;  %v10751_v42 = vcombine.high %v2283_v39, %v2287_v40  ;;  %v2213_v36 = vld [vmem:[#allocation2 + $0x68] sm:$0xff] }
 0x3e8   : > { %4536 = vmatpush1.bf16.msra.mxu0 %v12880_v44  ;;  %4988 = vmatpush1.bf16.msra.mxu1 %v12883_v45  ;;  %v2295_v44 = vld [vmem:[%s13494_s15 + $0xf8] sm:$0xff]  ;;  %v10750_v45 = vcombine.low %v2283_v39, %v2287_v40 }
 0x3e9   : > { %4537 = vmatprep.subr.bf16.mxu0 %v12888_v46  ;;  %4989 = vmatprep.subr.bf16.mxu1 %v12891_v47  ;;  %v10759_v46 = vcombine.high %v2291_v43, %v2295_v44  ;;  %v2299_v47 = vld [vmem:[%s13494_s15 + $0x118] sm:$0xff] }
 0x3ea   : > { %4482 = vmatprep.mubr.bf16.mxu0 %v10765_v49  ;;  %4934 = vmatprep.mubr.bf16.mxu1 %v10765_v49  ;;  %v2303_v49 = vld [vmem:[%s13494_s15 + $0x138] sm:$0xff] }
 0x3ec   : > { %4538 = vmatpush1.bf16.msra.mxu0 %v12886_v50  ;;  %4990 = vmatpush1.bf16.msra.mxu1 %v12889_v51  ;;  %v10758_v50 = vcombine.low %v2291_v43, %v2295_v44  ;;  %v10767_v51 = vcombine.high %v2299_v47, %v2303_v49 }
 0x3ed   : > { %4539 = vmatprep.subr.bf16.mxu0 %v12894_v52  ;;  %4991 = vmatprep.subr.bf16.mxu1 %v12897_v53  ;;  %v2307_v52 = vld [vmem:[%s13494_s15 + $0x158] sm:$0xff] }
 0x3ee   : > { %v2311_v53 = vld [vmem:[%s13494_s15 + $0x178] sm:$0xff] }
 0x3ef   : > { %4483 = vmatmul.mubr.bf16.gmra.mrb[16].mxu0 %v10764_v54  ;;  %4935 = vmatmul.mubr.bf16.gmra.mrb[16].mxu1 %v10764_v54  ;;  %v10766_v54 = vcombine.low %v2299_v47, %v2303_v49  ;;  %v10775_v55 = vcombine.high %v2307_v52, %v2311_v53  ;;  %v2216_v49 = vld [vmem:[#allocation2 + $0x80] sm:$0xff] }
 0x3f0   : > { %4540 = vmatpush1.bf16.msra.mxu0 %v12892_v57  ;;  %4992 = vmatpush1.bf16.msra.mxu1 %v12895_v58  ;;  %v2319_v57 = vld [vmem:[%s13494_s15 + $0x1b8] sm:$0xff]  ;;  %v10774_v58 = vcombine.low %v2307_v52, %v2311_v53 }
 0x3f1   : > { %4541 = vmatprep.subr.bf16.mxu0 %v12900_v59  ;;  %4993 = vmatprep.subr.bf16.mxu1 %v12903_v60  ;;  %v10783_v59 = vcombine.high %v2315_v56, %v2319_v57  ;;  %v2323_v60 = vld [vmem:[%s13494_s15 + $0x1d8] sm:$0xff] }
 0x3f2   : > { %4492 = vmatprep.mubr.bf16.mxu0 %v10773_v61  ;;  %4944 = vmatprep.mubr.bf16.mxu1 %v10773_v61  ;;  %v2327_v61 = vld [vmem:[%s13494_s15 + $0x1f8] sm:$0xff] }
 0x3f3   : > { %v2219_v52 = vld [vmem:[#allocation2 + $0x98] sm:$0xff] }
 0x3f4   : > { %4542 = vmatpush1.bf16.msra.mxu0 %v12898_v48  ;;  %4994 = vmatpush1.bf16.msra.mxu1 %v12901_v62  ;;  %v10782_v48 = vcombine.low %v2315_v56, %v2319_v57  ;;  %v10791_v62 = vcombine.high %v2323_v60, %v2327_v61  ;;  %v2222_v56 = vld [vmem:[#allocation2 + $0xb0] sm:$0xff] }
 0x3f5   : > { %4543 = vmatprep.subr.bf16.mxu0 %v12906_v63  ;;  %4995 = vmatprep.subr.bf16.mxu1 %v12909_v0  ;;  %v10790_v63 = vcombine.low %v2323_v60, %v2327_v61  ;;  %v2200_v0 = vld [vmem:[#allocation2] sm:$0xff]  ;;  %v2221_v61 = vld [vmem:[#allocation2 + $0xa8] sm:$0xff] }
 0x3f7   : > { %4493 = vmatmul.mubr.bf16.gmra.mrb[20].mxu0 %v10772_v1  ;;  %4945 = vmatmul.mubr.bf16.gmra.mrb[20].mxu1 %v10772_v1  ;;  %v2202_v1 = vld [vmem:[#allocation2 + $0x10] sm:$0xff] }
 0x3f8   : > { %4544 = vmatpush1.bf16.msra.mxu0 %v12904_v4  ;;  %4996 = vmatpush1.bf16.msra.mxu1 %v12907_v5 }
 0x3f9   : > { %4545 = vmatprep.subr.bf16.mxu0 %v12912_v6  ;;  %4997 = vmatprep.subr.bf16.mxu1 %v12915_v7  ;;  %v2204_v6 = vld [vmem:[#allocation2 + $0x20] sm:$0xff]  ;;  %v2206_v7 = vld [vmem:[#allocation2 + $0x30] sm:$0xff] }
 0x3fa   : > { %4502 = vmatprep.mubr.bf16.mxu0 %v10781_v8  ;;  %4954 = vmatprep.mubr.bf16.mxu1 %v10781_v8 }
 0x3fc   : > { %4546 = vmatpush1.bf16.msra.mxu0 %v12910_v9  ;;  %4998 = vmatpush1.bf16.msra.mxu1 %v12913_v10 }
 0x3fd   : > { %4547 = vmatprep.subr.bf16.mxu0 %v12918_v11  ;;  %4999 = vmatprep.subr.bf16.mxu1 %v12921_v12  ;;  %v2205_v12 = vld [vmem:[#allocation2 + $0x28] sm:$0xff] }
 0x3ff   : > { %4503 = vmatmul.mubr.bf16.gmra.mrb[24].mxu0 %v10780_v13  ;;  %4955 = vmatmul.mubr.bf16.gmra.mrb[24].mxu1 %v10780_v13  ;;  %v2207_v13 = vld [vmem:[#allocation2 + $0x38] sm:$0xff] }
 0x400   : > { %4548 = vmatpush1.bf16.msra.mxu0 %v12916_v16  ;;  %5000 = vmatpush1.bf16.msra.mxu1 %v12919_v17 }
 0x401   : > { %4549 = vmatprep.subr.bf16.mxu0 %v12924_v18  ;;  %5001 = vmatprep.subr.bf16.mxu1 %v12927_v19 }
 0x402   : > { %4512 = vmatprep.mubr.bf16.mxu0 %v10789_v20  ;;  %4964 = vmatprep.mubr.bf16.mxu1 %v10789_v20 }
 0x404   : > { %4550 = vmatpush1.bf16.msra.mxu0 %v12922_v21  ;;  %5002 = vmatpush1.bf16.msra.mxu1 %v12925_v22 }
 0x405   : > { %4551 = vmatprep.subr.bf16.mxu0 %v12930_v23  ;;  %5003 = vmatprep.subr.bf16.mxu1 %v12933_v24  ;;  %v2208_v24 = vld [vmem:[#allocation2 + $0x40] sm:$0xff] }
 0x407   : > { %4513 = vmatmul.mubr.bf16.gmra.mrb[28].mxu0 %v10788_v25  ;;  %4965 = vmatmul.mubr.bf16.gmra.mrb[28].mxu1 %v10788_v25  ;;  %v2210_v25 = vld [vmem:[#allocation2 + $0x50] sm:$0xff] }
 0x408   : > { %4552 = vmatpush1.bf16.msra.mxu0 %v12928_v28  ;;  %5004 = vmatpush1.bf16.msra.mxu1 %v12931_v29 }
 0x409   : > { %4553 = vmatprep.subr.bf16.mxu0 %v12936_v30  ;;  %5005 = vmatprep.subr.bf16.mxu1 %v12939_v31  ;;  %v2212_v30 = vld [vmem:[#allocation2 + $0x60] sm:$0xff]  ;;  %v2214_v31 = vld [vmem:[#allocation2 + $0x70] sm:$0xff] }
 0x40a   : > { %4555 = vmatprep.mubr.bf16.mxu0 %v10735_v32  ;;  %5007 = vmatprep.mubr.bf16.mxu1 %v10735_v32 }
 0x40c   : > { %4554 = vmatpush1.bf16.msra.mxu0 %v12934_v33  ;;  %5006 = vmatpush1.bf16.msra.mxu1 %v12937_v34 }
 0x40f   : > { %4556 = vmatmul.mubr.bf16.vlgmr.msra.gmra.mrb[0].mxu0 %v10734_v37  ;;  %5008 = vmatmul.mubr.bf16.vlgmr.msra.gmra.mrb[0].mxu1 %v10734_v37  ;;  %v2215_v37 = vld [vmem:[#allocation2 + $0x78] sm:$0xff] }
 0x410   : > { %4565 = vmatprep.mubr.bf16.mxu0 %v10743_v38  ;;  %5017 = vmatprep.mubr.bf16.mxu1 %v10743_v38 }
 0x417   : > { %4566 = vmatmul.mubr.bf16.gmra.mrb[4].mxu0 %v10742_v41  ;;  %5018 = vmatmul.mubr.bf16.gmra.mrb[4].mxu1 %v10742_v41 }
 0x418   : > { %4575 = vmatprep.mubr.bf16.mxu0 %v10751_v42  ;;  %5027 = vmatprep.mubr.bf16.mxu1 %v10751_v42 }
 0x41f   : > { %4576 = vmatmul.mubr.bf16.gmra.mrb[8].mxu0 %v10750_v45  ;;  %5028 = vmatmul.mubr.bf16.gmra.mrb[8].mxu1 %v10750_v45 }
 0x420   : > { %4585 = vmatprep.mubr.bf16.mxu0 %v10759_v46  ;;  %5037 = vmatprep.mubr.bf16.mxu1 %v10759_v46 }
 0x427   : > { %4586 = vmatmul.mubr.bf16.gmra.mrb[12].mxu0 %v10758_v50  ;;  %5038 = vmatmul.mubr.bf16.gmra.mrb[12].mxu1 %v10758_v50  ;;  %v2218_v50 = vld [vmem:[#allocation2 + $0x90] sm:$0xff] }
 0x428   : > { %4595 = vmatprep.mubr.bf16.mxu0 %v10767_v51  ;;  %5047 = vmatprep.mubr.bf16.mxu1 %v10767_v51  ;;  %v2217_v51 = vld [vmem:[#allocation2 + $0x88] sm:$0xff] }
 0x42f   : > { %4596 = vmatmul.mubr.bf16.gmra.mrb[16].mxu0 %v10766_v54  ;;  %5048 = vmatmul.mubr.bf16.gmra.mrb[16].mxu1 %v10766_v54 }
 0x430   : > { %4605 = vmatprep.mubr.bf16.mxu0 %v10775_v55  ;;  %5057 = vmatprep.mubr.bf16.mxu1 %v10775_v55  ;;  %v2220_v55 = vld [vmem:[#allocation2 + $0xa0] sm:$0xff] }
 0x437   : > { %4606 = vmatmul.mubr.bf16.gmra.mrb[20].mxu0 %v10774_v58  ;;  %5058 = vmatmul.mubr.bf16.gmra.mrb[20].mxu1 %v10774_v58 }
 0x438   : > { %4615 = vmatprep.mubr.bf16.mxu0 %v10783_v59  ;;  %5067 = vmatprep.mubr.bf16.mxu1 %v10783_v59 }
 0x43f   : > { %4616 = vmatmul.mubr.bf16.gmra.mrb[24].mxu0 %v10782_v48  ;;  %5068 = vmatmul.mubr.bf16.gmra.mrb[24].mxu1 %v10782_v48  ;;  %v2223_v48 = vld [vmem:[#allocation2 + $0xb8] sm:$0xff] }
 0x440   : > { %4625 = vmatprep.mubr.bf16.mxu0 %v10791_v62  ;;  %5077 = vmatprep.mubr.bf16.mxu1 %v10791_v62 }
 0x447   : > { %4626 = vmatmul.mubr.bf16.gmra.mrb[28].mxu0 %v10790_v63  ;;  %5078 = vmatmul.mubr.bf16.gmra.mrb[28].mxu1 %v10790_v63 }
 0x4e2   : > { %v4557_v4 = vpop.f32.mrb[0].mxu0  ;;  %v5009_v5 = vpop.f32.mrb[0].mxu1 }
 0x4e3   : > { %v5088_v8 = vadd.f32 %v4557_v4, %v2200_v0  ;;  %v5090_v9 = vadd.f32 %v5009_v5, %v2202_v1  ;;  %v4559_v10 = vpop.f32.mrb[1].mxu0  ;;  %v5011_v11 = vpop.f32.mrb[1].mxu1 }
 0x4e4   : > { %v5089_v14 = vadd.f32 %v4559_v10, %v2201_v2  ;;  %v5091_v15 = vadd.f32 %v5011_v11, %v2203_v3  ;;  %v4561_v16 = vpop.f32.mrb[2].mxu0  ;;  %v5013_v17 = vpop.f32.mrb[2].mxu1  ;;  %v2225_v10 = vld [vmem:[#allocation2 + $0xc8] sm:$0xff]  ;;  %v2227_v11 = vld [vmem:[#allocation2 + $0xd8] sm:$0xff] }
 0x4e5   : > { %5152 = vst [vmem:[#allocation2] sm:$0xff] %v5088_v8  ;;  %5154 = vst [vmem:[#allocation2 + $0x10] sm:$0xff] %v5090_v9  ;;  %v5092_v18 = vadd.f32 %v4561_v16, %v2204_v6  ;;  %v5094_v19 = vadd.f32 %v5013_v17, %v2206_v7  ;;  %v4563_v20 = vpop.f32.mrb[3].mxu0  ;;  %v5015_v21 = vpop.f32.mrb[3].mxu1  ;;  %v2224_v8 = vld [vmem:[#allocation2 + $0xc0] sm:$0xff]  ;;  %v2226_v9 = vld [vmem:[#allocation2 + $0xd0] sm:$0xff] }
 0x4e6   : > { %5153 = vst [vmem:[#allocation2 + $0x8] sm:$0xff] %v5089_v14  ;;  %5155 = vst [vmem:[#allocation2 + $0x18] sm:$0xff] %v5091_v15  ;;  %v5093_v22 = vadd.f32 %v4563_v20, %v2205_v12  ;;  %v5095_v23 = vadd.f32 %v5015_v21, %v2207_v13  ;;  %v2228_v14 = vld [vmem:[#allocation2 + $0xe0] sm:$0xff]  ;;  %v2230_v15 = vld [vmem:[#allocation2 + $0xf0] sm:$0xff] }
 0x4e7   : > { %5156 = vst [vmem:[#allocation2 + $0x20] sm:$0xff] %v5092_v18  ;;  %5158 = vst [vmem:[#allocation2 + $0x30] sm:$0xff] %v5094_v19  ;;  %v2229_v20 = vld [vmem:[#allocation2 + $0xe8] sm:$0xff]  ;;  %v2231_v21 = vld [vmem:[#allocation2 + $0xf8] sm:$0xff] }
 0x4e8   : > { %5157 = vst [vmem:[#allocation2 + $0x28] sm:$0xff] %v5093_v22  ;;  %5159 = vst [vmem:[#allocation2 + $0x38] sm:$0xff] %v5095_v23 }
 0x4ea   : > { %v4567_v28 = vpop.f32.mrb[4].mxu0  ;;  %v5019_v29 = vpop.f32.mrb[4].mxu1 }
 0x4eb   : > { %v5096_v32 = vadd.f32 %v4567_v28, %v2208_v24  ;;  %v5098_v33 = vadd.f32 %v5019_v29, %v2210_v25  ;;  %v4569_v34 = vpop.f32.mrb[5].mxu0  ;;  %v5021_v35 = vpop.f32.mrb[5].mxu1 }
 0x4ec   : > { %v5097_v38 = vadd.f32 %v4569_v34, %v2209_v26  ;;  %v5099_v39 = vadd.f32 %v5021_v35, %v2211_v27  ;;  %v4571_v40 = vpop.f32.mrb[6].mxu0  ;;  %v5023_v41 = vpop.f32.mrb[6].mxu1  ;;  %v2233_v34 = vld [vmem:[#allocation2 + $0x108] sm:$0xff]  ;;  %v2235_v35 = vld [vmem:[#allocation2 + $0x118] sm:$0xff] }
 0x4ed   : > { %5160 = vst [vmem:[#allocation2 + $0x40] sm:$0xff] %v5096_v32  ;;  %5162 = vst [vmem:[#allocation2 + $0x50] sm:$0xff] %v5098_v33  ;;  %v5100_v42 = vadd.f32 %v4571_v40, %v2212_v30  ;;  %v5102_v43 = vadd.f32 %v5023_v41, %v2214_v31  ;;  %v4573_v44 = vpop.f32.mrb[7].mxu0  ;;  %v5025_v45 = vpop.f32.mrb[7].mxu1  ;;  %v2232_v32 = vld [vmem:[#allocation2 + $0x100] sm:$0xff]  ;;  %v2234_v33 = vld [vmem:[#allocation2 + $0x110] sm:$0xff] }
 0x4ee   : > { %5161 = vst [vmem:[#allocation2 + $0x48] sm:$0xff] %v5097_v38  ;;  %5163 = vst [vmem:[#allocation2 + $0x58] sm:$0xff] %v5099_v39  ;;  %v5101_v46 = vadd.f32 %v4573_v44, %v2213_v36  ;;  %v5103_v47 = vadd.f32 %v5025_v45, %v2215_v37  ;;  %v2236_v38 = vld [vmem:[#allocation2 + $0x120] sm:$0xff]  ;;  %v2238_v39 = vld [vmem:[#allocation2 + $0x130] sm:$0xff] }
 0x4ef   : > { %5164 = vst [vmem:[#allocation2 + $0x60] sm:$0xff] %v5100_v42  ;;  %5166 = vst [vmem:[#allocation2 + $0x70] sm:$0xff] %v5102_v43  ;;  %v2237_v44 = vld [vmem:[#allocation2 + $0x128] sm:$0xff]  ;;  %v2239_v45 = vld [vmem:[#allocation2 + $0x138] sm:$0xff] }
 0x4f0   : > { %5165 = vst [vmem:[#allocation2 + $0x68] sm:$0xff] %v5101_v46  ;;  %5167 = vst [vmem:[#allocation2 + $0x78] sm:$0xff] %v5103_v47 }
 0x4f2   : > { %v4577_v53 = vpop.f32.mrb[8].mxu0  ;;  %v5029_v54 = vpop.f32.mrb[8].mxu1 }
 0x4f3   : > { %v5104_v57 = vadd.f32 %v4577_v53, %v2216_v49  ;;  %v5106_v58 = vadd.f32 %v5029_v54, %v2218_v50  ;;  %v4579_v59 = vpop.f32.mrb[9].mxu0  ;;  %v5031_v60 = vpop.f32.mrb[9].mxu1 }
 0x4f4   : > { %v5105_v62 = vadd.f32 %v4579_v59, %v2217_v51  ;;  %v5107_v63 = vadd.f32 %v5031_v60, %v2219_v52  ;;  %v4581_v0 = vpop.f32.mrb[10].mxu0  ;;  %v5033_v1 = vpop.f32.mrb[10].mxu1  ;;  %v2241_v59 = vld [vmem:[#allocation2 + $0x148] sm:$0xff]  ;;  %v2243_v60 = vld [vmem:[#allocation2 + $0x158] sm:$0xff] }
 0x4f5   : > { %5168 = vst [vmem:[#allocation2 + $0x80] sm:$0xff] %v5104_v57  ;;  %5170 = vst [vmem:[#allocation2 + $0x90] sm:$0xff] %v5106_v58  ;;  %v5108_v2 = vadd.f32 %v4581_v0, %v2220_v55  ;;  %v5110_v3 = vadd.f32 %v5033_v1, %v2222_v56  ;;  %v4583_v4 = vpop.f32.mrb[11].mxu0  ;;  %v5035_v5 = vpop.f32.mrb[11].mxu1  ;;  %v2240_v57 = vld [vmem:[#allocation2 + $0x140] sm:$0xff]  ;;  %v2242_v58 = vld [vmem:[#allocation2 + $0x150] sm:$0xff] }
 0x4f6   : > { %5169 = vst [vmem:[#allocation2 + $0x88] sm:$0xff] %v5105_v62  ;;  %5171 = vst [vmem:[#allocation2 + $0x98] sm:$0xff] %v5107_v63  ;;  %v5109_v6 = vadd.f32 %v4583_v4, %v2221_v61  ;;  %v5111_v7 = vadd.f32 %v5035_v5, %v2223_v48  ;;  %v2244_v62 = vld [vmem:[#allocation2 + $0x160] sm:$0xff]  ;;  %v2246_v63 = vld [vmem:[#allocation2 + $0x170] sm:$0xff] }
 0x4f7   : > { %5172 = vst [vmem:[#allocation2 + $0xa0] sm:$0xff] %v5108_v2  ;;  %5174 = vst [vmem:[#allocation2 + $0xb0] sm:$0xff] %v5110_v3  ;;  %v2245_v4 = vld [vmem:[#allocation2 + $0x168] sm:$0xff]  ;;  %v2247_v5 = vld [vmem:[#allocation2 + $0x178] sm:$0xff] }
 0x4f8   : > { %5173 = vst [vmem:[#allocation2 + $0xa8] sm:$0xff] %v5109_v6  ;;  %5175 = vst [vmem:[#allocation2 + $0xb8] sm:$0xff] %v5111_v7 }
 0x4fa   : > { %v4587_v12 = vpop.f32.mrb[12].mxu0  ;;  %v5039_v13 = vpop.f32.mrb[12].mxu1 }
 0x4fb   : > { %v5112_v16 = vadd.f32 %v4587_v12, %v2224_v8  ;;  %v5114_v17 = vadd.f32 %v5039_v13, %v2226_v9  ;;  %v4589_v18 = vpop.f32.mrb[13].mxu0  ;;  %v5041_v19 = vpop.f32.mrb[13].mxu1 }
 0x4fc   : > { %v5113_v22 = vadd.f32 %v4589_v18, %v2225_v10  ;;  %v5115_v23 = vadd.f32 %v5041_v19, %v2227_v11  ;;  %v4591_v24 = vpop.f32.mrb[14].mxu0  ;;  %v5043_v25 = vpop.f32.mrb[14].mxu1  ;;  %v2249_v18 = vld [vmem:[#allocation2 + $0x188] sm:$0xff]  ;;  %v2251_v19 = vld [vmem:[#allocation2 + $0x198] sm:$0xff] }
 0x4fd   : > { %5176 = vst [vmem:[#allocation2 + $0xc0] sm:$0xff] %v5112_v16  ;;  %5178 = vst [vmem:[#allocation2 + $0xd0] sm:$0xff] %v5114_v17  ;;  %v5116_v26 = vadd.f32 %v4591_v24, %v2228_v14  ;;  %v5118_v27 = vadd.f32 %v5043_v25, %v2230_v15  ;;  %v4593_v28 = vpop.f32.mrb[15].mxu0  ;;  %v5045_v29 = vpop.f32.mrb[15].mxu1  ;;  %v2248_v16 = vld [vmem:[#allocation2 + $0x180] sm:$0xff]  ;;  %v2250_v17 = vld [vmem:[#allocation2 + $0x190] sm:$0xff] }
 0x4fe   : > { %5177 = vst [vmem:[#allocation2 + $0xc8] sm:$0xff] %v5113_v22  ;;  %5179 = vst [vmem:[#allocation2 + $0xd8] sm:$0xff] %v5115_v23  ;;  %v5117_v30 = vadd.f32 %v4593_v28, %v2229_v20  ;;  %v5119_v31 = vadd.f32 %v5045_v29, %v2231_v21  ;;  %v2252_v22 = vld [vmem:[#allocation2 + $0x1a0] sm:$0xff]  ;;  %v2254_v23 = vld [vmem:[#allocation2 + $0x1b0] sm:$0xff] }
 0x4ff   : > { %5180 = vst [vmem:[#allocation2 + $0xe0] sm:$0xff] %v5116_v26  ;;  %5182 = vst [vmem:[#allocation2 + $0xf0] sm:$0xff] %v5118_v27  ;;  %v2253_v28 = vld [vmem:[#allocation2 + $0x1a8] sm:$0xff]  ;;  %v2255_v29 = vld [vmem:[#allocation2 + $0x1b8] sm:$0xff] }
 0x500   : > { %5181 = vst [vmem:[#allocation2 + $0xe8] sm:$0xff] %v5117_v30  ;;  %5183 = vst [vmem:[#allocation2 + $0xf8] sm:$0xff] %v5119_v31 }
 0x502   : > { %v4597_v36 = vpop.f32.mrb[16].mxu0  ;;  %v5049_v37 = vpop.f32.mrb[16].mxu1 }
 0x503   : > { %v5120_v40 = vadd.f32 %v4597_v36, %v2232_v32  ;;  %v5122_v41 = vadd.f32 %v5049_v37, %v2234_v33  ;;  %v4599_v42 = vpop.f32.mrb[17].mxu0  ;;  %v5051_v43 = vpop.f32.mrb[17].mxu1 }
 0x504   : > { %v5121_v46 = vadd.f32 %v4599_v42, %v2233_v34  ;;  %v5123_v47 = vadd.f32 %v5051_v43, %v2235_v35  ;;  %v4601_v49 = vpop.f32.mrb[18].mxu0  ;;  %v5053_v50 = vpop.f32.mrb[18].mxu1  ;;  %v2257_v42 = vld [vmem:[#allocation2 + $0x1c8] sm:$0xff]  ;;  %v2259_v43 = vld [vmem:[#allocation2 + $0x1d8] sm:$0xff] }
 0x505   : > { %5184 = vst [vmem:[#allocation2 + $0x100] sm:$0xff] %v5120_v40  ;;  %5186 = vst [vmem:[#allocation2 + $0x110] sm:$0xff] %v5122_v41  ;;  %v5124_v51 = vadd.f32 %v4601_v49, %v2236_v38  ;;  %v5126_v52 = vadd.f32 %v5053_v50, %v2238_v39  ;;  %v4603_v53 = vpop.f32.mrb[19].mxu0  ;;  %v5055_v54 = vpop.f32.mrb[19].mxu1  ;;  %v2256_v40 = vld [vmem:[#allocation2 + $0x1c0] sm:$0xff]  ;;  %v2258_v41 = vld [vmem:[#allocation2 + $0x1d0] sm:$0xff] }
 0x506   : > { %5185 = vst [vmem:[#allocation2 + $0x108] sm:$0xff] %v5121_v46  ;;  %5187 = vst [vmem:[#allocation2 + $0x118] sm:$0xff] %v5123_v47  ;;  %v5125_v55 = vadd.f32 %v4603_v53, %v2237_v44  ;;  %v5127_v56 = vadd.f32 %v5055_v54, %v2239_v45  ;;  %v2260_v46 = vld [vmem:[#allocation2 + $0x1e0] sm:$0xff]  ;;  %v2262_v47 = vld [vmem:[#allocation2 + $0x1f0] sm:$0xff] }
 0x507   : > { %5188 = vst [vmem:[#allocation2 + $0x120] sm:$0xff] %v5124_v51  ;;  %5190 = vst [vmem:[#allocation2 + $0x130] sm:$0xff] %v5126_v52  ;;  %v2261_v53 = vld [vmem:[#allocation2 + $0x1e8] sm:$0xff]  ;;  %v2263_v54 = vld [vmem:[#allocation2 + $0x1f8] sm:$0xff] }
 0x508   : > { %5189 = vst [vmem:[#allocation2 + $0x128] sm:$0xff] %v5125_v55  ;;  %5191 = vst [vmem:[#allocation2 + $0x138] sm:$0xff] %v5127_v56 }
 0x50a   : > { %v4607_v61 = vpop.f32.mrb[20].mxu0  ;;  %v5059_v48 = vpop.f32.mrb[20].mxu1 }
 0x50b   : > { %v5128_v0 = vadd.f32 %v4607_v61, %v2240_v57  ;;  %v5130_v1 = vadd.f32 %v5059_v48, %v2242_v58  ;;  %v4609_v2 = vpop.f32.mrb[21].mxu0  ;;  %v5061_v3 = vpop.f32.mrb[21].mxu1 }
 0x50c   : > { %v5129_v6 = vadd.f32 %v4609_v2, %v2241_v59  ;;  %v5131_v7 = vadd.f32 %v5061_v3, %v2243_v60  ;;  %v4611_v8 = vpop.f32.mrb[22].mxu0  ;;  %v5063_v9 = vpop.f32.mrb[22].mxu1 }
 0x50d   : > { %5192 = vst [vmem:[#allocation2 + $0x140] sm:$0xff] %v5128_v0  ;;  %5194 = vst [vmem:[#allocation2 + $0x150] sm:$0xff] %v5130_v1  ;;  %v5132_v10 = vadd.f32 %v4611_v8, %v2244_v62  ;;  %v5134_v11 = vadd.f32 %v5063_v9, %v2246_v63  ;;  %v4613_v12 = vpop.f32.mrb[23].mxu0  ;;  %v5065_v13 = vpop.f32.mrb[23].mxu1 }
 0x50e   : > { %5193 = vst [vmem:[#allocation2 + $0x148] sm:$0xff] %v5129_v6  ;;  %5195 = vst [vmem:[#allocation2 + $0x158] sm:$0xff] %v5131_v7  ;;  %v5133_v14 = vadd.f32 %v4613_v12, %v2245_v4  ;;  %v5135_v15 = vadd.f32 %v5065_v13, %v2247_v5 }
 0x50f   : > { %5196 = vst [vmem:[#allocation2 + $0x160] sm:$0xff] %v5132_v10  ;;  %5198 = vst [vmem:[#allocation2 + $0x170] sm:$0xff] %v5134_v11 }
 0x510   : > { %5197 = vst [vmem:[#allocation2 + $0x168] sm:$0xff] %v5133_v14  ;;  %5199 = vst [vmem:[#allocation2 + $0x178] sm:$0xff] %v5135_v15 }
 0x512   : > { %v4617_v20 = vpop.f32.mrb[24].mxu0  ;;  %v5069_v21 = vpop.f32.mrb[24].mxu1 }
 0x513   : > { %v5136_v24 = vadd.f32 %v4617_v20, %v2248_v16  ;;  %v5138_v25 = vadd.f32 %v5069_v21, %v2250_v17  ;;  %v4619_v26 = vpop.f32.mrb[25].mxu0  ;;  %v5071_v27 = vpop.f32.mrb[25].mxu1 }
 0x514   : > { %v5137_v30 = vadd.f32 %v4619_v26, %v2249_v18  ;;  %v5139_v31 = vadd.f32 %v5071_v27, %v2251_v19  ;;  %v4621_v32 = vpop.f32.mrb[26].mxu0  ;;  %v5073_v33 = vpop.f32.mrb[26].mxu1 }
 0x515   : > { %5200 = vst [vmem:[#allocation2 + $0x180] sm:$0xff] %v5136_v24  ;;  %5202 = vst [vmem:[#allocation2 + $0x190] sm:$0xff] %v5138_v25  ;;  %v5140_v34 = vadd.f32 %v4621_v32, %v2252_v22  ;;  %v5142_v35 = vadd.f32 %v5073_v33, %v2254_v23  ;;  %v4623_v36 = vpop.f32.mrb[27].mxu0  ;;  %v5075_v37 = vpop.f32.mrb[27].mxu1 }
 0x516   : > { %5201 = vst [vmem:[#allocation2 + $0x188] sm:$0xff] %v5137_v30  ;;  %5203 = vst [vmem:[#allocation2 + $0x198] sm:$0xff] %v5139_v31  ;;  %v5141_v38 = vadd.f32 %v4623_v36, %v2253_v28  ;;  %v5143_v39 = vadd.f32 %v5075_v37, %v2255_v29 }
 0x517   : > { %5204 = vst [vmem:[#allocation2 + $0x1a0] sm:$0xff] %v5140_v34  ;;  %5206 = vst [vmem:[#allocation2 + $0x1b0] sm:$0xff] %v5142_v35 }
 0x518   : > { %5205 = vst [vmem:[#allocation2 + $0x1a8] sm:$0xff] %v5141_v38  ;;  %5207 = vst [vmem:[#allocation2 + $0x1b8] sm:$0xff] %v5143_v39 }
 0x51a   : > { %v4627_v44 = vpop.f32.mrb[28].mxu0  ;;  %v5079_v45 = vpop.f32.mrb[28].mxu1  ;;  %5219 = sbr.rel (%p11048_p5) target bundleno = 2671 (0xa6f), region = 76 }
 0x51b   : > { %v5144_v49 = vadd.f32 %v4627_v44, %v2256_v40  ;;  %v5146_v50 = vadd.f32 %v5079_v45, %v2258_v41  ;;  %v4629_v51 = vpop.f32.mrb[29].mxu0  ;;  %v5081_v52 = vpop.f32.mrb[29].mxu1 }
 0x51c   : > { %v5145_v55 = vadd.f32 %v4629_v51, %v2257_v42  ;;  %v5147_v56 = vadd.f32 %v5081_v52, %v2259_v43  ;;  %v4631_v57 = vpop.f32.mrb[30].mxu0  ;;  %v5083_v58 = vpop.f32.mrb[30].mxu1 }
 0x51d   : > { %5208 = vst [vmem:[#allocation2 + $0x1c0] sm:$0xff] %v5144_v49  ;;  %5210 = vst [vmem:[#allocation2 + $0x1d0] sm:$0xff] %v5146_v50  ;;  %v5148_v59 = vadd.f32 %v4631_v57, %v2260_v46  ;;  %v5150_v60 = vadd.f32 %v5083_v58, %v2262_v47  ;;  %v4633_v61 = vpop.f32.mrb[31].mxu0  ;;  %v5085_v48 = vpop.f32.mrb[31].mxu1 }
 0x51e   : > { %5209 = vst [vmem:[#allocation2 + $0x1c8] sm:$0xff] %v5145_v55  ;;  %5211 = vst [vmem:[#allocation2 + $0x1d8] sm:$0xff] %v5147_v56  ;;  %v5149_v62 = vadd.f32 %v4633_v61, %v2261_v53  ;;  %v5151_v63 = vadd.f32 %v5085_v48, %v2263_v54 }
 0x51f   : > { %5212 = vst [vmem:[#allocation2 + $0x1e0] sm:$0xff] %v5148_v59  ;;  %5214 = vst [vmem:[#allocation2 + $0x1f0] sm:$0xff] %v5150_v60 }
 0x520   : > { %5213 = vst [vmem:[#allocation2 + $0x1e8] sm:$0xff] %v5149_v62  ;;  %5215 = vst [vmem:[#allocation2 + $0x1f8] sm:$0xff] %v5151_v63 }
 0x521   : > { %v5286_v0 = vlaneseq  ;;  %v13406_v1 = vmov 0   ;;  %v5284_v3 = vld [vmem:[%s16210_s5] sm:$0xf]  ;;  %v5221_v4 = vld [vmem:[#allocation2 + $0x8] sm:$0xff]  ;;  %v5223_v10 = vld [vmem:[#allocation2 + $0x18] sm:$0xff]  ;;  %vm9433_vm1 = vcmask 261120  }
 0x522   : > { %5642 = vmatprep.mubr.bf16.mxu0 %v13406_v1  ;;  %5855 = vmatprep.mubr.bf16.mxu1 %v13406_v1  ;;  %v5225_v5 = vld [vmem:[#allocation2 + $0x28] sm:$0xff]  ;;  %v5227_v11 = vld [vmem:[#allocation2 + $0x38] sm:$0xff]  ;;  %v5220_v12 = vld [vmem:[#allocation2] sm:$0xff]  ;;  %vm10503_vm2 = vcmask 1043456   ;;  %vm10523_vm3 = vcmask 1041409  }
 0x523   : > { %v5287_v2 = vshrl.u32 %v5286_v0, 7  ;;  %v5224_v15 = vld [vmem:[#allocation2 + $0x20] sm:$0xff]  ;;  %v5222_v17 = vld [vmem:[#allocation2 + $0x10] sm:$0xff]  ;;  %v5229_v28 = vld [vmem:[#allocation2 + $0x48] sm:$0xff] }
 0x524   : > { %v5226_v18 = vld [vmem:[#allocation2 + $0x30] sm:$0xff]  ;;  %v5233_v29 = vld [vmem:[#allocation2 + $0x68] sm:$0xff]  ;;  %v5231_v34 = vld [vmem:[#allocation2 + $0x58] sm:$0xff] }
 0x525   : > { %v5292_v6 = vsub.s32 1, %v5287_v2  ;;  %v5300_v7 = vsub.s32 3, %v5287_v2  ;;  %v5288_v8 = vsub.s32 0, %v5287_v2  ;;  %v5296_v9 = vsub.s32 2, %v5287_v2  ;;  %v5235_v35 = vld [vmem:[#allocation2 + $0x78] sm:$0xff]  ;;  %v5228_v40 = vld [vmem:[#allocation2 + $0x40] sm:$0xff] }
 0x526   : > { %v5232_v41 = vld [vmem:[#allocation2 + $0x60] sm:$0xff]  ;;  %v5230_v46 = vld [vmem:[#allocation2 + $0x50] sm:$0xff]  ;;  %v5237_v53 = vld [vmem:[#allocation2 + $0x88] sm:$0xff] }
 0x527   : > { %v14251_v13 = vrot.slane %v5284_v3, %v5292_v6  ;;  %v14253_v14 = vrot.slane %v5284_v3, %v5300_v7  ;;  %v14255_v16 = vrot.slane %v5284_v3, %v5288_v8  ;;  %v14257_v19 = vrot.slane %v5284_v3, %v5296_v9  ;;  %v5234_v47 = vld [vmem:[#allocation2 + $0x70] sm:$0xff]  ;;  %v5241_v58 = vld [vmem:[#allocation2 + $0xa8] sm:$0xff]  ;;  %v5239_v62 = vld [vmem:[#allocation2 + $0x98] sm:$0xff] }
 0x528   : > { %v5243_v63 = vld [vmem:[#allocation2 + $0xb8] sm:$0xff]  ;;  %v5240_v6 = vld [vmem:[#allocation2 + $0xa0] sm:$0xff] }
 0x529   : > { %v5307_v20 = vadd.f32 %v14251_v13, %v5221_v4  ;;  %v5311_v21 = vadd.f32 %v14251_v13, %v5225_v5  ;;  %v5309_v22 = vadd.f32 %v14253_v14, %v5223_v10  ;;  %v5313_v23 = vadd.f32 %v14253_v14, %v5227_v11  ;;  %v5236_v5 = vld [vmem:[#allocation2 + $0x80] sm:$0xff]  ;;  %v5238_v11 = vld [vmem:[#allocation2 + $0x90] sm:$0xff] }
 0x52a   : > { %v5306_v24 = vadd.f32 %v14255_v16, %v5220_v12  ;;  %v5310_v25 = vadd.f32 %v14255_v16, %v5224_v15  ;;  %v5308_v26 = vadd.f32 %v14257_v19, %v5222_v17  ;;  %v5312_v27 = vadd.f32 %v14257_v19, %v5226_v18  ;;  %v5242_v12 = vld [vmem:[#allocation2 + $0xb0] sm:$0xff] }
 0x52b   : > { %v5371_v30 = vmax.f32 %v5307_v20, 0.0  ;;  %v5375_v31 = vmax.f32 %v5311_v21, 0.0  ;;  %v5373_v32 = vmax.f32 %v5309_v22, 0.0  ;;  %v5377_v33 = vmax.f32 %v5313_v23, 0.0  ;;  %v5245_v21 = vld [vmem:[#allocation2 + $0xc8] sm:$0xff] }
 0x52c   : > { %v5370_v36 = vmax.f32 %v5306_v24, 0.0  ;;  %v5374_v37 = vmax.f32 %v5310_v25, 0.0  ;;  %v5372_v38 = vmax.f32 %v5308_v26, 0.0  ;;  %v5376_v39 = vmax.f32 %v5312_v27, 0.0  ;;  %v5249_v26 = vld [vmem:[#allocation2 + $0xe8] sm:$0xff] }
 0x52d   : > { %v5435_v42 = vpack.c.bf16 %v5375_v31, %v5371_v30  ;;  %v5437_v43 = vpack.c.bf16 %v5377_v33, %v5373_v32  ;;  %v5315_v44 = vadd.f32 %v14251_v13, %v5229_v28  ;;  %v5319_v45 = vadd.f32 %v14251_v13, %v5233_v29  ;;  %v5247_v31 = vld [vmem:[#allocation2 + $0xd8] sm:$0xff]  ;;  %v5244_v33 = vld [vmem:[#allocation2 + $0xc0] sm:$0xff] }
 0x52e   : > { %v5434_v49 = vpack.c.bf16 %v5374_v37, %v5370_v36  ;;  %v5436_v50 = vpack.c.bf16 %v5376_v39, %v5372_v38  ;;  %v5317_v51 = vadd.f32 %v14253_v14, %v5231_v34  ;;  %v5321_v52 = vadd.f32 %v14253_v14, %v5235_v35  ;;  %v5251_v32 = vld [vmem:[#allocation2 + $0xf8] sm:$0xff]  ;;  %v5248_v38 = vld [vmem:[#allocation2 + $0xe0] sm:$0xff]  ;;  %v5246_v39 = vld [vmem:[#allocation2 + $0xd0] sm:$0xff] }
 0x52f   : > { %5610 = vmatprep.subr.bf16.mxu0 %v5435_v42  ;;  %5823 = vmatprep.subr.bf16.mxu1 %v5437_v43  ;;  %v5379_v54 = vmax.f32 %v5315_v44, 0.0  ;;  %v5383_v55 = vmax.f32 %v5319_v45, 0.0  ;;  %v5314_v56 = vadd.f32 %v14255_v16, %v5228_v40  ;;  %v5318_v57 = vadd.f32 %v14255_v16, %v5232_v41  ;;  %v5250_v40 = vld [vmem:[#allocation2 + $0xf0] sm:$0xff]  ;;  %v5253_v45 = vld [vmem:[#allocation2 + $0x108] sm:$0xff] }
 0x530   : > { %5611 = vmatpush1.bf16.msra.mxu0 %v5434_v49  ;;  %5824 = vmatpush1.bf16.msra.mxu1 %v5436_v50  ;;  %v5381_v59 = vmax.f32 %v5317_v51, 0.0  ;;  %v5385_v60 = vmax.f32 %v5321_v52, 0.0  ;;  %v5316_v61 = vadd.f32 %v14257_v19, %v5230_v46  ;;  %v5320_v48 = vadd.f32 %v14257_v19, %v5234_v47  ;;  %v5257_v46 = vld [vmem:[#allocation2 + $0x128] sm:$0xff]  ;;  %v5255_v52 = vld [vmem:[#allocation2 + $0x118] sm:$0xff] }
 0x531   : > { %v5439_v0 = vpack.c.bf16 %v5383_v55, %v5379_v54  ;;  %v5378_v2 = vmax.f32 %v5314_v56, 0.0  ;;  %v5382_v3 = vmax.f32 %v5318_v57, 0.0  ;;  %v5323_v4 = vadd.f32 %v14251_v13, %v5237_v53  ;;  %v5259_v53 = vld [vmem:[#allocation2 + $0x138] sm:$0xff] }
 0x532   : > { %v5441_v7 = vpack.c.bf16 %v5385_v60, %v5381_v59  ;;  %v5380_v8 = vmax.f32 %v5316_v61, 0.0  ;;  %v5384_v9 = vmax.f32 %v5320_v48, 0.0  ;;  %v5327_v10 = vadd.f32 %v14251_v13, %v5241_v58  ;;  %v5252_v58 = vld [vmem:[#allocation2 + $0x100] sm:$0xff] }
 0x533   : > { %5612 = vmatprep.subr.bf16.mxu0 %v5439_v0  ;;  %v5438_v15 = vpack.c.bf16 %v5382_v3, %v5378_v2  ;;  %v5387_v17 = vmax.f32 %v5323_v4, 0.0  ;;  %v5325_v18 = vadd.f32 %v14253_v14, %v5239_v62  ;;  %v5329_v20 = vadd.f32 %v14253_v14, %v5243_v63  ;;  %v5256_v59 = vld [vmem:[#allocation2 + $0x120] sm:$0xff]  ;;  %v5254_v63 = vld [vmem:[#allocation2 + $0x110] sm:$0xff] }
 0x534   : > { %5825 = vmatprep.subr.bf16.mxu1 %v5441_v7  ;;  %v5440_v22 = vpack.c.bf16 %v5384_v9, %v5380_v8  ;;  %v5391_v23 = vmax.f32 %v5327_v10, 0.0  ;;  %v5322_v24 = vadd.f32 %v14255_v16, %v5236_v5  ;;  %v5326_v25 = vadd.f32 %v14255_v16, %v5240_v6  ;;  %v5258_v0 = vld [vmem:[#allocation2 + $0x130] sm:$0xff]  ;;  %v5261_v6 = vld [vmem:[#allocation2 + $0x148] sm:$0xff] }
 0x535   : > { %5613 = vmatpush1.bf16.msra.mxu0 %v5438_v15  ;;  %v5389_v27 = vmax.f32 %v5325_v18, 0.0  ;;  %v5393_v28 = vmax.f32 %v5329_v20, 0.0  ;;  %v5324_v29 = vadd.f32 %v14257_v19, %v5238_v11  ;;  %v5328_v30 = vadd.f32 %v14257_v19, %v5242_v12  ;;  %v5265_v11 = vld [vmem:[#allocation2 + $0x168] sm:$0xff]  ;;  %v5263_v20 = vld [vmem:[#allocation2 + $0x158] sm:$0xff] }
 0x536   : > { %5826 = vmatpush1.bf16.msra.mxu1 %v5440_v22  ;;  %v5443_v34 = vpack.c.bf16 %v5391_v23, %v5387_v17  ;;  %v5386_v35 = vmax.f32 %v5322_v24, 0.0  ;;  %v5390_v36 = vmax.f32 %v5326_v25, 0.0  ;;  %v5331_v37 = vadd.f32 %v14251_v13, %v5245_v21  ;;  %v5267_v21 = vld [vmem:[#allocation2 + $0x178] sm:$0xff] }
 0x537   : > { %v5445_v41 = vpack.c.bf16 %v5393_v28, %v5389_v27  ;;  %v5388_v42 = vmax.f32 %v5324_v29, 0.0  ;;  %v5392_v43 = vmax.f32 %v5328_v30, 0.0  ;;  %v5335_v44 = vadd.f32 %v14251_v13, %v5249_v26  ;;  %v5260_v26 = vld [vmem:[#allocation2 + $0x140] sm:$0xff] }
 0x538   : > { %5614 = vmatprep.subr.bf16.mxu0 %v5443_v34  ;;  %v5442_v47 = vpack.c.bf16 %v5390_v36, %v5386_v35  ;;  %v5395_v49 = vmax.f32 %v5331_v37, 0.0  ;;  %v5333_v50 = vadd.f32 %v14253_v14, %v5247_v31  ;;  %v5337_v51 = vadd.f32 %v14253_v14, %v5251_v32  ;;  %v5264_v27 = vld [vmem:[#allocation2 + $0x160] sm:$0xff]  ;;  %v5262_v32 = vld [vmem:[#allocation2 + $0x150] sm:$0xff] }
 0x539   : > { %5827 = vmatprep.subr.bf16.mxu1 %v5445_v41  ;;  %v5444_v54 = vpack.c.bf16 %v5392_v43, %v5388_v42  ;;  %v5399_v55 = vmax.f32 %v5335_v44, 0.0  ;;  %v5330_v56 = vadd.f32 %v14255_v16, %v5244_v33  ;;  %v5334_v57 = vadd.f32 %v14255_v16, %v5248_v38  ;;  %v5266_v33 = vld [vmem:[#allocation2 + $0x170] sm:$0xff]  ;;  %v5269_v42 = vld [vmem:[#allocation2 + $0x188] sm:$0xff] }
 0x53a   : > { %5615 = vmatpush1.bf16.msra.mxu0 %v5442_v47  ;;  %v5397_v60 = vmax.f32 %v5333_v50, 0.0  ;;  %v5401_v61 = vmax.f32 %v5337_v51, 0.0  ;;  %v5332_v48 = vadd.f32 %v14257_v19, %v5246_v39  ;;  %v5336_v62 = vadd.f32 %v14257_v19, %v5250_v40  ;;  %v5273_v43 = vld [vmem:[#allocation2 + $0x1a8] sm:$0xff]  ;;  %v5275_v50 = vld [vmem:[#allocation2 + $0x1b8] sm:$0xff] }
 0x53b   : > { %5828 = vmatpush1.bf16.msra.mxu1 %v5444_v54  ;;  %v5447_v2 = vpack.c.bf16 %v5399_v55, %v5395_v49  ;;  %v5394_v3 = vmax.f32 %v5330_v56, 0.0  ;;  %v5398_v4 = vmax.f32 %v5334_v57, 0.0  ;;  %v5339_v5 = vadd.f32 %v14251_v13, %v5253_v45  ;;  %v5271_v49 = vld [vmem:[#allocation2 + $0x198] sm:$0xff]  ;;  %v5268_v55 = vld [vmem:[#allocation2 + $0x180] sm:$0xff] }
 0x53c   : > { %v5449_v7 = vpack.c.bf16 %v5401_v61, %v5397_v60  ;;  %v5396_v8 = vmax.f32 %v5332_v48, 0.0  ;;  %v5400_v9 = vmax.f32 %v5336_v62, 0.0  ;;  %v5343_v10 = vadd.f32 %v14251_v13, %v5257_v46  ;;  %v5272_v56 = vld [vmem:[#allocation2 + $0x1a0] sm:$0xff]  ;;  %v5270_v61 = vld [vmem:[#allocation2 + $0x190] sm:$0xff] }
 0x53d   : > { %5616 = vmatprep.subr.bf16.mxu0 %v5447_v2  ;;  %v5446_v12 = vpack.c.bf16 %v5398_v4, %v5394_v3  ;;  %v5403_v15 = vmax.f32 %v5339_v5, 0.0  ;;  %v5341_v17 = vadd.f32 %v14253_v14, %v5255_v52  ;;  %v5345_v18 = vadd.f32 %v14253_v14, %v5259_v53  ;;  %v5274_v48 = vld [vmem:[#allocation2 + $0x1b0] sm:$0xff] }
 0x53e   : > { %5829 = vmatprep.subr.bf16.mxu1 %v5449_v7  ;;  %v5448_v22 = vpack.c.bf16 %v5400_v9, %v5396_v8  ;;  %v5407_v23 = vmax.f32 %v5343_v10, 0.0  ;;  %v5338_v24 = vadd.f32 %v14255_v16, %v5252_v58  ;;  %v5342_v25 = vadd.f32 %v14255_v16, %v5256_v59  ;;  %v5277_v7 = vld [vmem:[#allocation2 + $0x1c8] sm:$0xff] }
 0x53f   : > { %5617 = vmatpush1.bf16.msra.mxu0 %v5446_v12  ;;  %v5405_v28 = vmax.f32 %v5341_v17, 0.0  ;;  %v5409_v29 = vmax.f32 %v5345_v18, 0.0  ;;  %v5340_v30 = vadd.f32 %v14257_v19, %v5254_v63  ;;  %v5344_v31 = vadd.f32 %v14257_v19, %v5258_v0  ;;  %v5281_v8 = vld [vmem:[#allocation2 + $0x1e8] sm:$0xff]  ;;  %v5283_v17 = vld [vmem:[#allocation2 + $0x1f8] sm:$0xff] }
 0x540   : > { %5830 = vmatpush1.bf16.msra.mxu1 %v5448_v22  ;;  %v5451_v34 = vpack.c.bf16 %v5407_v23, %v5403_v15  ;;  %v5402_v35 = vmax.f32 %v5338_v24, 0.0  ;;  %v5406_v36 = vmax.f32 %v5342_v25, 0.0  ;;  %v5347_v37 = vadd.f32 %v14251_v13, %v5261_v6  ;;  %v5279_v15 = vld [vmem:[#allocation2 + $0x1d8] sm:$0xff]  ;;  %v5276_v23 = vld [vmem:[#allocation2 + $0x1c0] sm:$0xff] }
 0x541   : > { %v5453_v38 = vpack.c.bf16 %v5409_v29, %v5405_v28  ;;  %v5404_v39 = vmax.f32 %v5340_v30, 0.0  ;;  %v5408_v40 = vmax.f32 %v5344_v31, 0.0  ;;  %v5351_v41 = vadd.f32 %v14251_v13, %v5265_v11  ;;  %v5280_v24 = vld [vmem:[#allocation2 + $0x1e0] sm:$0xff] }
 0x542   : > { %5618 = vmatprep.subr.bf16.mxu0 %v5451_v34  ;;  %v5450_v44 = vpack.c.bf16 %v5406_v36, %v5402_v35  ;;  %v5411_v45 = vmax.f32 %v5347_v37, 0.0  ;;  %v5349_v46 = vadd.f32 %v14253_v14, %v5263_v20  ;;  %v5353_v47 = vadd.f32 %v14253_v14, %v5267_v21  ;;  %v5282_v34 = vld [vmem:[#allocation2 + $0x1f0] sm:$0xff] }
 0x543   : > { %5831 = vmatprep.subr.bf16.mxu1 %v5453_v38  ;;  %v5452_v51 = vpack.c.bf16 %v5408_v40, %v5404_v39  ;;  %v5415_v52 = vmax.f32 %v5351_v41, 0.0  ;;  %v5346_v53 = vadd.f32 %v14255_v16, %v5260_v26  ;;  %v5350_v54 = vadd.f32 %v14255_v16, %v5264_v27 }
 0x544   : > { %5619 = vmatpush1.bf16.msra.mxu0 %v5450_v44  ;;  %v5413_v57 = vmax.f32 %v5349_v46, 0.0  ;;  %v5417_v58 = vmax.f32 %v5353_v47, 0.0  ;;  %v5348_v59 = vadd.f32 %v14257_v19, %v5262_v32  ;;  %v5352_v60 = vadd.f32 %v14257_v19, %v5266_v33  ;;  %v5278_v33 = vld [vmem:[#allocation2 + $0x1d0] sm:$0xff] }
 0x545   : > { %5832 = vmatpush1.bf16.msra.mxu1 %v5452_v51  ;;  %v5455_v62 = vpack.c.bf16 %v5415_v52, %v5411_v45  ;;  %v5410_v63 = vmax.f32 %v5346_v53, 0.0  ;;  %v5414_v0 = vmax.f32 %v5350_v54, 0.0  ;;  %v5355_v2 = vadd.f32 %v14251_v13, %v5269_v42 }
 0x546   : > { %v5457_v3 = vpack.c.bf16 %v5417_v58, %v5413_v57  ;;  %v5412_v4 = vmax.f32 %v5348_v59, 0.0  ;;  %v5416_v5 = vmax.f32 %v5352_v60, 0.0  ;;  %v5359_v6 = vadd.f32 %v14251_v13, %v5273_v43  ;;  %v12954_v57 = vld [vmem:[%s16212_s7 + $0xc0] sm:$0xff]  }
 0x547   : > { %5620 = vmatprep.subr.bf16.mxu0 %v5455_v62  ;;  %v5454_v9 = vpack.c.bf16 %v5414_v0, %v5410_v63  ;;  %v5419_v10 = vmax.f32 %v5355_v2, 0.0  ;;  %v5357_v11 = vadd.f32 %v14253_v14, %v5271_v49  ;;  %v5361_v12 = vadd.f32 %v14253_v14, %v5275_v50  ;;  %v12953_v59 = vld [vmem:[%s16212_s7] sm:$0xff]   ;;  %v12957_v62 = vld [vmem:[%s16212_s7 + $0x8] sm:$0xff]   ;;  %v12961_v2 = vld [vmem:[%s16212_s7 + $0x50] sm:$0xff]  }
 0x548   : > { %5833 = vmatprep.subr.bf16.mxu1 %v5457_v3  ;;  %v5456_v18 = vpack.c.bf16 %v5416_v5, %v5412_v4  ;;  %v5423_v20 = vmax.f32 %v5359_v6, 0.0  ;;  %v5354_v21 = vadd.f32 %v14255_v16, %v5268_v55  ;;  %v5358_v22 = vadd.f32 %v14255_v16, %v5272_v56  ;;  %v12955_v60 = vld [vmem:[%s16212_s7 + $0x80] sm:$0xff]   ;;  %v12941_v63 = vld [vmem:[%s16211_s6 + $0x8] sm:$0xff]   ;;  %v12963_v3 = vld [vmem:[%s16212_s7 + $0xd0] sm:$0xff]  }
 0x549   : > { %5621 = vmatpush1.bf16.msra.mxu0 %v5454_v9  ;;  %v5421_v25 = vmax.f32 %v5357_v11, 0.0  ;;  %v5425_v26 = vmax.f32 %v5361_v12, 0.0  ;;  %v5356_v27 = vadd.f32 %v14257_v19, %v5270_v61  ;;  %v5360_v28 = vadd.f32 %v14257_v19, %v5274_v48  ;;  %v12956_v61 = vld [vmem:[%s16212_s7 + $0x48] sm:$0xff]   ;;  %v12962_v4 = vld [vmem:[%s16212_s7 + $0x10] sm:$0xff]   ;;  %v12966_v6 = vld [vmem:[%s16212_s7 + $0x58] sm:$0xff]  }
 0x54a   : > { %5834 = vmatpush1.bf16.msra.mxu1 %v5456_v18  ;;  %v5459_v29 = vpack.c.bf16 %v5423_v20, %v5419_v10  ;;  %v5418_v30 = vmax.f32 %v5354_v21, 0.0  ;;  %v5422_v31 = vmax.f32 %v5358_v22, 0.0  ;;  %v5363_v32 = vadd.f32 %v14251_v13, %v5277_v7  ;;  %v12958_v48 = vld [vmem:[%s16212_s7 + $0xc8] sm:$0xff]   ;;  %v12964_v5 = vld [vmem:[%s16212_s7 + $0x90] sm:$0xff]   ;;  %v12968_v7 = vld [vmem:[%s16212_s7 + $0xd8] sm:$0xff]  }
 0x54b   : > { %v5461_v35 = vpack.c.bf16 %v5425_v26, %v5421_v25  ;;  %v5420_v36 = vmax.f32 %v5356_v27, 0.0  ;;  %v5424_v37 = vmax.f32 %v5360_v28, 0.0  ;;  %v5367_v38 = vadd.f32 %v14251_v13, %v5281_v8  ;;  %v12959_v0 = vld [vmem:[%s16212_s7 + $0x88] sm:$0xff]   ;;  %v12967_v8 = vld [vmem:[%s16212_s7 + $0x18] sm:$0xff]   ;;  %v12942_v9 = vld [vmem:[%s16211_s6 + $0x10] sm:$0xff]  }
 0x54c   : > { %5622 = vmatprep.subr.bf16.mxu0 %v5459_v29  ;;  %v5458_v39 = vpack.c.bf16 %v5422_v31, %v5418_v30  ;;  %v5427_v40 = vmax.f32 %v5363_v32, 0.0  ;;  %v5365_v41 = vadd.f32 %v14253_v14, %v5279_v15  ;;  %v5369_v42 = vadd.f32 %v14253_v14, %v5283_v17  ;;  %v12952_v14 = vld [vmem:[%s16212_s7 + $0x40] sm:$0xff]   ;;  %v12969_v10 = vld [vmem:[%s16212_s7 + $0x98] sm:$0xff]   ;;  %v12977_v18 = vld [vmem:[%s16212_s7 + $0x68] sm:$0xff]  }
 0x54d   : > { %5835 = vmatprep.subr.bf16.mxu1 %v5461_v35  ;;  %v5460_v43 = vpack.c.bf16 %v5424_v37, %v5420_v36  ;;  %v5431_v44 = vmax.f32 %v5367_v38, 0.0  ;;  %v5362_v45 = vadd.f32 %v14255_v16, %v5276_v23  ;;  %v5366_v46 = vadd.f32 %v14255_v16, %v5280_v24  ;;  %v12972_v11 = vld [vmem:[%s16212_s7 + $0x60] sm:$0xff]   ;;  %v12978_v20 = vld [vmem:[%s16212_s7 + $0xe8] sm:$0xff]   ;;  %v12982_v23 = vld [vmem:[%s16212_s7 + $0x70] sm:$0xff]  }
 0x54e   : > { %5623 = vmatpush1.bf16.msra.mxu0 %v5458_v39  ;;  %v5429_v47 = vmax.f32 %v5365_v41, 0.0  ;;  %v5433_v49 = vmax.f32 %v5369_v42, 0.0  ;;  %v5364_v50 = vadd.f32 %v14257_v19, %v5278_v33  ;;  %v5368_v13 = vadd.f32 %v14257_v19, %v5282_v34  ;;  %v12940_v19 = vld [vmem:[%s16211_s6] sm:$0xff]   ;;  %v12979_v21 = vld [vmem:[%s16212_s7 + $0x28] sm:$0xff]   ;;  %v12943_v24 = vld [vmem:[%s16211_s6 + $0x18] sm:$0xff]  }
 0x54f   : > { %5836 = vmatpush1.bf16.msra.mxu1 %v5460_v43  ;;  %v5463_v51 = vpack.c.bf16 %v5431_v44, %v5427_v40  ;;  %v5426_v52 = vmax.f32 %v5362_v45, 0.0  ;;  %v5430_v53 = vmax.f32 %v5366_v46, 0.0  ;;  %v12973_v12 = vld [vmem:[%s16212_s7 + $0x20] sm:$0xff]   ;;  %v12980_v22 = vld [vmem:[%s16212_s7 + $0xa8] sm:$0xff]   ;;  %v12983_v25 = vld [vmem:[%s16212_s7 + $0xf0] sm:$0xff]  }
 0x550   : > { %v5465_v54 = vpack.c.bf16 %v5433_v49, %v5429_v47  ;;  %v5428_v55 = vmax.f32 %v5364_v50, 0.0  ;;  %v5432_v56 = vmax.f32 %v5368_v13, 0.0  ;;  %v12974_v15 = vld [vmem:[%s16212_s7 + $0xe0] sm:$0xff]   ;;  %v12945_v27 = vld [vmem:[%s16211_s6 + $0x28] sm:$0xff]   ;;  %v12946_v28 = vld [vmem:[%s16211_s6 + $0x30] sm:$0xff]  }
 0x551   : > { %5624 = vmatprep.subr.bf16.mxu0 %v5463_v51  ;;  %v5462_v16 = vpack.c.bf16 %v5430_v53, %v5426_v52  ;;  %v12975_v17 = vld [vmem:[%s16212_s7 + $0xa0] sm:$0xff]   ;;  %v12947_v29 = vld [vmem:[%s16211_s6 + $0x38] sm:$0xff]   ;;  %v12949_v31 = vld [vmem:[%s16211_s6 + $0x48] sm:$0xff]  }
 0x552   : > { %5837 = vmatprep.subr.bf16.mxu1 %v5465_v54  ;;  %v5464_v58 = vpack.c.bf16 %v5432_v56, %v5428_v55  ;;  %v12944_v26 = vld [vmem:[%s16211_s6 + $0x20] sm:$0xff]   ;;  %v12950_v32 = vld [vmem:[%s16211_s6 + $0x50] sm:$0xff]   ;;  %v12951_v33 = vld [vmem:[%s16211_s6 + $0x58] sm:$0xff]  }
 0x553   : > { %5625 = vmatpush1.bf16.msra.mxu0 %v5462_v16  ;;  %v12948_v30 = vld [vmem:[%s16211_s6 + $0x40] sm:$0xff]   ;;  %v12984_v34 = vld [vmem:[%s16212_s7 + $0x30] sm:$0xff]   ;;  %v12986_v36 = vld [vmem:[%s16212_s7 + $0x78] sm:$0xff]  }
 0x554   : > { %5838 = vmatpush1.bf16.msra.mxu1 %v5464_v58  ;;  %11473 = vmatprep.subr.bf16.mxu0 %v12952_v14  ;;  %v12985_v35 = vld [vmem:[%s16212_s7 + $0xb0] sm:$0xff]   ;;  %v12987_v37 = vld [vmem:[%s16212_s7 + $0xf8] sm:$0xff]   ;;  %v12960_v40 = vld [vmem:[%s16211_s6 + $0x60] sm:$0xff]  }
 0x555   : > { %11501 = vmatprep.subr.bf16.mxu1 %v12954_v57  ;;  %v12988_v38 = vld [vmem:[%s16212_s7 + $0x38] sm:$0xff]   ;;  %v12965_v41 = vld [vmem:[%s16211_s6 + $0x68] sm:$0xff]   ;;  %v12970_v42 = vld [vmem:[%s16211_s6 + $0x70] sm:$0xff]  }
 0x556   : > { %5643 = vmatmul.mubr.bf16.vlgmr.msra.gmra.mrb[0].mxu0 %v12940_v19  ;;  %v12989_v39 = vld [vmem:[%s16212_s7 + $0xb8] sm:$0xff]   ;;  %v12976_v44 = vld [vmem:[%s16211_s6 + $0x80] sm:$0xff]   ;;  %v12981_v45 = vld [vmem:[%s16211_s6 + $0x88] sm:$0xff]  }
 0x557   : > { %5856 = vmatmul.mubr.bf16.vlgmr.msra.gmra.mrb[0].mxu1 %v12940_v19  ;;  %5652 = vmatprep.mubr.bf16.mxu0 %v13406_v1  ;;  %v12971_v43 = vld [vmem:[%s16211_s6 + $0x78] sm:$0xff]   ;;  %v12990_v46 = vld [vmem:[%s16212_s7 + $0x140] sm:$0xff]   ;;  %v12994_v19 = vld [vmem:[%s16212_s7 + $0x148] sm:$0xff]  }
 0x558   : > { %5865 = vmatprep.mubr.bf16.mxu1 %v13406_v1  ;;  %11474 = vmatpush3.bf16.msra.mxu0 %v12953_v59  ;;  %v12991_v47 = vld [vmem:[%s16212_s7 + $0x1c0] sm:$0xff]   ;;  %v12995_v59 = vld [vmem:[%s16212_s7 + $0x1c8] sm:$0xff]  }
 0x559   : > { %11502 = vmatpush3.bf16.msra.mxu1 %v12955_v60  ;;  %11475 = vmatprep.subr.bf16.mxu0 %v12956_v61  ;;  %v12992_v16 = vld [vmem:[%s16212_s7 + $0x100] sm:$0xff]   ;;  %v12996_v61 = vld [vmem:[%s16212_s7 + $0x108] sm:$0xff]  }
 0x55a   : > { %11503 = vmatprep.subr.bf16.mxu1 %v12958_v48  ;;  %v12993_v58 = vld [vmem:[%s16212_s7 + $0x180] sm:$0xff]  }
 0x55c   : > { %11476 = vmatpush3.bf16.msra.mxu0 %v12957_v62 }
 0x55d   : > { %11504 = vmatpush3.bf16.msra.mxu1 %v12959_v0  ;;  %11477 = vmatprep.subr.bf16.mxu0 %v12961_v2  ;;  %v12998_v0 = vld [vmem:[%s16212_s7 + $0x150] sm:$0xff]  }
 0x55e   : > { %5653 = vmatmul.mubr.bf16.gmra.mrb[4].mxu0 %v12941_v63  ;;  %11505 = vmatprep.subr.bf16.mxu1 %v12963_v3 }
 0x55f   : > { %5866 = vmatmul.mubr.bf16.gmra.mrb[4].mxu1 %v12941_v63  ;;  %5662 = vmatprep.mubr.bf16.mxu0 %v13406_v1  ;;  %v12997_v63 = vld [vmem:[%s16212_s7 + $0x188] sm:$0xff]  }
 0x560   : > { %5875 = vmatprep.mubr.bf16.mxu1 %v13406_v1  ;;  %11478 = vmatpush3.bf16.msra.mxu0 %v12962_v4  ;;  %v12999_v4 = vld [vmem:[%s16212_s7 + $0x1d0] sm:$0xff]  }
 0x561   : > { %11506 = vmatpush3.bf16.msra.mxu1 %v12964_v5  ;;  %11479 = vmatprep.subr.bf16.mxu0 %v12966_v6 }
 0x562   : > { %11507 = vmatprep.subr.bf16.mxu1 %v12968_v7 }
 0x564   : > { %11480 = vmatpush3.bf16.msra.mxu0 %v12967_v8 }
 0x565   : > { %11508 = vmatpush3.bf16.msra.mxu1 %v12969_v10  ;;  %11481 = vmatprep.subr.bf16.mxu0 %v12972_v11  ;;  %v13000_v11 = vld [vmem:[%s16212_s7 + $0x110] sm:$0xff]  }
 0x566   : > { %5663 = vmatmul.mubr.bf16.gmra.mrb[8].mxu0 %v12942_v9  ;;  %11509 = vmatprep.subr.bf16.mxu1 %v12974_v15  ;;  %v13001_v15 = vld [vmem:[%s16212_s7 + $0x190] sm:$0xff]  }
 0x567   : > { %5876 = vmatmul.mubr.bf16.gmra.mrb[8].mxu1 %v12942_v9  ;;  %5672 = vmatprep.mubr.bf16.mxu0 %v13406_v1 }
 0x568   : > { %5885 = vmatprep.mubr.bf16.mxu1 %v13406_v1  ;;  %11482 = vmatpush3.bf16.msra.mxu0 %v12973_v12 }
 0x569   : > { %11510 = vmatpush3.bf16.msra.mxu1 %v12975_v17  ;;  %11483 = vmatprep.subr.bf16.mxu0 %v12977_v18  ;;  %v13002_v17 = vld [vmem:[%s16212_s7 + $0x158] sm:$0xff]  }
 0x56a   : > { %11511 = vmatprep.subr.bf16.mxu1 %v12978_v20  ;;  %v13003_v18 = vld [vmem:[%s16212_s7 + $0x1d8] sm:$0xff]  }
 0x56c   : > { %11484 = vmatpush3.bf16.msra.mxu0 %v12979_v21  ;;  %v13004_v21 = vld [vmem:[%s16212_s7 + $0x118] sm:$0xff]  }
 0x56d   : > { %11512 = vmatpush3.bf16.msra.mxu1 %v12980_v22  ;;  %11485 = vmatprep.subr.bf16.mxu0 %v12982_v23 }
 0x56e   : > { %5673 = vmatmul.mubr.bf16.gmra.mrb[12].mxu0 %v12943_v24  ;;  %11513 = vmatprep.subr.bf16.mxu1 %v12983_v25  ;;  %v13006_v25 = vld [vmem:[%s16212_s7 + $0x160] sm:$0xff]  }
 0x56f   : > { %5886 = vmatmul.mubr.bf16.gmra.mrb[12].mxu1 %v12943_v24  ;;  %5682 = vmatprep.mubr.bf16.mxu0 %v13406_v1  ;;  %v13005_v24 = vld [vmem:[%s16212_s7 + $0x198] sm:$0xff]  }
 0x570   : > { %5895 = vmatprep.mubr.bf16.mxu1 %v13406_v1  ;;  %11486 = vmatpush3.bf16.msra.mxu0 %v12984_v34  ;;  %v13010_v34 = vld [vmem:[%s16212_s7 + $0x168] sm:$0xff]  }
 0x571   : > { %11514 = vmatpush3.bf16.msra.mxu1 %v12985_v35  ;;  %11487 = vmatprep.subr.bf16.mxu0 %v12986_v36 }
 0x572   : > { %11515 = vmatprep.subr.bf16.mxu1 %v12987_v37 }
 0x574   : > { %11488 = vmatpush3.bf16.msra.mxu0 %v12988_v38  ;;  %v13011_v38 = vld [vmem:[%s16212_s7 + $0x1e8] sm:$0xff]  }
 0x575   : > { %11516 = vmatpush3.bf16.msra.mxu1 %v12989_v39  ;;  %11529 = vmatprep.subr.bf16.mxu0 %v12990_v46 }
 0x576   : > { %5683 = vmatmul.mubr.bf16.gmra.mrb[16].mxu0 %v12944_v26  ;;  %11557 = vmatprep.subr.bf16.mxu1 %v12991_v47 }
 0x577   : > { %5896 = vmatmul.mubr.bf16.gmra.mrb[16].mxu1 %v12944_v26  ;;  %5692 = vmatprep.mubr.bf16.mxu0 %v13406_v1 }
 0x578   : > { %5905 = vmatprep.mubr.bf16.mxu1 %v13406_v1 }
 0x57e   : > { %5693 = vmatmul.mubr.bf16.gmra.mrb[20].mxu0 %v12945_v27 }
 0x57f   : > { %5906 = vmatmul.mubr.bf16.gmra.mrb[20].mxu1 %v12945_v27  ;;  %5702 = vmatprep.mubr.bf16.mxu0 %v13406_v1 }
 0x580   : > { %5915 = vmatprep.mubr.bf16.mxu1 %v13406_v1 }
 0x586   : > { %5703 = vmatmul.mubr.bf16.gmra.mrb[24].mxu0 %v12946_v28 }
 0x587   : > { %5916 = vmatmul.mubr.bf16.gmra.mrb[24].mxu1 %v12946_v28  ;;  %5712 = vmatprep.mubr.bf16.mxu0 %v13406_v1  ;;  %v13007_v28 = vld [vmem:[%s16212_s7 + $0x1e0] sm:$0xff]  }
 0x588   : > { %5925 = vmatprep.mubr.bf16.mxu1 %v13406_v1 }
 0x58e   : > { %5713 = vmatmul.mubr.bf16.gmra.mrb[28].mxu0 %v12947_v29 }
 0x58f   : > { %5926 = vmatmul.mubr.bf16.gmra.mrb[28].mxu1 %v12947_v29  ;;  %5722 = vmatprep.mubr.bf16.mxu0 %v13406_v1  ;;  %v13008_v29 = vld [vmem:[%s16212_s7 + $0x120] sm:$0xff]  }
 0x590   : > { %5935 = vmatprep.mubr.bf16.mxu1 %v13406_v1 }
 0x596   : > { %5723 = vmatmul.mubr.bf16.gmra.mrb[32].mxu0 %v12948_v30 }
 0x597   : > { %5936 = vmatmul.mubr.bf16.gmra.mrb[32].mxu1 %v12948_v30  ;;  %5732 = vmatprep.mubr.bf16.mxu0 %v13406_v1 }
 0x598   : > { %5945 = vmatprep.mubr.bf16.mxu1 %v13406_v1 }
 0x59e   : > { %5733 = vmatmul.mubr.bf16.gmra.mrb[36].mxu0 %v12949_v31 }
 0x59f   : > { %5946 = vmatmul.mubr.bf16.gmra.mrb[36].mxu1 %v12949_v31  ;;  %5742 = vmatprep.mubr.bf16.mxu0 %v13406_v1 }
 0x5a0   : > { %5955 = vmatprep.mubr.bf16.mxu1 %v13406_v1 }
 0x5a6   : > { %5743 = vmatmul.mubr.bf16.gmra.mrb[40].mxu0 %v12950_v32 }
 0x5a7   : > { %5956 = vmatmul.mubr.bf16.gmra.mrb[40].mxu1 %v12950_v32  ;;  %5752 = vmatprep.mubr.bf16.mxu0 %v13406_v1 }
 0x5a8   : > { %5965 = vmatprep.mubr.bf16.mxu1 %v13406_v1 }
 0x5ae   : > { %5753 = vmatmul.mubr.bf16.gmra.mrb[44].mxu0 %v12951_v33 }
 0x5af   : > { %5966 = vmatmul.mubr.bf16.gmra.mrb[44].mxu1 %v12951_v33  ;;  %5762 = vmatprep.mubr.bf16.mxu0 %v13406_v1  ;;  %v13009_v33 = vld [vmem:[%s16212_s7 + $0x1a0] sm:$0xff]  }
 0x5b0   : > { %5975 = vmatprep.mubr.bf16.mxu1 %v13406_v1 }
 0x5b6   : > { %5763 = vmatmul.mubr.bf16.gmra.mrb[48].mxu0 %v12960_v40 }
 0x5b7   : > { %5976 = vmatmul.mubr.bf16.gmra.mrb[48].mxu1 %v12960_v40  ;;  %5772 = vmatprep.mubr.bf16.mxu0 %v13406_v1 }
 0x5b8   : > { %5985 = vmatprep.mubr.bf16.mxu1 %v13406_v1 }
 0x5be   : > { %5773 = vmatmul.mubr.bf16.gmra.mrb[52].mxu0 %v12965_v41 }
 0x5bf   : > { %5986 = vmatmul.mubr.bf16.gmra.mrb[52].mxu1 %v12965_v41  ;;  %5782 = vmatprep.mubr.bf16.mxu0 %v13406_v1  ;;  %v13012_v41 = vld [vmem:[%s16212_s7 + $0x128] sm:$0xff]  }
 0x5c0   : > { %5995 = vmatprep.mubr.bf16.mxu1 %v13406_v1 }
 0x5c6   : > { %5783 = vmatmul.mubr.bf16.gmra.mrb[56].mxu0 %v12970_v42 }
 0x5c7   : > { %5996 = vmatmul.mubr.bf16.gmra.mrb[56].mxu1 %v12970_v42  ;;  %5792 = vmatprep.mubr.bf16.mxu0 %v13406_v1 }
 0x5c8   : > { %6005 = vmatprep.mubr.bf16.mxu1 %v13406_v1 }
 0x5ce   : > { %5793 = vmatmul.mubr.bf16.gmra.mrb[60].mxu0 %v12971_v43 }
 0x5cf   : > { %6006 = vmatmul.mubr.bf16.gmra.mrb[60].mxu1 %v12971_v43  ;;  %5802 = vmatprep.mubr.bf16.mxu0 %v13406_v1 }
 0x5d0   : > { %6015 = vmatprep.mubr.bf16.mxu1 %v13406_v1 }
 0x5d6   : > { %5803 = vmatmul.mubr.bf16.gmra.mrb[64].mxu0 %v12976_v44 }
 0x5d7   : > { %6016 = vmatmul.mubr.bf16.gmra.mrb[64].mxu1 %v12976_v44  ;;  %5812 = vmatprep.mubr.bf16.mxu0 %v13406_v1  ;;  %v13013_v44 = vld [vmem:[%s16212_s7 + $0x1a8] sm:$0xff]  }
 0x5d8   : > { %6025 = vmatprep.mubr.bf16.mxu1 %v13406_v1 }
 0x5de   : > { %5813 = vmatmul.mubr.bf16.gmra.mrb[68].mxu0 %v12981_v45 }
 0x5df   : > { %6026 = vmatmul.mubr.bf16.gmra.mrb[68].mxu1 %v12981_v45  ;;  %v13014_v45 = vld [vmem:[%s16212_s7 + $0x170] sm:$0xff]  }
 0x629   : > { %v5644_v49 = vpop.f32.mrb[0].mxu0 }
 0x62a   : > { %v5857_v50 = vpop.f32.mrb[0].mxu1  ;;  %v5646_v13 = vpop.f32.mrb[1].mxu0 }
 0x62b   : > { %v5859_v1 = vpop.f32.mrb[1].mxu1  ;;  %v5648_v51 = vpop.f32.mrb[2].mxu0 }
 0x62c   : > { %v6036_v52 = vpack.c.bf16 %v5648_v51, %v5644_v49  ;;  %v5861_v53 = vpop.f32.mrb[2].mxu1  ;;  %v5650_v14 = vpop.f32.mrb[3].mxu0  ;;  %v13015_v49 = vld [vmem:[%s16212_s7 + $0x1f0] sm:$0xff]  }
 0x62d   : > { %v6038_v54 = vpack.c.bf16 %v5861_v53, %v5857_v50  ;;  %v6037_v55 = vpack.c.bf16 %v5650_v14, %v5646_v13  ;;  %v5863_v56 = vpop.f32.mrb[3].mxu1  ;;  %v13016_v50 = vld [vmem:[%s16212_s7 + $0x130] sm:$0xff]   ;;  %v13018_v53 = vld [vmem:[%s16212_s7 + $0x178] sm:$0xff]  }
 0x62e   : > { %v6039_v57 = vpack.c.bf16 %v5863_v56, %v5859_v1  ;;  %v13019_v56 = vld [vmem:[%s16212_s7 + $0x1f8] sm:$0xff]  }
 0x62f   : > { %8451 = vmatprep.mubr.bf16.mxu0 %v6037_v55 }
 0x630   : > { %8500 = vmatprep.mubr.bf16.mxu1 %v6039_v57  ;;  %8452 = vmatmul.mubr.bf16.vlgmr.msra.gmra.mrb[72].mxu0 %v6036_v52  ;;  %v13017_v52 = vld [vmem:[%s16212_s7 + $0x1b0] sm:$0xff]   ;;  %v13020_v57 = vld [vmem:[%s16212_s7 + $0x138] sm:$0xff]  }
 0x631   : > { %8501 = vmatmul.mubr.bf16.vlgmr.msra.gmra.mrb[72].mxu1 %v6038_v54  ;;  %v14525_v60 = vpop.f32.mrb[4].mxu0  ;;  %11530 = vmatpush3.bf16.msra.mxu0 %v12992_v16 }
 0x632   : > { %v14530_v48 = vpop.f32.mrb[4].mxu1  ;;  %v14532_v62 = vpop.f32.mrb[5].mxu0  ;;  %11558 = vmatpush3.bf16.msra.mxu1 %v12993_v58  ;;  %11531 = vmatprep.subr.bf16.mxu0 %v12994_v19  ;;  %v13021_v19 = vld [vmem:[%s16212_s7 + $0x1b8] sm:$0xff]  }
 0x633   : > { %v14540_v2 = vpop.f32.mrb[5].mxu1  ;;  %v14542_v3 = vpop.f32.mrb[6].mxu0  ;;  %11559 = vmatprep.subr.bf16.mxu1 %v12995_v59  ;;  %v13022_v59 = vld [vmem:[%s16212_s7 + $0x240] sm:$0xff]  }
 0x634   : > { %v14549_v6 = vpop.f32.mrb[6].mxu1  ;;  %v14551_v7 = vpop.f32.mrb[7].mxu0 }
 0x635   : > { %v14557_v10 = vpop.f32.mrb[7].mxu1  ;;  %11532 = vmatpush3.bf16.msra.mxu0 %v12996_v61 }
 0x636   : > { %11560 = vmatpush3.bf16.msra.mxu1 %v12997_v63  ;;  %11533 = vmatprep.subr.bf16.mxu0 %v12998_v0 }
 0x637   : > { %11561 = vmatprep.subr.bf16.mxu1 %v12999_v4 }
 0x639   : > { %v14573_v20 = vpop.f32.mrb[8].mxu0  ;;  %11534 = vmatpush3.bf16.msra.mxu0 %v13000_v11  ;;  %v13023_v11 = vld [vmem:[%s16212_s7 + $0x2c0] sm:$0xff]  }
 0x63a   : > { %v14578_v22 = vpop.f32.mrb[8].mxu1  ;;  %v14580_v23 = vpop.f32.mrb[9].mxu0  ;;  %11562 = vmatpush3.bf16.msra.mxu1 %v13001_v15  ;;  %11535 = vmatprep.subr.bf16.mxu0 %v13002_v17 }
 0x63b   : > { %v14588_v26 = vpop.f32.mrb[9].mxu1  ;;  %v14590_v27 = vpop.f32.mrb[10].mxu0  ;;  %11563 = vmatprep.subr.bf16.mxu1 %v13003_v18 }
 0x63c   : > { %v14600_v31 = vpop.f32.mrb[10].mxu1  ;;  %v14602_v32 = vpop.f32.mrb[11].mxu0 }
 0x63d   : > { %v14614_v37 = vpop.f32.mrb[11].mxu1  ;;  %11536 = vmatpush3.bf16.msra.mxu0 %v13004_v21 }
 0x63e   : > { %11564 = vmatpush3.bf16.msra.mxu1 %v13005_v24  ;;  %11537 = vmatprep.subr.bf16.mxu0 %v13006_v25 }
 0x63f   : > { %11565 = vmatprep.subr.bf16.mxu1 %v13007_v28 }
 0x641   : > { %v14621_v40 = vpop.f32.mrb[12].mxu0  ;;  %11538 = vmatpush3.bf16.msra.mxu0 %v13008_v29 }
 0x642   : > { %v14626_v42 = vpop.f32.mrb[12].mxu1  ;;  %v14628_v43 = vpop.f32.mrb[13].mxu0  ;;  %11566 = vmatpush3.bf16.msra.mxu1 %v13009_v33  ;;  %11539 = vmatprep.subr.bf16.mxu0 %v13010_v34 }
 0x643   : > { %v14636_v46 = vpop.f32.mrb[13].mxu1  ;;  %v14638_v47 = vpop.f32.mrb[14].mxu0  ;;  %11567 = vmatprep.subr.bf16.mxu1 %v13011_v38 }
 0x644   : > { %v14648_v1 = vpop.f32.mrb[14].mxu1  ;;  %v14650_v51 = vpop.f32.mrb[15].mxu0 }
 0x645   : > { %v14662_v55 = vpop.f32.mrb[15].mxu1  ;;  %11540 = vmatpush3.bf16.msra.mxu0 %v13012_v41 }
 0x646   : > { %11568 = vmatpush3.bf16.msra.mxu1 %v13013_v44  ;;  %11541 = vmatprep.subr.bf16.mxu0 %v13014_v45 }
 0x647   : > { %11569 = vmatprep.subr.bf16.mxu1 %v13015_v49 }
 0x649   : > { %v14672_v58 = vpop.f32.mrb[16].mxu0  ;;  %11542 = vmatpush3.bf16.msra.mxu0 %v13016_v50 }
 0x64a   : > { %v14680_v61 = vpop.f32.mrb[16].mxu1  ;;  %v14682_v63 = vpop.f32.mrb[17].mxu0  ;;  %11570 = vmatpush3.bf16.msra.mxu1 %v13017_v52  ;;  %11543 = vmatprep.subr.bf16.mxu0 %v13018_v53 }
 0x64b   : > { %v14684_v0 = vpop.f32.mrb[17].mxu1  ;;  %v14686_v4 = vpop.f32.mrb[18].mxu0  ;;  %11571 = vmatprep.subr.bf16.mxu1 %v13019_v56 }
 0x64c   : > { %v14693_v17 = vpop.f32.mrb[18].mxu1  ;;  %v14695_v18 = vpop.f32.mrb[19].mxu0 }
 0x64d   : > { %v14701_v25 = vpop.f32.mrb[19].mxu1  ;;  %11544 = vmatpush3.bf16.msra.mxu0 %v13020_v57 }
 0x64e   : > { %11572 = vmatpush3.bf16.msra.mxu1 %v13021_v19  ;;  %11585 = vmatprep.subr.bf16.mxu0 %v13022_v59 }
 0x64f   : > { %11613 = vmatprep.subr.bf16.mxu1 %v13023_v11 }
 0x651   : > { %v14705_v29 = vpop.f32.mrb[20].mxu0 }
 0x652   : > { %16256 = vst [vmem:[#allocation9_spill] sm:$0xff] %v14705_v29  ;;  %v14707_v33 = vpop.f32.mrb[20].mxu1  ;;  %v14709_v34 = vpop.f32.mrb[21].mxu0  ;;  %v13060_v29 = vld [vmem:[%s16212_s7 + $0x308] sm:$0xff]  }
 0x653   : > { %16257 = vst [vmem:[#allocation10_spill] sm:$0xff] %v14707_v33  ;;  %v14711_v38 = vpop.f32.mrb[21].mxu1  ;;  %v14713_v41 = vpop.f32.mrb[22].mxu0 }
 0x654   : > { %16258 = vst [vmem:[#allocation11_spill] sm:$0xff] %v14713_v41  ;;  %v14717_v45 = vpop.f32.mrb[22].mxu1  ;;  %v14719_v49 = vpop.f32.mrb[23].mxu0 }
 0x655   : > { %16259 = vst [vmem:[#allocation12_spill] sm:$0xff] %v14717_v45  ;;  %v14725_v53 = vpop.f32.mrb[23].mxu1  ;;  %v13059_v45 = vld [vmem:[%s16212_s7 + $0x3c8] sm:$0xff]  }
 0x659   : > { %v14729_v57 = vpop.f32.mrb[24].mxu0 }
 0x65a   : > { %16260 = vst [vmem:[#allocation13_spill] sm:$0xff] %v14729_v57  ;;  %v14731_v19 = vpop.f32.mrb[24].mxu1  ;;  %v14733_v59 = vpop.f32.mrb[25].mxu0 }
 0x65b   : > { %16261 = vst [vmem:[#allocation14_spill] sm:$0xff] %v14731_v19  ;;  %16262 = vst [vmem:[#allocation15_spill] sm:$0xff] %v14733_v59  ;;  %v14735_v11 = vpop.f32.mrb[25].mxu1  ;;  %v14737_v44 = vpop.f32.mrb[26].mxu0 }
 0x65c   : > { %16263 = vst [vmem:[#allocation16_spill] sm:$0xff] %v14735_v11  ;;  %16264 = vst [vmem:[#allocation17_spill] sm:$0xff] %v14737_v44  ;;  %v14741_v21 = vpop.f32.mrb[26].mxu1  ;;  %v14743_v52 = vpop.f32.mrb[27].mxu0 }
 0x65d   : > { %16265 = vst [vmem:[#allocation18_spill] sm:$0xff] %v14741_v21  ;;  %16266 = vst [vmem:[#allocation19_spill] sm:$0xff] %v14743_v52  ;;  %v14749_v28 = vpop.f32.mrb[27].mxu1 }
 0x65e   : > { %16267 = vst [vmem:[#allocation20_spill] sm:$0xff] %v14749_v28 }
 0x661   : > { %v14753_v14 = vpop.f32.mrb[28].mxu0 }
 0x662   : > { %16268 = vst [vmem:[#allocation21_spill] sm:$0xff] %v14753_v14  ;;  %v14755_v13 = vpop.f32.mrb[28].mxu1  ;;  %v14757_v50 = vpop.f32.mrb[29].mxu0 }
 0x663   : > { %16269 = vst [vmem:[#allocation22_spill] sm:$0xff] %v14755_v13  ;;  %16270 = vst [vmem:[#allocation23_spill] sm:$0xff] %v14757_v50  ;;  %v14759_v16 = vpop.f32.mrb[29].mxu1  ;;  %v14761_v54 = vpop.f32.mrb[30].mxu0 }
 0x664   : > { %16271 = vst [vmem:[#allocation24_spill] sm:$0xff] %v14759_v16  ;;  %16272 = vst [vmem:[#allocation25_spill] sm:$0xff] %v14761_v54  ;;  %v14765_v35 = vpop.f32.mrb[30].mxu1  ;;  %v14767_v15 = vpop.f32.mrb[31].mxu0 }
 0x665   : > { %16273 = vst [vmem:[#allocation26_spill] sm:$0xff] %v14765_v35  ;;  %16274 = vst [vmem:[#allocation27_spill] sm:$0xff] %v14767_v15  ;;  %v14773_v39 = vpop.f32.mrb[31].mxu1  ;;  %v16284_v35 = vpack.c.bf16 %v14551_v7, %v14532_v62  ;;  %v13026_v7 = vld [vmem:[%s16212_s7 + $0x248] sm:$0xff]  }
 0x666   : > { %16275 = vst [vmem:[#allocation28_spill] sm:$0xff] %v14773_v39 }
 0x669   : > { %v14777_v8 = vpop.f32.mrb[32].mxu0 }
 0x66a   : > { %16276 = vst [vmem:[#allocation29_spill] sm:$0xff] %v14777_v8  ;;  %v14779_v5 = vpop.f32.mrb[32].mxu1  ;;  %v14781_v56 = vpop.f32.mrb[33].mxu0 }
 0x66b   : > { %16277 = vst [vmem:[#allocation30_spill] sm:$0xff] %v14779_v5  ;;  %16278 = vst [vmem:[#allocation31_spill] sm:$0xff] %v14781_v56  ;;  %v14783_v12 = vpop.f32.mrb[33].mxu1  ;;  %v14785_v9 = vpop.f32.mrb[34].mxu0  ;;  %v16285_v5 = vpack.c.bf16 %v14557_v10, %v14540_v2  ;;  %v13027_v10 = vld [vmem:[%s16212_s7 + $0x2c8] sm:$0xff]   ;;  %v13053_v56 = vld [vmem:[%s16212_s7 + $0x2b8] sm:$0xff]  }
 0x66c   : > { %16279 = vst [vmem:[#allocation32_spill] sm:$0xff] %v14783_v12  ;;  %16280 = vst [vmem:[#allocation33_spill] sm:$0xff] %v14785_v9  ;;  %v14789_v13 = vpop.f32.mrb[34].mxu1  ;;  %v14791_v30 = vpop.f32.mrb[35].mxu0 }
 0x66d   : > { %16281 = vst [vmem:[#allocation34_spill] sm:$0xff] %v14789_v13  ;;  %16282 = vst [vmem:[#allocation35_spill] sm:$0xff] %v14791_v30  ;;  %v14797_v14 = vpop.f32.mrb[35].mxu1 }
 0x66e   : > { %16283 = vst [vmem:[#allocation36_spill] sm:$0xff] %v14797_v14  ;;  %v13051_v14 = vld [vmem:[%s16212_s7 + $0x2f8] sm:$0xff]  }
 0x671   : > { %v5734_v16 = vpop.f32.mrb[36].mxu0 }
 0x672   : > { %v5947_v39 = vpop.f32.mrb[36].mxu1  ;;  %v5736_v50 = vpop.f32.mrb[37].mxu0 }
 0x673   : > { %v5949_v15 = vpop.f32.mrb[37].mxu1  ;;  %v5738_v24 = vpop.f32.mrb[38].mxu0 }
 0x674   : > { %v6072_v8 = vpack.c.bf16 %v5738_v24, %v5734_v16  ;;  %v5951_v9 = vpop.f32.mrb[38].mxu1  ;;  %v5740_v19 = vpop.f32.mrb[39].mxu0 }
 0x675   : > { %v6074_v21 = vpack.c.bf16 %v5951_v9, %v5947_v39  ;;  %v6073_v57 = vpack.c.bf16 %v5740_v19, %v5736_v50  ;;  %v5953_v44 = vpop.f32.mrb[39].mxu1  ;;  %v13024_v9 = vld [vmem:[%s16212_s7 + $0x200] sm:$0xff]   ;;  %v16286_v50 = vpack.c.bf16 %v14542_v3, %v14525_v60  ;;  %v16287_v19 = vpack.c.bf16 %v14549_v6, %v14530_v48  ;;  %v13031_v60 = vld [vmem:[%s16212_s7 + $0x2d0] sm:$0xff]  }
 0x676   : > { %v6075_v36 = vpack.c.bf16 %v5953_v44, %v5949_v15 }
 0x677   : > { %8459 = vmatprep.mubr.bf16.mxu0 %v6073_v57  ;;  %v13029_v57 = vld [vmem:[%s16212_s7 + $0x288] sm:$0xff]  }
 0x678   : > { %8508 = vmatprep.mubr.bf16.mxu1 %v6075_v36  ;;  %8460 = vmatmul.mubr.bf16.gmra.mrb[76].mxu0 %v6072_v8  ;;  %v13025_v8 = vld [vmem:[%s16212_s7 + $0x280] sm:$0xff]  }
 0x679   : > { %8509 = vmatmul.mubr.bf16.gmra.mrb[76].mxu1 %v6074_v21  ;;  %8549 = vmatprep.mubr.bf16.mxu0 %v16284_v35  ;;  %v5744_v54 = vpop.f32.mrb[40].mxu0 }
 0x67a   : > { %8598 = vmatprep.mubr.bf16.mxu1 %v16285_v5  ;;  %v5957_v16 = vpop.f32.mrb[40].mxu1  ;;  %v5746_v24 = vpop.f32.mrb[41].mxu0 }
 0x67b   : > { %v5959_v39 = vpop.f32.mrb[41].mxu1  ;;  %v5748_v15 = vpop.f32.mrb[42].mxu0 }
 0x67c   : > { %v6076_v36 = vpack.c.bf16 %v5748_v15, %v5744_v54  ;;  %v5961_v62 = vpop.f32.mrb[42].mxu1  ;;  %v5750_v2 = vpop.f32.mrb[43].mxu0  ;;  %v13028_v54 = vld [vmem:[%s16212_s7 + $0x208] sm:$0xff]  }
 0x67d   : > { %v6078_v5 = vpack.c.bf16 %v5961_v62, %v5957_v16  ;;  %v6077_v35 = vpack.c.bf16 %v5750_v2, %v5746_v24  ;;  %v5963_v21 = vpop.f32.mrb[43].mxu1  ;;  %v13030_v16 = vld [vmem:[%s16212_s7 + $0x250] sm:$0xff]   ;;  %v13034_v2 = vld [vmem:[%s16212_s7 + $0x258] sm:$0xff]  }
 0x67e   : > { %v6079_v44 = vpack.c.bf16 %v5963_v21, %v5959_v39 }
 0x680   : > { %8550 = vmatmul.mubr.bf16.vlgmr.msra.gmra.mrb[80].mxu0 %v16286_v50  ;;  %v13035_v50 = vld [vmem:[%s16212_s7 + $0x2d8] sm:$0xff]  }
 0x681   : > { %8599 = vmatmul.mubr.bf16.vlgmr.msra.gmra.mrb[80].mxu1 %v16287_v19  ;;  %11586 = vmatpush3.bf16.msra.mxu0 %v13024_v9  ;;  %v14837_v3 = vpop.f32.mrb[44].mxu0  ;;  %v13032_v9 = vld [vmem:[%s16212_s7 + $0x210] sm:$0xff]   ;;  %v13038_v19 = vld [vmem:[%s16212_s7 + $0x260] sm:$0xff]  }
 0x682   : > { %11614 = vmatpush3.bf16.msra.mxu1 %v13025_v8  ;;  %11587 = vmatprep.subr.bf16.mxu0 %v13026_v7  ;;  %v14839_v24 = vpop.f32.mrb[44].mxu1  ;;  %v14841_v39 = vpop.f32.mrb[45].mxu0  ;;  %v13033_v7 = vld [vmem:[%s16212_s7 + $0x290] sm:$0xff]  }
 0x683   : > { %11615 = vmatprep.subr.bf16.mxu1 %v13027_v10  ;;  %8557 = vmatprep.mubr.bf16.mxu0 %v6077_v35  ;;  %v14843_v48 = vpop.f32.mrb[45].mxu1  ;;  %v14845_v6 = vpop.f32.mrb[46].mxu0 }
 0x684   : > { %8606 = vmatprep.mubr.bf16.mxu1 %v6079_v44  ;;  %v14852_v8 = vpop.f32.mrb[46].mxu1  ;;  %v14854_v62 = vpop.f32.mrb[47].mxu0 }
 0x685   : > { %11588 = vmatpush3.bf16.msra.mxu0 %v13028_v54  ;;  %v14866_v21 = vpop.f32.mrb[47].mxu1  ;;  %v13036_v54 = vld [vmem:[%s16212_s7 + $0x218] sm:$0xff]  }
 0x686   : > { %11616 = vmatpush3.bf16.msra.mxu1 %v13029_v57  ;;  %11589 = vmatprep.subr.bf16.mxu0 %v13030_v16  ;;  %v13037_v57 = vld [vmem:[%s16212_s7 + $0x298] sm:$0xff]  }
 0x687   : > { %11617 = vmatprep.subr.bf16.mxu1 %v13031_v60 }
 0x688   : > { %8558 = vmatmul.mubr.bf16.gmra.mrb[84].mxu0 %v6076_v36  ;;  %v16288_v36 = vpack.c.bf16 %v14602_v32, %v14580_v23 }
 0x689   : > { %8607 = vmatmul.mubr.bf16.gmra.mrb[84].mxu1 %v6078_v5  ;;  %11590 = vmatpush3.bf16.msra.mxu0 %v13032_v9  ;;  %v14882_v16 = vpop.f32.mrb[48].mxu0  ;;  %v16289_v5 = vpack.c.bf16 %v14614_v37, %v14588_v26  ;;  %v13039_v9 = vld [vmem:[%s16212_s7 + $0x2e0] sm:$0xff]   ;;  %v13043_v37 = vld [vmem:[%s16212_s7 + $0x2e8] sm:$0xff]  }
 0x68a   : > { %11618 = vmatpush3.bf16.msra.mxu1 %v13033_v7  ;;  %8647 = vmatprep.mubr.bf16.mxu0 %v16288_v36  ;;  %v14887_v60 = vpop.f32.mrb[48].mxu1  ;;  %v14889_v10 = vpop.f32.mrb[49].mxu0  ;;  %v13040_v26 = vld [vmem:[%s16212_s7 + $0x220] sm:$0xff]  }
 0x68b   : > { %8696 = vmatprep.mubr.bf16.mxu1 %v16289_v5  ;;  %11591 = vmatprep.subr.bf16.mxu0 %v13034_v2  ;;  %v14897_v15 = vpop.f32.mrb[49].mxu1  ;;  %v14899_v7 = vpop.f32.mrb[50].mxu0  ;;  %v13045_v2 = vld [vmem:[%s16212_s7 + $0x2a8] sm:$0xff]  }
 0x68c   : > { %11619 = vmatprep.subr.bf16.mxu1 %v13035_v50  ;;  %v14903_v32 = vpop.f32.mrb[50].mxu1  ;;  %v14905_v36 = vpop.f32.mrb[51].mxu0  ;;  %v13041_v50 = vld [vmem:[%s16212_s7 + $0x2a0] sm:$0xff]  }
 0x68d   : > { %11592 = vmatpush3.bf16.msra.mxu0 %v13036_v54  ;;  %v14914_v5 = vpop.f32.mrb[51].mxu1  ;;  %v13042_v54 = vld [vmem:[%s16212_s7 + $0x268] sm:$0xff]  }
 0x68e   : > { %11620 = vmatpush3.bf16.msra.mxu1 %v13037_v57  ;;  %11593 = vmatprep.subr.bf16.mxu0 %v13038_v19  ;;  %v13044_v57 = vld [vmem:[%s16212_s7 + $0x228] sm:$0xff]  }
 0x68f   : > { %11621 = vmatprep.subr.bf16.mxu1 %v13039_v9  ;;  %v13046_v9 = vld [vmem:[%s16212_s7 + $0x270] sm:$0xff]  }
 0x691   : > { %11594 = vmatpush3.bf16.msra.mxu0 %v13040_v26  ;;  %v14930_v19 = vpop.f32.mrb[52].mxu0  ;;  %v13047_v26 = vld [vmem:[%s16212_s7 + $0x2f0] sm:$0xff]  }
 0x692   : > { %11622 = vmatpush3.bf16.msra.mxu1 %v13041_v50  ;;  %11595 = vmatprep.subr.bf16.mxu0 %v13042_v54  ;;  %v14938_v23 = vpop.f32.mrb[52].mxu1  ;;  %v14940_v44 = vpop.f32.mrb[53].mxu0  ;;  %v13049_v54 = vld [vmem:[%s16212_s7 + $0x2b0] sm:$0xff]  }
 0x693   : > { %11623 = vmatprep.subr.bf16.mxu1 %v13043_v37  ;;  %v14945_v35 = vpop.f32.mrb[53].mxu1  ;;  %v14947_v50 = vpop.f32.mrb[54].mxu0  ;;  %v13048_v37 = vld [vmem:[%s16212_s7 + $0x230] sm:$0xff]  }
 0x694   : > { %v14951_v13 = vpop.f32.mrb[54].mxu1  ;;  %v14953_v12 = vpop.f32.mrb[55].mxu0 }
 0x695   : > { %11596 = vmatpush3.bf16.msra.mxu0 %v13044_v57  ;;  %v14962_v30 = vpop.f32.mrb[55].mxu1  ;;  %v13050_v57 = vld [vmem:[%s16212_s7 + $0x278] sm:$0xff]  }
 0x696   : > { %11624 = vmatpush3.bf16.msra.mxu1 %v13045_v2  ;;  %11597 = vmatprep.subr.bf16.mxu0 %v13046_v9  ;;  %v13052_v2 = vld [vmem:[%s16212_s7 + $0x238] sm:$0xff]  }
 0x697   : > { %11625 = vmatprep.subr.bf16.mxu1 %v13047_v26  ;;  %v13054_v26 = vld [vmem:[%s16212_s7 + $0x340] sm:$0xff]  }
 0x699   : > { %11598 = vmatpush3.bf16.msra.mxu0 %v13048_v37  ;;  %v14978_v9 = vpop.f32.mrb[56].mxu0  ;;  %v13055_v37 = vld [vmem:[%s16212_s7 + $0x3c0] sm:$0xff]  }
 0x69a   : > { %16290 = vst [vmem:[#allocation37_spill] sm:$0xff] %v14978_v9  ;;  %11626 = vmatpush3.bf16.msra.mxu1 %v13049_v54  ;;  %11599 = vmatprep.subr.bf16.mxu0 %v13050_v57  ;;  %v14986_v11 = vpop.f32.mrb[56].mxu1  ;;  %v14988_v28 = vpop.f32.mrb[57].mxu0  ;;  %v13057_v57 = vld [vmem:[%s16212_s7 + $0x380] sm:$0xff]  }
 0x69b   : > { %16291 = vst [vmem:[#allocation38_spill] sm:$0xff] %v14986_v11  ;;  %11627 = vmatprep.subr.bf16.mxu1 %v13051_v14  ;;  %v14993_v59 = vpop.f32.mrb[57].mxu1  ;;  %v14995_v54 = vpop.f32.mrb[58].mxu0  ;;  %v13056_v14 = vld [vmem:[%s16212_s7 + $0x300] sm:$0xff]  }
 0x69c   : > { %v14999_v52 = vpop.f32.mrb[58].mxu1  ;;  %v15001_v33 = vpop.f32.mrb[59].mxu0 }
 0x69d   : > { %11600 = vmatpush3.bf16.msra.mxu0 %v13052_v2  ;;  %v15010_v41 = vpop.f32.mrb[59].mxu1  ;;  %v13058_v2 = vld [vmem:[%s16212_s7 + $0x348] sm:$0xff]  }
 0x69e   : > { %11628 = vmatpush3.bf16.msra.mxu1 %v13053_v56  ;;  %11641 = vmatprep.subr.bf16.mxu0 %v13054_v26  ;;  %v16292_v56 = vpack.c.bf16 %v14590_v27, %v14573_v20  ;;  %v16293_v26 = vpack.c.bf16 %v14600_v31, %v14578_v22  ;;  %v13062_v20 = vld [vmem:[%s16212_s7 + $0x350] sm:$0xff]   ;;  %v16294_v31 = vpack.c.bf16 %v14854_v62, %v14841_v39 }
 0x69f   : > { %11669 = vmatprep.subr.bf16.mxu1 %v13055_v37  ;;  %v13061_v37 = vld [vmem:[%s16212_s7 + $0x388] sm:$0xff]   ;;  %v13064_v39 = vld [vmem:[%s16212_s7 + $0x310] sm:$0xff]   ;;  %v16296_v62 = vpack.c.bf16 %v14845_v6, %v14837_v3  ;;  %v13069_v3 = vld [vmem:[%s16212_s7 + $0x398] sm:$0xff]  }
 0x6a0   : > { %8648 = vmatmul.mubr.bf16.vlgmr.msra.gmra.mrb[88].mxu0 %v16292_v56  ;;  %v16295_v56 = vpack.c.bf16 %v14866_v21, %v14843_v48  ;;  %v13065_v21 = vld [vmem:[%s16212_s7 + $0x390] sm:$0xff]  }
 0x6a1   : > { %8697 = vmatmul.mubr.bf16.vlgmr.msra.gmra.mrb[88].mxu1 %v16293_v26  ;;  %11642 = vmatpush3.bf16.msra.mxu0 %v13056_v14  ;;  %v15032_v11 = vpop.f32.mrb[60].mxu0 }
 0x6a2   : > { %11670 = vmatpush3.bf16.msra.mxu1 %v13057_v57  ;;  %11643 = vmatprep.subr.bf16.mxu0 %v13058_v2  ;;  %v15040_v27 = vpop.f32.mrb[60].mxu1  ;;  %v15042_v22 = vpop.f32.mrb[61].mxu0  ;;  %v13063_v57 = vld [vmem:[%s16212_s7 + $0x3d0] sm:$0xff]  }
 0x6a3   : > { %11671 = vmatprep.subr.bf16.mxu1 %v13059_v45  ;;  %8655 = vmatprep.mubr.bf16.mxu0 %v16294_v31  ;;  %v15050_v14 = vpop.f32.mrb[61].mxu1  ;;  %v15052_v2 = vpop.f32.mrb[62].mxu0 }
 0x6a4   : > { %8704 = vmatprep.mubr.bf16.mxu1 %v16295_v56  ;;  %v15059_v45 = vpop.f32.mrb[62].mxu1  ;;  %v15061_v9 = vpop.f32.mrb[63].mxu0  ;;  %v13066_v56 = vld [vmem:[%s16212_s7 + $0x358] sm:$0xff]  }
 0x6a5   : > { %11644 = vmatpush3.bf16.msra.mxu0 %v13060_v29  ;;  %v15070_v48 = vpop.f32.mrb[63].mxu1  ;;  %v16299_v29 = vpack.c.bf16 %v14650_v51, %v14628_v43  ;;  %v13071_v43 = vld [vmem:[%s16212_s7 + $0x3e0] sm:$0xff]  }
 0x6a6   : > { %11672 = vmatpush3.bf16.msra.mxu1 %v13061_v37  ;;  %11645 = vmatprep.subr.bf16.mxu0 %v13062_v20  ;;  %v13067_v37 = vld [vmem:[%s16212_s7 + $0x3d8] sm:$0xff]   ;;  %v16297_v20 = vpack.c.bf16 %v14852_v8, %v14839_v24  ;;  %v13070_v24 = vld [vmem:[%s16212_s7 + $0x360] sm:$0xff]  }
 0x6a7   : > { %11673 = vmatprep.subr.bf16.mxu1 %v13063_v57  ;;  %v13068_v57 = vld [vmem:[%s16212_s7 + $0x318] sm:$0xff]  }
 0x6a8   : > { %8656 = vmatmul.mubr.bf16.gmra.mrb[92].mxu0 %v16296_v62 }
 0x6a9   : > { %8705 = vmatmul.mubr.bf16.gmra.mrb[92].mxu1 %v16297_v20  ;;  %11646 = vmatpush3.bf16.msra.mxu0 %v13064_v39  ;;  %v15092_v26 = vpop.f32.mrb[64].mxu0  ;;  %v16301_v39 = vpack.c.bf16 %v14662_v55, %v14636_v46  ;;  %v13072_v46 = vld [vmem:[%s16212_s7 + $0x320] sm:$0xff]   ;;  %v13075_v55 = vld [vmem:[%s16212_s7 + $0x3e8] sm:$0xff]  }
 0x6aa   : > { %16298 = vst [vmem:[#allocation39_spill] sm:$0xff] %v15092_v26  ;;  %8745 = vmatprep.mubr.bf16.mxu0 %v16299_v29  ;;  %11674 = vmatpush3.bf16.msra.mxu1 %v13065_v21  ;;  %v15103_v6 = vpop.f32.mrb[64].mxu1  ;;  %v15105_v8 = vpop.f32.mrb[65].mxu0 }
 0x6ab   : > { %16300 = vst [vmem:[#allocation40_spill] sm:$0xff] %v15103_v6  ;;  %8794 = vmatprep.mubr.bf16.mxu1 %v16301_v39  ;;  %11647 = vmatprep.subr.bf16.mxu0 %v13066_v56  ;;  %v15113_v51 = vpop.f32.mrb[65].mxu1  ;;  %v15115_v62 = vpop.f32.mrb[66].mxu0  ;;  %v13077_v56 = vld [vmem:[%s16212_s7 + $0x3a8] sm:$0xff]  }
 0x6ac   : > { %16302 = vst [vmem:[#allocation41_spill] sm:$0xff] %v15113_v51  ;;  %16303 = vst [vmem:[#allocation42_spill] sm:$0xff] %v15115_v62  ;;  %11675 = vmatprep.subr.bf16.mxu1 %v13067_v37  ;;  %v15119_v29 = vpop.f32.mrb[66].mxu1  ;;  %v15121_v20 = vpop.f32.mrb[67].mxu0  ;;  %v13073_v37 = vld [vmem:[%s16212_s7 + $0x3a0] sm:$0xff]   ;;  %v13083_v62 = vld [vmem:[%s16212_s7 + $0x3f8] sm:$0xff]  }
 0x6ad   : > { %16304 = vst [vmem:[#allocation43_spill] sm:$0xff] %v15119_v29  ;;  %11648 = vmatpush3.bf16.msra.mxu0 %v13068_v57  ;;  %v15130_v39 = vpop.f32.mrb[67].mxu1  ;;  %v13074_v57 = vld [vmem:[%s16212_s7 + $0x368] sm:$0xff]  }
 0x6ae   : > { %16305 = vst [vmem:[#allocation44_spill] sm:$0xff] %v15130_v39  ;;  %11676 = vmatpush3.bf16.msra.mxu1 %v13069_v3  ;;  %11649 = vmatprep.subr.bf16.mxu0 %v13070_v24  ;;  %v13076_v3 = vld [vmem:[%s16212_s7 + $0x328] sm:$0xff]  }
 0x6af   : > { %11677 = vmatprep.subr.bf16.mxu1 %v13071_v43  ;;  %v13078_v43 = vld [vmem:[%s16212_s7 + $0x370] sm:$0xff]  }
 0x6b1   : > { %11650 = vmatpush3.bf16.msra.mxu0 %v13072_v46  ;;  %v15146_v24 = vpop.f32.mrb[68].mxu0  ;;  %v13079_v46 = vld [vmem:[%s16212_s7 + $0x3f0] sm:$0xff]  }
 0x6b2   : > { %16306 = vst [vmem:[#allocation45_spill] sm:$0xff] %v15146_v24  ;;  %11678 = vmatpush3.bf16.msra.mxu1 %v13073_v37  ;;  %11651 = vmatprep.subr.bf16.mxu0 %v13074_v57  ;;  %v15154_v21 = vpop.f32.mrb[68].mxu1  ;;  %v15156_v31 = vpop.f32.mrb[69].mxu0  ;;  %v13081_v57 = vld [vmem:[%s16212_s7 + $0x3b0] sm:$0xff]   ;;  %v13086_v24 = vld [vmem:[%s16212_s7 + $0x440] sm:$0xff]  }
 0x6b3   : > { %11679 = vmatprep.subr.bf16.mxu1 %v13075_v55  ;;  %v15161_v6 = vpop.f32.mrb[69].mxu1  ;;  %v15163_v37 = vpop.f32.mrb[70].mxu0  ;;  %v13080_v55 = vld [vmem:[%s16212_s7 + $0x330] sm:$0xff]  }
 0x6b4   : > { %v15167_v29 = vpop.f32.mrb[70].mxu1  ;;  %v15169_v26 = vpop.f32.mrb[71].mxu0 }
 0x6b5   : > { %11652 = vmatpush3.bf16.msra.mxu0 %v13076_v3  ;;  %v6105_v51 = vpack.c.bf16 %v15169_v26, %v15156_v31  ;;  %v15178_v39 = vpop.f32.mrb[71].mxu1  ;;  %v13082_v3 = vld [vmem:[%s16212_s7 + $0x378] sm:$0xff]  }
 0x6b6   : > { %11680 = vmatpush3.bf16.msra.mxu1 %v13077_v56  ;;  %11653 = vmatprep.subr.bf16.mxu0 %v13078_v43  ;;  %v13084_v56 = vld [vmem:[%s16212_s7 + $0x338] sm:$0xff]  }
 0x6b7   : > { %11681 = vmatprep.subr.bf16.mxu1 %v13079_v46  ;;  %v13085_v43 = vld [vmem:[%s16212_s7 + $0x3b8] sm:$0xff]   ;;  %v13087_v46 = vld [vmem:[%s16212_s7 + $0x4c0] sm:$0xff]  }
 0x6b9   : > { %11654 = vmatpush3.bf16.msra.mxu0 %v13080_v55  ;;  %v13088_v55 = vld [vmem:[%s16212_s7 + $0x400] sm:$0xff]  }
 0x6ba   : > { %11682 = vmatpush3.bf16.msra.mxu1 %v13081_v57  ;;  %11655 = vmatprep.subr.bf16.mxu0 %v13082_v3  ;;  %v13089_v57 = vld [vmem:[%s16212_s7 + $0x480] sm:$0xff]   ;;  %v13090_v3 = vld [vmem:[%s16212_s7 + $0x448] sm:$0xff]  }
 0x6bb   : > { %11683 = vmatprep.subr.bf16.mxu1 %v13083_v62  ;;  %v13091_v62 = vld [vmem:[%s16212_s7 + $0x4c8] sm:$0xff]  }
 0x6bd   : > { %11656 = vmatpush3.bf16.msra.mxu0 %v13084_v56  ;;  %v16307_v56 = vpack.c.bf16 %v14638_v47, %v14621_v40  ;;  %v13094_v40 = vld [vmem:[%s16212_s7 + $0x450] sm:$0xff]  }
 0x6be   : > { %11684 = vmatpush3.bf16.msra.mxu1 %v13085_v43  ;;  %11697 = vmatprep.subr.bf16.mxu0 %v13086_v24  ;;  %v16308_v24 = vpack.c.bf16 %v14648_v1, %v14626_v42  ;;  %v13092_v43 = vld [vmem:[%s16212_s7 + $0x408] sm:$0xff]   ;;  %v16309_v42 = vpack.c.bf16 %v14905_v36, %v14889_v10  ;;  %v13095_v47 = vld [vmem:[%s16212_s7 + $0x4d0] sm:$0xff]   ;;  %v16310_v1 = vpack.c.bf16 %v14914_v5, %v14897_v15  ;;  %v13098_v36 = vld [vmem:[%s16212_s7 + $0x458] sm:$0xff]  }
 0x6bf   : > { %11725 = vmatprep.subr.bf16.mxu1 %v13087_v46  ;;  %v13093_v46 = vld [vmem:[%s16212_s7 + $0x488] sm:$0xff]   ;;  %v13097_v10 = vld [vmem:[%s16212_s7 + $0x490] sm:$0xff]   ;;  %v16311_v15 = vpack.c.bf16 %v14899_v7, %v14882_v16  ;;  %v13099_v5 = vld [vmem:[%s16212_s7 + $0x4d8] sm:$0xff]  }
 0x6c0   : > { %8746 = vmatmul.mubr.bf16.vlgmr.msra.gmra.mrb[96].mxu0 %v16307_v56  ;;  %v13101_v16 = vld [vmem:[%s16212_s7 + $0x498] sm:$0xff]   ;;  %v13102_v7 = vld [vmem:[%s16212_s7 + $0x460] sm:$0xff]   ;;  %v13108_v56 = vld [vmem:[%s16212_s7 + $0x428] sm:$0xff]  }
 0x6c1   : > { %8795 = vmatmul.mubr.bf16.vlgmr.msra.gmra.mrb[96].mxu1 %v16308_v24  ;;  %11698 = vmatpush3.bf16.msra.mxu0 %v13088_v55  ;;  %v13096_v55 = vld [vmem:[%s16212_s7 + $0x410] sm:$0xff]   ;;  %v13109_v24 = vld [vmem:[%s16212_s7 + $0x4a8] sm:$0xff]  }
 0x6c2   : > { %11726 = vmatpush3.bf16.msra.mxu1 %v13089_v57  ;;  %11699 = vmatprep.subr.bf16.mxu0 %v13090_v3  ;;  %v16312_v57 = vpack.c.bf16 %v14903_v32, %v14887_v60  ;;  %v13100_v3 = vld [vmem:[%s16212_s7 + $0x418] sm:$0xff]   ;;  %v16314_v60 = vpack.c.bf16 %v14701_v25, %v14684_v0  ;;  %v13103_v32 = vld [vmem:[%s16212_s7 + $0x4e0] sm:$0xff]   ;;  %v13106_v0 = vld [vmem:[%s16212_s7 + $0x468] sm:$0xff]  }
 0x6c3   : > { %11727 = vmatprep.subr.bf16.mxu1 %v13091_v62  ;;  %8753 = vmatprep.mubr.bf16.mxu0 %v16309_v42  ;;  %v16313_v62 = vpack.c.bf16 %v14695_v18, %v14682_v63  ;;  %v13104_v63 = vld [vmem:[%s16212_s7 + $0x420] sm:$0xff]   ;;  %v13107_v25 = vld [vmem:[%s16212_s7 + $0x4e8] sm:$0xff]   ;;  %v13113_v42 = vld [vmem:[%s16212_s7 + $0x4b0] sm:$0xff]  }
 0x6c4   : > { %8802 = vmatprep.mubr.bf16.mxu1 %v16310_v1  ;;  %v13105_v18 = vld [vmem:[%s16212_s7 + $0x4a0] sm:$0xff]   ;;  %v13115_v1 = vld [vmem:[%s16212_s7 + $0x4f8] sm:$0xff]  }
 0x6c5   : > { %11700 = vmatpush3.bf16.msra.mxu0 %v13092_v43  ;;  %v13110_v43 = vld [vmem:[%s16212_s7 + $0x470] sm:$0xff]  }
 0x6c6   : > { %11728 = vmatpush3.bf16.msra.mxu1 %v13093_v46  ;;  %11701 = vmatprep.subr.bf16.mxu0 %v13094_v40  ;;  %v13111_v46 = vld [vmem:[%s16212_s7 + $0x4f0] sm:$0xff]  }
 0x6c7   : > { %11729 = vmatprep.subr.bf16.mxu1 %v13095_v47  ;;  %v13112_v40 = vld [vmem:[%s16212_s7 + $0x430] sm:$0xff]   ;;  %v13114_v47 = vld [vmem:[%s16212_s7 + $0x478] sm:$0xff]  }
 0x6c8   : > { %8754 = vmatmul.mubr.bf16.gmra.mrb[100].mxu0 %v16311_v15  ;;  %v13119_v15 = vld [vmem:[%s16212_s7 + $0x5c0] sm:$0xff]  }
 0x6c9   : > { %8803 = vmatmul.mubr.bf16.gmra.mrb[100].mxu1 %v16312_v57  ;;  %11702 = vmatpush3.bf16.msra.mxu0 %v13096_v55  ;;  %v13116_v55 = vld [vmem:[%s16212_s7 + $0x438] sm:$0xff]   ;;  %v13121_v57 = vld [vmem:[%s16212_s7 + $0x580] sm:$0xff]  }
 0x6ca   : > { %8843 = vmatprep.mubr.bf16.mxu0 %v16313_v62  ;;  %11730 = vmatpush3.bf16.msra.mxu1 %v13097_v10  ;;  %v13117_v10 = vld [vmem:[%s16212_s7 + $0x4b8] sm:$0xff]   ;;  %v13123_v62 = vld [vmem:[%s16212_s7 + $0x5c8] sm:$0xff]  }
 0x6cb   : > { %8892 = vmatprep.mubr.bf16.mxu1 %v16314_v60  ;;  %11703 = vmatprep.subr.bf16.mxu0 %v13098_v36  ;;  %v13118_v36 = vld [vmem:[%s16212_s7 + $0x540] sm:$0xff]   ;;  %v13124_v60 = vld [vmem:[%s16212_s7 + $0x508] sm:$0xff]  }
 0x6cc   : > { %11731 = vmatprep.subr.bf16.mxu1 %v13099_v5  ;;  %v13120_v5 = vld [vmem:[%s16212_s7 + $0x500] sm:$0xff]  }
 0x6cd   : > { %11704 = vmatpush3.bf16.msra.mxu0 %v13100_v3  ;;  %v13122_v3 = vld [vmem:[%s16212_s7 + $0x548] sm:$0xff]  }
 0x6ce   : > { %11732 = vmatpush3.bf16.msra.mxu1 %v13101_v16  ;;  %11705 = vmatprep.subr.bf16.mxu0 %v13102_v7  ;;  %v16315_v16 = vpack.c.bf16 %v14686_v4, %v14672_v58  ;;  %v16316_v7 = vpack.c.bf16 %v14693_v17, %v14680_v61  ;;  %v13126_v58 = vld [vmem:[%s16212_s7 + $0x550] sm:$0xff]   ;;  %v16317_v61 = vpack.c.bf16 %v14953_v12, %v14940_v44  ;;  %v13130_v44 = vld [vmem:[%s16212_s7 + $0x558] sm:$0xff]  }
 0x6cf   : > { %11733 = vmatprep.subr.bf16.mxu1 %v13103_v32  ;;  %v13125_v32 = vld [vmem:[%s16212_s7 + $0x588] sm:$0xff]   ;;  %v13127_v4 = vld [vmem:[%s16212_s7 + $0x5d0] sm:$0xff]   ;;  %v16318_v17 = vpack.c.bf16 %v14962_v30, %v14945_v35  ;;  %v16319_v30 = vpack.c.bf16 %v14947_v50, %v14930_v19  ;;  %v13131_v35 = vld [vmem:[%s16212_s7 + $0x5d8] sm:$0xff]  }
 0x6d0   : > { %v13129_v12 = vld [vmem:[%s16212_s7 + $0x590] sm:$0xff]   ;;  %v13133_v19 = vld [vmem:[%s16212_s7 + $0x598] sm:$0xff]   ;;  %v13134_v50 = vld [vmem:[%s16212_s7 + $0x560] sm:$0xff]  }
 0x6d1   : > { %11706 = vmatpush3.bf16.msra.mxu0 %v13104_v63  ;;  %v13128_v63 = vld [vmem:[%s16212_s7 + $0x510] sm:$0xff]  }
 0x6d2   : > { %11734 = vmatpush3.bf16.msra.mxu1 %v13105_v18  ;;  %11707 = vmatprep.subr.bf16.mxu0 %v13106_v0  ;;  %v16320_v18 = vpack.c.bf16 %v14951_v13, %v14938_v23  ;;  %v13132_v0 = vld [vmem:[%s16212_s7 + $0x518] sm:$0xff]   ;;  %v16322_v13 = vpack.c.bf16 %v14725_v53, %v14711_v38  ;;  %v13135_v23 = vld [vmem:[%s16212_s7 + $0x5e0] sm:$0xff]   ;;  %v13138_v38 = vld [vmem:[%s16212_s7 + $0x568] sm:$0xff]  }
 0x6d3   : > { %11735 = vmatprep.subr.bf16.mxu1 %v13107_v25  ;;  %v16321_v25 = vpack.c.bf16 %v14719_v49, %v14709_v34  ;;  %v13136_v34 = vld [vmem:[%s16212_s7 + $0x520] sm:$0xff]   ;;  %v13139_v53 = vld [vmem:[%s16212_s7 + $0x5e8] sm:$0xff]  }
 0x6d4   : > { %v13137_v49 = vld [vmem:[%s16212_s7 + $0x5a0] sm:$0xff]  }
 0x6d5   : > { %11708 = vmatpush3.bf16.msra.mxu0 %v13108_v56  ;;  %v13140_v56 = vld [vmem:[%s16212_s7 + $0x528] sm:$0xff]  }
 0x6d6   : > { %11736 = vmatpush3.bf16.msra.mxu1 %v13109_v24  ;;  %11709 = vmatprep.subr.bf16.mxu0 %v13110_v43  ;;  %v13141_v24 = vld [vmem:[%s16212_s7 + $0x5a8] sm:$0xff]   ;;  %v13142_v43 = vld [vmem:[%s16212_s7 + $0x570] sm:$0xff]  }
 0x6d7   : > { %11737 = vmatprep.subr.bf16.mxu1 %v13111_v46  ;;  %v13143_v46 = vld [vmem:[%s16212_s7 + $0x5f0] sm:$0xff]  }
 0x6d9   : > { %11710 = vmatpush3.bf16.msra.mxu0 %v13112_v40  ;;  %v13144_v40 = vld [vmem:[%s16212_s7 + $0x530] sm:$0xff]  }
 0x6da   : > { %11738 = vmatpush3.bf16.msra.mxu1 %v13113_v42  ;;  %11711 = vmatprep.subr.bf16.mxu0 %v13114_v47  ;;  %v13145_v42 = vld [vmem:[%s16212_s7 + $0x5b0] sm:$0xff]   ;;  %v13146_v47 = vld [vmem:[%s16212_s7 + $0x578] sm:$0xff]  }
 0x6db   : > { %11739 = vmatprep.subr.bf16.mxu1 %v13115_v1  ;;  %v13147_v1 = vld [vmem:[%s16212_s7 + $0x5f8] sm:$0xff]  }
 0x6dd   : > { %11712 = vmatpush3.bf16.msra.mxu0 %v13116_v55  ;;  %v13148_v55 = vld [vmem:[%s16212_s7 + $0x538] sm:$0xff]  }
 0x6de   : > { %11740 = vmatpush3.bf16.msra.mxu1 %v13117_v10  ;;  %11753 = vmatprep.subr.bf16.mxu0 %v13118_v36  ;;  %v13149_v10 = vld [vmem:[%s16212_s7 + $0x5b8] sm:$0xff]   ;;  %v13150_v36 = vld [vmem:[%s16212_s7 + $0x640] sm:$0xff]  }
 0x6df   : > { %11781 = vmatprep.subr.bf16.mxu1 %v13119_v15  ;;  %v13151_v15 = vld [vmem:[%s16212_s7 + $0x6c0] sm:$0xff]  }
 0x6e0   : > { %8844 = vmatmul.mubr.bf16.vlgmr.msra.gmra.mrb[104].mxu0 %v16315_v16  ;;  %v16323_v16 = vld [vmem:[#allocation11_spill] sm:$0xff] }
 0x6e1   : > { %8893 = vmatmul.mubr.bf16.vlgmr.msra.gmra.mrb[104].mxu1 %v16316_v7  ;;  %11754 = vmatpush3.bf16.msra.mxu0 %v13120_v5  ;;  %v13152_v5 = vld [vmem:[%s16212_s7 + $0x600] sm:$0xff]  }
 0x6e2   : > { %11782 = vmatpush3.bf16.msra.mxu1 %v13121_v57  ;;  %11755 = vmatprep.subr.bf16.mxu0 %v13122_v3  ;;  %v13153_v57 = vld [vmem:[%s16212_s7 + $0x680] sm:$0xff]   ;;  %v13154_v3 = vld [vmem:[%s16212_s7 + $0x648] sm:$0xff]  }
 0x6e3   : > { %11783 = vmatprep.subr.bf16.mxu1 %v13123_v62  ;;  %8851 = vmatprep.mubr.bf16.mxu0 %v16317_v61  ;;  %v13155_v62 = vld [vmem:[%s16212_s7 + $0x6c8] sm:$0xff]  }
 0x6e4   : > { %8900 = vmatprep.mubr.bf16.mxu1 %v16318_v17  ;;  %v16324_v7 = vld [vmem:[#allocation9_spill] sm:$0xff] }
 0x6e5   : > { %11756 = vmatpush3.bf16.msra.mxu0 %v13124_v60  ;;  %v16325_v60 = vpack.c.bf16 %v16323_v16, %v16324_v7  ;;  %v13157_v17 = vld [vmem:[%s16212_s7 + $0x688] sm:$0xff]   ;;  %v13167_v16 = vld [vmem:[%s16212_s7 + $0x6e0] sm:$0xff]  }
 0x6e6   : > { %11784 = vmatpush3.bf16.msra.mxu1 %v13125_v32  ;;  %11757 = vmatprep.subr.bf16.mxu0 %v13126_v58  ;;  %v16326_v32 = vld [vmem:[#allocation12_spill] sm:$0xff]  ;;  %v16327_v58 = vld [vmem:[#allocation10_spill] sm:$0xff] }
 0x6e7   : > { %11785 = vmatprep.subr.bf16.mxu1 %v13127_v4  ;;  %v16328_v61 = vpack.c.bf16 %v16326_v32, %v16327_v58  ;;  %v13156_v4 = vld [vmem:[%s16212_s7 + $0x608] sm:$0xff]   ;;  %v13168_v7 = vld [vmem:[%s16212_s7 + $0x620] sm:$0xff]  }
 0x6e8   : > { %8852 = vmatmul.mubr.bf16.gmra.mrb[108].mxu0 %v16319_v30  ;;  %v13159_v30 = vld [vmem:[%s16212_s7 + $0x6d0] sm:$0xff]   ;;  %v13170_v32 = vld [vmem:[%s16212_s7 + $0x668] sm:$0xff]  }
 0x6e9   : > { %8901 = vmatmul.mubr.bf16.gmra.mrb[108].mxu1 %v16320_v18  ;;  %11758 = vmatpush3.bf16.msra.mxu0 %v13128_v63  ;;  %v13158_v63 = vld [vmem:[%s16212_s7 + $0x650] sm:$0xff]   ;;  %v15479_v18 = vld [vmem:[%s16213_s8] ss:$0 sm:$0xff]  ;;  %v13171_v58 = vld [vmem:[%s16212_s7 + $0x6e8] sm:$0xff]  }
 0x6ea   : > { %8941 = vmatprep.mubr.bf16.mxu0 %v16321_v25  ;;  %11786 = vmatpush3.bf16.msra.mxu1 %v13129_v12  ;;  %v16330_v25 = vpack.c.bf16 %v15010_v41, %v14993_v59 }
 0x6eb   : > { %8990 = vmatprep.mubr.bf16.mxu1 %v16322_v13  ;;  %11759 = vmatprep.subr.bf16.mxu0 %v13130_v44  ;;  %v16329_v44 = vpack.c.bf16 %v15001_v33, %v14988_v28  ;;  %v13160_v33 = vld [vmem:[%s16212_s7 + $0x610] sm:$0xff]  }
 0x6ec   : > { %11787 = vmatprep.subr.bf16.mxu1 %v13131_v35 }
 0x6ed   : > { %11760 = vmatpush3.bf16.msra.mxu0 %v13132_v0 }
 0x6ee   : > { %11788 = vmatpush3.bf16.msra.mxu1 %v13133_v19  ;;  %11761 = vmatprep.subr.bf16.mxu0 %v13134_v50 }
 0x6ef   : > { %11789 = vmatprep.subr.bf16.mxu1 %v13135_v23 }
 0x6f1   : > { %11762 = vmatpush3.bf16.msra.mxu0 %v13136_v34 }
 0x6f2   : > { %11790 = vmatpush3.bf16.msra.mxu1 %v13137_v49  ;;  %11763 = vmatprep.subr.bf16.mxu0 %v13138_v38  ;;  %v13161_v49 = vld [vmem:[%s16212_s7 + $0x690] sm:$0xff]  }
 0x6f3   : > { %11791 = vmatprep.subr.bf16.mxu1 %v13139_v53  ;;  %v13162_v53 = vld [vmem:[%s16212_s7 + $0x658] sm:$0xff]  }
 0x6f5   : > { %11764 = vmatpush3.bf16.msra.mxu0 %v13140_v56 }
 0x6f6   : > { %11792 = vmatpush3.bf16.msra.mxu1 %v13141_v24  ;;  %11765 = vmatprep.subr.bf16.mxu0 %v13142_v43  ;;  %v16331_v24 = vld [vmem:[#allocation37_spill] sm:$0xff] }
 0x6f7   : > { %11793 = vmatprep.subr.bf16.mxu1 %v13143_v46  ;;  %v16332_v43 = vpack.c.bf16 %v14995_v54, %v16331_v24  ;;  %v13163_v46 = vld [vmem:[%s16212_s7 + $0x6d8] sm:$0xff]   ;;  %v16348_v24 = vpack.c.bf16 %v15070_v48, %v15050_v14  ;;  %v13192_v14 = vld [vmem:[%s16212_s7 + $0x710] sm:$0xff]  }
 0x6f8   : > { %v16336_v54 = vld [vmem:[#allocation15_spill] sm:$0xff] }
 0x6f9   : > { %11766 = vmatpush3.bf16.msra.mxu0 %v13144_v40  ;;  %v13193_v48 = vld [vmem:[%s16212_s7 + $0x790] sm:$0xff]  }
 0x6fa   : > { %11794 = vmatpush3.bf16.msra.mxu1 %v13145_v42  ;;  %11767 = vmatprep.subr.bf16.mxu0 %v13146_v47  ;;  %v16333_v47 = vld [vmem:[#allocation38_spill] sm:$0xff] }
 0x6fb   : > { %11795 = vmatprep.subr.bf16.mxu1 %v13147_v1  ;;  %v16334_v1 = vpack.c.bf16 %v14999_v52, %v16333_v47  ;;  %v16349_v47 = vpack.c.bf16 %v15052_v2, %v15032_v11  ;;  %v13196_v11 = vld [vmem:[%s16212_s7 + $0x718] sm:$0xff]   ;;  %v13198_v2 = vld [vmem:[%s16212_s7 + $0x760] sm:$0xff]  }
 0x6fd   : > { %11768 = vmatpush3.bf16.msra.mxu0 %v13148_v55  ;;  %v13164_v55 = vld [vmem:[%s16212_s7 + $0x618] sm:$0xff]  }
 0x6fe   : > { %11796 = vmatpush3.bf16.msra.mxu1 %v13149_v10  ;;  %11809 = vmatprep.subr.bf16.mxu0 %v13150_v36  ;;  %v16335_v10 = vld [vmem:[#allocation19_spill] sm:$0xff] }
 0x6ff   : > { %11837 = vmatprep.subr.bf16.mxu1 %v13151_v15  ;;  %v16337_v36 = vpack.c.bf16 %v16335_v10, %v16336_v54  ;;  %v13165_v15 = vld [vmem:[%s16212_s7 + $0x698] sm:$0xff]  }
 0x700   : > { %8942 = vmatmul.mubr.bf16.vlgmr.msra.gmra.mrb[112].mxu0 %v16325_v60  ;;  %v13169_v60 = vld [vmem:[%s16212_s7 + $0x6a0] sm:$0xff]   ;;  %v16351_v10 = vld [vmem:[#allocation27_spill] sm:$0xff] }
 0x701   : > { %8991 = vmatmul.mubr.bf16.vlgmr.msra.gmra.mrb[112].mxu1 %v16328_v61  ;;  %11810 = vmatpush3.bf16.msra.mxu0 %v13152_v5  ;;  %v13166_v5 = vld [vmem:[%s16212_s7 + $0x660] sm:$0xff]   ;;  %v13172_v61 = vld [vmem:[%s16212_s7 + $0x628] sm:$0xff]   ;;  %v16352_v54 = vld [vmem:[#allocation23_spill] sm:$0xff] }
 0x702   : > { %11838 = vmatpush3.bf16.msra.mxu1 %v13153_v57  ;;  %11811 = vmatprep.subr.bf16.mxu0 %v13154_v3  ;;  %v16338_v57 = vld [vmem:[#allocation20_spill] sm:$0xff] }
 0x703   : > { %v11489_v12 = vpop.f32.mrb[72].mxu0  ;;  %11839 = vmatprep.subr.bf16.mxu1 %v13155_v62  ;;  %8949 = vmatprep.mubr.bf16.mxu0 %v16329_v44  ;;  %v16339_v3 = vld [vmem:[#allocation16_spill] sm:$0xff]  ;;  %v13177_v44 = vld [vmem:[%s16212_s7 + $0x6b0] sm:$0xff]  }
 0x704   : > { %v11517_v35 = vpop.f32.mrb[72].mxu1  ;;  %v11490_v0 = vpop.f32.mrb[73].mxu0  ;;  %8998 = vmatprep.mubr.bf16.mxu1 %v16330_v25  ;;  %v16340_v62 = vpack.c.bf16 %v16338_v57, %v16339_v3  ;;  %v13181_v25 = vld [vmem:[%s16212_s7 + $0x6b8] sm:$0xff]   ;;  %v13200_v3 = vld [vmem:[%s16212_s7 + $0x720] sm:$0xff]  }
 0x705   : > { %v11491_v19 = vadd.f32 %v11490_v0, %v11489_v12  ;;  %v11518_v50 = vpop.f32.mrb[73].mxu1  ;;  %11812 = vmatpush3.bf16.msra.mxu0 %v13156_v4  ;;  %v11492_v28 = vpop.f32.mrb[74].mxu0  ;;  %v13173_v4 = vld [vmem:[%s16212_s7 + $0x6a8] sm:$0xff]   ;;  %v13176_v12 = vld [vmem:[%s16212_s7 + $0x630] sm:$0xff]   ;;  %v13180_v0 = vld [vmem:[%s16212_s7 + $0x638] sm:$0xff]  }
 0x706   : > { %v11519_v13 = vadd.f32 %v11518_v50, %v11517_v35  ;;  %11840 = vmatpush3.bf16.msra.mxu1 %v13157_v17  ;;  %v11520_v23 = vpop.f32.mrb[74].mxu1  ;;  %v11493_v34 = vpop.f32.mrb[75].mxu0  ;;  %11813 = vmatprep.subr.bf16.mxu0 %v13158_v63  ;;  %v13174_v17 = vld [vmem:[%s16212_s7 + $0x670] sm:$0xff]   ;;  %v13179_v35 = vld [vmem:[%s16212_s7 + $0x6f8] sm:$0xff]   ;;  %v13183_v50 = vld [vmem:[%s16212_s7 + $0x7c0] sm:$0xff]  }
 0x707   : > { %v8454_v41 = vadd.f32 %v11491_v19, %v15479_v18  ;;  %v11494_v59 = vadd.f32 %v11493_v34, %v11492_v28  ;;  %v11521_v38 = vpop.f32.mrb[75].mxu1  ;;  %11841 = vmatprep.subr.bf16.mxu1 %v13159_v30  ;;  %v13175_v63 = vld [vmem:[%s16212_s7 + $0x6f0] sm:$0xff]   ;;  %v13178_v30 = vld [vmem:[%s16212_s7 + $0x678] sm:$0xff]   ;;  %v13182_v19 = vld [vmem:[%s16212_s7 + $0x740] sm:$0xff]  }
 0x708   : > { %v11522_v56 = vadd.f32 %v11521_v38, %v11520_v23  ;;  %8950 = vmatmul.mubr.bf16.gmra.mrb[116].mxu0 %v16332_v43  ;;  %v13184_v28 = vld [vmem:[%s16212_s7 + $0x700] sm:$0xff]   ;;  %v16345_v38 = vld [vmem:[#allocation14_spill] sm:$0xff] }
 0x709   : > { %v15500_v40 = vadd.f32 %v11519_v13, %v8454_v41  ;;  %v8457_v42 = vadd.f32 %v11494_v59, %v15479_v18  ;;  %8999 = vmatmul.mubr.bf16.gmra.mrb[116].mxu1 %v16334_v1  ;;  %11814 = vmatpush3.bf16.msra.mxu0 %v13160_v33  ;;  %v13185_v33 = vld [vmem:[%s16212_s7 + $0x780] sm:$0xff]   ;;  %v13186_v13 = vld [vmem:[%s16212_s7 + $0x748] sm:$0xff]   ;;  %v13195_v1 = vld [vmem:[%s16212_s7 + $0x7d8] sm:$0xff]  }
 0x70a   : > { %9039 = vmatprep.mubr.bf16.mxu0 %v16337_v36  ;;  %11842 = vmatpush3.bf16.msra.mxu1 %v13161_v49  ;;  %v16341_v23 = vld [vmem:[#allocation17_spill] sm:$0xff]  ;;  %v16344_v59 = vld [vmem:[#allocation18_spill] sm:$0xff]  ;;  %v16353_v36 = vpack.c.bf16 %v16351_v10, %v16352_v54  ;;  %v16373_v54 = vld [vmem:[#allocation35_spill] sm:$0xff] }
 0x70b   : > { %v15518_v52 = vadd.f32 %v11522_v56, %v8457_v42  ;;  %9088 = vmatprep.mubr.bf16.mxu1 %v16340_v62  ;;  %11815 = vmatprep.subr.bf16.mxu0 %v13162_v53  ;;  %v16342_v34 = vld [vmem:[#allocation13_spill] sm:$0xff]  ;;  %v16346_v53 = vpack.c.bf16 %v16344_v59, %v16345_v38  ;;  %v16347_v56 = vpack.c.bf16 %v15061_v9, %v15042_v22  ;;  %v13190_v9 = vld [vmem:[%s16212_s7 + $0x750] sm:$0xff]   ;;  %v13194_v42 = vld [vmem:[%s16212_s7 + $0x758] sm:$0xff]  }
 0x70c   : > { %11843 = vmatprep.subr.bf16.mxu1 %v13163_v46  ;;  %v16343_v49 = vpack.c.bf16 %v16341_v23, %v16342_v34  ;;  %v13187_v41 = vld [vmem:[%s16212_s7 + $0x7c8] sm:$0xff]   ;;  %v13191_v22 = vld [vmem:[%s16212_s7 + $0x7d0] sm:$0xff]   ;;  %v13201_v62 = vld [vmem:[%s16212_s7 + $0x7a0] sm:$0xff]   ;;  %v16363_v59 = vpack.c.bf16 %v15121_v20, %v15105_v8 }
 0x70d   : > { %11816 = vmatpush3.bf16.msra.mxu0 %v13164_v55  ;;  %v13188_v43 = vld [vmem:[%s16212_s7 + $0x708] sm:$0xff]   ;;  %v16350_v55 = vpack.c.bf16 %v15059_v45, %v15040_v27  ;;  %v13197_v27 = vld [vmem:[%s16212_s7 + $0x798] sm:$0xff]   ;;  %v13199_v45 = vld [vmem:[%s16212_s7 + $0x7e0] sm:$0xff]  }
 0x70e   : > { %11844 = vmatpush3.bf16.msra.mxu1 %v13165_v15  ;;  %11817 = vmatprep.subr.bf16.mxu0 %v13166_v5  ;;  %v13189_v46 = vld [vmem:[%s16212_s7 + $0x788] sm:$0xff]   ;;  %v16354_v15 = vld [vmem:[#allocation28_spill] sm:$0xff]  ;;  %v13222_v8 = vld [vmem:[%s16212_s7 + $0x850] sm:$0xff]  }
 0x70f   : > { %11845 = vmatprep.subr.bf16.mxu1 %v13167_v16  ;;  %v16355_v5 = vld [vmem:[#allocation24_spill] sm:$0xff]  ;;  %v13202_v16 = vld [vmem:[%s16212_s7 + $0x768] sm:$0xff]   ;;  %v13223_v20 = vld [vmem:[%s16212_s7 + $0x8d0] sm:$0xff]  }
 0x710   : > { %v16356_v57 = vpack.c.bf16 %v16354_v15, %v16355_v5  ;;  %v13219_v23 = vld [vmem:[%s16212_s7 + $0x8c8] sm:$0xff]   ;;  %v16364_v38 = vld [vmem:[#allocation44_spill] sm:$0xff] }
 0x711   : > { %11818 = vmatpush3.bf16.msra.mxu0 %v13168_v7  ;;  %v13203_v7 = vld [vmem:[%s16212_s7 + $0x7e8] sm:$0xff]   ;;  %v16376_v5 = vld [vmem:[#allocation36_spill] sm:$0xff] }
 0x712   : > { %11846 = vmatpush3.bf16.msra.mxu1 %v13169_v60  ;;  %11819 = vmatprep.subr.bf16.mxu0 %v13170_v32  ;;  %v13204_v60 = vld [vmem:[%s16212_s7 + $0x728] sm:$0xff]  }
 0x713   : > { %11847 = vmatprep.subr.bf16.mxu1 %v13171_v58  ;;  %v13205_v32 = vld [vmem:[%s16212_s7 + $0x7a8] sm:$0xff]   ;;  %v13206_v58 = vld [vmem:[%s16212_s7 + $0x770] sm:$0xff]  }
 0x714   : > { %v16360_v34 = vld [vmem:[#allocation26_spill] sm:$0xff] }
 0x715   : > { %11820 = vmatpush3.bf16.msra.mxu0 %v13172_v61  ;;  %v13207_v61 = vld [vmem:[%s16212_s7 + $0x7f0] sm:$0xff]  }
 0x716   : > { %11848 = vmatpush3.bf16.msra.mxu1 %v13173_v4  ;;  %11821 = vmatprep.subr.bf16.mxu0 %v13174_v17  ;;  %v13208_v4 = vld [vmem:[%s16212_s7 + $0x730] sm:$0xff]  }
 0x717   : > { %11849 = vmatprep.subr.bf16.mxu1 %v13175_v63  ;;  %v13209_v17 = vld [vmem:[%s16212_s7 + $0x7b0] sm:$0xff]   ;;  %v13210_v63 = vld [vmem:[%s16212_s7 + $0x778] sm:$0xff]  }
 0x719   : > { %11822 = vmatpush3.bf16.msra.mxu0 %v13176_v12  ;;  %v13211_v12 = vld [vmem:[%s16212_s7 + $0x7f8] sm:$0xff]  }
 0x71a   : > { %11850 = vmatpush3.bf16.msra.mxu1 %v13177_v44  ;;  %11823 = vmatprep.subr.bf16.mxu0 %v13178_v30  ;;  %v13212_v44 = vld [vmem:[%s16212_s7 + $0x738] sm:$0xff]  }
 0x71b   : > { %11851 = vmatprep.subr.bf16.mxu1 %v13179_v35  ;;  %v13213_v30 = vld [vmem:[%s16212_s7 + $0x7b8] sm:$0xff]   ;;  %v13214_v35 = vld [vmem:[%s16212_s7 + $0x840] sm:$0xff]  }
 0x71d   : > { %11824 = vmatpush3.bf16.msra.mxu0 %v13180_v0  ;;  %v13215_v0 = vld [vmem:[%s16212_s7 + $0x8c0] sm:$0xff]  }
 0x71e   : > { %11852 = vmatpush3.bf16.msra.mxu1 %v13181_v25  ;;  %11865 = vmatprep.subr.bf16.mxu0 %v13182_v19  ;;  %v13216_v25 = vld [vmem:[%s16212_s7 + $0x800] sm:$0xff]  }
 0x71f   : > { %11893 = vmatprep.subr.bf16.mxu1 %v13183_v50  ;;  %v13217_v19 = vld [vmem:[%s16212_s7 + $0x880] sm:$0xff]   ;;  %v13218_v50 = vld [vmem:[%s16212_s7 + $0x848] sm:$0xff]  }
 0x720   : > { %9040 = vmatmul.mubr.bf16.vlgmr.msra.gmra.mrb[120].mxu0 %v16343_v49  ;;  %v16361_v49 = vld [vmem:[#allocation22_spill] sm:$0xff] }
 0x721   : > { %9089 = vmatmul.mubr.bf16.vlgmr.msra.gmra.mrb[120].mxu1 %v16346_v53  ;;  %9047 = vmatprep.mubr.bf16.mxu0 %v16347_v56  ;;  %v16365_v53 = vld [vmem:[#allocation41_spill] sm:$0xff] }
 0x722   : > { %9096 = vmatprep.mubr.bf16.mxu1 %v16348_v24  ;;  %11866 = vmatpush3.bf16.msra.mxu0 %v13184_v28  ;;  %v16357_v28 = vld [vmem:[#allocation25_spill] sm:$0xff]  ;;  %v16366_v56 = vpack.c.bf16 %v16364_v38, %v16365_v53 }
 0x723   : > { %11894 = vmatpush3.bf16.msra.mxu1 %v13185_v33  ;;  %11867 = vmatprep.subr.bf16.mxu0 %v13186_v13  ;;  %v16358_v33 = vld [vmem:[#allocation21_spill] sm:$0xff] }
 0x724   : > { %11895 = vmatprep.subr.bf16.mxu1 %v13187_v41  ;;  %v16359_v13 = vpack.c.bf16 %v16357_v28, %v16358_v33  ;;  %v16362_v41 = vpack.c.bf16 %v16360_v34, %v16361_v49  ;;  %v13220_v24 = vld [vmem:[%s16212_s7 + $0x808] sm:$0xff]  }
 0x725   : > { %v13235_v28 = vld [vmem:[%s16212_s7 + $0x8e8] sm:$0xff]  }
 0x726   : > { %11868 = vmatpush3.bf16.msra.mxu0 %v13188_v43  ;;  %v13221_v43 = vld [vmem:[%s16212_s7 + $0x888] sm:$0xff]  }
 0x727   : > { %11896 = vmatpush3.bf16.msra.mxu1 %v13189_v46  ;;  %11869 = vmatprep.subr.bf16.mxu0 %v13190_v9  ;;  %v13224_v46 = vld [vmem:[%s16212_s7 + $0x810] sm:$0xff]  }
 0x728   : > { %9048 = vmatmul.mubr.bf16.gmra.mrb[124].mxu0 %v16349_v47  ;;  %11897 = vmatprep.subr.bf16.mxu1 %v13191_v22  ;;  %v13225_v9 = vld [vmem:[%s16212_s7 + $0x890] sm:$0xff]   ;;  %v13226_v22 = vld [vmem:[%s16212_s7 + $0x858] sm:$0xff]  }
 0x729   : > { %9097 = vmatmul.mubr.bf16.gmra.mrb[124].mxu1 %v16350_v55  ;;  %9137 = vmatprep.mubr.bf16.mxu0 %v16353_v36  ;;  %v13227_v47 = vld [vmem:[%s16212_s7 + $0x8d8] sm:$0xff]  }
 0x72a   : > { %11870 = vmatpush3.bf16.msra.mxu0 %v13192_v14  ;;  %9186 = vmatprep.mubr.bf16.mxu1 %v16356_v57  ;;  %v16367_v14 = vld [vmem:[#allocation42_spill] sm:$0xff]  ;;  %v16371_v55 = vld [vmem:[#allocation40_spill] sm:$0xff]  ;;  %v16374_v36 = vld [vmem:[#allocation31_spill] sm:$0xff] }
 0x72b   : > { %11898 = vmatpush3.bf16.msra.mxu1 %v13193_v48  ;;  %11871 = vmatprep.subr.bf16.mxu0 %v13194_v42  ;;  %v16368_v48 = vld [vmem:[#allocation39_spill] sm:$0xff]  ;;  %v16375_v15 = vpack.c.bf16 %v16373_v54, %v16374_v36  ;;  %v16377_v57 = vld [vmem:[#allocation32_spill] sm:$0xff] }
 0x72c   : > { %11899 = vmatprep.subr.bf16.mxu1 %v13195_v1  ;;  %v16369_v42 = vpack.c.bf16 %v16367_v14, %v16368_v48  ;;  %v16370_v1 = vld [vmem:[#allocation43_spill] sm:$0xff] }
 0x72d   : > { %v16372_v10 = vpack.c.bf16 %v16370_v1, %v16371_v55  ;;  %v13241_v48 = vld [vmem:[%s16212_s7 + $0x8b0] sm:$0xff]   ;;  %v13243_v1 = vld [vmem:[%s16212_s7 + $0x8f8] sm:$0xff]  }
 0x72e   : > { %11872 = vmatpush3.bf16.msra.mxu0 %v13196_v11  ;;  %v16378_v11 = vpack.c.bf16 %v16376_v5, %v16377_v57  ;;  %v13244_v54 = vld [vmem:[%s16212_s7 + $0x838] sm:$0xff]  }
 0x72f   : > { %11900 = vmatpush3.bf16.msra.mxu1 %v13197_v27  ;;  %11873 = vmatprep.subr.bf16.mxu0 %v13198_v2  ;;  %v13228_v2 = vld [vmem:[%s16212_s7 + $0x818] sm:$0xff]  }
 0x730   : > { %11901 = vmatprep.subr.bf16.mxu1 %v13199_v45 }
 0x732   : > { %11874 = vmatpush3.bf16.msra.mxu0 %v13200_v3 }
 0x733   : > { %11902 = vmatpush3.bf16.msra.mxu1 %v13201_v62  ;;  %11875 = vmatprep.subr.bf16.mxu0 %v13202_v16  ;;  %v13229_v62 = vld [vmem:[%s16212_s7 + $0x898] sm:$0xff]   ;;  %v13230_v16 = vld [vmem:[%s16212_s7 + $0x860] sm:$0xff]  }
 0x734   : > { %11903 = vmatprep.subr.bf16.mxu1 %v13203_v7 }
 0x736   : > { %11876 = vmatpush3.bf16.msra.mxu0 %v13204_v60 }
 0x737   : > { %11904 = vmatpush3.bf16.msra.mxu1 %v13205_v32  ;;  %11877 = vmatprep.subr.bf16.mxu0 %v13206_v58  ;;  %v13231_v58 = vld [vmem:[%s16212_s7 + $0x8e0] sm:$0xff]  }
 0x738   : > { %11905 = vmatprep.subr.bf16.mxu1 %v13207_v61 }
 0x73a   : > { %11878 = vmatpush3.bf16.msra.mxu0 %v13208_v4 }
 0x73b   : > { %11906 = vmatpush3.bf16.msra.mxu1 %v13209_v17  ;;  %11879 = vmatprep.subr.bf16.mxu0 %v13210_v63 }
 0x73c   : > { %11907 = vmatprep.subr.bf16.mxu1 %v13211_v12 }
 0x73e   : > { %11880 = vmatpush3.bf16.msra.mxu0 %v13212_v44 }
 0x73f   : > { %11908 = vmatpush3.bf16.msra.mxu1 %v13213_v30  ;;  %11921 = vmatprep.subr.bf16.mxu0 %v13214_v35  ;;  %v13232_v30 = vld [vmem:[%s16212_s7 + $0x820] sm:$0xff]  }
 0x740   : > { %11949 = vmatprep.subr.bf16.mxu1 %v13215_v0  ;;  %v13233_v0 = vld [vmem:[%s16212_s7 + $0x8a0] sm:$0xff]  }
 0x741   : > { %9138 = vmatmul.mubr.bf16.vlgmr.msra.gmra.mrb[128].mxu0 %v16359_v13 }
 0x742   : > { %9187 = vmatmul.mubr.bf16.vlgmr.msra.gmra.mrb[128].mxu1 %v16362_v41  ;;  %9145 = vmatprep.mubr.bf16.mxu0 %v16363_v59  ;;  %v13238_v41 = vld [vmem:[%s16212_s7 + $0x870] sm:$0xff]  }
 0x743   : > { %9194 = vmatprep.mubr.bf16.mxu1 %v16366_v56  ;;  %11922 = vmatpush3.bf16.msra.mxu0 %v13216_v25  ;;  %v13234_v25 = vld [vmem:[%s16212_s7 + $0x868] sm:$0xff]   ;;  %v13239_v56 = vld [vmem:[%s16212_s7 + $0x8f0] sm:$0xff]  }
 0x744   : > { %11950 = vmatpush3.bf16.msra.mxu1 %v13217_v19  ;;  %11923 = vmatprep.subr.bf16.mxu0 %v13218_v50 }
 0x745   : > { %11951 = vmatprep.subr.bf16.mxu1 %v13219_v23  ;;  %v13236_v23 = vld [vmem:[%s16212_s7 + $0x828] sm:$0xff]  }
 0x747   : > { %11924 = vmatpush3.bf16.msra.mxu0 %v13220_v24 }
 0x748   : > { %11952 = vmatpush3.bf16.msra.mxu1 %v13221_v43  ;;  %11925 = vmatprep.subr.bf16.mxu0 %v13222_v8 }
 0x749   : > { %9146 = vmatmul.mubr.bf16.gmra.mrb[132].mxu0 %v16369_v42  ;;  %11953 = vmatprep.subr.bf16.mxu1 %v13223_v20  ;;  %v13242_v42 = vld [vmem:[%s16212_s7 + $0x878] sm:$0xff]  }
 0x74a   : > { %9195 = vmatmul.mubr.bf16.gmra.mrb[132].mxu1 %v16372_v10  ;;  %9235 = vmatprep.mubr.bf16.mxu0 %v16375_v15  ;;  %v13245_v15 = vld [vmem:[%s16212_s7 + $0x8b8] sm:$0xff]  }
 0x74b   : > { %11926 = vmatpush3.bf16.msra.mxu0 %v13224_v46  ;;  %9284 = vmatprep.mubr.bf16.mxu1 %v16378_v11  ;;  %v11495_v27 = vpop.f32.mrb[76].mxu0 }
 0x74c   : > { %11954 = vmatpush3.bf16.msra.mxu1 %v13225_v9  ;;  %v11523_v45 = vpop.f32.mrb[76].mxu1  ;;  %11927 = vmatprep.subr.bf16.mxu0 %v13226_v22  ;;  %v11496_v3 = vpop.f32.mrb[77].mxu0  ;;  %v13240_v22 = vld [vmem:[%s16212_s7 + $0x830] sm:$0xff]  }
 0x74d   : > { %11955 = vmatprep.subr.bf16.mxu1 %v13227_v47  ;;  %v11497_v7 = vadd.f32 %v11496_v3, %v11495_v27  ;;  %v11524_v60 = vpop.f32.mrb[77].mxu1  ;;  %v11498_v32 = vpop.f32.mrb[78].mxu0 }
 0x74e   : > { %v11525_v61 = vadd.f32 %v11524_v60, %v11523_v45  ;;  %v11526_v4 = vpop.f32.mrb[78].mxu1  ;;  %v11499_v17 = vpop.f32.mrb[79].mxu0 }
 0x74f   : > { %v8462_v63 = vadd.f32 %v11497_v7, %v15479_v18  ;;  %11928 = vmatpush3.bf16.msra.mxu0 %v13228_v2  ;;  %v11500_v12 = vadd.f32 %v11499_v17, %v11498_v32  ;;  %v11527_v44 = vpop.f32.mrb[79].mxu1  ;;  %v16382_v17 = vld [vmem:[#allocation34_spill] sm:$0xff] }
 0x750   : > { %11956 = vmatpush3.bf16.msra.mxu1 %v13229_v62  ;;  %v11528_v35 = vadd.f32 %v11527_v44, %v11526_v4  ;;  %11929 = vmatprep.subr.bf16.mxu0 %v13230_v16 }
 0x751   : > { %v8511_v19 = vadd.f32 %v11525_v61, %v8462_v63  ;;  %v8465_v50 = vadd.f32 %v11500_v12, %v15479_v18  ;;  %11957 = vmatprep.subr.bf16.mxu1 %v13231_v58  ;;  %v13237_v18 = vld [vmem:[%s16212_s7 + $0x8a8] sm:$0xff]  }
 0x752   : > { %v16379_v58 = vld [vmem:[#allocation33_spill] sm:$0xff]  ;;  %v16383_v63 = vld [vmem:[#allocation30_spill] sm:$0xff] }
 0x753   : > { %v8514_v33 = vadd.f32 %v11528_v35, %v8465_v50  ;;  %11930 = vmatpush3.bf16.msra.mxu0 %v13232_v30  ;;  %v11545_v13 = vpop.f32.mrb[80].mxu0  ;;  %v16380_v61 = vld [vmem:[#allocation29_spill] sm:$0xff]  ;;  %v16384_v12 = vpack.c.bf16 %v16382_v17, %v16383_v63  ;;  %v16385_v30 = vpack.c.bf16 %v15178_v39, %v15161_v6 }
 0x754   : > { %11958 = vmatpush3.bf16.msra.mxu1 %v13233_v0  ;;  %v11573_v34 = vpop.f32.mrb[80].mxu1  ;;  %11931 = vmatprep.subr.bf16.mxu0 %v13234_v25  ;;  %v11546_v49 = vpop.f32.mrb[81].mxu0  ;;  %v16381_v4 = vpack.c.bf16 %v16379_v58, %v16380_v61  ;;  %v16386_v35 = vld [vmem:[#allocation45_spill] sm:$0xff]  ;;  %v16388_v25 = vpack.c.bf16 %v15167_v29, %v15154_v21 }
 0x755   : > { %11959 = vmatprep.subr.bf16.mxu1 %v13235_v28  ;;  %v11547_v59 = vadd.f32 %v11546_v49, %v11545_v13  ;;  %v11574_v38 = vpop.f32.mrb[81].mxu1  ;;  %v11548_v53 = vpop.f32.mrb[82].mxu0  ;;  %v16387_v0 = vpack.c.bf16 %v15163_v37, %v16386_v35 }
 0x756   : > { %v11575_v24 = vadd.f32 %v11574_v38, %v11573_v34  ;;  %v11576_v43 = vpop.f32.mrb[82].mxu1  ;;  %v11549_v8 = vpop.f32.mrb[83].mxu0 }
 0x757   : > { %v8552_v20 = vadd.f32 %v11547_v59, %v15500_v40  ;;  %11932 = vmatpush3.bf16.msra.mxu0 %v13236_v23  ;;  %v11550_v46 = vadd.f32 %v11549_v8, %v11548_v53  ;;  %v11577_v9 = vpop.f32.mrb[83].mxu1 }
 0x758   : > { %11960 = vmatpush3.bf16.msra.mxu1 %v13237_v18  ;;  %v11578_v14 = vadd.f32 %v11577_v9, %v11576_v43  ;;  %11933 = vmatprep.subr.bf16.mxu0 %v13238_v41 }
 0x759   : > { %v8601_v47 = vadd.f32 %v11575_v24, %v8552_v20  ;;  %v8555_v40 = vadd.f32 %v11550_v46, %v15518_v52  ;;  %11961 = vmatprep.subr.bf16.mxu1 %v13239_v56 }
 0x75b   : > { %v8604_v55 = vadd.f32 %v11578_v14, %v8555_v40  ;;  %11934 = vmatpush3.bf16.msra.mxu0 %v13240_v22  ;;  %v11551_v10 = vpop.f32.mrb[84].mxu0 }
 0x75c   : > { %11962 = vmatpush3.bf16.msra.mxu1 %v13241_v48  ;;  %11935 = vmatprep.subr.bf16.mxu0 %v13242_v42  ;;  %v11552_v36 = vpop.f32.mrb[85].mxu0  ;;  %v11579_v52 = vpop.f32.mrb[84].mxu1 }
 0x75d   : > { %11963 = vmatprep.subr.bf16.mxu1 %v13243_v1  ;;  %v11553_v5 = vadd.f32 %v11552_v36, %v11551_v10  ;;  %v11554_v57 = vpop.f32.mrb[86].mxu0  ;;  %v11580_v11 = vpop.f32.mrb[85].mxu1 }
 0x75e   : > { %v11555_v27 = vpop.f32.mrb[87].mxu0  ;;  %v11581_v2 = vadd.f32 %v11580_v11, %v11579_v52  ;;  %v11582_v45 = vpop.f32.mrb[86].mxu1 }
 0x75f   : > { %v8560_v3 = vadd.f32 %v11553_v5, %v8511_v19  ;;  %11936 = vmatpush3.bf16.msra.mxu0 %v13244_v54  ;;  %v11556_v62 = vadd.f32 %v11555_v27, %v11554_v57  ;;  %v11583_v16 = vpop.f32.mrb[87].mxu1 }
 0x760   : > { %11964 = vmatpush3.bf16.msra.mxu1 %v13245_v15  ;;  %v11584_v7 = vadd.f32 %v11583_v16, %v11582_v45 }
 0x761   : > { %v8563_v60 = vadd.f32 %v11556_v62, %v8514_v33  ;;  %v8609_v32 = vadd.f32 %v11581_v2, %v8560_v3 }
 0x762   : > { %9236 = vmatmul.mubr.bf16.vlgmr.msra.gmra.mrb[136].mxu0 %v16381_v4 }
 0x763   : > { %9285 = vmatmul.mubr.bf16.vlgmr.msra.gmra.mrb[136].mxu1 %v16384_v12  ;;  %v8612_v44 = vadd.f32 %v11584_v7, %v8563_v60  ;;  %9243 = vmatprep.mubr.bf16.mxu0 %v6105_v51 }
 0x764   : > { %9292 = vmatprep.mubr.bf16.mxu1 %v16385_v30 }
 0x76a   : > { %9244 = vmatmul.mubr.bf16.gmra.mrb[140].mxu0 %v16387_v0 }
 0x76b   : > { %9293 = vmatmul.mubr.bf16.gmra.mrb[140].mxu1 %v16388_v25 }
 0x773   : > { %v11601_v19 = vpop.f32.mrb[88].mxu0 }
 0x774   : > { %v11629_v50 = vpop.f32.mrb[88].mxu1  ;;  %v11602_v28 = vpop.f32.mrb[89].mxu0 }
 0x775   : > { %v11603_v33 = vadd.f32 %v11602_v28, %v11601_v19  ;;  %v11630_v13 = vpop.f32.mrb[89].mxu1  ;;  %v11604_v23 = vpop.f32.mrb[90].mxu0 }
 0x776   : > { %v11631_v26 = vadd.f32 %v11630_v13, %v11629_v50  ;;  %v11632_v31 = vpop.f32.mrb[90].mxu1  ;;  %v11605_v51 = vpop.f32.mrb[91].mxu0 }
 0x777   : > { %v8650_v34 = vadd.f32 %v11603_v33, %v8601_v47  ;;  %v11606_v6 = vadd.f32 %v11605_v51, %v11604_v23  ;;  %v11633_v39 = vpop.f32.mrb[91].mxu1 }
 0x778   : > { %v11634_v49 = vadd.f32 %v11633_v39, %v11632_v31 }
 0x779   : > { %v8699_v18 = vadd.f32 %v11631_v26, %v8650_v34  ;;  %v8653_v37 = vadd.f32 %v11606_v6, %v8604_v55 }
 0x77b   : > { %v8702_v41 = vadd.f32 %v11634_v49, %v8653_v37  ;;  %v11607_v59 = vpop.f32.mrb[92].mxu0 }
 0x77c   : > { %v11608_v38 = vpop.f32.mrb[93].mxu0  ;;  %v11635_v21 = vpop.f32.mrb[92].mxu1 }
 0x77d   : > { %v11609_v29 = vadd.f32 %v11608_v38, %v11607_v59  ;;  %v11610_v53 = vpop.f32.mrb[94].mxu0  ;;  %v11636_v56 = vpop.f32.mrb[93].mxu1 }
 0x77e   : > { %v11611_v24 = vpop.f32.mrb[95].mxu0  ;;  %v11637_v43 = vadd.f32 %v11636_v56, %v11635_v21  ;;  %v11638_v8 = vpop.f32.mrb[94].mxu1 }
 0x77f   : > { %v8658_v20 = vadd.f32 %v11609_v29, %v8609_v32  ;;  %v11612_v46 = vadd.f32 %v11611_v24, %v11610_v53  ;;  %v11639_v9 = vpop.f32.mrb[95].mxu1 }
 0x780   : > { %v11640_v22 = vadd.f32 %v11639_v9, %v11638_v8 }
 0x781   : > { %v8661_v14 = vadd.f32 %v11612_v46, %v8612_v44  ;;  %v8707_v48 = vadd.f32 %v11637_v43, %v8658_v20 }
 0x783   : > { %v8710_v42 = vadd.f32 %v11640_v22, %v8661_v14 }
 0x793   : > { %v11657_v47 = vpop.f32.mrb[96].mxu0 }
 0x794   : > { %v11685_v40 = vpop.f32.mrb[96].mxu1  ;;  %v11658_v1 = vpop.f32.mrb[97].mxu0 }
 0x795   : > { %v11659_v55 = vadd.f32 %v11658_v1, %v11657_v47  ;;  %v11686_v10 = vpop.f32.mrb[97].mxu1  ;;  %v11660_v54 = vpop.f32.mrb[98].mxu0  ;;  %v13246_v47 = vld [vmem:[%s16214_s9] sm:$0xff]  }
 0x796   : > { %v11687_v36 = vadd.f32 %v11686_v10, %v11685_v40  ;;  %v11688_v15 = vpop.f32.mrb[98].mxu1  ;;  %v11661_v52 = vpop.f32.mrb[99].mxu0  ;;  %12123 = vmatprep.mubr.msk.bf16.mxu0 %vm9433_vm1, %v13246_v47 }
 0x797   : > { %v8748_v5 = vadd.f32 %v11659_v55, %v8699_v18  ;;  %v11662_v57 = vadd.f32 %v11661_v52, %v11660_v54  ;;  %v11689_v11 = vpop.f32.mrb[99].mxu1 }
 0x798   : > { %v11690_v27 = vadd.f32 %v11689_v11, %v11688_v15 }
 0x799   : > { %v8797_v2 = vadd.f32 %v11687_v36, %v8748_v5  ;;  %v8751_v45 = vadd.f32 %v11662_v57, %v8702_v41 }
 0x79b   : > { %v8800_v3 = vadd.f32 %v11690_v27, %v8751_v45  ;;  %v11663_v62 = vpop.f32.mrb[100].mxu0 }
 0x79c   : > { %v11664_v16 = vpop.f32.mrb[101].mxu0  ;;  %v11691_v7 = vpop.f32.mrb[100].mxu1 }
 0x79d   : > { %v11665_v60 = vadd.f32 %v11664_v16, %v11663_v62  ;;  %v11666_v32 = vpop.f32.mrb[102].mxu0  ;;  %v11692_v58 = vpop.f32.mrb[101].mxu1 }
 0x79e   : > { %v11667_v61 = vpop.f32.mrb[103].mxu0  ;;  %v11693_v4 = vadd.f32 %v11692_v58, %v11691_v7  ;;  %v11694_v17 = vpop.f32.mrb[102].mxu1 }
 0x79f   : > { %v8756_v63 = vadd.f32 %v11665_v60, %v8707_v48  ;;  %v11668_v12 = vadd.f32 %v11667_v61, %v11666_v32  ;;  %v11695_v44 = vpop.f32.mrb[103].mxu1 }
 0x7a0   : > { %v11696_v30 = vadd.f32 %v11695_v44, %v11694_v17 }
 0x7a1   : > { %v8759_v35 = vadd.f32 %v11668_v12, %v8710_v42  ;;  %v8805_v0 = vadd.f32 %v11693_v4, %v8756_v63 }
 0x7a3   : > { %v8808_v25 = vadd.f32 %v11696_v30, %v8759_v35 }
 0x7b3   : > { %v11713_v19 = vpop.f32.mrb[104].mxu0 }
 0x7b4   : > { %v11741_v50 = vpop.f32.mrb[104].mxu1  ;;  %v11714_v28 = vpop.f32.mrb[105].mxu0 }
 0x7b5   : > { %v11715_v33 = vadd.f32 %v11714_v28, %v11713_v19  ;;  %v11742_v13 = vpop.f32.mrb[105].mxu1  ;;  %v11716_v23 = vpop.f32.mrb[106].mxu0 }
 0x7b6   : > { %v11743_v26 = vadd.f32 %v11742_v13, %v11741_v50  ;;  %v11744_v31 = vpop.f32.mrb[106].mxu1  ;;  %v11717_v51 = vpop.f32.mrb[107].mxu0 }
 0x7b7   : > { %v8846_v34 = vadd.f32 %v11715_v33, %v8797_v2  ;;  %v11718_v6 = vadd.f32 %v11717_v51, %v11716_v23  ;;  %v11745_v39 = vpop.f32.mrb[107].mxu1 }
 0x7b8   : > { %v11746_v49 = vadd.f32 %v11745_v39, %v11744_v31 }
 0x7b9   : > { %v8895_v18 = vadd.f32 %v11743_v26, %v8846_v34  ;;  %v8849_v37 = vadd.f32 %v11718_v6, %v8800_v3 }
 0x7bb   : > { %v8898_v41 = vadd.f32 %v11746_v49, %v8849_v37  ;;  %v11719_v59 = vpop.f32.mrb[108].mxu0 }
 0x7bc   : > { %v11720_v38 = vpop.f32.mrb[109].mxu0  ;;  %v11747_v21 = vpop.f32.mrb[108].mxu1 }
 0x7bd   : > { %v11721_v29 = vadd.f32 %v11720_v38, %v11719_v59  ;;  %v11722_v53 = vpop.f32.mrb[110].mxu0  ;;  %v11748_v56 = vpop.f32.mrb[109].mxu1 }
 0x7be   : > { %v11723_v24 = vpop.f32.mrb[111].mxu0  ;;  %v11749_v43 = vadd.f32 %v11748_v56, %v11747_v21  ;;  %v11750_v8 = vpop.f32.mrb[110].mxu1 }
 0x7bf   : > { %v8854_v20 = vadd.f32 %v11721_v29, %v8805_v0  ;;  %v11724_v46 = vadd.f32 %v11723_v24, %v11722_v53  ;;  %v11751_v9 = vpop.f32.mrb[111].mxu1 }
 0x7c0   : > { %v11752_v22 = vadd.f32 %v11751_v9, %v11750_v8 }
 0x7c1   : > { %v8857_v14 = vadd.f32 %v11724_v46, %v8808_v25  ;;  %v8903_v48 = vadd.f32 %v11749_v43, %v8854_v20 }
 0x7c3   : > { %v8906_v42 = vadd.f32 %v11752_v22, %v8857_v14 }
 0x7d3   : > { %v11769_v40 = vpop.f32.mrb[112].mxu0 }
 0x7d4   : > { %v11797_v1 = vpop.f32.mrb[112].mxu1  ;;  %v11770_v55 = vpop.f32.mrb[113].mxu0 }
 0x7d5   : > { %v11771_v10 = vadd.f32 %v11770_v55, %v11769_v40  ;;  %v11798_v54 = vpop.f32.mrb[113].mxu1  ;;  %v11772_v36 = vpop.f32.mrb[114].mxu0  ;;  %v13264_v40 = vld [vmem:[%s16215_s10 + $0x40] sm:$0xff]   ;;  %v13266_v55 = vld [vmem:[%s16215_s10 + $0x48] sm:$0xff]  }
 0x7d6   : > { %v11799_v15 = vadd.f32 %v11798_v54, %v11797_v1  ;;  %v11800_v52 = vpop.f32.mrb[114].mxu1  ;;  %v11773_v5 = vpop.f32.mrb[115].mxu0  ;;  %v13265_v1 = vld [vmem:[%s16215_s10] sm:$0xff]   ;;  %11997 = vmatprep.subr.bf16.mxu1 %v13264_v40  ;;  %v13268_v54 = vld [vmem:[%s16215_s10 + $0x50] sm:$0xff]  }
 0x7d7   : > { %v8944_v57 = vadd.f32 %v11771_v10, %v8895_v18  ;;  %v11774_v11 = vadd.f32 %v11773_v5, %v11772_v36  ;;  %v11801_v27 = vpop.f32.mrb[115].mxu1  ;;  %11998 = vmatpush3.bf16.msra.mxu1 %v13265_v1  ;;  %v13267_v10 = vld [vmem:[%s16215_s10 + $0x8] sm:$0xff]  }
 0x7d8   : > { %v11802_v2 = vadd.f32 %v11801_v27, %v11800_v52  ;;  %11999 = vmatprep.subr.bf16.mxu1 %v13266_v55  ;;  %v13269_v27 = vld [vmem:[%s16215_s10 + $0x10] sm:$0xff]  }
 0x7d9   : > { %v8993_v45 = vadd.f32 %v11799_v15, %v8944_v57  ;;  %v8947_v3 = vadd.f32 %v11774_v11, %v8898_v41 }
 0x7db   : > { %v8996_v62 = vadd.f32 %v11802_v2, %v8947_v3  ;;  %v11775_v16 = vpop.f32.mrb[116].mxu0  ;;  %12000 = vmatpush3.bf16.msra.mxu1 %v13267_v10 }
 0x7dc   : > { %v11776_v7 = vpop.f32.mrb[117].mxu0  ;;  %v11803_v60 = vpop.f32.mrb[116].mxu1  ;;  %12001 = vmatprep.subr.bf16.mxu1 %v13268_v54 }
 0x7dd   : > { %v11777_v32 = vadd.f32 %v11776_v7, %v11775_v16  ;;  %v11778_v58 = vpop.f32.mrb[118].mxu0  ;;  %v11804_v61 = vpop.f32.mrb[117].mxu1 }
 0x7de   : > { %v11779_v4 = vpop.f32.mrb[119].mxu0  ;;  %v11805_v17 = vadd.f32 %v11804_v61, %v11803_v60  ;;  %v11806_v63 = vpop.f32.mrb[118].mxu1 }
 0x7df   : > { %v8952_v12 = vadd.f32 %v11777_v32, %v8903_v48  ;;  %v11780_v44 = vadd.f32 %v11779_v4, %v11778_v58  ;;  %v11807_v30 = vpop.f32.mrb[119].mxu1  ;;  %12002 = vmatpush3.bf16.msra.mxu1 %v13269_v27  ;;  %v13271_v4 = vld [vmem:[%s16215_s10 + $0x18] sm:$0xff]  }
 0x7e0   : > { %v11808_v35 = vadd.f32 %v11807_v30, %v11806_v63 }
 0x7e1   : > { %v8955_v0 = vadd.f32 %v11780_v44, %v8906_v42  ;;  %v9001_v25 = vadd.f32 %v11805_v17, %v8952_v12  ;;  %v13272_v17 = vld [vmem:[%s16215_s10 + $0x60] sm:$0xff]  }
 0x7e3   : > { %v9004_v19 = vadd.f32 %v11808_v35, %v8955_v0 }
 0x7f3   : > { %v11825_v50 = vpop.f32.mrb[120].mxu0 }
 0x7f4   : > { %v11853_v28 = vpop.f32.mrb[120].mxu1  ;;  %v11826_v33 = vpop.f32.mrb[121].mxu0 }
 0x7f5   : > { %v11827_v13 = vadd.f32 %v11826_v33, %v11825_v50  ;;  %v11854_v23 = vpop.f32.mrb[121].mxu1  ;;  %v11828_v26 = vpop.f32.mrb[122].mxu0 }
 0x7f6   : > { %v11855_v31 = vadd.f32 %v11854_v23, %v11853_v28  ;;  %v11856_v51 = vpop.f32.mrb[122].mxu1  ;;  %v11829_v34 = vpop.f32.mrb[123].mxu0 }
 0x7f7   : > { %v9042_v6 = vadd.f32 %v11827_v13, %v8993_v45  ;;  %v11830_v39 = vadd.f32 %v11829_v34, %v11828_v26  ;;  %v11857_v49 = vpop.f32.mrb[123].mxu1  ;;  %v13276_v13 = vld [vmem:[%s16215_s10 + $0x68] sm:$0xff]  }
 0x7f8   : > { %v11858_v18 = vadd.f32 %v11857_v49, %v11856_v51  ;;  %v13280_v49 = vld [vmem:[%s16215_s10 + $0x70] sm:$0xff]  }
 0x7f9   : > { %v9091_v37 = vadd.f32 %v11855_v31, %v9042_v6  ;;  %v9045_v41 = vadd.f32 %v11830_v39, %v8996_v62  ;;  %v13270_v62 = vld [vmem:[%s16215_s10 + $0x58] sm:$0xff]   ;;  %v13278_v39 = vld [vmem:[%s16215_s10 + $0x28] sm:$0xff]  }
 0x7fa   : > { %12003 = vmatprep.subr.bf16.mxu1 %v13270_v62 }
 0x7fb   : > { %v9094_v59 = vadd.f32 %v11858_v18, %v9045_v41  ;;  %v11831_v38 = vpop.f32.mrb[124].mxu0  ;;  %12004 = vmatpush3.bf16.msra.mxu1 %v13271_v4  ;;  %v13248_v4 = vld [vmem:[%s16214_s9 + $0x10] sm:$0xff]  }
 0x7fc   : > { %v11859_v21 = vpop.f32.mrb[124].mxu1  ;;  %v11832_v29 = vpop.f32.mrb[125].mxu0  ;;  %12005 = vmatprep.subr.bf16.mxu1 %v13272_v17  ;;  %v13275_v17 = vld [vmem:[%s16215_s10 + $0x100] sm:$0xff]  }
 0x7fd   : > { %v11833_v53 = vadd.f32 %v11832_v29, %v11831_v38  ;;  %v11860_v56 = vpop.f32.mrb[125].mxu1  ;;  %v11834_v24 = vpop.f32.mrb[126].mxu0 }
 0x7fe   : > { %v11861_v43 = vadd.f32 %v11860_v56, %v11859_v21  ;;  %v11862_v8 = vpop.f32.mrb[126].mxu1  ;;  %v11835_v20 = vpop.f32.mrb[127].mxu0 }
 0x7ff   : > { %v9050_v46 = vadd.f32 %v11833_v53, %v9001_v25  ;;  %v11836_v9 = vadd.f32 %v11835_v20, %v11834_v24  ;;  %v11863_v22 = vpop.f32.mrb[127].mxu1 }
 0x800   : > { %v11864_v14 = vadd.f32 %v11863_v22, %v11862_v8 }
 0x801   : > { %v9099_v48 = vadd.f32 %v11861_v43, %v9050_v46  ;;  %v9053_v42 = vadd.f32 %v11836_v9, %v9004_v19  ;;  %v13274_v19 = vld [vmem:[%s16215_s10 + $0x20] sm:$0xff]  }
 0x802   : > { %12006 = vmatpush3.bf16.msra.mxu1 %v13274_v19  ;;  %v13252_v19 = vld [vmem:[%s16214_s9 + $0x30] sm:$0xff]  }
 0x803   : > { %v9102_v47 = vadd.f32 %v11864_v14, %v9053_v42  ;;  %12007 = vmatprep.subr.bf16.mxu1 %v13276_v13  ;;  %v13256_v13 = vld [vmem:[%s16214_s9 + $0x50] sm:$0xff]  }
 0x806   : > { %12008 = vmatpush3.bf16.msra.mxu1 %v13278_v39  ;;  %v13263_v39 = vld [vmem:[%s16214_s9 + $0x88] sm:$0xff]  }
 0x807   : > { %12009 = vmatprep.subr.bf16.mxu1 %v13280_v49  ;;  %v13284_v49 = vld [vmem:[%s16215_s10 + $0x78] sm:$0xff]  }
 0x814   : > { %v11881_v36 = vpop.f32.mrb[128].mxu0 }
 0x815   : > { %v11909_v15 = vpop.f32.mrb[128].mxu1  ;;  %v11882_v52 = vpop.f32.mrb[129].mxu0 }
 0x816   : > { %v11883_v5 = vadd.f32 %v11882_v52, %v11881_v36  ;;  %v11910_v57 = vpop.f32.mrb[129].mxu1  ;;  %v11884_v11 = vpop.f32.mrb[130].mxu0 }
 0x817   : > { %v11911_v2 = vadd.f32 %v11910_v57, %v11909_v15  ;;  %v11912_v45 = vpop.f32.mrb[130].mxu1  ;;  %v11885_v3 = vpop.f32.mrb[131].mxu0 }
 0x818   : > { %v9140_v16 = vadd.f32 %v11883_v5, %v9091_v37  ;;  %v11886_v7 = vadd.f32 %v11885_v3, %v11884_v11  ;;  %v11913_v60 = vpop.f32.mrb[131].mxu1  ;;  %v13282_v37 = vld [vmem:[%s16215_s10 + $0x30] sm:$0xff]  }
 0x819   : > { %v11914_v32 = vadd.f32 %v11913_v60, %v11912_v45  ;;  %12010 = vmatpush3.bf16.msra.mxu1 %v13282_v37  ;;  %v13286_v37 = vld [vmem:[%s16215_s10 + $0x38] sm:$0xff]  }
 0x81a   : > { %v9189_v58 = vadd.f32 %v11911_v2, %v9140_v16  ;;  %v9143_v61 = vadd.f32 %v11886_v7, %v9094_v59  ;;  %12011 = vmatprep.subr.bf16.mxu1 %v13284_v49  ;;  %v13330_v49 = vld [vmem:[%s16215_s10 + $0x228] sm:$0xff]  }
 0x81c   : > { %v9192_v63 = vadd.f32 %v11914_v32, %v9143_v61  ;;  %v11887_v12 = vpop.f32.mrb[132].mxu0  ;;  %v13247_v61 = vld [vmem:[%s16214_s9 + $0x8] sm:$0xff]  }
 0x81d   : > { %v11915_v44 = vpop.f32.mrb[132].mxu1  ;;  %v11888_v30 = vpop.f32.mrb[133].mxu0  ;;  %12012 = vmatpush3.bf16.msra.mxu1 %v13286_v37  ;;  %v13333_v37 = vld [vmem:[%s16215_s10 + $0x230] sm:$0xff]  }
 0x81e   : > { %v11889_v35 = vadd.f32 %v11888_v30, %v11887_v12  ;;  %v11916_v0 = vpop.f32.mrb[133].mxu1  ;;  %v11890_v25 = vpop.f32.mrb[134].mxu0  ;;  %v13279_v12 = vld [vmem:[%s16215_s10 + $0x108] sm:$0xff]   ;;  %v13249_v30 = vld [vmem:[%s16214_s9 + $0x18] sm:$0xff]  }
 0x81f   : > { %v11917_v50 = vadd.f32 %v11916_v0, %v11915_v44  ;;  %v11918_v28 = vpop.f32.mrb[134].mxu1  ;;  %v11891_v33 = vpop.f32.mrb[135].mxu0  ;;  %v13281_v44 = vld [vmem:[%s16215_s10 + $0x150] sm:$0xff]  }
 0x820   : > { %v9148_v23 = vadd.f32 %v11889_v35, %v9099_v48  ;;  %v11892_v26 = vadd.f32 %v11891_v33, %v11890_v25  ;;  %v11919_v31 = vpop.f32.mrb[135].mxu1  ;;  %v13250_v35 = vld [vmem:[%s16214_s9 + $0x20] sm:$0xff]   ;;  %v13283_v0 = vld [vmem:[%s16215_s10 + $0x110] sm:$0xff]   ;;  %v13251_v25 = vld [vmem:[%s16214_s9 + $0x28] sm:$0xff]  }
 0x821   : > { %v11920_v51 = vadd.f32 %v11919_v31, %v11918_v28  ;;  %v13254_v28 = vld [vmem:[%s16214_s9 + $0x40] sm:$0xff]   ;;  %v13255_v33 = vld [vmem:[%s16214_s9 + $0x48] sm:$0xff]  }
 0x822   : > { %v9197_v34 = vadd.f32 %v11917_v50, %v9148_v23  ;;  %v9151_v6 = vadd.f32 %v11892_v26, %v9102_v47  ;;  %v13253_v50 = vld [vmem:[%s16214_s9 + $0x38] sm:$0xff]   ;;  %v13258_v26 = vld [vmem:[%s16214_s9 + $0x60] sm:$0xff]   ;;  %v13259_v31 = vld [vmem:[%s16214_s9 + $0x68] sm:$0xff]  }
 0x823   : > { %v13257_v23 = vld [vmem:[%s16214_s9 + $0x58] sm:$0xff]  }
 0x824   : > { %v9200_v18 = vadd.f32 %v11920_v51, %v9151_v6  ;;  %v13260_v51 = vld [vmem:[%s16214_s9 + $0x70] sm:$0xff]   ;;  %v13262_v6 = vld [vmem:[%s16214_s9 + $0x80] sm:$0xff]  }
 0x835   : > { %v11937_v41 = vpop.f32.mrb[136].mxu0 }
 0x836   : > { %v11965_v59 = vpop.f32.mrb[136].mxu1  ;;  %v11938_v38 = vpop.f32.mrb[137].mxu0 }
 0x837   : > { %v11939_v21 = vadd.f32 %v11938_v38, %v11937_v41  ;;  %v11966_v29 = vpop.f32.mrb[137].mxu1  ;;  %v11940_v53 = vpop.f32.mrb[138].mxu0  ;;  %v13287_v41 = vld [vmem:[%s16215_s10 + $0x118] sm:$0xff]   ;;  %v13289_v38 = vld [vmem:[%s16215_s10 + $0x120] sm:$0xff]  }
 0x838   : > { %v11967_v56 = vadd.f32 %v11966_v29, %v11965_v59  ;;  %v11968_v24 = vpop.f32.mrb[138].mxu1  ;;  %v11941_v43 = vpop.f32.mrb[139].mxu0  ;;  %v13288_v59 = vld [vmem:[%s16215_s10 + $0x160] sm:$0xff]   ;;  %v13291_v29 = vld [vmem:[%s16215_s10 + $0x128] sm:$0xff]  }
 0x839   : > { %v9238_v8 = vadd.f32 %v11939_v21, %v9189_v58  ;;  %v11942_v20 = vadd.f32 %v11941_v43, %v11940_v53  ;;  %v11969_v46 = vpop.f32.mrb[139].mxu1  ;;  %v13273_v58 = vld [vmem:[%s16215_s10 + $0x140] sm:$0xff]   ;;  %v13290_v21 = vld [vmem:[%s16215_s10 + $0x168] sm:$0xff]   ;;  %v13292_v53 = vld [vmem:[%s16215_s10 + $0x170] sm:$0xff]  }
 0x83a   : > { %v11970_v9 = vadd.f32 %v11969_v46, %v11968_v24  ;;  %v13294_v24 = vld [vmem:[%s16215_s10 + $0x178] sm:$0xff]  }
 0x83b   : > { %v9287_v22 = vadd.f32 %v11967_v56, %v9238_v8  ;;  %v9241_v14 = vadd.f32 %v11942_v20, %v9192_v63  ;;  %v13277_v63 = vld [vmem:[%s16215_s10 + $0x148] sm:$0xff]   ;;  %v13293_v56 = vld [vmem:[%s16215_s10 + $0x130] sm:$0xff]   ;;  %v13295_v43 = vld [vmem:[%s16215_s10 + $0x138] sm:$0xff]  }
 0x83c   : > { %v13296_v8 = vld [vmem:[%s16215_s10 + $0xc0] sm:$0xff]  }
 0x83d   : > { %v9290_v48 = vadd.f32 %v11970_v9, %v9241_v14  ;;  %v11943_v42 = vpop.f32.mrb[140].mxu0  ;;  %v9301_v1 = vmax.f32 %v9287_v22, 0.0  ;;  %12025 = vmatprep.subr.bf16.mxu1 %v13296_v8  ;;  %v13315_v20 = vld [vmem:[%s16215_s10 + $0x200] sm:$0xff]  }
 0x83e   : > { %v11971_v47 = vpop.f32.mrb[140].mxu1  ;;  %v11944_v40 = vpop.f32.mrb[141].mxu0 }
 0x83f   : > { %v9302_v55 = vmax.f32 %v9290_v48, 0.0  ;;  %v11945_v10 = vadd.f32 %v11944_v40, %v11943_v42  ;;  %v11972_v54 = vpop.f32.mrb[141].mxu1  ;;  %v11946_v36 = vpop.f32.mrb[142].mxu0  ;;  %v13297_v42 = vld [vmem:[%s16215_s10 + $0x80] sm:$0xff]   ;;  %v13298_v40 = vld [vmem:[%s16215_s10 + $0xc8] sm:$0xff]  }
 0x840   : > { %v11973_v15 = vadd.f32 %v11972_v54, %v11971_v47  ;;  %v11974_v52 = vpop.f32.mrb[142].mxu1  ;;  %v11947_v5 = vpop.f32.mrb[143].mxu0 }
 0x841   : > { %v9246_v57 = vadd.f32 %v11945_v10, %v9197_v34  ;;  %v11948_v11 = vadd.f32 %v11947_v5, %v11946_v36  ;;  %v11975_v27 = vpop.f32.mrb[143].mxu1  ;;  %v9305_v2 = vpack.c.bf16 %v9302_v55, %v9301_v1  ;;  %v13261_v34 = vld [vmem:[%s16214_s9 + $0x78] sm:$0xff]   ;;  %v13299_v1 = vld [vmem:[%s16215_s10 + $0x88] sm:$0xff]   ;;  %v13300_v10 = vld [vmem:[%s16215_s10 + $0xd0] sm:$0xff]  }
 0x842   : > { %v11976_v45 = vadd.f32 %v11975_v27, %v11974_v52  ;;  %v13301_v5 = vld [vmem:[%s16215_s10 + $0x90] sm:$0xff]   ;;  %v13303_v27 = vld [vmem:[%s16215_s10 + $0x98] sm:$0xff]  }
 0x843   : > { %v9295_v3 = vadd.f32 %v11973_v15, %v9246_v57  ;;  %v9249_v62 = vadd.f32 %v11948_v11, %v9200_v18  ;;  %12119 = vmatprep.subr.bf16.mxu0 %v9305_v2  ;;  %v13285_v18 = vld [vmem:[%s16215_s10 + $0x158] sm:$0xff]  }
 0x844   : > { %12120 = vmatpush3.bf16.msra.mxu0 %v9305_v2  ;;  %v13302_v11 = vld [vmem:[%s16215_s10 + $0xd8] sm:$0xff]  }
 0x845   : > { %v9298_v16 = vadd.f32 %v11976_v45, %v9249_v62  ;;  %v9303_v7 = vmax.f32 %v9295_v3, 0.0  ;;  %v13304_v45 = vld [vmem:[%s16215_s10 + $0xe0] sm:$0xff]  }
 0x847   : > { %v9304_v60 = vmax.f32 %v9298_v16, 0.0 }
 0x849   : > { %v9306_v32 = vpack.c.bf16 %v9304_v60, %v9303_v7  ;;  %v13305_v60 = vld [vmem:[%s16215_s10 + $0xa0] sm:$0xff]  }
 0x84b   : > { %12121 = vmatprep.subr.bf16.mxu0 %v9306_v32 }
 0x84c   : > { %12122 = vmatpush3.bf16.msra.mxu0 %v9306_v32 }
 0x84d   : > { %12053 = vmatprep.subr.bf16.mxu0 %v13273_v58  ;;  %v13306_v58 = vld [vmem:[%s16215_s10 + $0xe8] sm:$0xff]  }
 0x84f   : > { %12124 = vmatmul.mubr.msk.bf16.vlgmr.msra.gmra.mrb[144].mxu0 %vm9433_vm1, %v13247_v61  ;;  %v13318_v61 = vld [vmem:[%s16215_s10 + $0x208] sm:$0xff]  }
 0x850   : > { %12127 = vmatprep.mubr.msk.bf16.mxu0 %vm9433_vm1, %v13248_v4  ;;  %12054 = vmatpush3.bf16.msra.mxu0 %v13275_v17  ;;  %v13307_v4 = vld [vmem:[%s16215_s10 + $0xa8] sm:$0xff]  }
 0x851   : > { %12055 = vmatprep.subr.bf16.mxu0 %v13277_v63  ;;  %v13308_v63 = vld [vmem:[%s16215_s10 + $0xf0] sm:$0xff]  }
 0x854   : > { %12056 = vmatpush3.bf16.msra.mxu0 %v13279_v12  ;;  %v13321_v12 = vld [vmem:[%s16215_s10 + $0x210] sm:$0xff]  }
 0x855   : > { %12057 = vmatprep.subr.bf16.mxu0 %v13281_v44 }
 0x857   : > { %12128 = vmatmul.mubr.msk.bf16.gmra.mrb[148].mxu0 %vm9433_vm1, %v13249_v30 }
 0x858   : > { %12131 = vmatprep.mubr.msk.bf16.mxu0 %vm9433_vm1, %v13250_v35  ;;  %12058 = vmatpush3.bf16.msra.mxu0 %v13283_v0 }
 0x859   : > { %12059 = vmatprep.subr.bf16.mxu0 %v13285_v18 }
 0x85c   : > { %12060 = vmatpush3.bf16.msra.mxu0 %v13287_v41 }
 0x85d   : > { %12061 = vmatprep.subr.bf16.mxu0 %v13288_v59 }
 0x85f   : > { %12132 = vmatmul.mubr.msk.bf16.gmra.mrb[152].mxu0 %vm9433_vm1, %v13251_v25  ;;  %v13309_v25 = vld [vmem:[%s16215_s10 + $0xb0] sm:$0xff]  }
 0x860   : > { %12135 = vmatprep.mubr.msk.bf16.mxu0 %vm9433_vm1, %v13252_v19  ;;  %12062 = vmatpush3.bf16.msra.mxu0 %v13289_v38 }
 0x861   : > { %12063 = vmatprep.subr.bf16.mxu0 %v13290_v21 }
 0x864   : > { %12064 = vmatpush3.bf16.msra.mxu0 %v13291_v29 }
 0x865   : > { %12065 = vmatprep.subr.bf16.mxu0 %v13292_v53  ;;  %v13335_v53 = vld [vmem:[%s16215_s10 + $0x238] sm:$0xff]  }
 0x867   : > { %12136 = vmatmul.mubr.msk.bf16.gmra.mrb[156].mxu0 %vm9433_vm1, %v13253_v50  ;;  %v13310_v50 = vld [vmem:[%s16215_s10 + $0xf8] sm:$0xff]  }
 0x868   : > { %12139 = vmatprep.mubr.msk.bf16.mxu0 %vm9433_vm1, %v13254_v28  ;;  %12066 = vmatpush3.bf16.msra.mxu0 %v13293_v56  ;;  %v13324_v28 = vld [vmem:[%s16215_s10 + $0x218] sm:$0xff]  }
 0x869   : > { %12067 = vmatprep.subr.bf16.mxu0 %v13294_v24 }
 0x86c   : > { %12068 = vmatpush3.bf16.msra.mxu0 %v13295_v43 }
 0x86d   : > { %12159 = vmatprep.subr.bf16.mxu0 %v13315_v20 }
 0x86f   : > { %12140 = vmatmul.mubr.msk.bf16.gmra.mrb[160].mxu0 %vm9433_vm1, %v13255_v33  ;;  %v13311_v33 = vld [vmem:[%s16215_s10 + $0xb8] sm:$0xff]  }
 0x870   : > { %12143 = vmatprep.mubr.msk.bf16.mxu0 %vm9433_vm1, %v13256_v13 }
 0x877   : > { %12144 = vmatmul.mubr.msk.bf16.gmra.mrb[164].mxu0 %vm9433_vm1, %v13257_v23  ;;  %v13312_v23 = vld [vmem:[%s16215_s10 + $0x1c0] sm:$0xff]  }
 0x878   : > { %12147 = vmatprep.mubr.msk.bf16.mxu0 %vm9433_vm1, %v13258_v26  ;;  %v13327_v26 = vld [vmem:[%s16215_s10 + $0x220] sm:$0xff]  }
 0x87f   : > { %12148 = vmatmul.mubr.msk.bf16.gmra.mrb[168].mxu0 %vm9433_vm1, %v13259_v31 }
 0x880   : > { %12151 = vmatprep.mubr.msk.bf16.mxu0 %vm9433_vm1, %v13260_v51 }
 0x887   : > { %12152 = vmatmul.mubr.msk.bf16.gmra.mrb[172].mxu0 %vm9433_vm1, %v13261_v34 }
 0x888   : > { %12155 = vmatprep.mubr.msk.bf16.mxu0 %vm9433_vm1, %v13262_v6 }
 0x88f   : > { %12156 = vmatmul.mubr.msk.bf16.gmra.mrb[176].mxu0 %vm9433_vm1, %v13263_v39 }
 0x922   : > { %v12125_v46 = vpop.f32.mrb[144].mxu0 }
 0x923   : > { %v9522_v9 = vpop.f32.mrb[145].mxu0 }
 0x924   : > { %v12126_v22 = vpop.f32.mrb[146].mxu0 }
 0x925   : > { %v9666_v14 = vpack.c.bf16 %v12126_v22, %v12125_v46  ;;  %v9525_v48 = vpop.f32.mrb[147].mxu0  ;;  %v13314_v22 = vld [vmem:[%s16215_s10 + $0x1c8] sm:$0xff]  }
 0x926   : > { %v9665_v47 = vpack.c.bf16 %v9525_v48, %v9522_v9  ;;  %v13313_v9 = vld [vmem:[%s16215_s10 + $0x180] sm:$0xff]   ;;  %v13316_v48 = vld [vmem:[%s16215_s10 + $0x188] sm:$0xff]  }
 0x927   : > { %10298 = vmatprep.mubr.bf16.mxu1 %v9666_v14 }
 0x928   : > { %10299 = vmatmul.mubr.bf16.vlgmr.msra.gmra.mrb[144].mxu1 %v9665_v47  ;;  %v13317_v47 = vld [vmem:[%s16215_s10 + $0x1d0] sm:$0xff]  }
 0x929   : > { %12026 = vmatpush3.bf16.msra.mxu1 %v13297_v42 }
 0x92a   : > { %v16013_v55 = vpop.f32.mrb[148].mxu0  ;;  %12027 = vmatprep.subr.bf16.mxu1 %v13298_v40 }
 0x92b   : > { %v16018_v54 = vpop.f32.mrb[149].mxu0 }
 0x92c   : > { %v16020_v36 = vpop.f32.mrb[150].mxu0 }
 0x92d   : > { %v9668_v15 = vpack.c.bf16 %v16020_v36, %v16013_v55  ;;  %v16024_v52 = vpop.f32.mrb[151].mxu0  ;;  %12028 = vmatpush3.bf16.msra.mxu1 %v13299_v1  ;;  %v13320_v36 = vld [vmem:[%s16215_s10 + $0x1d8] sm:$0xff]  }
 0x92e   : > { %v9667_v57 = vpack.c.bf16 %v16024_v52, %v16018_v54  ;;  %12029 = vmatprep.subr.bf16.mxu1 %v13300_v10  ;;  %v13319_v54 = vld [vmem:[%s16215_s10 + $0x190] sm:$0xff]  }
 0x931   : > { %12030 = vmatpush3.bf16.msra.mxu1 %v13301_v5  ;;  %v13323_v5 = vld [vmem:[%s16215_s10 + $0x1e0] sm:$0xff]  }
 0x932   : > { %v12133_v2 = vpop.f32.mrb[152].mxu0  ;;  %12031 = vmatprep.subr.bf16.mxu1 %v13302_v11 }
 0x933   : > { %v9554_v3 = vpop.f32.mrb[153].mxu0 }
 0x934   : > { %v12134_v62 = vpop.f32.mrb[154].mxu0 }
 0x935   : > { %v9670_v16 = vpack.c.bf16 %v12134_v62, %v12133_v2  ;;  %v9557_v7 = vpop.f32.mrb[155].mxu0  ;;  %12032 = vmatpush3.bf16.msra.mxu1 %v13303_v27  ;;  %v13326_v62 = vld [vmem:[%s16215_s10 + $0x1e8] sm:$0xff]  }
 0x936   : > { %v9669_v32 = vpack.c.bf16 %v9557_v7, %v9554_v3  ;;  %12033 = vmatprep.subr.bf16.mxu1 %v13304_v45  ;;  %v13325_v45 = vld [vmem:[%s16215_s10 + $0x1a0] sm:$0xff]   ;;  %v13329_v7 = vld [vmem:[%s16215_s10 + $0x1f0] sm:$0xff]  }
 0x937   : > { %10392 = vmatprep.mubr.bf16.mxu0 %v9670_v16  ;;  %v13328_v16 = vld [vmem:[%s16215_s10 + $0x1a8] sm:$0xff]  }
 0x938   : > { %10393 = vmatmul.mubr.bf16.vlgmr.msra.gmra.mrb[180].mxu0 %v9669_v32  ;;  %v13332_v32 = vld [vmem:[%s16215_s10 + $0x1f8] sm:$0xff]  }
 0x939   : > { %12034 = vmatpush3.bf16.msra.mxu1 %v13305_v60  ;;  %12160 = vmatpush3.bf16.msra.mxu0 %v13315_v20  ;;  %v13331_v60 = vld [vmem:[%s16215_s10 + $0x1b0] sm:$0xff]  }
 0x93a   : > { %v16052_v17 = vpop.f32.mrb[156].mxu0  ;;  %12035 = vmatprep.subr.bf16.mxu1 %v13306_v58  ;;  %12161 = vmatprep.subr.bf16.mxu0 %v13318_v61  ;;  %v13334_v58 = vld [vmem:[%s16215_s10 + $0x1b8] sm:$0xff]  }
 0x93b   : > { %v16060_v44 = vpop.f32.mrb[157].mxu0 }
 0x93c   : > { %v16062_v30 = vpop.f32.mrb[158].mxu0 }
 0x93d   : > { %v9672_v35 = vpack.c.bf16 %v16062_v30, %v16052_v17  ;;  %v16066_v0 = vpop.f32.mrb[159].mxu0  ;;  %12036 = vmatpush3.bf16.msra.mxu1 %v13307_v4  ;;  %12162 = vmatpush3.bf16.msra.mxu0 %v13318_v61 }
 0x93e   : > { %v9671_v19 = vpack.c.bf16 %v16066_v0, %v16060_v44  ;;  %12037 = vmatprep.subr.bf16.mxu1 %v13308_v63  ;;  %12163 = vmatprep.subr.bf16.mxu0 %v13321_v12  ;;  %v11392_v44 = vld [vmem:[%s16216_s11] ss:$0 sm:$0xff] }
 0x941   : > { %12038 = vmatpush3.bf16.msra.mxu1 %v13309_v25  ;;  %12164 = vmatpush3.bf16.msra.mxu0 %v13321_v12 }
 0x942   : > { %v12141_v13 = vpop.f32.mrb[160].mxu0  ;;  %12039 = vmatprep.subr.bf16.mxu1 %v13310_v50  ;;  %12165 = vmatprep.subr.bf16.mxu0 %v13324_v28 }
 0x943   : > { %v9586_v31 = vpop.f32.mrb[161].mxu0 }
 0x944   : > { %v12142_v51 = vpop.f32.mrb[162].mxu0 }
 0x945   : > { %v9674_v34 = vpack.c.bf16 %v12142_v51, %v12141_v13  ;;  %v9589_v6 = vpop.f32.mrb[163].mxu0  ;;  %12040 = vmatpush3.bf16.msra.mxu1 %v13311_v33  ;;  %12166 = vmatpush3.bf16.msra.mxu0 %v13324_v28 }
 0x946   : > { %v9673_v39 = vpack.c.bf16 %v9589_v6, %v9586_v31  ;;  %12081 = vmatprep.subr.bf16.mxu1 %v13312_v23  ;;  %12167 = vmatprep.subr.bf16.mxu0 %v13327_v26 }
 0x949   : > { %12168 = vmatpush3.bf16.msra.mxu0 %v13327_v26 }
 0x94a   : > { %v12145_v18 = vpop.f32.mrb[164].mxu0  ;;  %12169 = vmatprep.subr.bf16.mxu0 %v13330_v49 }
 0x94b   : > { %v9602_v41 = vpop.f32.mrb[165].mxu0 }
 0x94c   : > { %v12146_v59 = vpop.f32.mrb[166].mxu0 }
 0x94d   : > { %v9676_v38 = vpack.c.bf16 %v12146_v59, %v12145_v18  ;;  %v9605_v21 = vpop.f32.mrb[167].mxu0  ;;  %12170 = vmatpush3.bf16.msra.mxu0 %v13330_v49 }
 0x94e   : > { %v9675_v29 = vpack.c.bf16 %v9605_v21, %v9602_v41  ;;  %12171 = vmatprep.subr.bf16.mxu0 %v13333_v37 }
 0x950   : > { %10305 = vmatprep.mubr.bf16.mxu1 %v9675_v29 }
 0x951   : > { %10306 = vmatmul.mubr.bf16.gmra.mrb[148].mxu1 %v9674_v34  ;;  %12172 = vmatpush3.bf16.msra.mxu0 %v13333_v37 }
 0x952   : > { %10345 = vmatprep.mubr.bf16.mxu1 %v9668_v15  ;;  %v12149_v56 = vpop.f32.mrb[168].mxu0  ;;  %12173 = vmatprep.subr.bf16.mxu0 %v13335_v53  ;;  %v13322_v15 = vld [vmem:[%s16215_s10 + $0x198] sm:$0xff]  }
 0x953   : > { %v9618_v24 = vpop.f32.mrb[169].mxu0 }
 0x954   : > { %v12150_v43 = vpop.f32.mrb[170].mxu0 }
 0x955   : > { %v9678_v8 = vpack.c.bf16 %v12150_v43, %v12149_v56  ;;  %v9621_v20 = vpop.f32.mrb[171].mxu0  ;;  %12174 = vmatpush3.bf16.msra.mxu0 %v13335_v53 }
 0x956   : > { %v9677_v46 = vpack.c.bf16 %v9621_v20, %v9618_v24 }
 0x959   : > { %10346 = vmatmul.mubr.bf16.vlgmr.msra.gmra.mrb[152].mxu1 %v9667_v57 }
 0x95a   : > { %12082 = vmatpush3.bf16.msra.mxu1 %v13313_v9  ;;  %v12153_v14 = vpop.f32.mrb[172].mxu0  ;;  %10352 = vmatprep.mubr.bf16.mxu1 %v9677_v46 }
 0x95b   : > { %v9634_v42 = vpop.f32.mrb[173].mxu0  ;;  %12083 = vmatprep.subr.bf16.mxu1 %v13314_v22 }
 0x95c   : > { %v12154_v40 = vpop.f32.mrb[174].mxu0 }
 0x95d   : > { %v9680_v1 = vpack.c.bf16 %v12154_v40, %v12153_v14  ;;  %v9637_v55 = vpop.f32.mrb[175].mxu0 }
 0x95e   : > { %v9679_v10 = vpack.c.bf16 %v9637_v55, %v9634_v42  ;;  %12084 = vmatpush3.bf16.msra.mxu1 %v13316_v48 }
 0x95f   : > { %12085 = vmatprep.subr.bf16.mxu1 %v13317_v47 }
 0x960   : > { %10399 = vmatprep.mubr.bf16.mxu0 %v9679_v10 }
 0x961   : > { %10353 = vmatmul.mubr.bf16.gmra.mrb[156].mxu1 %v9676_v38  ;;  %10400 = vmatmul.mubr.bf16.gmra.mrb[184].mxu0 %v9678_v8 }
 0x962   : > { %12086 = vmatpush3.bf16.msra.mxu1 %v13319_v54  ;;  %10439 = vmatprep.mubr.bf16.mxu1 %v9672_v35  ;;  %v12157_v52 = vpop.f32.mrb[176].mxu0 }
 0x963   : > { %12175 = vmatprep.mubr.bf16.mxu0 %v9673_v39  ;;  %12087 = vmatprep.subr.bf16.mxu1 %v13320_v36  ;;  %v9650_v57 = vpop.f32.mrb[177].mxu0 }
 0x964   : > { %v12158_v11 = vpop.f32.mrb[178].mxu0 }
 0x965   : > { %v9682_v27 = vpack.c.bf16 %v12158_v11, %v12157_v52  ;;  %v9653_v2 = vpop.f32.mrb[179].mxu0 }
 0x966   : > { %12088 = vmatpush3.bf16.msra.mxu1 %v13322_v15  ;;  %v9681_v3 = vpack.c.bf16 %v9653_v2, %v9650_v57 }
 0x967   : > { %12089 = vmatprep.subr.bf16.mxu1 %v13323_v5 }
 0x969   : > { %12176 = vmatmul.mubr.bf16.vlgmr.msra.gmra.mrb[188].mxu0 %v9682_v27 }
 0x96a   : > { %12090 = vmatpush3.bf16.msra.mxu1 %v13325_v45 }
 0x96b   : > { %12091 = vmatprep.subr.bf16.mxu1 %v13326_v62 }
 0x96e   : > { %12092 = vmatpush3.bf16.msra.mxu1 %v13328_v16 }
 0x96f   : > { %12093 = vmatprep.subr.bf16.mxu1 %v13329_v7 }
 0x972   : > { %12094 = vmatpush3.bf16.msra.mxu1 %v13331_v60 }
 0x973   : > { %12095 = vmatprep.subr.bf16.mxu1 %v13332_v32 }
 0x976   : > { %12096 = vmatpush3.bf16.msra.mxu1 %v13334_v58 }
 0x979   : > { %10440 = vmatmul.mubr.bf16.vlgmr.msra.gmra.mrb[160].mxu1 %v9671_v19 }
 0x97a   : > { %10446 = vmatprep.mubr.bf16.mxu1 %v9681_v3 }
 0x981   : > { %10447 = vmatmul.mubr.bf16.gmra.mrb[164].mxu1 %v9680_v1 }
 0x9fb   : > { %v12013_v61 = vpop.f32.mrb[144].mxu1 }
 0x9fc   : > { %v12014_v4 = vpop.f32.mrb[145].mxu1 }
 0x9fd   : > { %v12015_v17 = vadd.f32 %v12014_v4, %v12013_v61  ;;  %v12016_v63 = vpop.f32.mrb[146].mxu1 }
 0x9fe   : > { %v12017_v12 = vpop.f32.mrb[147].mxu1 }
 0x9ff   : > { %v10301_v51 = vadd.f32 %v12015_v17, %v11392_v44 }
 0xa0b   : > { %v12069_v30 = vpop.f32.mrb[180].mxu0 }
 0xa0c   : > { %v12070_v35 = vpop.f32.mrb[181].mxu0 }
 0xa0d   : > { %v12071_v25 = vadd.f32 %v12070_v35, %v12069_v30  ;;  %v12072_v50 = vpop.f32.mrb[182].mxu0 }
 0xa0e   : > { %v12073_v28 = vpop.f32.mrb[183].mxu0 }
 0xa24   : > { %v12019_v33 = vpop.f32.mrb[148].mxu1 }
 0xa25   : > { %v12020_v13 = vpop.f32.mrb[149].mxu1 }
 0xa26   : > { %v12021_v23 = vadd.f32 %v12020_v13, %v12019_v33  ;;  %v12022_v26 = vpop.f32.mrb[150].mxu1 }
 0xa27   : > { %v12023_v31 = vpop.f32.mrb[151].mxu1 }
 0xa28   : > { %v10308_v21 = vadd.f32 %v12021_v23, %v11392_v44 }
 0xa2c   : > { %v12041_v0 = vpop.f32.mrb[152].mxu1 }
 0xa2d   : > { %v12042_v19 = vpop.f32.mrb[153].mxu1 }
 0xa2e   : > { %v12043_v34 = vadd.f32 %v12042_v19, %v12041_v0  ;;  %v12044_v6 = vpop.f32.mrb[154].mxu1 }
 0xa2f   : > { %v12045_v39 = vpop.f32.mrb[155].mxu1 }
 0xa30   : > { %v10348_v49 = vadd.f32 %v12043_v34, %v10301_v51 }
 0xa32   : > { %v10395_v18 = vadd.f32 %v12071_v25, %v10348_v49 }
 0xa34   : > { %v12047_v37 = vpop.f32.mrb[156].mxu1  ;;  %v12075_v41 = vpop.f32.mrb[184].mxu0 }
 0xa35   : > { %v12048_v59 = vpop.f32.mrb[157].mxu1  ;;  %v12076_v38 = vpop.f32.mrb[185].mxu0 }
 0xa36   : > { %v12049_v29 = vadd.f32 %v12048_v59, %v12047_v37  ;;  %v12050_v53 = vpop.f32.mrb[158].mxu1  ;;  %v12077_v56 = vadd.f32 %v12076_v38, %v12075_v41  ;;  %v12078_v24 = vpop.f32.mrb[186].mxu0 }
 0xa37   : > { %v12051_v43 = vpop.f32.mrb[159].mxu1  ;;  %v12079_v8 = vpop.f32.mrb[187].mxu0 }
 0xa38   : > { %v10355_v20 = vadd.f32 %v12049_v29, %v10308_v21 }
 0xa3a   : > { %v10402_v46 = vadd.f32 %v12077_v56, %v10355_v20 }
 0xa3c   : > { %v12177_v9 = vpop.f32.mrb[188].mxu0 }
 0xa3d   : > { %v10488_v22 = vpop.f32.mrb[189].mxu0 }
 0xa3e   : > { %v12178_v14 = vpop.f32.mrb[190].mxu0 }
 0xa3f   : > { %v10491_v48 = vpop.f32.mrb[191].mxu0 }
 0xa4c   : > { %v12097_v42 = vpop.f32.mrb[160].mxu1 }
 0xa4d   : > { %v12098_v47 = vpop.f32.mrb[161].mxu1 }
 0xa4e   : > { %v12099_v40 = vadd.f32 %v12098_v47, %v12097_v42  ;;  %v12100_v1 = vpop.f32.mrb[162].mxu1 }
 0xa4f   : > { %v12101_v55 = vpop.f32.mrb[163].mxu1 }
 0xa50   : > { %v10442_v10 = vadd.f32 %v12099_v40, %v10395_v18 }
 0xa52   : > { %v10489_v54 = vadd.f32 %v10488_v22, %v10442_v10 }
 0xa54   : > { %v10501_v36 = vmax.f32 %v10489_v54, 0.0  ;;  %v12103_v15 = vpop.f32.mrb[164].mxu1 }
 0xa55   : > { %v12104_v52 = vpop.f32.mrb[165].mxu1 }
 0xa56   : > { %v10504_v5 = vsel %vm10503_vm2, %v10501_v36, 0.0  ;;  %v12105_v57 = vadd.f32 %v12104_v52, %v12103_v15  ;;  %v12106_v11 = vpop.f32.mrb[166].mxu1 }
 0xa57   : > { %v10505_v27 = vrot.slane %v10504_v5, 4  ;;  %v12107_v2 = vpop.f32.mrb[167].mxu1 }
 0xa58   : > { %v10449_v45 = vadd.f32 %v12105_v57, %v10402_v46 }
 0xa59   : > { %v10506_v3 = vadd.f32 %v10505_v27, %v10504_v5 }
 0xa5a   : > { %v10496_v62 = vadd.f32 %v12177_v9, %v10449_v45 }
 0xa5b   : > { %v10507_v16 = vrot.slane %v10506_v3, 2 }
 0xa5c   : > { %v10502_v7 = vmax.f32 %v10496_v62, 0.0 }
 0xa5d   : > { %v10508_v32 = vadd.f32 %v10507_v16, %v10506_v3 }
 0xa5e   : > { %v10511_v60 = vsel %vm10503_vm2, %v10502_v7, 0.0 }
 0xa5f   : > { %v10512_v58 = vrot.slane %v10511_v60, 4  ;;  %v10509_v4 = vrot.slane %v10508_v32, 1 }
 0xa61   : > { %v10513_v61 = vadd.f32 %v10512_v58, %v10511_v60  ;;  %v10510_v12 = vadd.f32 %v10509_v4, %v10508_v32 }
 0xa63   : > { %v10514_v17 = vrot.slane %v10513_v61, 2  ;;  %v10519_v25 = vmul.f32 0.25, %v10510_v12 }
 0xa65   : > { %v10515_v63 = vadd.f32 %v10514_v17, %v10513_v61 }
 0xa67   : > { %v10516_v30 = vrot.slane %v10515_v63, 1 }
 0xa69   : > { %v10517_v35 = vadd.f32 %v10516_v30, %v10515_v63 }
 0xa6b   : > { %v10520_v50 = vmul.f32 0.25, %v10517_v35 }
 0xa6d   : > { %v10524_v28 = vsel %vm10523_vm3, %v10520_v50, %v10519_v25 }
 0xa6e   : > { %10526 = vst [vmem:[#allocation5] sm:$0x3] %v10524_v28 }
 0xa6f PF: > { %p12379_p6 = scmp.eq.s32.totalorder %s13485_s26, 8  ;;  %s13407_s23 = smov [#allocation3]  }
 0xa70   : > { %s10534_s24 = sshll.u32 %s13407_s23, 4  ;;  %s13408_s27 = smov [#allocation5]   ;;  %s10535_s24 = int_to_ptr.vmem [resolvable:$true] %s10534_s24 }
 0xa71   : > { %s10545_s28 = sshll.u32 %s13408_s27, 4  ;;  %s13336_s29 = scalar_lea.vmem %s10535_s24, 32  ;;  %s10546_s28 = int_to_ptr.vmem [resolvable:$true] %s10545_s28 }
 0xa72   : > { %p13337_p7 = scmp.ne.s32.totalorder %s10535_s24, %s13336_s29  ;;  %p13343_p10 = scmp.lt.s32.totalorder %s10535_s24, %s10535_s24 }
 0xa73   : > { %p13344_p11 = scmp.lt.s32.totalorder %s13336_s29, %s13336_s29 }
 0xa74   : > { %p13338_p8 = pnand %p13337_p7, %p12379_p6 }
 0xa75   : > { %p13345_p12 = por %p13344_p11, %p13343_p10 }
 0xa76   : > { %p13339_p9 = pneg %p13338_p8 }
 0xa78   : > { %p13346_p13 = pnand %p13345_p12, %p13339_p9 }
 0xa7a   : > { %13349 = shalt.err (!%p13346_p13)
}
 0xa7b   : > { %s13350_s16 = scalar_lea.hbm %s16217_s12, 32 }
 0xa7c   : > { %p13351_p0 = scmp.ne.s32.totalorder %s16217_s12, %s13350_s16  ;;  %p13356_p3 = scmp.lt.u32.totalorder %s13350_s16, %s16217_s12 }
 0xa7e   : > { %p13352_p1 = pnand %p13351_p0, %p12379_p6 }
 0xa80   : > { %p13353_p2 = pneg %p13352_p1 }
 0xa82   : > { %p13358_p4 = pnand %p13356_p3, %p13353_p2 }
 0xa84   : > { %13361 = shalt.err (!%p13358_p4)
}
 0xa85   : > { %12372 = dma.vmem_to_hbm [thread:$0]  (%p12379_p6), %s10535_s24, 32, %s16217_s12, [#allocation4]  }
 0xa86   : > { %s13362_s22 = scalar_lea.vmem %s10546_s28, 32  ;;  %p13369_p9 = scmp.lt.s32.totalorder %s10546_s28, %s10546_s28 }
 0xa87   : > { %p13363_p5 = scmp.ne.s32.totalorder %s10546_s28, %s13362_s22  ;;  %p13370_p10 = scmp.lt.s32.totalorder %s13362_s22, %s13362_s22 }
 0xa89   : > { %p13364_p7 = pnand %p13363_p5, %p12379_p6  ;;  %p13371_p11 = por %p13370_p10, %p13369_p9 }
 0xa8b   : > { %p13365_p8 = pneg %p13364_p7 }
 0xa8d   : > { %p13372_p12 = pnand %p13371_p11, %p13365_p8 }
 0xa8f   : > { %13375 = shalt.err (!%p13372_p12)
}
 0xa90   : > { %s13376_s29 = scalar_lea.hbm %s16218_s13, 32 }
 0xa91   : > { %p13377_p13 = scmp.ne.s32.totalorder %s16218_s13, %s13376_s29  ;;  %p13382_p2 = scmp.lt.u32.totalorder %s13376_s29, %s16218_s13 }
 0xa93   : > { %p13378_p0 = pnand %p13377_p13, %p12379_p6 }
 0xa95   : > { %p13379_p1 = pneg %p13378_p0 }
 0xa97   : > { %p13384_p3 = pnand %p13382_p2, %p13379_p1 }
 0xa99   : > { %13387 = shalt.err (!%p13384_p3)
}
 0xa9a   : > { %12374 = dma.vmem_to_hbm [thread:$0]  (%p12379_p6), %s10546_s28, 32, %s16218_s13, [#allocation6]  }
 0xa9b   : > { %13393 = dma.done.wait (%p12379_p6), [#allocation4], 32  }
 0xa9c   : > { %13395 = vsyncadd (%p12379_p6), [#allocation4], 4294967264 }
 0xa9d   : > { %13397 = dma.done.wait (%p12379_p6), [#allocation6], 32  }
 0xa9e   : > { %13399 = vsyncadd (%p12379_p6), [#allocation6], 4294967264 }
 0xa9f PF: > { %s26_s25 = sadd.s32 1, %s13402_s25  }
 0xaa0   : > { %p23_p4 = scmp.ge.s32.totalorder %s26_s25, 11  }
 0xaa2   :  { %25 = sbr.rel (!%p23_p4) target bundleno = 2 (0x2), region = 114 }
 0xaa9   :  { %10562 = vsyncpa [#allocation4], 1 }
 0xaaa   :  { %10564 = vsyncpa [#allocation4 + $0x1], 1 }
 0xaab   :  { %10565 = vsyncpa [#allocation6], 1 }

</bundles_post_ra>
